<compile_context>
chip_gen: v5e
topology: v5e:2x2
jax: 0.10.0
libtpu: 0.0.40
codegen_flags: <defaults>
</compile_context>

<pallas_src>
import jax
import jax.numpy as jnp
from jax.experimental import pallas as pl
from jax.experimental.pallas import tpu as pltpu


# ----------------------------- kernel -------------------------------------- #

def _branching_forward_kernel(wA_ref, bA_ref, wB_ref, bB_ref, x_ref, o_ref):
    # wA_ref: SMEM (3, 4)  -> folded stage-1 weights [out_ch, kh*2 + kw]
    # bA_ref: SMEM (3,)    -> folded stage-1 bias    [out_ch]
    # wB_ref: SMEM (3, 9)  -> folded stage-2 weights [in_ch, kh*3 + kw]
    # bB_ref: SMEM (1,)    -> folded stage-2 bias
    # x_ref : VMEM (H, W, Bt)      -- batch on the lane axis
    # o_ref : VMEM (H-3, W-3, Bt)
    H, W, Bt = x_ref.shape
    H1, W1 = H - 1, W - 1          # stage-1 (k=2, VALID) output
    H2, W2 = H - 3, W - 3          # stage-2 (k=3, VALID) output

    # Hoist every SMEM scalar read to the top so the sld traffic overlaps the
    # input DMA / first VPU work instead of interleaving with the MAC chain.
    wA = [[wA_ref[o, t] for t in range(4)] for o in range(3)]
    bA = [bA_ref[o] for o in range(3)]
    wB = [[wB_ref[c, t] for t in range(9)] for c in range(3)]
    bB = bB_ref[0]

    x = x_ref[...].astype(jnp.float32)                       # (H, W, Bt)

    # The 4 distinct shifted windows of x (kh on outer dim, kw on sublane dim),
    # computed once and shared by all 3 stage-1 output channels.
    xs = [[x[kh:kh + H1, kw:kw + W1, :] for kw in range(2)] for kh in range(2)]

    # Stage 1: relu(conv1 + conv2 + conv3), branches pre-folded.
    # Bias is folded into the accumulator init.
    ys = []
    for o in range(3):                                       # output channel
        acc = jnp.full((H1, W1, Bt), bA[o], jnp.float32)
        for kh in range(2):
            for kw in range(2):
                acc = acc + wA[o][kh * 2 + kw] * xs[kh][kw]
        ys.append(jnp.maximum(acc, 0.0))                     # ReLU

    # Stage 2: conv4 + conv5 (branches pre-folded), 3 -> 1 channels, k=3.
    out = jnp.full((H2, W2, Bt), bB, jnp.float32)
    for c in range(3):                                       # input channel
        yc = ys[c]
        for kh in range(3):
            for kw in range(3):
                out = out + wB[c][kh * 3 + kw] * yc[kh:kh + H2, kw:kw + W2, :]

    o_ref[...] = out.astype(o_ref.dtype)


# --------------------------- parameters & forward -------------------------- #

def make_params():
    f32 = jnp.float32
    eye2 = jnp.eye(2, dtype=f32)
    eye3 = jnp.eye(3, dtype=f32)

    def w_1to3(init):  # Conv2d(1, 3, k=2), OIHW
        return jnp.broadcast_to(init + eye2, (3, 1, 2, 2)).astype(f32)

    def w_3to1(init):  # Conv2d(3, 1, k=3), OIHW
        return jnp.broadcast_to(init + eye3, (1, 3, 3, 3)).astype(f32)

    w1, w2, w3 = w_1to3(1.0), w_1to3(2.0), w_1to3(3.0)
    b1 = b2 = b3 = jnp.full((3,), -2.0, f32)
    w4, w5 = w_3to1(10.0), w_3to1(-10.0)
    b4 = b5 = jnp.zeros((1,), f32)
    return (w1, b1, w2, b2, w3, b3, w4, b4, w5, b5)


def _pick_batch_tile(n: int) -> int:
    """Lane-dense batch tile.

    Tiny batches go in a single block (block dim == full array dim is legal).
    Large batches use a multiple of 128 that leaves >= 2 grid steps (v7x has
    two TensorCores) while the per-image VMEM footprint (~5 KiB) keeps even
    Bt=1024 far below the 32 MiB scoped-VMEM default on every generation.
    """
    if n <= 128:
        return n
    for bt in (1024, 512, 256, 128):
        if n % bt == 0 and n // bt >= 2:
            return bt
    return 128  # batch will be zero-padded up to a multiple of 128


def forward(x_nchw, params):
    (w1, b1, w2, b2, w3, b3, w4, b4, w5, b5) = params
    N, cin, H, W = x_nchw.shape
    assert cin == 1, "TestModelBranching expects a single input channel"
    H2, W2 = H - 3, W - 3

    # ---- Fold the parallel conv branches (exact by linearity of conv) ------
    wA = (w1 + w2 + w3)[:, 0].reshape(3, 4)       # (out_ch, kh*2 + kw)
    bA = (b1 + b2 + b3).astype(jnp.float32)       # (3,)
    wB = (w4 + w5)[0].reshape(3, 9)               # (in_ch, kh*3 + kw)
    bB = (b4 + b5).astype(jnp.float32)            # (1,)

    # ---- Lane-dense layout: batch on the 128-lane axis ---------------------
    x_hwn = jnp.transpose(x_nchw[:, 0], (1, 2, 0))            # (H, W, N)
    bt = _pick_batch_tile(N)
    n_blocks = pl.cdiv(N, bt)
    n_pad = n_blocks * bt
    if n_pad != N:
        x_hwn = jnp.pad(x_hwn, ((0, 0), (0, 0), (0, n_pad - N)))

    smem = pl.BlockSpec(memory_space=pltpu.MemorySpace.SMEM)
    out_hwn = pl.pallas_call(
        _branching_forward_kernel,
        out_shape=jax.ShapeDtypeStruct((H2, W2, n_pad), x_nchw.dtype),
        grid=(n_blocks,),
        in_specs=[smem, smem, smem, smem,
                  pl.BlockSpec((H, W, bt), lambda n: (0, 0, n))],
        out_specs=pl.BlockSpec((H2, W2, bt), lambda n: (0, 0, n)),
        compiler_params=pltpu.CompilerParams(
            dimension_semantics=("parallel",)),
    )(wA, bA, wB, bB, x_hwn)

    out = jnp.transpose(out_hwn, (2, 0, 1))[:N]               # (N, H2, W2)
    return out[:, None, :, :]                                 # NCHW: (N, 1, H-3, W-3)


# ------------------------------ reference ---------------------------------- #

def ref_forward(x_nchw, params):
    (w1, b1, w2, b2, w3, b3, w4, b4, w5, b5) = params
    dn = ("NCHW", "OIHW", "NCHW")

    def conv(x, w, b):
        y = jax.lax.conv_general_dilated(x, w, (1, 1), "VALID", dimension_numbers=dn)
        return y + b.reshape(1, -1, 1, 1)

    a = conv(x_nchw, w1, b1) + conv(x_nchw, w2, b2) + conv(x_nchw, w3, b3)
    a = jnp.maximum(a, 0.0)
    return conv(a, w4, b4) + conv(a, w5, b5)


if __name__ == "__main__":
    key = jax.random.PRNGKey(0)
    x = jax.random.normal(key, (2, 1, 16, 16), dtype=jnp.float32)   # NCHW like PyTorch
    params = make_params()

    y = jax.jit(forward)(x, params)
    jax.block_until_ready(y)
    assert y.shape == (2, 1, 13, 13), y.shape

    r = jax.jit(ref_forward)(x, params)
    jax.block_until_ready(r)

    err = float(jnp.max(jnp.abs(y - r)))
    scale = float(jnp.max(jnp.abs(r)))
    assert err <= 1e-4 * scale + 1e-4, f"mismatch vs reference: max_err={err}, scale={scale}"

    print("KERNEL_OK")
</pallas_src>

<mosaic_0001>
module attributes {stable_mosaic.version = 11 : i64} {
  func.func @_branching_forward_kernel(%arg0: i32, %arg1: memref<3x4xf32, #tpu.memory_space<smem>>, %arg2: memref<3xf32, #tpu.memory_space<smem>>, %arg3: memref<3x9xf32, #tpu.memory_space<smem>>, %arg4: memref<1xf32, #tpu.memory_space<smem>>, %arg5: memref<16x16x2xf32, #tpu.memory_space<vmem>>, %arg6: memref<13x13x2xf32, #tpu.memory_space<vmem>>) attributes {dimension_semantics = [#tpu.dimension_semantics<parallel>], iteration_bounds = array<i64: 1>, scalar_prefetch = 0 : i64, scratch_operands = 0 : i64, tpu.core_type = #tpu.core_type<tc>, window_params = [{transform_indices = @transform_0, window_bounds = array<i64: 3, 4>}, {transform_indices = @transform_1, window_bounds = array<i64: 3>}, {transform_indices = @transform_2, window_bounds = array<i64: 3, 9>}, {transform_indices = @transform_3, window_bounds = array<i64: 1>}, {transform_indices = @transform_4, window_bounds = array<i64: 16, 16, 2>}, {transform_indices = @transform_5, window_bounds = array<i64: 13, 13, 2>}]} {
    %c0 = arith.constant 0 : index
    %c0_0 = arith.constant 0 : index
    %0 = memref.load %arg1[%c0, %c0_0] : memref<3x4xf32, #tpu.memory_space<smem>>
    %c0_1 = arith.constant 0 : index
    %c1 = arith.constant 1 : index
    %1 = memref.load %arg1[%c0_1, %c1] : memref<3x4xf32, #tpu.memory_space<smem>>
    %c0_2 = arith.constant 0 : index
    %c2 = arith.constant 2 : index
    %2 = memref.load %arg1[%c0_2, %c2] : memref<3x4xf32, #tpu.memory_space<smem>>
    %c0_3 = arith.constant 0 : index
    %c3 = arith.constant 3 : index
    %3 = memref.load %arg1[%c0_3, %c3] : memref<3x4xf32, #tpu.memory_space<smem>>
    %c1_4 = arith.constant 1 : index
    %c0_5 = arith.constant 0 : index
    %4 = memref.load %arg1[%c1_4, %c0_5] : memref<3x4xf32, #tpu.memory_space<smem>>
    %c1_6 = arith.constant 1 : index
    %c1_7 = arith.constant 1 : index
    %5 = memref.load %arg1[%c1_6, %c1_7] : memref<3x4xf32, #tpu.memory_space<smem>>
    %c1_8 = arith.constant 1 : index
    %c2_9 = arith.constant 2 : index
    %6 = memref.load %arg1[%c1_8, %c2_9] : memref<3x4xf32, #tpu.memory_space<smem>>
    %c1_10 = arith.constant 1 : index
    %c3_11 = arith.constant 3 : index
    %7 = memref.load %arg1[%c1_10, %c3_11] : memref<3x4xf32, #tpu.memory_space<smem>>
    %c2_12 = arith.constant 2 : index
    %c0_13 = arith.constant 0 : index
    %8 = memref.load %arg1[%c2_12, %c0_13] : memref<3x4xf32, #tpu.memory_space<smem>>
    %c2_14 = arith.constant 2 : index
    %c1_15 = arith.constant 1 : index
    %9 = memref.load %arg1[%c2_14, %c1_15] : memref<3x4xf32, #tpu.memory_space<smem>>
    %c2_16 = arith.constant 2 : index
    %c2_17 = arith.constant 2 : index
    %10 = memref.load %arg1[%c2_16, %c2_17] : memref<3x4xf32, #tpu.memory_space<smem>>
    %c2_18 = arith.constant 2 : index
    %c3_19 = arith.constant 3 : index
    %11 = memref.load %arg1[%c2_18, %c3_19] : memref<3x4xf32, #tpu.memory_space<smem>>
    %c0_20 = arith.constant 0 : index
    %12 = memref.load %arg2[%c0_20] : memref<3xf32, #tpu.memory_space<smem>>
    %c1_21 = arith.constant 1 : index
    %13 = memref.load %arg2[%c1_21] : memref<3xf32, #tpu.memory_space<smem>>
    %c2_22 = arith.constant 2 : index
    %14 = memref.load %arg2[%c2_22] : memref<3xf32, #tpu.memory_space<smem>>
    %c0_23 = arith.constant 0 : index
    %c0_24 = arith.constant 0 : index
    %15 = memref.load %arg3[%c0_23, %c0_24] : memref<3x9xf32, #tpu.memory_space<smem>>
    %c0_25 = arith.constant 0 : index
    %c1_26 = arith.constant 1 : index
    %16 = memref.load %arg3[%c0_25, %c1_26] : memref<3x9xf32, #tpu.memory_space<smem>>
    %c0_27 = arith.constant 0 : index
    %c2_28 = arith.constant 2 : index
    %17 = memref.load %arg3[%c0_27, %c2_28] : memref<3x9xf32, #tpu.memory_space<smem>>
    %c0_29 = arith.constant 0 : index
    %c3_30 = arith.constant 3 : index
    %18 = memref.load %arg3[%c0_29, %c3_30] : memref<3x9xf32, #tpu.memory_space<smem>>
    %c0_31 = arith.constant 0 : index
    %c4 = arith.constant 4 : index
    %19 = memref.load %arg3[%c0_31, %c4] : memref<3x9xf32, #tpu.memory_space<smem>>
    %c0_32 = arith.constant 0 : index
    %c5 = arith.constant 5 : index
    %20 = memref.load %arg3[%c0_32, %c5] : memref<3x9xf32, #tpu.memory_space<smem>>
    %c0_33 = arith.constant 0 : index
    %c6 = arith.constant 6 : index
    %21 = memref.load %arg3[%c0_33, %c6] : memref<3x9xf32, #tpu.memory_space<smem>>
    %c0_34 = arith.constant 0 : index
    %c7 = arith.constant 7 : index
    %22 = memref.load %arg3[%c0_34, %c7] : memref<3x9xf32, #tpu.memory_space<smem>>
    %c0_35 = arith.constant 0 : index
    %c8 = arith.constant 8 : index
    %23 = memref.load %arg3[%c0_35, %c8] : memref<3x9xf32, #tpu.memory_space<smem>>
    %c1_36 = arith.constant 1 : index
    %c0_37 = arith.constant 0 : index
    %24 = memref.load %arg3[%c1_36, %c0_37] : memref<3x9xf32, #tpu.memory_space<smem>>
    %c1_38 = arith.constant 1 : index
    %c1_39 = arith.constant 1 : index
    %25 = memref.load %arg3[%c1_38, %c1_39] : memref<3x9xf32, #tpu.memory_space<smem>>
    %c1_40 = arith.constant 1 : index
    %c2_41 = arith.constant 2 : index
    %26 = memref.load %arg3[%c1_40, %c2_41] : memref<3x9xf32, #tpu.memory_space<smem>>
    %c1_42 = arith.constant 1 : index
    %c3_43 = arith.constant 3 : index
    %27 = memref.load %arg3[%c1_42, %c3_43] : memref<3x9xf32, #tpu.memory_space<smem>>
    %c1_44 = arith.constant 1 : index
    %c4_45 = arith.constant 4 : index
    %28 = memref.load %arg3[%c1_44, %c4_45] : memref<3x9xf32, #tpu.memory_space<smem>>
    %c1_46 = arith.constant 1 : index
    %c5_47 = arith.constant 5 : index
    %29 = memref.load %arg3[%c1_46, %c5_47] : memref<3x9xf32, #tpu.memory_space<smem>>
    %c1_48 = arith.constant 1 : index
    %c6_49 = arith.constant 6 : index
    %30 = memref.load %arg3[%c1_48, %c6_49] : memref<3x9xf32, #tpu.memory_space<smem>>
    %c1_50 = arith.constant 1 : index
    %c7_51 = arith.constant 7 : index
    %31 = memref.load %arg3[%c1_50, %c7_51] : memref<3x9xf32, #tpu.memory_space<smem>>
    %c1_52 = arith.constant 1 : index
    %c8_53 = arith.constant 8 : index
    %32 = memref.load %arg3[%c1_52, %c8_53] : memref<3x9xf32, #tpu.memory_space<smem>>
    %c2_54 = arith.constant 2 : index
    %c0_55 = arith.constant 0 : index
    %33 = memref.load %arg3[%c2_54, %c0_55] : memref<3x9xf32, #tpu.memory_space<smem>>
    %c2_56 = arith.constant 2 : index
    %c1_57 = arith.constant 1 : index
    %34 = memref.load %arg3[%c2_56, %c1_57] : memref<3x9xf32, #tpu.memory_space<smem>>
    %c2_58 = arith.constant 2 : index
    %c2_59 = arith.constant 2 : index
    %35 = memref.load %arg3[%c2_58, %c2_59] : memref<3x9xf32, #tpu.memory_space<smem>>
    %c2_60 = arith.constant 2 : index
    %c3_61 = arith.constant 3 : index
    %36 = memref.load %arg3[%c2_60, %c3_61] : memref<3x9xf32, #tpu.memory_space<smem>>
    %c2_62 = arith.constant 2 : index
    %c4_63 = arith.constant 4 : index
    %37 = memref.load %arg3[%c2_62, %c4_63] : memref<3x9xf32, #tpu.memory_space<smem>>
    %c2_64 = arith.constant 2 : index
    %c5_65 = arith.constant 5 : index
    %38 = memref.load %arg3[%c2_64, %c5_65] : memref<3x9xf32, #tpu.memory_space<smem>>
    %c2_66 = arith.constant 2 : index
    %c6_67 = arith.constant 6 : index
    %39 = memref.load %arg3[%c2_66, %c6_67] : memref<3x9xf32, #tpu.memory_space<smem>>
    %c2_68 = arith.constant 2 : index
    %c7_69 = arith.constant 7 : index
    %40 = memref.load %arg3[%c2_68, %c7_69] : memref<3x9xf32, #tpu.memory_space<smem>>
    %c2_70 = arith.constant 2 : index
    %c8_71 = arith.constant 8 : index
    %41 = memref.load %arg3[%c2_70, %c8_71] : memref<3x9xf32, #tpu.memory_space<smem>>
    %c0_72 = arith.constant 0 : index
    %42 = memref.load %arg4[%c0_72] : memref<1xf32, #tpu.memory_space<smem>>
    %c0_73 = arith.constant 0 : index
    %c0_74 = arith.constant 0 : index
    %c0_75 = arith.constant 0 : index
    %43 = vector.load %arg5[%c0_73, %c0_74, %c0_75] : memref<16x16x2xf32, #tpu.memory_space<vmem>>, vector<16x16x2xf32>
    %44 = vector.extract_strided_slice %43 {offsets = [0, 0, 0], sizes = [15, 15, 2], strides = [1, 1, 1]} : vector<16x16x2xf32> to vector<15x15x2xf32>
    %45 = vector.extract_strided_slice %43 {offsets = [0, 1, 0], sizes = [15, 15, 2], strides = [1, 1, 1]} : vector<16x16x2xf32> to vector<15x15x2xf32>
    %46 = vector.extract_strided_slice %43 {offsets = [1, 0, 0], sizes = [15, 15, 2], strides = [1, 1, 1]} : vector<16x16x2xf32> to vector<15x15x2xf32>
    %47 = vector.extract_strided_slice %43 {offsets = [1, 1, 0], sizes = [15, 15, 2], strides = [1, 1, 1]} : vector<16x16x2xf32> to vector<15x15x2xf32>
    %48 = vector.broadcast %12 : f32 to vector<15x15x2xf32>
    %49 = vector.broadcast %0 : f32 to vector<15x15x2xf32>
    %50 = arith.mulf %49, %44 : vector<15x15x2xf32>
    %51 = arith.addf %48, %50 : vector<15x15x2xf32>
    %52 = vector.broadcast %1 : f32 to vector<15x15x2xf32>
    %53 = arith.mulf %52, %45 : vector<15x15x2xf32>
    %54 = arith.addf %51, %53 : vector<15x15x2xf32>
    %55 = vector.broadcast %2 : f32 to vector<15x15x2xf32>
    %56 = arith.mulf %55, %46 : vector<15x15x2xf32>
    %57 = arith.addf %54, %56 : vector<15x15x2xf32>
    %58 = vector.broadcast %3 : f32 to vector<15x15x2xf32>
    %59 = arith.mulf %58, %47 : vector<15x15x2xf32>
    %60 = arith.addf %57, %59 : vector<15x15x2xf32>
    %cst = arith.constant 0.000000e+00 : f32
    %61 = vector.broadcast %cst : f32 to vector<15x15x2xf32>
    %62 = arith.maximumf %60, %61 : vector<15x15x2xf32>
    %63 = vector.broadcast %13 : f32 to vector<15x15x2xf32>
    %64 = vector.broadcast %4 : f32 to vector<15x15x2xf32>
    %65 = arith.mulf %64, %44 : vector<15x15x2xf32>
    %66 = arith.addf %63, %65 : vector<15x15x2xf32>
    %67 = vector.broadcast %5 : f32 to vector<15x15x2xf32>
    %68 = arith.mulf %67, %45 : vector<15x15x2xf32>
    %69 = arith.addf %66, %68 : vector<15x15x2xf32>
    %70 = vector.broadcast %6 : f32 to vector<15x15x2xf32>
    %71 = arith.mulf %70, %46 : vector<15x15x2xf32>
    %72 = arith.addf %69, %71 : vector<15x15x2xf32>
    %73 = vector.broadcast %7 : f32 to vector<15x15x2xf32>
    %74 = arith.mulf %73, %47 : vector<15x15x2xf32>
    %75 = arith.addf %72, %74 : vector<15x15x2xf32>
    %cst_76 = arith.constant 0.000000e+00 : f32
    %76 = vector.broadcast %cst_76 : f32 to vector<15x15x2xf32>
    %77 = arith.maximumf %75, %76 : vector<15x15x2xf32>
    %78 = vector.broadcast %14 : f32 to vector<15x15x2xf32>
    %79 = vector.broadcast %8 : f32 to vector<15x15x2xf32>
    %80 = arith.mulf %79, %44 : vector<15x15x2xf32>
    %81 = arith.addf %78, %80 : vector<15x15x2xf32>
    %82 = vector.broadcast %9 : f32 to vector<15x15x2xf32>
    %83 = arith.mulf %82, %45 : vector<15x15x2xf32>
    %84 = arith.addf %81, %83 : vector<15x15x2xf32>
    %85 = vector.broadcast %10 : f32 to vector<15x15x2xf32>
    %86 = arith.mulf %85, %46 : vector<15x15x2xf32>
    %87 = arith.addf %84, %86 : vector<15x15x2xf32>
    %88 = vector.broadcast %11 : f32 to vector<15x15x2xf32>
    %89 = arith.mulf %88, %47 : vector<15x15x2xf32>
    %90 = arith.addf %87, %89 : vector<15x15x2xf32>
    %cst_77 = arith.constant 0.000000e+00 : f32
    %91 = vector.broadcast %cst_77 : f32 to vector<15x15x2xf32>
    %92 = arith.maximumf %90, %91 : vector<15x15x2xf32>
    %93 = vector.broadcast %42 : f32 to vector<13x13x2xf32>
    %94 = vector.extract_strided_slice %62 {offsets = [0, 0, 0], sizes = [13, 13, 2], strides = [1, 1, 1]} : vector<15x15x2xf32> to vector<13x13x2xf32>
    %95 = vector.broadcast %15 : f32 to vector<13x13x2xf32>
    %96 = arith.mulf %95, %94 : vector<13x13x2xf32>
    %97 = arith.addf %93, %96 : vector<13x13x2xf32>
    %98 = vector.extract_strided_slice %62 {offsets = [0, 1, 0], sizes = [13, 13, 2], strides = [1, 1, 1]} : vector<15x15x2xf32> to vector<13x13x2xf32>
    %99 = vector.broadcast %16 : f32 to vector<13x13x2xf32>
    %100 = arith.mulf %99, %98 : vector<13x13x2xf32>
    %101 = arith.addf %97, %100 : vector<13x13x2xf32>
    %102 = vector.extract_strided_slice %62 {offsets = [0, 2, 0], sizes = [13, 13, 2], strides = [1, 1, 1]} : vector<15x15x2xf32> to vector<13x13x2xf32>
    %103 = vector.broadcast %17 : f32 to vector<13x13x2xf32>
    %104 = arith.mulf %103, %102 : vector<13x13x2xf32>
    %105 = arith.addf %101, %104 : vector<13x13x2xf32>
    %106 = vector.extract_strided_slice %62 {offsets = [1, 0, 0], sizes = [13, 13, 2], strides = [1, 1, 1]} : vector<15x15x2xf32> to vector<13x13x2xf32>
    %107 = vector.broadcast %18 : f32 to vector<13x13x2xf32>
    %108 = arith.mulf %107, %106 : vector<13x13x2xf32>
    %109 = arith.addf %105, %108 : vector<13x13x2xf32>
    %110 = vector.extract_strided_slice %62 {offsets = [1, 1, 0], sizes = [13, 13, 2], strides = [1, 1, 1]} : vector<15x15x2xf32> to vector<13x13x2xf32>
    %111 = vector.broadcast %19 : f32 to vector<13x13x2xf32>
    %112 = arith.mulf %111, %110 : vector<13x13x2xf32>
    %113 = arith.addf %109, %112 : vector<13x13x2xf32>
    %114 = vector.extract_strided_slice %62 {offsets = [1, 2, 0], sizes = [13, 13, 2], strides = [1, 1, 1]} : vector<15x15x2xf32> to vector<13x13x2xf32>
    %115 = vector.broadcast %20 : f32 to vector<13x13x2xf32>
    %116 = arith.mulf %115, %114 : vector<13x13x2xf32>
    %117 = arith.addf %113, %116 : vector<13x13x2xf32>
    %118 = vector.extract_strided_slice %62 {offsets = [2, 0, 0], sizes = [13, 13, 2], strides = [1, 1, 1]} : vector<15x15x2xf32> to vector<13x13x2xf32>
    %119 = vector.broadcast %21 : f32 to vector<13x13x2xf32>
    %120 = arith.mulf %119, %118 : vector<13x13x2xf32>
    %121 = arith.addf %117, %120 : vector<13x13x2xf32>
    %122 = vector.extract_strided_slice %62 {offsets = [2, 1, 0], sizes = [13, 13, 2], strides = [1, 1, 1]} : vector<15x15x2xf32> to vector<13x13x2xf32>
    %123 = vector.broadcast %22 : f32 to vector<13x13x2xf32>
    %124 = arith.mulf %123, %122 : vector<13x13x2xf32>
    %125 = arith.addf %121, %124 : vector<13x13x2xf32>
    %126 = vector.extract_strided_slice %62 {offsets = [2, 2, 0], sizes = [13, 13, 2], strides = [1, 1, 1]} : vector<15x15x2xf32> to vector<13x13x2xf32>
    %127 = vector.broadcast %23 : f32 to vector<13x13x2xf32>
    %128 = arith.mulf %127, %126 : vector<13x13x2xf32>
    %129 = arith.addf %125, %128 : vector<13x13x2xf32>
    %130 = vector.extract_strided_slice %77 {offsets = [0, 0, 0], sizes = [13, 13, 2], strides = [1, 1, 1]} : vector<15x15x2xf32> to vector<13x13x2xf32>
    %131 = vector.broadcast %24 : f32 to vector<13x13x2xf32>
    %132 = arith.mulf %131, %130 : vector<13x13x2xf32>
    %133 = arith.addf %129, %132 : vector<13x13x2xf32>
    %134 = vector.extract_strided_slice %77 {offsets = [0, 1, 0], sizes = [13, 13, 2], strides = [1, 1, 1]} : vector<15x15x2xf32> to vector<13x13x2xf32>
    %135 = vector.broadcast %25 : f32 to vector<13x13x2xf32>
    %136 = arith.mulf %135, %134 : vector<13x13x2xf32>
    %137 = arith.addf %133, %136 : vector<13x13x2xf32>
    %138 = vector.extract_strided_slice %77 {offsets = [0, 2, 0], sizes = [13, 13, 2], strides = [1, 1, 1]} : vector<15x15x2xf32> to vector<13x13x2xf32>
    %139 = vector.broadcast %26 : f32 to vector<13x13x2xf32>
    %140 = arith.mulf %139, %138 : vector<13x13x2xf32>
    %141 = arith.addf %137, %140 : vector<13x13x2xf32>
    %142 = vector.extract_strided_slice %77 {offsets = [1, 0, 0], sizes = [13, 13, 2], strides = [1, 1, 1]} : vector<15x15x2xf32> to vector<13x13x2xf32>
    %143 = vector.broadcast %27 : f32 to vector<13x13x2xf32>
    %144 = arith.mulf %143, %142 : vector<13x13x2xf32>
    %145 = arith.addf %141, %144 : vector<13x13x2xf32>
    %146 = vector.extract_strided_slice %77 {offsets = [1, 1, 0], sizes = [13, 13, 2], strides = [1, 1, 1]} : vector<15x15x2xf32> to vector<13x13x2xf32>
    %147 = vector.broadcast %28 : f32 to vector<13x13x2xf32>
    %148 = arith.mulf %147, %146 : vector<13x13x2xf32>
    %149 = arith.addf %145, %148 : vector<13x13x2xf32>
    %150 = vector.extract_strided_slice %77 {offsets = [1, 2, 0], sizes = [13, 13, 2], strides = [1, 1, 1]} : vector<15x15x2xf32> to vector<13x13x2xf32>
    %151 = vector.broadcast %29 : f32 to vector<13x13x2xf32>
    %152 = arith.mulf %151, %150 : vector<13x13x2xf32>
    %153 = arith.addf %149, %152 : vector<13x13x2xf32>
    %154 = vector.extract_strided_slice %77 {offsets = [2, 0, 0], sizes = [13, 13, 2], strides = [1, 1, 1]} : vector<15x15x2xf32> to vector<13x13x2xf32>
    %155 = vector.broadcast %30 : f32 to vector<13x13x2xf32>
    %156 = arith.mulf %155, %154 : vector<13x13x2xf32>
    %157 = arith.addf %153, %156 : vector<13x13x2xf32>
    %158 = vector.extract_strided_slice %77 {offsets = [2, 1, 0], sizes = [13, 13, 2], strides = [1, 1, 1]} : vector<15x15x2xf32> to vector<13x13x2xf32>
    %159 = vector.broadcast %31 : f32 to vector<13x13x2xf32>
    %160 = arith.mulf %159, %158 : vector<13x13x2xf32>
    %161 = arith.addf %157, %160 : vector<13x13x2xf32>
    %162 = vector.extract_strided_slice %77 {offsets = [2, 2, 0], sizes = [13, 13, 2], strides = [1, 1, 1]} : vector<15x15x2xf32> to vector<13x13x2xf32>
    %163 = vector.broadcast %32 : f32 to vector<13x13x2xf32>
    %164 = arith.mulf %163, %162 : vector<13x13x2xf32>
    %165 = arith.addf %161, %164 : vector<13x13x2xf32>
    %166 = vector.extract_strided_slice %92 {offsets = [0, 0, 0], sizes = [13, 13, 2], strides = [1, 1, 1]} : vector<15x15x2xf32> to vector<13x13x2xf32>
    %167 = vector.broadcast %33 : f32 to vector<13x13x2xf32>
    %168 = arith.mulf %167, %166 : vector<13x13x2xf32>
    %169 = arith.addf %165, %168 : vector<13x13x2xf32>
    %170 = vector.extract_strided_slice %92 {offsets = [0, 1, 0], sizes = [13, 13, 2], strides = [1, 1, 1]} : vector<15x15x2xf32> to vector<13x13x2xf32>
    %171 = vector.broadcast %34 : f32 to vector<13x13x2xf32>
    %172 = arith.mulf %171, %170 : vector<13x13x2xf32>
    %173 = arith.addf %169, %172 : vector<13x13x2xf32>
    %174 = vector.extract_strided_slice %92 {offsets = [0, 2, 0], sizes = [13, 13, 2], strides = [1, 1, 1]} : vector<15x15x2xf32> to vector<13x13x2xf32>
    %175 = vector.broadcast %35 : f32 to vector<13x13x2xf32>
    %176 = arith.mulf %175, %174 : vector<13x13x2xf32>
    %177 = arith.addf %173, %176 : vector<13x13x2xf32>
    %178 = vector.extract_strided_slice %92 {offsets = [1, 0, 0], sizes = [13, 13, 2], strides = [1, 1, 1]} : vector<15x15x2xf32> to vector<13x13x2xf32>
    %179 = vector.broadcast %36 : f32 to vector<13x13x2xf32>
    %180 = arith.mulf %179, %178 : vector<13x13x2xf32>
    %181 = arith.addf %177, %180 : vector<13x13x2xf32>
    %182 = vector.extract_strided_slice %92 {offsets = [1, 1, 0], sizes = [13, 13, 2], strides = [1, 1, 1]} : vector<15x15x2xf32> to vector<13x13x2xf32>
    %183 = vector.broadcast %37 : f32 to vector<13x13x2xf32>
    %184 = arith.mulf %183, %182 : vector<13x13x2xf32>
    %185 = arith.addf %181, %184 : vector<13x13x2xf32>
    %186 = vector.extract_strided_slice %92 {offsets = [1, 2, 0], sizes = [13, 13, 2], strides = [1, 1, 1]} : vector<15x15x2xf32> to vector<13x13x2xf32>
    %187 = vector.broadcast %38 : f32 to vector<13x13x2xf32>
    %188 = arith.mulf %187, %186 : vector<13x13x2xf32>
    %189 = arith.addf %185, %188 : vector<13x13x2xf32>
    %190 = vector.extract_strided_slice %92 {offsets = [2, 0, 0], sizes = [13, 13, 2], strides = [1, 1, 1]} : vector<15x15x2xf32> to vector<13x13x2xf32>
    %191 = vector.broadcast %39 : f32 to vector<13x13x2xf32>
    %192 = arith.mulf %191, %190 : vector<13x13x2xf32>
    %193 = arith.addf %189, %192 : vector<13x13x2xf32>
    %194 = vector.extract_strided_slice %92 {offsets = [2, 1, 0], sizes = [13, 13, 2], strides = [1, 1, 1]} : vector<15x15x2xf32> to vector<13x13x2xf32>
    %195 = vector.broadcast %40 : f32 to vector<13x13x2xf32>
    %196 = arith.mulf %195, %194 : vector<13x13x2xf32>
    %197 = arith.addf %193, %196 : vector<13x13x2xf32>
    %198 = vector.extract_strided_slice %92 {offsets = [2, 2, 0], sizes = [13, 13, 2], strides = [1, 1, 1]} : vector<15x15x2xf32> to vector<13x13x2xf32>
    %199 = vector.broadcast %41 : f32 to vector<13x13x2xf32>
    %200 = arith.mulf %199, %198 : vector<13x13x2xf32>
    %201 = arith.addf %197, %200 : vector<13x13x2xf32>
    %c0_78 = arith.constant 0 : index
    %c0_79 = arith.constant 0 : index
    %c0_80 = arith.constant 0 : index
    %202 = vector.load %arg6[%c0_78, %c0_79, %c0_80] : memref<13x13x2xf32, #tpu.memory_space<vmem>>, vector<13x13x2xf32>
    tpu.vector_store %arg6[%c0_78, %c0_79, %c0_80], %201 {strides = array<i32>} : memref<13x13x2xf32, #tpu.memory_space<vmem>>, vector<13x13x2xf32>,
    return
  }
  func.func @transform_0(%arg0: i32) -> (i32, i32) {
    %c0_i32 = arith.constant 0 : i32
    %c0_i32_0 = arith.constant 0 : i32
    %c0_i32_1 = arith.constant 0 : i32
    return %c0_i32, %c0_i32_0 : i32, i32
  }
  func.func @transform_1(%arg0: i32) -> i32 {
    %c0_i32 = arith.constant 0 : i32
    %c0_i32_0 = arith.constant 0 : i32
    return %c0_i32 : i32
  }
  func.func @transform_2(%arg0: i32) -> (i32, i32) {
    %c0_i32 = arith.constant 0 : i32
    %c0_i32_0 = arith.constant 0 : i32
    %c0_i32_1 = arith.constant 0 : i32
    return %c0_i32, %c0_i32_0 : i32, i32
  }
  func.func @transform_3(%arg0: i32) -> i32 {
    %c0_i32 = arith.constant 0 : i32
    %c0_i32_0 = arith.constant 0 : i32
    return %c0_i32 : i32
  }
  func.func @transform_4(%arg0: i32) -> (i32, i32, i32) {
    %c0_i32 = arith.constant 0 : i32
    %c0_i32_0 = arith.constant 0 : i32
    %c0_i32_1 = arith.constant 0 : i32
    return %c0_i32, %c0_i32_0, %arg0 : i32, i32, i32
  }
  func.func @transform_5(%arg0: i32) -> (i32, i32, i32) {
    %c0_i32 = arith.constant 0 : i32
    %c0_i32_0 = arith.constant 0 : i32
    %c0_i32_1 = arith.constant 0 : i32
    return %c0_i32, %c0_i32_0, %arg0 : i32, i32, i32
  }
}

</mosaic_0001>

<bundles_post_ra>
// kernel: squeeze.4
= control target key start
LH: loop header
LB: loop body
LE: loop exit
PB: predicated region body
PF: predicated region fallthrough
CT: control target
= control target key end

     0   :  { %s40_s12 = smov 3   ;;  %vm15_vm0 = vcmask 23552   ;;  %vm21_vm1 = vcmask 72752   ;;  %vm27_vm2 = vcmask 48152   ;;  %s63_s0 = inlined_call_operand.vmem [shape: f32[3,3,3], index: 0, kind: input, shape index: {}]   ;;  %s64_s1 = inlined_call_operand.vmem [shape: f32[3,9], index: 1, kind: output, shape index: {}]  }
   0x1   :  { %v35_v0 = vld [vmem:[%s63_s0 + $0x8] sm:$0xf]  ;;  %v36_v1 = vld [vmem:[%s63_s0 + $0x4] sm:$0xf]  ;;  %v12_v2 = vld [vmem:[%s63_s0] sm:$0xf] }
   0x2   :  { %7 = vst [vmem:[#allocation1 + $0x10] sm:$0xf] %v35_v0  ;;  %s39_s0 = smov 6  }
   0x3   :  { %11 = vst [vmem:[#allocation1 + $0x8] sm:$0xf] %v36_v1 }
   0x4   :  { %13 = vst [vmem:[#allocation1] sm:$0xf] %v12_v2 }
   0xb   :  { %v18_v3 = vld [vmem:[#allocation1 + $0x2] ss:$8 sm:$0x7]   ;;  %v24_v4 = vld [vmem:[#allocation1 + $0x1] ss:$8 sm:$0x7]  }
   0xc   :  { %19 = vrot.lane.b32.xlu0 %v18_v3, %s39_s0  ;;  %v14_v5 = vld [vmem:[#allocation1] ss:$8 sm:$0x7]  }
   0xd   :  { %16 = vst.msk [vmem:[#allocation0] sm:$0x7] %vm15_vm0, %v14_v5  }
  0x14   :  { %25 = vrot.lane.b32.xlu0 %v24_v4, %s40_s12 }
  0x7e   :  { %v20_v6 = vpop.permute.xlu0 %19  }
  0x7f   :  { %22 = vst.msk [vmem:[#allocation0] sm:$0x7] %vm21_vm1, %v20_v6  }
  0x86   :  { %v26_v7 = vpop.permute.xlu0 %25  }
  0x87   :  { %28 = vst.msk [vmem:[#allocation0] sm:$0x7] %vm27_vm2, %v26_v7  }
  0x8e   :  { %v31_v8 = vld [vmem:[#allocation0] sm:$0xf] }
  0x8f   :  { %34 = vst [vmem:[%s64_s1] sm:$0xf] %v31_v8 }

// kernel: forward.1
= control target key start
LH: loop header
LB: loop body
LE: loop exit
PB: predicated region body
PF: predicated region fallthrough
CT: control target
= control target key end

     0   :  { %11 = vsyncpa [#allocation4], 0  ;;  %s10818_s0 = inlined_call_operand.vmem [shape: f32[3,4], index: 0, kind: input, shape index: {}]   ;;  %s10819_s1 = inlined_call_operand.vmem [shape: f32[3], index: 1, kind: input, shape index: {}]   ;;  %s10820_s2 = inlined_call_operand.vmem [shape: f32[3,9], index: 2, kind: input, shape index: {}]   ;;  %s10821_s3 = inlined_call_operand.<no memory space> [shape: f32[1], index: 3, kind: input, shape index: {}]   ;;  %s10822_s4 = inlined_call_operand.vmem [shape: f32[16,16,2], index: 4, kind: input, shape index: {}]   ;;  %s10823_s5 = inlined_call_operand.vmem [shape: f32[13,13,2], index: 5, kind: output, shape index: {}]  }
   0x1   :  { %12 = vsyncpa [#allocation6], 0  ;;  %s27_s20 = sshll.u32 %s10819_s1, 4  ;;  %s18_s23 = sshll.u32 %s10818_s0, 4  ;;  %s28_s20 = int_to_ptr.vmem [resolvable:$true] %s27_s20  ;;  %s19_s23 = int_to_ptr.vmem [resolvable:$true] %s18_s23 }
   0x2   :  { %s4807_s24 = smov [#allocation5]   ;;  %s4808_s25 = smov [#allocation3]  }
   0x3   :  { %30 = dma.vmem_to_smem %s28_s20, 16, %s4807_s24, [#allocation6]  }
   0x4   :  { %21 = dma.vmem_to_smem %s19_s23, 64, %s4808_s25, [#allocation4]  }
   0x5   :  { %s36_s28 = sshll.u32 %s10820_s2, 4  ;;  %s4809_s29 = smov [#allocation7]   ;;  %s37_s28 = int_to_ptr.vmem [resolvable:$true] %s36_s28 }
   0x6   :  { %39 = dma.vmem_to_smem %s37_s28, 64, %s4809_s29, [#allocation6]  }
   0x7   :  { %4803 = dma.done.wait [#allocation4], 64  }
   0x8   :  { %4804 = vsyncadd [#allocation4], 4294967232 }
   0x9   :  { %4805 = dma.done.wait [#allocation6], 80  }
   0xa   :  { %4806 = vsyncadd [#allocation6], 4294967216 }
   0xb   :  { %56 = sfence }
   0xc   :  { %s57_s1 = sld [smem:[#allocation3]]  ;;  %v4852_v0 = vld [vmem:[%s10822_s4] sm:$0xff]  ;;  %v4857_v1 = vld [vmem:[%s10822_s4 + $0x8] sm:$0xff]  ;;  %v4862_v2 = vld [vmem:[%s10822_s4 + $0x10] sm:$0xff]  ;;  %vm255_vm0 = vcmask 1046528   ;;  %vm1839_vm1 = vcmask 1045504  }
   0xd   :  { %11123 = vst [vmem:[#allocation10_spill] sm:$0xff] %v4852_v0  ;;  %s4864_s9 = sld [smem:[#allocation3 + $0x1]]  ;;  %v4869_v3 = vld [vmem:[%s10822_s4 + $0x18] sm:$0xff]  ;;  %v4874_v4 = vld [vmem:[%s10822_s4 + $0x20] sm:$0xff]  ;;  %v4879_v5 = vld [vmem:[%s10822_s4 + $0x28] sm:$0xff]  ;;  %vm4659_vm2 = vcmask 15360  }
   0xe   :  { %11124 = vst [vmem:[#allocation11_spill] sm:$0xff] %v4857_v1  ;;  %v4884_v7 = vld [vmem:[%s10822_s4 + $0x30] sm:$0xff]  ;;  %v4889_v8 = vld [vmem:[%s10822_s4 + $0x38] sm:$0xff]  ;;  %v4894_v9 = vld [vmem:[%s10822_s4 + $0x40] sm:$0xff]  ;;  %s4911_s28 = sld [smem:[#allocation3 + $0x2]]  ;;  %vm4661_vm3 = vcmask 12288  }
   0xf   :  { %11125 = vst [vmem:[#allocation12_spill] sm:$0xff] %v4862_v2  ;;  %v4899_v10 = vld [vmem:[%s10822_s4 + $0x48] sm:$0xff]  ;;  %v4904_v11 = vld [vmem:[%s10822_s4 + $0x50] sm:$0xff]  ;;  %v4909_v12 = vld [vmem:[%s10822_s4 + $0x58] sm:$0xff]  ;;  %s4929_s2 = sld [smem:[#allocation5]] }
  0x10   :  { %11126 = vst [vmem:[#allocation13_spill] sm:$0xff] %v4869_v3  ;;  %v4916_v13 = vld [vmem:[%s10822_s4 + $0x60] sm:$0xff]  ;;  %v4921_v14 = vld [vmem:[%s10822_s4 + $0x68] sm:$0xff]  ;;  %v4926_v15 = vld [vmem:[%s10822_s4 + $0x70] sm:$0xff]  ;;  %s5375_s13 = sld [smem:[#allocation3 + $0x3]] }
  0x11   :  { %11127 = vst [vmem:[#allocation14_spill] sm:$0xff] %v4874_v4  ;;  %v4934_v17 = vld [vmem:[%s10822_s4 + $0x78] sm:$0xff]  ;;  %v4939_v18 = vld [vmem:[%s10822_s4 + $0x80] sm:$0xff]  ;;  %v4944_v19 = vld [vmem:[%s10822_s4 + $0x88] sm:$0xff]  ;;  %s5606_s16 = sld [smem:[#allocation3 + $0x80]] }
  0x12   :  { %11128 = vst [vmem:[#allocation15_spill] sm:$0xff] %v4879_v5  ;;  %v133_v6 = vstv %s57_s1  ;;  %v4953_v24 = vld [vmem:[%s10822_s4 + $0x90] sm:$0xff]  ;;  %v4958_v25 = vld [vmem:[%s10822_s4 + $0x98] sm:$0xff]  ;;  %v4963_v26 = vld [vmem:[%s10822_s4 + $0xa0] sm:$0xff]  ;;  %s5616_s17 = sld [smem:[#allocation3 + $0x81]] }
  0x13   :  { %11129 = vst [vmem:[#allocation16_spill] sm:$0xff] %v4884_v7  ;;  %v134_v16 = vmul.f32 %v133_v6, %v4852_v0  ;;  %v135_v20 = vmul.f32 %v133_v6, %v4857_v1  ;;  %v136_v21 = vmul.f32 %v133_v6, %v4862_v2  ;;  %v137_v22 = vmul.f32 %v133_v6, %v4869_v3  ;;  %v4972_v31 = vld [vmem:[%s10822_s4 + $0xa8] sm:$0xff]  ;;  %v4977_v32 = vld [vmem:[%s10822_s4 + $0xb0] sm:$0xff]  ;;  %v4982_v33 = vld [vmem:[%s10822_s4 + $0xb8] sm:$0xff]  ;;  %s5622_s18 = sld [smem:[#allocation5 + $0x1]] }
  0x14   :  { %11130 = vst [vmem:[#allocation17_spill] sm:$0xff] %v4889_v8  ;;  %v138_v23 = vmul.f32 %v133_v6, %v4874_v4  ;;  %v139_v27 = vmul.f32 %v133_v6, %v4879_v5  ;;  %v140_v28 = vmul.f32 %v133_v6, %v4884_v7  ;;  %v141_v29 = vmul.f32 %v133_v6, %v4889_v8  ;;  %v4991_v38 = vld [vmem:[%s10822_s4 + $0xc0] sm:$0xff]  ;;  %v4996_v39 = vld [vmem:[%s10822_s4 + $0xc8] sm:$0xff]  ;;  %v5011_v48 = vld [vmem:[%s10822_s4 + $0xd0] sm:$0xff]  ;;  %s5887_s19 = sld [smem:[#allocation3 + $0x82]] }
  0x15   :  { %11131 = vst [vmem:[#allocation18_spill] sm:$0xff] %v4894_v9  ;;  %v142_v30 = vmul.f32 %v133_v6, %v4894_v9  ;;  %v143_v34 = vmul.f32 %v133_v6, %v4899_v10  ;;  %v144_v35 = vmul.f32 %v133_v6, %v4904_v11  ;;  %v145_v36 = vmul.f32 %v133_v6, %v4909_v12  ;;  %v5016_v49 = vld [vmem:[%s10822_s4 + $0xd8] sm:$0xff]  ;;  %v5025_v54 = vld [vmem:[%s10822_s4 + $0xe0] sm:$0xff]  ;;  %v5030_v55 = vld [vmem:[%s10822_s4 + $0xe8] sm:$0xff]  ;;  %s5903_s20 = sld [smem:[#allocation3 + $0x83]] }
  0x16   :  { %11132 = vst [vmem:[#allocation19_spill] sm:$0xff] %v4899_v10  ;;  %v146_v37 = vmul.f32 %v133_v6, %v4916_v13  ;;  %v147_v40 = vmul.f32 %v133_v6, %v4921_v14  ;;  %v148_v41 = vmul.f32 %v133_v6, %v4926_v15  ;;  %v149_v42 = vmul.f32 %v133_v6, %v4934_v17  ;;  %s6426_s21 = sld [smem:[#allocation3 + $0x100]] }
  0x17   :  { %11133 = vst [vmem:[#allocation20_spill] sm:$0xff] %v4904_v11  ;;  %v150_v43 = vmul.f32 %v133_v6, %v4939_v18  ;;  %v151_v44 = vmul.f32 %v133_v6, %v4944_v19  ;;  %v152_v45 = vmul.f32 %v133_v6, %v4953_v24  ;;  %v153_v46 = vmul.f32 %v133_v6, %v4958_v25  ;;  %s6436_s22 = sld [smem:[#allocation3 + $0x101]] }
  0x18   :  { %11134 = vst [vmem:[#allocation21_spill] sm:$0xff] %v4909_v12  ;;  %v5006_v47 = vstv %s4864_s9  ;;  %v154_v50 = vmul.f32 %v133_v6, %v4963_v26  ;;  %v155_v51 = vmul.f32 %v133_v6, %v4972_v31  ;;  %v156_v52 = vmul.f32 %v133_v6, %v4977_v32  ;;  %s6442_s23 = sld [smem:[#allocation5 + $0x2]] }
  0x19   :  { %11135 = vst [vmem:[#allocation22_spill] sm:$0xff] %v4916_v13  ;;  %v157_v53 = vmul.f32 %v133_v6, %v4982_v33  ;;  %v158_v56 = vmul.f32 %v133_v6, %v4991_v38  ;;  %v159_v57 = vmul.f32 %v133_v6, %v4996_v39  ;;  %v160_v58 = vmul.f32 %v133_v6, %v5011_v48  ;;  %s6746_s29 = sld [smem:[#allocation3 + $0x102]] }
  0x1a   :  { %11136 = vst [vmem:[#allocation23_spill] sm:$0xff] %v4921_v14  ;;  %v161_v59 = vmul.f32 %v133_v6, %v5016_v49  ;;  %v162_v60 = vmul.f32 %v133_v6, %v5025_v54  ;;  %v163_v61 = vmul.f32 %v133_v6, %v5030_v55  ;;  %v5040_v62 = vmul.f32 %v5006_v47, %v4852_v0  ;;  %s6759_s1 = sld [smem:[#allocation3 + $0x103]] }
  0x1b   :  { %11137 = vst [vmem:[#allocation24_spill] sm:$0xff] %v4926_v15  ;;  %v5043_v63 = vstv %s4911_s28  ;;  %v5060_v6 = vmul.f32 %v5006_v47, %v4874_v4  ;;  %v5064_v0 = vmul.f32 %v5006_v47, %v4879_v5  ;;  %v5080_v4 = vmul.f32 %v5006_v47, %v4899_v10  ;;  %s7214_s9 = sld [smem:[#allocation7 + $0x1]] }
  0x1c   :  { %11138 = vst [vmem:[#allocation25_spill] sm:$0xff] %v4934_v17  ;;  %v5084_v5 = vmul.f32 %v5006_v47, %v4904_v11  ;;  %v5102_v10 = vmul.f32 %v5006_v47, %v4926_v15  ;;  %s7344_s10 = sld [smem:[#allocation7 + $0x2]] }
  0x1d   :  { %11139 = vst [vmem:[#allocation26_spill] sm:$0xff] %v4939_v18  ;;  %s7562_s11 = sld [smem:[#allocation7 + $0x3]] }
  0x1e   :  { %11140 = vst [vmem:[#allocation27_spill] sm:$0xff] %v4944_v19  ;;  %s7574_s12 = sld [smem:[#allocation7 + $0x4]] }
  0x1f   :  { %11141 = vst [vmem:[#allocation28_spill] sm:$0xff] %v4953_v24  ;;  %s7780_s28 = sld [smem:[#allocation7 + $0x5]] }
  0x20   :  { %11142 = vst [vmem:[#allocation29_spill] sm:$0xff] %v4958_v25  ;;  %s8105_s14 = sld [smem:[#allocation7 + $0x8]] }
  0x21   :  { %11143 = vst [vmem:[#allocation30_spill] sm:$0xff] %v4963_v26  ;;  %s8318_s15 = sld [smem:[#allocation7 + $0x80]] }
  0x22   :  { %11144 = vst [vmem:[#allocation31_spill] sm:$0xff] %v4972_v31  ;;  %s9456_s24 = sld [smem:[#allocation7 + $0x100]] }
  0x23   :  { %11145 = vst [vmem:[#allocation32_spill] sm:$0xff] %v4977_v32  ;;  %s9509_s25 = sld [smem:[#allocation7 + $0x101]] }
  0x24   :  { %11146 = vst [vmem:[#allocation33_spill] sm:$0xff] %v4982_v33  ;;  %v132_v33 = vstv %s4929_s2  ;;  %s7942_s2 = sld [smem:[#allocation7 + $0x6]] }
  0x25   :  { %11147 = vst [vmem:[#allocation34_spill] sm:$0xff] %v4991_v38  ;;  %v5048_v38 = vmul.f32 %v5006_v47, %v4857_v1  ;;  %v5068_v1 = vmul.f32 %v5006_v47, %v4884_v7  ;;  %v5088_v7 = vmul.f32 %v5006_v47, %v4909_v12  ;;  %v5104_v11 = vadd.f32 %v135_v20, %v132_v33  ;;  %s9619_s26 = sld [smem:[#allocation7 + $0x102]] }
  0x26   :  { %11148 = vst [vmem:[#allocation35_spill] sm:$0xff] %v4996_v39  ;;  %v5108_v12 = vadd.f32 %v137_v22, %v132_v33  ;;  %v5122_v15 = vadd.f32 %v144_v35, %v132_v33  ;;  %v5124_v20 = vadd.f32 %v145_v36, %v132_v33  ;;  %v5128_v22 = vadd.f32 %v147_v40, %v132_v33  ;;  %s9832_s27 = sld [smem:[#allocation7 + $0x103]] }
  0x27   :  { %11149 = vst [vmem:[#allocation36_spill] sm:$0xff] %v5011_v48  ;;  %v5052_v48 = vmul.f32 %v5006_v47, %v4862_v2  ;;  %v5090_v2 = vadd.f32 %v134_v16, %v132_v33  ;;  %v5110_v16 = vadd.f32 %v138_v23, %v132_v33  ;;  %v5130_v23 = vadd.f32 %v148_v41, %v132_v33  ;;  %s10212_s30 = sld [smem:[#allocation7 + $0x106]] }
  0x28   :  { %11150 = vst [vmem:[#allocation37_spill] sm:$0xff] %v5016_v49  ;;  %v5142_v35 = vadd.f32 %v154_v50, %v132_v33  ;;  %v5144_v36 = vadd.f32 %v155_v51, %v132_v33  ;;  %v5148_v40 = vadd.f32 %v157_v53, %v132_v33  ;;  %v5150_v41 = vadd.f32 %v158_v56, %v132_v33  ;;  %s10271_s0 = sld [smem:[#allocation7 + $0x107]] }
  0x29   :  { %11151 = vst [vmem:[#allocation38_spill] sm:$0xff] %v5025_v54  ;;  %v5056_v54 = vmul.f32 %v5006_v47, %v4869_v3  ;;  %v5076_v3 = vmul.f32 %v5006_v47, %v4894_v9  ;;  %v5098_v9 = vmul.f32 %v5006_v47, %v4921_v14  ;;  %v5118_v14 = vadd.f32 %v142_v30, %v132_v33 }
  0x2a   :  { %11152 = vst [vmem:[#allocation39_spill] sm:$0xff] %v5030_v55  ;;  %v5138_v30 = vadd.f32 %v152_v45, %v132_v33  ;;  %v5158_v45 = vadd.f32 %v162_v60, %v132_v33  ;;  %v5164_v50 = vmul.f32 %v5006_v47, %v4934_v17  ;;  %v211_v51 = vmul.f32 %v5006_v47, %v4939_v18 }
  0x2b   :  { %11153 = vst [vmem:[#allocation40_spill] sm:$0xff] %v5043_v63  ;;  %v5072_v63 = vmul.f32 %v5006_v47, %v4889_v8  ;;  %v5094_v8 = vmul.f32 %v5006_v47, %v4916_v13  ;;  %v5114_v13 = vadd.f32 %v140_v28, %v132_v33  ;;  %v5134_v28 = vadd.f32 %v150_v43, %v132_v33 }
  0x2c   :  { %11154 = vst [vmem:[#allocation41_spill] sm:$0xff] %v5084_v5  ;;  %v5106_v5 = vadd.f32 %v136_v21, %v132_v33  ;;  %v5126_v21 = vadd.f32 %v146_v37, %v132_v33  ;;  %v5146_v37 = vadd.f32 %v156_v52, %v132_v33  ;;  %v5154_v43 = vadd.f32 %v160_v58, %v132_v33 }
  0x2d   :  { %11155 = vst [vmem:[#allocation42_spill] sm:$0xff] %v5090_v2  ;;  %v5112_v2 = vadd.f32 %v139_v27, %v132_v33  ;;  %v5132_v27 = vadd.f32 %v149_v42, %v132_v33  ;;  %v5152_v42 = vadd.f32 %v159_v57, %v132_v33  ;;  %v5170_v52 = vmul.f32 %v5006_v47, %v4944_v19 }
  0x2e   :  { %11156 = vst [vmem:[#allocation43_spill] sm:$0xff] %v5094_v8  ;;  %v5116_v8 = vadd.f32 %v141_v29, %v132_v33  ;;  %v5136_v29 = vadd.f32 %v151_v44, %v132_v33  ;;  %v5156_v44 = vadd.f32 %v161_v59, %v132_v33  ;;  %v213_v53 = vmul.f32 %v5006_v47, %v4953_v24 }
  0x2f   :  { %11157 = vst [vmem:[#allocation44_spill] sm:$0xff] %v5098_v9  ;;  %v5120_v9 = vadd.f32 %v143_v34, %v132_v33  ;;  %v5140_v34 = vadd.f32 %v153_v46, %v132_v33  ;;  %v5160_v46 = vadd.f32 %v163_v61, %v132_v33  ;;  %v5176_v56 = vmul.f32 %v5006_v47, %v4958_v25  ;;  %v11167_v25 = vld [vmem:[#allocation33_spill] sm:$0xff] }
  0x30   :  { %11158 = vst [vmem:[#allocation45_spill] sm:$0xff] %v5144_v36  ;;  %v256_v33 = vrot.slane %v5040_v62, 1  ;;  %v257_v57 = vrot.slane %v5048_v38, 1  ;;  %v215_v58 = vmul.f32 %v5006_v47, %v4963_v26  ;;  %v5184_v59 = vmul.f32 %v5006_v47, %v4972_v31  ;;  %v11168_v62 = vld [vmem:[#allocation34_spill] sm:$0xff]  ;;  %v11169_v31 = vld [vmem:[#allocation36_spill] sm:$0xff] }
  0x31   :  { %11159 = vst [vmem:[#allocation46_spill] sm:$0xff] %v5146_v37  ;;  %v259_v60 = vrot.slane %v5052_v48, 1  ;;  %v260_v61 = vrot.slane %v5056_v54, 1  ;;  %v217_v24 = vmul.f32 %v5006_v47, %v4977_v32  ;;  %v5192_v19 = vmul.f32 %v5006_v47, %v11167_v25  ;;  %v11170_v54 = vld [vmem:[#allocation38_spill] sm:$0xff] }
  0x32   :  { %11160 = vst [vmem:[#allocation47_spill] sm:$0xff] %v5148_v40  ;;  %v219_v38 = vmul.f32 %v5006_v47, %v11168_v62  ;;  %v5198_v26 = vmul.f32 %v5006_v47, %v4996_v39  ;;  %v221_v18 = vmul.f32 %v5006_v47, %v11169_v31  ;;  %v5204_v48 = vmul.f32 %v5006_v47, %v5016_v49 }
  0x33   :  { %11161 = vst [vmem:[#allocation48_spill] sm:$0xff] %v5150_v41  ;;  %v223_v32 = vmul.f32 %v5006_v47, %v11170_v54  ;;  %v5210_v25 = vmul.f32 %v5006_v47, %v5030_v55  ;;  %v258_v62 = vsel %vm255_vm0, %v256_v33, %v257_v57  ;;  %v262_v17 = vrot.slane %v5060_v6, 1 }
  0x34   :  { %11162 = vst [vmem:[#allocation49_spill] sm:$0xff] %v5152_v42  ;;  %v263_v39 = vrot.slane %v5064_v0, 1  ;;  %v261_v31 = vsel %vm255_vm0, %v259_v60, %v260_v61  ;;  %v266_v49 = vrot.slane %v5072_v63, 1  ;;  %v269_v54 = vrot.slane %v5080_v4, 1 }
  0x35   :  { %11163 = vst [vmem:[#allocation50_spill] sm:$0xff] %v5154_v43  ;;  %v272_v47 = vrot.slane %v5088_v7, 1  ;;  %v11172_v55 = vld [vmem:[#allocation43_spill] sm:$0xff]  ;;  %v277_v0 = vrot.slane %v5102_v10, 1  ;;  %v280_v41 = vrot.slane %v211_v51, 1  ;;  %v281_v60 = vrot.slane %v5170_v52, 1 }
  0x36   :  { %11164 = vst [vmem:[#allocation51_spill] sm:$0xff] %v5156_v44  ;;  %v11171_v44 = vld [vmem:[#allocation41_spill] sm:$0xff]  ;;  %v274_v33 = vrot.slane %v11172_v55, 1  ;;  %v11173_v42 = vld [vmem:[#allocation44_spill] sm:$0xff]  ;;  %v283_v63 = vrot.slane %v213_v53, 1  ;;  %v286_v40 = vrot.slane %v215_v58, 1  ;;  %v264_v51 = vsel %vm255_vm0, %v262_v17, %v263_v39 }
  0x37   :  { %11165 = vst [vmem:[#allocation52_spill] sm:$0xff] %v5158_v45  ;;  %v268_v45 = vrot.slane %v5076_v3, 1  ;;  %v271_v43 = vrot.slane %v11171_v44, 1  ;;  %v275_v6 = vrot.slane %v11173_v42, 1  ;;  %v284_v3 = vrot.slane %v5176_v56, 1  ;;  %v11174_v58 = vld [vmem:[#allocation42_spill] sm:$0xff] }
  0x38   :  { %11166 = vst [vmem:[#allocation53_spill] sm:$0xff] %v5160_v46  ;;  %v265_v46 = vrot.slane %v5068_v1, 1  ;;  %v278_v1 = vrot.slane %v5164_v50, 1  ;;  %v287_v4 = vrot.slane %v5184_v59, 1  ;;  %v289_v44 = vrot.slane %v217_v24, 1 }
  0x39   :  { %v290_v7 = vrot.slane %v5192_v19, 1  ;;  %v292_v37 = vrot.slane %v219_v38, 1  ;;  %v293_v55 = vrot.slane %v5198_v26, 1  ;;  %v295_v42 = vrot.slane %v221_v18, 1 }
  0x3a   :  { %v296_v10 = vrot.slane %v5204_v48, 1  ;;  %v298_v36 = vrot.slane %v223_v32, 1  ;;  %v299_v50 = vrot.slane %v5210_v25, 1  ;;  %v267_v52 = vsel %vm255_vm0, %v265_v46, %v266_v49 }
  0x3b   :  { %v270_v53 = vsel %vm255_vm0, %v268_v45, %v269_v54  ;;  %v273_v56 = vsel %vm255_vm0, %v271_v43, %v272_v47  ;;  %v276_v24 = vsel %vm255_vm0, %v274_v33, %v275_v6  ;;  %v279_v19 = vsel %vm255_vm0, %v277_v0, %v278_v1 }
  0x3c   :  { %v282_v26 = vsel %vm255_vm0, %v280_v41, %v281_v60  ;;  %v285_v18 = vsel %vm255_vm0, %v283_v63, %v284_v3  ;;  %v288_v32 = vsel %vm255_vm0, %v286_v40, %v287_v4  ;;  %v291_v25 = vsel %vm255_vm0, %v289_v44, %v290_v7  ;;  %v11191_v44 = vld [vmem:[#allocation14_spill] sm:$0xff] }
  0x3d   :  { %v294_v17 = vsel %vm255_vm0, %v292_v37, %v293_v55  ;;  %v5245_v46 = vadd.f32 %v258_v62, %v11174_v58  ;;  %v297_v45 = vsel %vm255_vm0, %v295_v42, %v296_v10  ;;  %v300_v43 = vsel %vm255_vm0, %v298_v36, %v299_v50 }
  0x3e   :  { %v5250_v59 = vadd.f32 %v257_v57, %v5104_v11  ;;  %v5253_v41 = vadd.f32 %v261_v31, %v5106_v5  ;;  %v5256_v38 = vadd.f32 %v260_v61, %v5108_v12  ;;  %v5259_v40 = vadd.f32 %v264_v51, %v5110_v16 }
  0x3f   :  { %v5262_v37 = vadd.f32 %v263_v39, %v5112_v2  ;;  %v5265_v62 = vadd.f32 %v267_v52, %v5114_v13  ;;  %v5268_v36 = vadd.f32 %v266_v49, %v5116_v8  ;;  %v5271_v11 = vadd.f32 %v270_v53, %v5118_v14  ;;  %v11194_v52 = vld [vmem:[#allocation17_spill] sm:$0xff] }
  0x40   :  { %v5274_v5 = vadd.f32 %v269_v54, %v5120_v9  ;;  %v5277_v12 = vadd.f32 %v273_v56, %v5122_v15  ;;  %v5280_v31 = vadd.f32 %v272_v47, %v5124_v20  ;;  %v5283_v2 = vadd.f32 %v276_v24, %v5126_v21  ;;  %v11175_v20 = vld [vmem:[#allocation45_spill] sm:$0xff]  ;;  %v11184_v47 = vld [vmem:[#allocation52_spill] sm:$0xff]  ;;  %v11196_v24 = vld [vmem:[#allocation19_spill] sm:$0xff] }
  0x41   :  { %v5286_v13 = vadd.f32 %v275_v6, %v5128_v22  ;;  %v5289_v8 = vadd.f32 %v279_v19, %v5130_v23  ;;  %v5292_v14 = vadd.f32 %v278_v1, %v5132_v27  ;;  %v5295_v9 = vadd.f32 %v282_v26, %v5134_v28  ;;  %v11176_v22 = vld [vmem:[#allocation46_spill] sm:$0xff]  ;;  %v11177_v27 = vld [vmem:[#allocation47_spill] sm:$0xff]  ;;  %v11186_v6 = vld [vmem:[#allocation53_spill] sm:$0xff] }
  0x42   :  { %v5298_v15 = vadd.f32 %v281_v60, %v5136_v29  ;;  %v5301_v39 = vadd.f32 %v285_v18, %v5138_v30  ;;  %v5304_v49 = vadd.f32 %v284_v3, %v5140_v34  ;;  %v5307_v16 = vadd.f32 %v288_v32, %v5142_v35  ;;  %v11178_v29 = vld [vmem:[#allocation48_spill] sm:$0xff]  ;;  %v11179_v30 = vld [vmem:[#allocation49_spill] sm:$0xff]  ;;  %v11180_v34 = vld [vmem:[#allocation50_spill] sm:$0xff] }
  0x43   :  { %v5310_v21 = vadd.f32 %v287_v4, %v11175_v20  ;;  %v5313_v23 = vadd.f32 %v291_v25, %v11176_v22  ;;  %v5316_v28 = vadd.f32 %v290_v7, %v11177_v27  ;;  %v5319_v57 = vadd.f32 %v294_v17, %v11178_v29  ;;  %v11182_v35 = vld [vmem:[#allocation51_spill] sm:$0xff]  ;;  %v11188_v1 = vld [vmem:[#allocation12_spill] sm:$0xff]  ;;  %v11190_v3 = vld [vmem:[#allocation13_spill] sm:$0xff] }
  0x44   :  { %v5322_v61 = vadd.f32 %v293_v55, %v11179_v30  ;;  %v5325_v48 = vadd.f32 %v297_v45, %v11180_v34  ;;  %v5328_v54 = vadd.f32 %v296_v10, %v11182_v35  ;;  %v5331_v33 = vadd.f32 %v300_v43, %v11184_v47  ;;  %v11189_v60 = vld [vmem:[#allocation40_spill] sm:$0xff]  ;;  %v11192_v55 = vld [vmem:[#allocation15_spill] sm:$0xff]  ;;  %v11198_v32 = vld [vmem:[#allocation21_spill] sm:$0xff] }
  0x45   :  { %v5334_v0 = vadd.f32 %v299_v50, %v11186_v6  ;;  %v362_v63 = vmul.f32 %v11189_v60, %v11188_v1  ;;  %v363_v4 = vmul.f32 %v11189_v60, %v11190_v3  ;;  %v364_v7 = vmul.f32 %v11189_v60, %v11191_v44  ;;  %v11193_v10 = vld [vmem:[#allocation16_spill] sm:$0xff]  ;;  %v11195_v50 = vld [vmem:[#allocation18_spill] sm:$0xff]  ;;  %v11200_v45 = vld [vmem:[#allocation23_spill] sm:$0xff] }
  0x46   :  { %11181 = vst [vmem:[#allocation41_spill] sm:$0xff] %v5325_v48  ;;  %v365_v42 = vmul.f32 %v11189_v60, %v11192_v55  ;;  %v366_v51 = vmul.f32 %v11189_v60, %v11193_v10  ;;  %v367_v53 = vmul.f32 %v11189_v60, %v11194_v52  ;;  %v368_v56 = vmul.f32 %v11189_v60, %v11195_v50  ;;  %v11197_v26 = vld [vmem:[#allocation20_spill] sm:$0xff]  ;;  %v11199_v17 = vld [vmem:[#allocation22_spill] sm:$0xff]  ;;  %v11203_v29 = vld [vmem:[#allocation25_spill] sm:$0xff] }
  0x47   :  { %11183 = vst [vmem:[#allocation43_spill] sm:$0xff] %v5328_v54  ;;  %v369_v19 = vmul.f32 %v11189_v60, %v11196_v24  ;;  %v370_v18 = vmul.f32 %v11189_v60, %v11197_v26  ;;  %v371_v25 = vmul.f32 %v11189_v60, %v11198_v32  ;;  %v372_v58 = vmul.f32 %v11189_v60, %v11199_v17  ;;  %v11201_v20 = vld [vmem:[#allocation24_spill] sm:$0xff]  ;;  %v11204_v34 = vld [vmem:[#allocation26_spill] sm:$0xff]  ;;  %v11205_v47 = vld [vmem:[#allocation27_spill] sm:$0xff] }
  0x48   :  { %11185 = vst [vmem:[#allocation44_spill] sm:$0xff] %v5331_v33  ;;  %v373_v43 = vmul.f32 %v11189_v60, %v11200_v45  ;;  %v374_v22 = vmul.f32 %v11189_v60, %v11201_v20  ;;  %v5365_v27 = vld [vmem:[%s10822_s4 + $0xf0] sm:$0xff]  ;;  %v375_v30 = vmul.f32 %v11189_v60, %v11203_v29  ;;  %v376_v35 = vmul.f32 %v11189_v60, %v11204_v34  ;;  %v5380_v20 = vld [vmem:[%s10822_s4 + $0xf8] sm:$0xff]  ;;  %v11209_v29 = vld [vmem:[#allocation30_spill] sm:$0xff] }
  0x49   :  { %11187 = vst [vmem:[#allocation42_spill] sm:$0xff] %v5334_v0  ;;  %v377_v6 = vmul.f32 %v11189_v60, %v11205_v47  ;;  %v11206_v17 = vld [vmem:[#allocation28_spill] sm:$0xff]  ;;  %v11208_v32 = vld [vmem:[#allocation29_spill] sm:$0xff]  ;;  %v380_v24 = vmul.f32 %v11189_v60, %v11209_v29  ;;  %v11210_v34 = vld [vmem:[#allocation31_spill] sm:$0xff] }
  0x4a   :  { %11202 = vst [vmem:[#allocation45_spill] sm:$0xff] %v5365_v27  ;;  %v378_v45 = vmul.f32 %v11189_v60, %v11206_v17  ;;  %v379_v26 = vmul.f32 %v11189_v60, %v11208_v32  ;;  %v381_v50 = vmul.f32 %v11189_v60, %v11210_v34  ;;  %v11211_v47 = vld [vmem:[#allocation32_spill] sm:$0xff]  ;;  %v11212_v17 = vld [vmem:[#allocation33_spill] sm:$0xff]  ;;  %v11213_v55 = vld [vmem:[#allocation34_spill] sm:$0xff] }
  0x4b   :  { %11207 = vst [vmem:[#allocation46_spill] sm:$0xff] %v5380_v20  ;;  %v382_v52 = vmul.f32 %v11189_v60, %v11211_v47  ;;  %v383_v10 = vmul.f32 %v11189_v60, %v11212_v17  ;;  %v384_v44 = vmul.f32 %v11189_v60, %v11213_v55  ;;  %v11214_v3 = vld [vmem:[#allocation35_spill] sm:$0xff]  ;;  %v11215_v0 = vld [vmem:[#allocation36_spill] sm:$0xff]  ;;  %v11216_v33 = vld [vmem:[#allocation37_spill] sm:$0xff]  ;;  %v390_v17 = vmul.f32 %v11189_v60, %v5365_v27 }
  0x4c   :  { %v385_v1 = vmul.f32 %v11189_v60, %v11214_v3  ;;  %v386_v32 = vmul.f32 %v11189_v60, %v11215_v0  ;;  %v387_v29 = vmul.f32 %v11189_v60, %v11216_v33  ;;  %v11217_v54 = vld [vmem:[#allocation38_spill] sm:$0xff]  ;;  %v11218_v48 = vld [vmem:[#allocation39_spill] sm:$0xff]  ;;  %v391_v55 = vmul.f32 %v11189_v60, %v5380_v20 }
  0x4d   :  { %v388_v34 = vmul.f32 %v11189_v60, %v11217_v54  ;;  %v389_v47 = vmul.f32 %v11189_v60, %v11218_v48  ;;  %v5409_v3 = vadd.f32 %v362_v63, %v5245_v46  ;;  %v5412_v0 = vadd.f32 %v363_v4, %v5250_v59 }
  0x4e   :  { %v5415_v33 = vadd.f32 %v364_v7, %v5253_v41  ;;  %v5418_v54 = vadd.f32 %v365_v42, %v5256_v38  ;;  %v5421_v48 = vadd.f32 %v366_v51, %v5259_v40  ;;  %v5424_v27 = vadd.f32 %v367_v53, %v5262_v37  ;;  %v11235_v51 = vld [vmem:[#allocation14_spill] sm:$0xff] }
  0x4f   :  { %v5427_v60 = vadd.f32 %v368_v56, %v5265_v62  ;;  %v5430_v46 = vadd.f32 %v369_v19, %v5268_v36  ;;  %v5433_v59 = vadd.f32 %v370_v18, %v5271_v11  ;;  %v5436_v41 = vadd.f32 %v371_v25, %v5274_v5  ;;  %v11241_v25 = vld [vmem:[#allocation20_spill] sm:$0xff] }
  0x50   :  { %v5439_v38 = vadd.f32 %v372_v58, %v5277_v12  ;;  %v5442_v40 = vadd.f32 %v373_v43, %v5280_v31  ;;  %v5445_v37 = vadd.f32 %v374_v22, %v5283_v2  ;;  %v5448_v62 = vadd.f32 %v375_v30, %v5286_v13  ;;  %v11242_v58 = vld [vmem:[#allocation21_spill] sm:$0xff]  ;;  %v11243_v43 = vld [vmem:[#allocation22_spill] sm:$0xff] }
  0x51   :  { %v5451_v36 = vadd.f32 %v376_v35, %v5289_v8  ;;  %v5454_v11 = vadd.f32 %v377_v6, %v5292_v14  ;;  %v5457_v5 = vadd.f32 %v378_v45, %v5295_v9  ;;  %v5460_v12 = vadd.f32 %v379_v26, %v5298_v15  ;;  %v11239_v26 = vld [vmem:[#allocation18_spill] sm:$0xff] }
  0x52   :  { %v5463_v31 = vadd.f32 %v380_v24, %v5301_v39  ;;  %v5466_v2 = vadd.f32 %v381_v50, %v5304_v49  ;;  %v5469_v13 = vadd.f32 %v382_v52, %v5307_v16  ;;  %v5472_v8 = vadd.f32 %v383_v10, %v5310_v21  ;;  %v11225_v49 = vld [vmem:[#allocation41_spill] sm:$0xff]  ;;  %v11227_v16 = vld [vmem:[#allocation43_spill] sm:$0xff]  ;;  %v11229_v21 = vld [vmem:[#allocation44_spill] sm:$0xff] }
  0x53   :  { %v422_v14 = vstv %s5375_s13  ;;  %v5476_v63 = vadd.f32 %v384_v44, %v5313_v23  ;;  %v5479_v9 = vadd.f32 %v385_v1, %v5316_v28  ;;  %v5482_v15 = vadd.f32 %v386_v32, %v5319_v57  ;;  %v11231_v23 = vld [vmem:[#allocation42_spill] sm:$0xff]  ;;  %v11233_v28 = vld [vmem:[#allocation12_spill] sm:$0xff]  ;;  %v11234_v10 = vld [vmem:[#allocation13_spill] sm:$0xff]  ;;  %s7995_s13 = sld [smem:[#allocation7 + $0x7]] }
  0x54   :  { %11219 = vst [vmem:[#allocation47_spill] sm:$0xff] %v5469_v13  ;;  %v5485_v39 = vadd.f32 %v387_v29, %v5322_v61  ;;  %v5488_v4 = vadd.f32 %v388_v34, %v11225_v49  ;;  %v5491_v7 = vadd.f32 %v389_v47, %v11227_v16  ;;  %v5494_v42 = vadd.f32 %v390_v17, %v11229_v21  ;;  %v11236_v52 = vld [vmem:[#allocation15_spill] sm:$0xff]  ;;  %v11237_v50 = vld [vmem:[#allocation16_spill] sm:$0xff]  ;;  %v11238_v24 = vld [vmem:[#allocation17_spill] sm:$0xff] }
  0x55   :  { %11220 = vst [vmem:[#allocation48_spill] sm:$0xff] %v5472_v8  ;;  %v5497_v44 = vadd.f32 %v391_v55, %v11231_v23  ;;  %v423_v1 = vmul.f32 %v422_v14, %v11233_v28  ;;  %v5501_v57 = vmul.f32 %v422_v14, %v11234_v10  ;;  %v425_v61 = vmul.f32 %v422_v14, %v11235_v51  ;;  %v11240_v32 = vld [vmem:[#allocation19_spill] sm:$0xff]  ;;  %v11245_v34 = vld [vmem:[#allocation24_spill] sm:$0xff]  ;;  %v11246_v47 = vld [vmem:[#allocation25_spill] sm:$0xff] }
  0x56   :  { %11221 = vst [vmem:[#allocation49_spill] sm:$0xff] %v5476_v63  ;;  %v5505_v53 = vmul.f32 %v422_v14, %v11236_v52  ;;  %v427_v56 = vmul.f32 %v422_v14, %v11237_v50  ;;  %v5509_v19 = vmul.f32 %v422_v14, %v11238_v24  ;;  %v429_v18 = vmul.f32 %v422_v14, %v11239_v26  ;;  %v11244_v29 = vld [vmem:[#allocation23_spill] sm:$0xff]  ;;  %v11247_v49 = vld [vmem:[#allocation26_spill] sm:$0xff]  ;;  %v11250_v26 = vld [vmem:[#allocation29_spill] sm:$0xff] }
  0x57   :  { %11222 = vst [vmem:[#allocation50_spill] sm:$0xff] %v5479_v9  ;;  %v5513_v55 = vmul.f32 %v422_v14, %v11240_v32  ;;  %v431_v17 = vmul.f32 %v422_v14, %v11241_v25  ;;  %v5517_v45 = vmul.f32 %v422_v14, %v11242_v58  ;;  %v433_v22 = vmul.f32 %v422_v14, %v11243_v43  ;;  %v11248_v21 = vld [vmem:[#allocation27_spill] sm:$0xff]  ;;  %v11249_v32 = vld [vmem:[#allocation28_spill] sm:$0xff]  ;;  %v11251_v24 = vld [vmem:[#allocation30_spill] sm:$0xff] }
  0x58   :  { %11223 = vst [vmem:[#allocation51_spill] sm:$0xff] %v5482_v15  ;;  %v5521_v30 = vmul.f32 %v422_v14, %v11244_v29  ;;  %v435_v35 = vmul.f32 %v422_v14, %v11245_v34  ;;  %v5525_v6 = vmul.f32 %v422_v14, %v11246_v47  ;;  %v437_v16 = vmul.f32 %v422_v14, %v11247_v49  ;;  %v11252_v50 = vld [vmem:[#allocation31_spill] sm:$0xff]  ;;  %v11253_v52 = vld [vmem:[#allocation32_spill] sm:$0xff]  ;;  %v11254_v51 = vld [vmem:[#allocation33_spill] sm:$0xff] }
  0x59   :  { %11224 = vst [vmem:[#allocation52_spill] sm:$0xff] %v5485_v39  ;;  %v5529_v23 = vmul.f32 %v422_v14, %v11248_v21  ;;  %v439_v25 = vmul.f32 %v422_v14, %v11249_v32  ;;  %v5533_v58 = vmul.f32 %v422_v14, %v11250_v26  ;;  %v441_v43 = vmul.f32 %v422_v14, %v11251_v24  ;;  %v11255_v21 = vld [vmem:[#allocation34_spill] sm:$0xff]  ;;  %v11257_v24 = vld [vmem:[#allocation36_spill] sm:$0xff] }
  0x5a   :  { %11226 = vst [vmem:[#allocation53_spill] sm:$0xff] %v5488_v4  ;;  %v5537_v29 = vmul.f32 %v422_v14, %v11252_v50  ;;  %v443_v34 = vmul.f32 %v422_v14, %v11253_v52  ;;  %v5541_v47 = vmul.f32 %v422_v14, %v11254_v51  ;;  %v483_v10 = vrot.slane %v423_v1, 1  ;;  %v11258_v50 = vld [vmem:[#allocation37_spill] sm:$0xff]  ;;  %v11259_v52 = vld [vmem:[#allocation38_spill] sm:$0xff]  ;;  %v11260_v51 = vld [vmem:[#allocation39_spill] sm:$0xff] }
  0x5b   :  { %11228 = vst [vmem:[#allocation40_spill] sm:$0xff] %v5491_v7  ;;  %v484_v49 = vrot.slane %v5501_v57, 1  ;;  %v445_v28 = vmul.f32 %v422_v14, %v11255_v21  ;;  %v486_v26 = vrot.slane %v425_v61, 1  ;;  %v447_v7 = vmul.f32 %v422_v14, %v11257_v24  ;;  %v11261_v1 = vld [vmem:[#allocation45_spill] sm:$0xff] }
  0x5c   :  { %11230 = vst [vmem:[#allocation41_spill] sm:$0xff] %v5494_v42  ;;  %v487_v42 = vrot.slane %v5505_v53, 1  ;;  %v5551_v4 = vmul.f32 %v422_v14, %v11258_v50  ;;  %v449_v39 = vmul.f32 %v422_v14, %v11259_v52  ;;  %v5555_v15 = vmul.f32 %v422_v14, %v11260_v51 }
  0x5d   :  { %11232 = vst [vmem:[#allocation43_spill] sm:$0xff] %v5497_v44  ;;  %v11256_v44 = vld [vmem:[#allocation35_spill] sm:$0xff]  ;;  %v451_v57 = vmul.f32 %v422_v14, %v11261_v1  ;;  %v5559_v21 = vmul.f32 %v422_v14, %v5380_v20  ;;  %v490_v61 = vrot.slane %v5509_v19, 1  ;;  %v485_v53 = vsel %vm255_vm0, %v483_v10, %v484_v49 }
  0x5e   :  { %v5546_v32 = vmul.f32 %v422_v14, %v11256_v44  ;;  %v489_v44 = vrot.slane %v427_v56, 1  ;;  %v492_v9 = vrot.slane %v429_v18, 1  ;;  %v493_v24 = vrot.slane %v5513_v55, 1 }
  0x5f   :  { %v495_v50 = vrot.slane %v431_v17, 1  ;;  %v488_v63 = vsel %vm255_vm0, %v486_v26, %v487_v42  ;;  %v496_v52 = vrot.slane %v5517_v45, 1  ;;  %v498_v51 = vrot.slane %v433_v22, 1 }
  0x60   :  { %v499_v8 = vrot.slane %v5521_v30, 1  ;;  %v501_v1 = vrot.slane %v435_v35, 1  ;;  %v502_v14 = vrot.slane %v5525_v6, 1  ;;  %v504_v20 = vrot.slane %v437_v16, 1 }
  0x61   :  { %v505_v56 = vrot.slane %v5529_v23, 1  ;;  %v507_v19 = vrot.slane %v439_v25, 1  ;;  %v508_v10 = vrot.slane %v5533_v58, 1  ;;  %v510_v18 = vrot.slane %v441_v43, 1 }
  0x62   :  { %v511_v55 = vrot.slane %v5537_v29, 1  ;;  %v513_v17 = vrot.slane %v443_v34, 1  ;;  %v514_v26 = vrot.slane %v5541_v47, 1  ;;  %v516_v13 = vrot.slane %v445_v28, 1 }
  0x63   :  { %v517_v45 = vrot.slane %v5546_v32, 1  ;;  %v491_v22 = vsel %vm255_vm0, %v489_v44, %v490_v61  ;;  %v494_v30 = vsel %vm255_vm0, %v492_v9, %v493_v24  ;;  %v519_v35 = vrot.slane %v447_v7, 1 }
  0x64   :  { %v520_v6 = vrot.slane %v5551_v4, 1  ;;  %v522_v16 = vrot.slane %v449_v39, 1  ;;  %v523_v25 = vrot.slane %v5555_v15, 1  ;;  %v525_v58 = vrot.slane %v451_v57, 1 }
  0x65   :  { %v526_v43 = vrot.slane %v5559_v21, 1  ;;  %v497_v29 = vsel %vm255_vm0, %v495_v50, %v496_v52  ;;  %v500_v34 = vsel %vm255_vm0, %v498_v51, %v499_v8  ;;  %v503_v28 = vsel %vm255_vm0, %v501_v1, %v502_v14 }
  0x66   :  { %v506_v32 = vsel %vm255_vm0, %v504_v20, %v505_v56  ;;  %v509_v44 = vsel %vm255_vm0, %v507_v19, %v508_v10  ;;  %v512_v9 = vsel %vm255_vm0, %v510_v18, %v511_v55  ;;  %v515_v4 = vsel %vm255_vm0, %v513_v17, %v514_v26  ;;  %v11271_v19 = vld [vmem:[#allocation43_spill] sm:$0xff] }
  0x67   :  { %v518_v39 = vsel %vm255_vm0, %v516_v13, %v517_v45  ;;  %v521_v15 = vsel %vm255_vm0, %v519_v35, %v520_v6  ;;  %v558_v7 = vadd.f32 %v485_v53, %v5409_v3  ;;  %v559_v50 = vadd.f32 %v484_v49, %v5412_v0  ;;  %v11268_v53 = vld [vmem:[#allocation53_spill] sm:$0xff] }
  0x68   :  { %v560_v51 = vadd.f32 %v488_v63, %v5415_v33  ;;  %v524_v47 = vsel %vm255_vm0, %v522_v16, %v523_v25  ;;  %v527_v20 = vsel %vm255_vm0, %v525_v58, %v526_v43  ;;  %v561_v21 = vadd.f32 %v487_v42, %v5418_v54  ;;  %v11264_v42 = vld [vmem:[#allocation49_spill] sm:$0xff] }
  0x69   :  { %v562_v23 = vadd.f32 %v491_v22, %v5421_v48  ;;  %v563_v1 = vadd.f32 %v490_v61, %v5424_v27  ;;  %v564_v13 = vadd.f32 %v494_v30, %v5427_v60  ;;  %v565_v57 = vadd.f32 %v493_v24, %v5430_v46  ;;  %v11266_v24 = vld [vmem:[#allocation51_spill] sm:$0xff] }
  0x6a   :  { %v566_v3 = vadd.f32 %v497_v29, %v5433_v59  ;;  %v567_v0 = vadd.f32 %v496_v52, %v5436_v41  ;;  %v568_v33 = vadd.f32 %v500_v34, %v5439_v38  ;;  %v569_v63 = vadd.f32 %v499_v8, %v5442_v40  ;;  %v11262_v38 = vld [vmem:[#allocation47_spill] sm:$0xff]  ;;  %v11263_v8 = vld [vmem:[#allocation48_spill] sm:$0xff]  ;;  %v11265_v52 = vld [vmem:[#allocation50_spill] sm:$0xff] }
  0x6b   :  { %v570_v49 = vadd.f32 %v503_v28, %v5445_v37  ;;  %v571_v54 = vadd.f32 %v502_v14, %v5448_v62  ;;  %v572_v48 = vadd.f32 %v506_v32, %v5451_v36  ;;  %v573_v27 = vadd.f32 %v505_v56, %v5454_v11  ;;  %v11269_v14 = vld [vmem:[#allocation40_spill] sm:$0xff]  ;;  %v11270_v56 = vld [vmem:[#allocation41_spill] sm:$0xff] }
  0x6c   :  { %v574_v60 = vadd.f32 %v509_v44, %v5457_v5  ;;  %v575_v46 = vadd.f32 %v508_v10, %v5460_v12  ;;  %v576_v59 = vadd.f32 %v512_v9, %v5463_v31  ;;  %v577_v41 = vadd.f32 %v511_v55, %v5466_v2  ;;  %v11267_v5 = vld [vmem:[#allocation52_spill] sm:$0xff] }
  0x6d   :  { %v578_v40 = vadd.f32 %v515_v4, %v11262_v38  ;;  %v579_v37 = vadd.f32 %v514_v26, %v11263_v8  ;;  %v580_v62 = vadd.f32 %v518_v39, %v11264_v42  ;;  %v581_v36 = vadd.f32 %v517_v45, %v11265_v52 }
  0x6e   :  { %v582_v11 = vadd.f32 %v521_v15, %v11266_v24  ;;  %v583_v61 = vadd.f32 %v520_v6, %v11267_v5  ;;  %v584_v12 = vadd.f32 %v524_v47, %v11268_v53  ;;  %v585_v31 = vadd.f32 %v523_v25, %v11269_v14 }
  0x6f   :  { %v586_v2 = vadd.f32 %v527_v20, %v11270_v56  ;;  %v587_v10 = vadd.f32 %v526_v43, %v11271_v19  ;;  %v5625_v18 = vmax.f32 %v558_v7, 0.0  ;;  %v5627_v55 = vmax.f32 %v559_v50, 0.0 }
  0x70   :  { %v5629_v17 = vmax.f32 %v560_v51, 0.0  ;;  %v5631_v26 = vmax.f32 %v561_v21, 0.0  ;;  %v5633_v45 = vmax.f32 %v562_v23, 0.0  ;;  %v5635_v22 = vmax.f32 %v563_v1, 0.0 }
  0x71   :  { %11272 = vst [vmem:[#allocation44_spill] sm:$0xff] %v5625_v18  ;;  %v5637_v30 = vmax.f32 %v564_v13, 0.0  ;;  %v5639_v35 = vmax.f32 %v565_v57, 0.0  ;;  %v5641_v6 = vmax.f32 %v566_v3, 0.0  ;;  %v5643_v16 = vmax.f32 %v567_v0, 0.0  ;;  %v11302_v3 = vld [vmem:[#allocation10_spill] sm:$0xff] }
  0x72   :  { %11273 = vst [vmem:[#allocation42_spill] sm:$0xff] %v5627_v55  ;;  %v5645_v25 = vmax.f32 %v568_v33, 0.0  ;;  %v5647_v58 = vmax.f32 %v569_v63, 0.0  ;;  %v5649_v43 = vmax.f32 %v570_v49, 0.0  ;;  %v5651_v29 = vmax.f32 %v571_v54, 0.0  ;;  %v11303_v33 = vld [vmem:[#allocation11_spill] sm:$0xff] }
  0x73   :  { %11274 = vst [vmem:[#allocation47_spill] sm:$0xff] %v5629_v17  ;;  %v5653_v34 = vmax.f32 %v572_v48, 0.0  ;;  %v5655_v28 = vmax.f32 %v573_v27, 0.0  ;;  %v5657_v32 = vmax.f32 %v574_v60, 0.0  ;;  %v5659_v44 = vmax.f32 %v575_v46, 0.0  ;;  %v11304_v54 = vld [vmem:[#allocation12_spill] sm:$0xff] }
  0x74   :  { %11275 = vst [vmem:[#allocation48_spill] sm:$0xff] %v5631_v26  ;;  %v5661_v9 = vmax.f32 %v576_v59, 0.0  ;;  %v5663_v4 = vmax.f32 %v577_v41, 0.0  ;;  %v5665_v39 = vmax.f32 %v578_v40, 0.0  ;;  %v5667_v15 = vmax.f32 %v579_v37, 0.0  ;;  %v11305_v27 = vld [vmem:[#allocation13_spill] sm:$0xff] }
  0x75   :  { %11276 = vst [vmem:[#allocation49_spill] sm:$0xff] %v5633_v45  ;;  %v619_v7 = vstv %s5606_s16  ;;  %v5670_v50 = vmax.f32 %v580_v62, 0.0  ;;  %v5672_v51 = vmax.f32 %v581_v36, 0.0  ;;  %v5674_v47 = vmax.f32 %v582_v11, 0.0  ;;  %v11306_v46 = vld [vmem:[#allocation14_spill] sm:$0xff]  ;;  %v11307_v41 = vld [vmem:[#allocation15_spill] sm:$0xff] }
  0x76   :  { %11277 = vst [vmem:[#allocation50_spill] sm:$0xff] %v5635_v22  ;;  %v5676_v20 = vmax.f32 %v583_v61, 0.0  ;;  %v5678_v21 = vmax.f32 %v584_v12, 0.0  ;;  %v5680_v23 = vmax.f32 %v585_v31, 0.0  ;;  %v5682_v1 = vmax.f32 %v586_v2, 0.0  ;;  %v11308_v40 = vld [vmem:[#allocation16_spill] sm:$0xff] }
  0x77   :  { %11278 = vst [vmem:[#allocation51_spill] sm:$0xff] %v5637_v30  ;;  %v5684_v13 = vmax.f32 %v587_v10, 0.0  ;;  %v618_v57 = vstv %s5622_s18  ;;  %v620_v0 = vmul.f32 %v619_v7, %v11302_v3  ;;  %v621_v63 = vmul.f32 %v619_v7, %v11303_v33  ;;  %v11309_v37 = vld [vmem:[#allocation17_spill] sm:$0xff]  ;;  %v11310_v62 = vld [vmem:[#allocation18_spill] sm:$0xff]  ;;  %v11311_v36 = vld [vmem:[#allocation19_spill] sm:$0xff]  ;;  %s8329_s16 = sld [smem:[#allocation7 + $0x81]] }
  0x78   :  { %11279 = vst [vmem:[#allocation52_spill] sm:$0xff] %v5639_v35  ;;  %v5690_v49 = vstv %s5616_s17  ;;  %v622_v48 = vmul.f32 %v619_v7, %v11304_v54  ;;  %v623_v60 = vmul.f32 %v619_v7, %v11305_v27  ;;  %v624_v59 = vmul.f32 %v619_v7, %v11306_v46  ;;  %v11312_v11 = vld [vmem:[#allocation20_spill] sm:$0xff]  ;;  %v11313_v61 = vld [vmem:[#allocation21_spill] sm:$0xff]  ;;  %v11314_v12 = vld [vmem:[#allocation22_spill] sm:$0xff]  ;;  %s8536_s17 = sld [smem:[#allocation7 + $0x82]] }
  0x79   :  { %11280 = vst [vmem:[#allocation53_spill] sm:$0xff] %v5641_v6  ;;  %v625_v38 = vmul.f32 %v619_v7, %v11307_v41  ;;  %v626_v8 = vmul.f32 %v619_v7, %v11308_v40  ;;  %v627_v42 = vmul.f32 %v619_v7, %v11309_v37  ;;  %v628_v52 = vmul.f32 %v619_v7, %v11310_v62  ;;  %v11315_v31 = vld [vmem:[#allocation23_spill] sm:$0xff]  ;;  %v11316_v2 = vld [vmem:[#allocation24_spill] sm:$0xff]  ;;  %v11317_v10 = vld [vmem:[#allocation25_spill] sm:$0xff]  ;;  %s8698_s18 = sld [smem:[#allocation7 + $0x83]] }
  0x7a   :  { %11281 = vst [vmem:[#allocation40_spill] sm:$0xff] %v5643_v16  ;;  %v629_v24 = vmul.f32 %v619_v7, %v11311_v36  ;;  %v630_v5 = vmul.f32 %v619_v7, %v11312_v11  ;;  %v631_v53 = vmul.f32 %v619_v7, %v11313_v61  ;;  %v632_v14 = vmul.f32 %v619_v7, %v11314_v12  ;;  %v11328_v6 = vld [vmem:[#allocation36_spill] sm:$0xff]  ;;  %v11329_v30 = vld [vmem:[#allocation37_spill] sm:$0xff]  ;;  %v11330_v45 = vld [vmem:[#allocation38_spill] sm:$0xff] }
  0x7b   :  { %11282 = vst [vmem:[#allocation41_spill] sm:$0xff] %v5645_v25  ;;  %v633_v56 = vmul.f32 %v619_v7, %v11315_v31  ;;  %v634_v19 = vmul.f32 %v619_v7, %v11316_v2  ;;  %v11327_v25 = vld [vmem:[#allocation35_spill] sm:$0xff]  ;;  %v646_v35 = vmul.f32 %v619_v7, %v11328_v6  ;;  %v647_v22 = vmul.f32 %v619_v7, %v11329_v30 }
  0x7c   :  { %11283 = vst [vmem:[#allocation43_spill] sm:$0xff] %v5647_v58  ;;  %v645_v16 = vmul.f32 %v619_v7, %v11327_v25  ;;  %v648_v26 = vmul.f32 %v619_v7, %v11330_v45  ;;  %v11331_v17 = vld [vmem:[#allocation39_spill] sm:$0xff]  ;;  %v5720_v18 = vadd.f32 %v620_v0, %v618_v57  ;;  %v5732_v25 = vadd.f32 %v626_v8, %v618_v57 }
  0x7d   :  { %11284 = vst [vmem:[#allocation54_spill] sm:$0xff] %v5649_v43  ;;  %v11326_v43 = vld [vmem:[#allocation34_spill] sm:$0xff]  ;;  %v649_v55 = vmul.f32 %v619_v7, %v11331_v17  ;;  %v5734_v6 = vadd.f32 %v627_v42, %v618_v57  ;;  %v5736_v30 = vadd.f32 %v628_v52, %v618_v57  ;;  %v5738_v45 = vadd.f32 %v629_v24, %v618_v57 }
  0x7e   :  { %11285 = vst [vmem:[#allocation55_spill] sm:$0xff] %v5651_v29  ;;  %v644_v58 = vmul.f32 %v619_v7, %v11326_v43  ;;  %v5730_v43 = vadd.f32 %v625_v38, %v618_v57  ;;  %v5742_v0 = vadd.f32 %v631_v53, %v618_v57 }
  0x7f   :  { %11286 = vst [vmem:[#allocation56_spill] sm:$0xff] %v5653_v34  ;;  %v11325_v34 = vld [vmem:[#allocation33_spill] sm:$0xff] }
  0x80   :  { %11287 = vst [vmem:[#allocation57_spill] sm:$0xff] %v5655_v28  ;;  %v643_v29 = vmul.f32 %v619_v7, %v11325_v34  ;;  %v5728_v34 = vadd.f32 %v624_v59, %v618_v57 }
  0x81   :  { %11288 = vst [vmem:[#allocation58_spill] sm:$0xff] %v5657_v32  ;;  %v11324_v32 = vld [vmem:[#allocation32_spill] sm:$0xff] }
  0x82   :  { %11289 = vst [vmem:[#allocation59_spill] sm:$0xff] %v5659_v44  ;;  %v642_v28 = vmul.f32 %v619_v7, %v11324_v32  ;;  %v5726_v32 = vadd.f32 %v623_v60, %v618_v57  ;;  %v5748_v60 = vadd.f32 %v634_v19, %v618_v57  ;;  %v11344_v19 = vld [vmem:[#allocation32_spill] sm:$0xff] }
  0x83   :  { %11290 = vst [vmem:[#allocation60_spill] sm:$0xff] %v5661_v9  ;;  %v11323_v9 = vld [vmem:[#allocation31_spill] sm:$0xff] }
  0x84   :  { %11291 = vst [vmem:[#allocation61_spill] sm:$0xff] %v5663_v4  ;;  %v641_v44 = vmul.f32 %v619_v7, %v11323_v9  ;;  %v5724_v9 = vadd.f32 %v622_v48, %v618_v57  ;;  %v5746_v48 = vadd.f32 %v633_v56, %v618_v57  ;;  %v5764_v53 = vadd.f32 %v642_v28, %v618_v57 }
  0x85   :  { %11292 = vst [vmem:[#allocation62_spill] sm:$0xff] %v5665_v39  ;;  %v11322_v39 = vld [vmem:[#allocation30_spill] sm:$0xff]  ;;  %v5768_v56 = vadd.f32 %v644_v58, %v618_v57  ;;  %v5784_v28 = vmul.f32 %v5690_v49, %v11303_v33  ;;  %v683_v58 = vmul.f32 %v5690_v49, %v11304_v54  ;;  %v693_v33 = vmul.f32 %v5690_v49, %v11314_v12 }
  0x86   :  { %11293 = vst [vmem:[#allocation63_spill] sm:$0xff] %v5667_v15  ;;  %v640_v4 = vmul.f32 %v619_v7, %v11322_v39  ;;  %v5722_v39 = vadd.f32 %v621_v63, %v618_v57  ;;  %v5744_v63 = vadd.f32 %v632_v14, %v618_v57  ;;  %v5766_v14 = vadd.f32 %v643_v29, %v618_v57 }
  0x87   :  { %11294 = vst [vmem:[#allocation64_spill] sm:$0xff] %v5670_v50  ;;  %v11321_v50 = vld [vmem:[#allocation29_spill] sm:$0xff]  ;;  %v689_v29 = vmul.f32 %v5690_v49, %v11310_v62  ;;  %v5820_v54 = vmul.f32 %v5690_v49, %v11315_v31  ;;  %v11343_v31 = vld [vmem:[#allocation31_spill] sm:$0xff] }
  0x88   :  { %11295 = vst [vmem:[#allocation65_spill] sm:$0xff] %v5672_v51  ;;  %v639_v15 = vmul.f32 %v619_v7, %v11321_v50  ;;  %v5760_v24 = vadd.f32 %v640_v4, %v618_v57  ;;  %v5808_v4 = vmul.f32 %v5690_v49, %v11311_v36  ;;  %v5838_v62 = vmul.f32 %v5690_v49, %v11321_v50 }
  0x89   :  { %11296 = vst [vmem:[#allocation66_spill] sm:$0xff] %v5674_v47  ;;  %v11320_v47 = vld [vmem:[#allocation28_spill] sm:$0xff] }
  0x8a   :  { %11297 = vst [vmem:[#allocation67_spill] sm:$0xff] %v5676_v20  ;;  %v638_v51 = vmul.f32 %v619_v7, %v11320_v47  ;;  %v5758_v52 = vadd.f32 %v639_v15, %v618_v57  ;;  %v5778_v15 = vadd.f32 %v649_v55, %v618_v57  ;;  %v5796_v55 = vmul.f32 %v5690_v49, %v11307_v41 }
  0x8b   :  { %11298 = vst [vmem:[#allocation68_spill] sm:$0xff] %v5678_v21  ;;  %v11319_v21 = vld [vmem:[#allocation27_spill] sm:$0xff] }
  0x8c   :  { %11299 = vst [vmem:[#allocation69_spill] sm:$0xff] %v5680_v23  ;;  %v637_v20 = vmul.f32 %v619_v7, %v11319_v21  ;;  %v5756_v42 = vadd.f32 %v638_v51, %v618_v57  ;;  %v5776_v51 = vadd.f32 %v648_v26, %v618_v57  ;;  %v685_v26 = vmul.f32 %v5690_v49, %v11306_v46 }
  0x8d   :  { %11300 = vst [vmem:[#allocation70_spill] sm:$0xff] %v5682_v1  ;;  %v11318_v1 = vld [vmem:[#allocation26_spill] sm:$0xff]  ;;  %v5826_v46 = vmul.f32 %v5690_v49, %v11317_v10 }
  0x8e   :  { %11301 = vst [vmem:[#allocation71_spill] sm:$0xff] %v5684_v13  ;;  %v635_v13 = vmul.f32 %v619_v7, %v11317_v10  ;;  %v636_v23 = vmul.f32 %v619_v7, %v11318_v1  ;;  %v5740_v7 = vadd.f32 %v630_v5, %v618_v57  ;;  %v5754_v8 = vadd.f32 %v637_v20, %v618_v57  ;;  %v11345_v10 = vld [vmem:[#allocation33_spill] sm:$0xff] }
  0x8f   :  { %11332 = vst [vmem:[#allocation10_spill] sm:$0xff] %v5760_v24  ;;  %v5762_v5 = vadd.f32 %v641_v44, %v618_v57  ;;  %v5774_v20 = vadd.f32 %v647_v22, %v618_v57  ;;  %v681_v44 = vmul.f32 %v5690_v49, %v11302_v3  ;;  %v687_v22 = vmul.f32 %v5690_v49, %v11308_v40 }
  0x90   :  { %v5750_v59 = vadd.f32 %v635_v13, %v618_v57  ;;  %v5752_v38 = vadd.f32 %v636_v23, %v618_v57  ;;  %11334 = vst [vmem:[#allocation12_spill] sm:$0xff] %v5764_v53  ;;  %v5770_v13 = vadd.f32 %v645_v16, %v618_v57  ;;  %v5772_v23 = vadd.f32 %v646_v35, %v618_v57 }
  0x91   :  { %11333 = vst [vmem:[#allocation11_spill] sm:$0xff] %v5762_v5  ;;  %v5790_v35 = vmul.f32 %v5690_v49, %v11305_v27  ;;  %v5802_v16 = vmul.f32 %v5690_v49, %v11309_v37  ;;  %v691_v57 = vmul.f32 %v5690_v49, %v11312_v11  ;;  %v5814_v3 = vmul.f32 %v5690_v49, %v11313_v61  ;;  %v11342_v61 = vld [vmem:[#allocation30_spill] sm:$0xff] }
  0x92   :  { %11335 = vst [vmem:[#allocation13_spill] sm:$0xff] %v5766_v14  ;;  %v695_v27 = vmul.f32 %v5690_v49, %v11316_v2  ;;  %v697_v41 = vmul.f32 %v5690_v49, %v11318_v1  ;;  %v5832_v40 = vmul.f32 %v5690_v49, %v11319_v21  ;;  %v699_v37 = vmul.f32 %v5690_v49, %v11320_v47 }
  0x93   :  { %11336 = vst [vmem:[#allocation14_spill] sm:$0xff] %v5768_v56  ;;  %v741_v36 = vrot.slane %v681_v44, 1  ;;  %v742_v11 = vrot.slane %v5784_v28, 1  ;;  %v701_v12 = vmul.f32 %v5690_v49, %v11342_v61  ;;  %v5845_v1 = vmul.f32 %v5690_v49, %v11343_v31  ;;  %v11346_v44 = vld [vmem:[#allocation34_spill] sm:$0xff] }
  0x94   :  { %11337 = vst [vmem:[#allocation15_spill] sm:$0xff] %v5770_v13  ;;  %v744_v2 = vrot.slane %v683_v58, 1  ;;  %v745_v21 = vrot.slane %v5790_v35, 1  ;;  %v703_v47 = vmul.f32 %v5690_v49, %v11344_v19  ;;  %v5852_v50 = vmul.f32 %v5690_v49, %v11345_v10  ;;  %v11349_v58 = vld [vmem:[#allocation37_spill] sm:$0xff] }
  0x95   :  { %11338 = vst [vmem:[#allocation16_spill] sm:$0xff] %v5772_v23  ;;  %v705_v28 = vmul.f32 %v5690_v49, %v11346_v44  ;;  %v5864_v35 = vmul.f32 %v5690_v49, %v11349_v58  ;;  %v5870_v10 = vmul.f32 %v5690_v49, %v11331_v17  ;;  %v743_v44 = vsel %vm255_vm0, %v741_v36, %v742_v11 }
  0x96   :  { %11339 = vst [vmem:[#allocation17_spill] sm:$0xff] %v5774_v20  ;;  %v11350_v20 = vld [vmem:[#allocation38_spill] sm:$0xff]  ;;  %v747_v23 = vrot.slane %v685_v26, 1  ;;  %v750_v13 = vrot.slane %v687_v22, 1  ;;  %v746_v56 = vsel %vm255_vm0, %v744_v2, %v745_v21  ;;  %v753_v14 = vrot.slane %v689_v29, 1 }
  0x97   :  { %11340 = vst [vmem:[#allocation18_spill] sm:$0xff] %v5776_v51  ;;  %v11348_v51 = vld [vmem:[#allocation36_spill] sm:$0xff]  ;;  %v709_v19 = vmul.f32 %v5690_v49, %v11350_v20  ;;  %v754_v58 = vrot.slane %v5808_v4, 1  ;;  %v756_v53 = vrot.slane %v691_v57, 1  ;;  %v757_v20 = vrot.slane %v5814_v3, 1 }
  0x98   :  { %11341 = vst [vmem:[#allocation19_spill] sm:$0xff] %v5778_v15  ;;  %v11347_v15 = vld [vmem:[#allocation35_spill] sm:$0xff]  ;;  %v707_v31 = vmul.f32 %v5690_v49, %v11348_v51  ;;  %v751_v51 = vrot.slane %v5802_v16, 1  ;;  %v759_v5 = vrot.slane %v693_v33, 1  ;;  %v760_v17 = vrot.slane %v5820_v54, 1 }
  0x99   :  { %v5858_v61 = vmul.f32 %v5690_v49, %v11347_v15  ;;  %v748_v15 = vrot.slane %v5796_v55, 1  ;;  %v762_v49 = vrot.slane %v695_v27, 1  ;;  %v763_v36 = vrot.slane %v5826_v46, 1 }
  0x9a   :  { %v765_v26 = vrot.slane %v697_v41, 1  ;;  %v766_v55 = vrot.slane %v5832_v40, 1  ;;  %v768_v22 = vrot.slane %v699_v37, 1  ;;  %v769_v2 = vrot.slane %v5838_v62, 1 }
  0x9b   :  { %v771_v24 = vrot.slane %v701_v12, 1  ;;  %v772_v16 = vrot.slane %v5845_v1, 1  ;;  %v774_v29 = vrot.slane %v703_v47, 1  ;;  %v775_v4 = vrot.slane %v5852_v50, 1 }
  0x9c   :  { %v777_v57 = vrot.slane %v705_v28, 1  ;;  %v778_v3 = vrot.slane %v5858_v61, 1  ;;  %v780_v33 = vrot.slane %v707_v31, 1  ;;  %v781_v54 = vrot.slane %v5864_v35, 1 }
  0x9d   :  { %v783_v27 = vrot.slane %v709_v19, 1  ;;  %v784_v46 = vrot.slane %v5870_v10, 1  ;;  %v749_v41 = vsel %vm255_vm0, %v747_v23, %v748_v15  ;;  %v752_v40 = vsel %vm255_vm0, %v750_v13, %v751_v51 }
  0x9e   :  { %v755_v37 = vsel %vm255_vm0, %v753_v14, %v754_v58  ;;  %v758_v62 = vsel %vm255_vm0, %v756_v53, %v757_v20  ;;  %v761_v12 = vsel %vm255_vm0, %v759_v5, %v760_v17  ;;  %v764_v1 = vsel %vm255_vm0, %v762_v49, %v763_v36 }
  0x9f   :  { %v767_v47 = vsel %vm255_vm0, %v765_v26, %v766_v55  ;;  %v770_v50 = vsel %vm255_vm0, %v768_v22, %v769_v2  ;;  %v773_v28 = vsel %vm255_vm0, %v771_v24, %v772_v16  ;;  %v776_v61 = vsel %vm255_vm0, %v774_v29, %v775_v4  ;;  %v6007_v29 = vld [vmem:[%s10822_s4 + $0x18] sm:$0xff] }
  0xa0   :  { %v779_v23 = vsel %vm255_vm0, %v777_v57, %v778_v3  ;;  %v5901_v13 = vadd.f32 %v743_v44, %v5720_v18  ;;  %v782_v53 = vsel %vm255_vm0, %v780_v33, %v781_v54  ;;  %v785_v5 = vsel %vm255_vm0, %v783_v27, %v784_v46  ;;  %11366 = vst [vmem:[#allocation25_spill] sm:$0xff] %v6007_v29  ;;  %v6014_v57 = vld [vmem:[%s10822_s4 + $0x20] sm:$0xff] }
  0xa1   :  { %v5908_v14 = vadd.f32 %v742_v11, %v5722_v39  ;;  %v5911_v31 = vadd.f32 %v746_v56, %v5724_v9  ;;  %v5914_v24 = vadd.f32 %v745_v21, %v5726_v32  ;;  %v5917_v35 = vadd.f32 %v749_v41, %v5728_v34  ;;  %11367 = vst [vmem:[#allocation26_spill] sm:$0xff] %v6014_v57 }
  0xa2   :  { %v5920_v18 = vadd.f32 %v748_v15, %v5730_v43  ;;  %v5923_v19 = vadd.f32 %v752_v40, %v5732_v25  ;;  %v5926_v10 = vadd.f32 %v751_v51, %v5734_v6  ;;  %v5929_v39 = vadd.f32 %v755_v37, %v5736_v30  ;;  %v6038_v40 = vld [vmem:[%s10822_s4 + $0x38] sm:$0xff] }
  0xa3   :  { %v5932_v9 = vadd.f32 %v754_v58, %v5738_v45  ;;  %v5935_v32 = vadd.f32 %v758_v62, %v5740_v7  ;;  %v5938_v34 = vadd.f32 %v757_v20, %v5742_v0  ;;  %v5941_v43 = vadd.f32 %v761_v12, %v5744_v63  ;;  %v11357_v58 = vld [vmem:[#allocation16_spill] sm:$0xff]  ;;  %11371 = vst [vmem:[#allocation39_spill] sm:$0xff] %v6038_v40  ;;  %v6045_v62 = vld [vmem:[%s10822_s4 + $0x40] sm:$0xff] }
  0xa4   :  { %v5944_v25 = vadd.f32 %v760_v17, %v5746_v48  ;;  %v5947_v6 = vadd.f32 %v764_v1, %v5748_v60  ;;  %v5950_v30 = vadd.f32 %v763_v36, %v5750_v59  ;;  %v5953_v45 = vadd.f32 %v767_v47, %v5752_v38  ;;  %v11351_v48 = vld [vmem:[#allocation10_spill] sm:$0xff]  ;;  %v11352_v60 = vld [vmem:[#allocation11_spill] sm:$0xff]  ;;  %v11353_v38 = vld [vmem:[#allocation12_spill] sm:$0xff]  ;;  %11372 = vst [vmem:[#allocation30_spill] sm:$0xff] %v6045_v62 }
  0xa5   :  { %v5956_v7 = vadd.f32 %v766_v55, %v5754_v8  ;;  %v5959_v0 = vadd.f32 %v770_v50, %v5756_v42  ;;  %v5962_v63 = vadd.f32 %v769_v2, %v5758_v52  ;;  %v5965_v56 = vadd.f32 %v773_v28, %v11351_v48  ;;  %v11354_v8 = vld [vmem:[#allocation13_spill] sm:$0xff]  ;;  %v11355_v42 = vld [vmem:[#allocation14_spill] sm:$0xff]  ;;  %v11356_v52 = vld [vmem:[#allocation15_spill] sm:$0xff] }
  0xa6   :  { %v5968_v11 = vadd.f32 %v772_v16, %v11352_v60  ;;  %v5971_v59 = vstv %s5887_s19  ;;  %v5974_v21 = vadd.f32 %v776_v61, %v11353_v38  ;;  %v5977_v44 = vadd.f32 %v775_v4, %v11354_v8  ;;  %v11359_v17 = vld [vmem:[#allocation17_spill] sm:$0xff]  ;;  %v11361_v36 = vld [vmem:[#allocation18_spill] sm:$0xff]  ;;  %v11363_v55 = vld [vmem:[#allocation19_spill] sm:$0xff]  ;;  %s8754_s19 = sld [smem:[#allocation7 + $0x84]] }
  0xa7   :  { %v5980_v15 = vadd.f32 %v779_v23, %v11355_v42  ;;  %v5983_v51 = vadd.f32 %v778_v3, %v11356_v52  ;;  %v5986_v20 = vadd.f32 %v782_v53, %v11357_v58  ;;  %v5989_v49 = vadd.f32 %v781_v54, %v11359_v17  ;;  %v6000_v2 = vld [vmem:[%s10822_s4 + $0x10] sm:$0xff]  ;;  %v6024_v54 = vld [vmem:[%s10822_s4 + $0x28] sm:$0xff]  ;;  %v6066_v61 = vld [vmem:[%s10822_s4 + $0x58] sm:$0xff] }
  0xa8   :  { %v5992_v26 = vadd.f32 %v785_v5, %v11361_v36  ;;  %v5995_v22 = vadd.f32 %v784_v46, %v11363_v55  ;;  %11365 = vst [vmem:[#allocation24_spill] sm:$0xff] %v6000_v2  ;;  %v847_v16 = vmul.f32 %v6000_v2, %v5971_v59  ;;  %v848_v4 = vmul.f32 %v6007_v29, %v5971_v59  ;;  %v6031_v46 = vld [vmem:[%s10822_s4 + $0x30] sm:$0xff]  ;;  %v6052_v1 = vld [vmem:[%s10822_s4 + $0x48] sm:$0xff]  ;;  %v6073_v53 = vld [vmem:[%s10822_s4 + $0x60] sm:$0xff] }
  0xa9   :  { %11358 = vst [vmem:[#allocation20_spill] sm:$0xff] %v5986_v20  ;;  %v849_v3 = vmul.f32 %v6014_v57, %v5971_v59  ;;  %v6019_v33 = vstv %s5903_s20  ;;  %v850_v27 = vmul.f32 %v6024_v54, %v5971_v59  ;;  %v851_v41 = vmul.f32 %v6031_v46, %v5971_v59  ;;  %v6059_v50 = vld [vmem:[%s10822_s4 + $0x50] sm:$0xff]  ;;  %v6080_v48 = vld [vmem:[%s10822_s4 + $0x68] sm:$0xff]  ;;  %v6094_v42 = vld [vmem:[%s10822_s4 + $0x78] sm:$0xff]  ;;  %s8858_s20 = sld [smem:[#allocation7 + $0x85]] }
  0xaa   :  { %11360 = vst [vmem:[#allocation21_spill] sm:$0xff] %v5989_v49  ;;  %v852_v37 = vmul.f32 %v6038_v40, %v5971_v59  ;;  %v853_v12 = vmul.f32 %v6045_v62, %v5971_v59  ;;  %v854_v47 = vmul.f32 %v6052_v1, %v5971_v59  ;;  %v855_v28 = vmul.f32 %v6059_v50, %v5971_v59  ;;  %v6087_v38 = vld [vmem:[%s10822_s4 + $0x70] sm:$0xff]  ;;  %v6101_v58 = vld [vmem:[%s10822_s4 + $0x80] sm:$0xff]  ;;  %v6108_v36 = vld [vmem:[%s10822_s4 + $0x88] sm:$0xff] }
  0xab   :  { %11362 = vst [vmem:[#allocation22_spill] sm:$0xff] %v5992_v26  ;;  %v856_v23 = vmul.f32 %v6066_v61, %v5971_v59  ;;  %v857_v5 = vmul.f32 %v6073_v53, %v5971_v59  ;;  %v858_v60 = vmul.f32 %v6080_v48, %v5971_v59  ;;  %v859_v8 = vmul.f32 %v6087_v38, %v5971_v59  ;;  %v11394_v2 = vld [vmem:[#allocation45_spill] sm:$0xff] }
  0xac   :  { %11364 = vst [vmem:[#allocation23_spill] sm:$0xff] %v5995_v22  ;;  %v860_v52 = vmul.f32 %v6094_v42, %v5971_v59  ;;  %v861_v17 = vmul.f32 %v6101_v58, %v5971_v59  ;;  %v862_v55 = vmul.f32 %v6108_v36, %v5971_v59  ;;  %v6201_v26 = vadd.f32 %v847_v16, %v5901_v13 }
  0xad   :  { %11368 = vst [vmem:[#allocation27_spill] sm:$0xff] %v6019_v33  ;;  %v875_v33 = vmul.f32 %v5971_v59, %v11394_v2  ;;  %v6204_v49 = vadd.f32 %v848_v4, %v5908_v14  ;;  %v6210_v20 = vadd.f32 %v850_v27, %v5914_v24  ;;  %v6216_v2 = vadd.f32 %v852_v37, %v5920_v18 }
  0xae   :  { %11369 = vst [vmem:[#allocation28_spill] sm:$0xff] %v6024_v54  ;;  %v6222_v13 = vadd.f32 %v854_v47, %v5926_v10  ;;  %v6225_v14 = vadd.f32 %v855_v28, %v5929_v39  ;;  %v6231_v24 = vadd.f32 %v857_v5, %v5935_v32  ;;  %v6237_v18 = vadd.f32 %v859_v8, %v5941_v43 }
  0xaf   :  { %11370 = vst [vmem:[#allocation29_spill] sm:$0xff] %v6031_v46  ;;  %v6243_v10 = vadd.f32 %v861_v17, %v5947_v6  ;;  %v6246_v39 = vadd.f32 %v862_v55, %v5950_v30 }
  0xb0   :  { %11373 = vst [vmem:[#allocation31_spill] sm:$0xff] %v6052_v1 }
  0xb1   :  { %11374 = vst [vmem:[#allocation32_spill] sm:$0xff] %v6059_v50 }
  0xb2   :  { %11375 = vst [vmem:[#allocation33_spill] sm:$0xff] %v6066_v61 }
  0xb3   :  { %11376 = vst [vmem:[#allocation34_spill] sm:$0xff] %v6073_v53 }
  0xb4   :  { %11377 = vst [vmem:[#allocation35_spill] sm:$0xff] %v6080_v48 }
  0xb5   :  { %11378 = vst [vmem:[#allocation36_spill] sm:$0xff] %v6087_v38 }
  0xb6   :  { %11379 = vst [vmem:[#allocation37_spill] sm:$0xff] %v6094_v42  ;;  %v6115_v42 = vld [vmem:[%s10822_s4 + $0x90] sm:$0xff] }
  0xb7   :  { %11380 = vst [vmem:[#allocation38_spill] sm:$0xff] %v6101_v58  ;;  %v863_v38 = vmul.f32 %v6115_v42, %v5971_v59  ;;  %v6122_v58 = vld [vmem:[%s10822_s4 + $0x98] sm:$0xff]  ;;  %v11418_v47 = vld [vmem:[#allocation31_spill] sm:$0xff] }
  0xb8   :  { %11381 = vst [vmem:[#allocation10_spill] sm:$0xff] %v6108_v36  ;;  %v864_v48 = vmul.f32 %v6122_v58, %v5971_v59  ;;  %v6129_v36 = vld [vmem:[%s10822_s4 + $0xa0] sm:$0xff]  ;;  %v11419_v28 = vld [vmem:[#allocation32_spill] sm:$0xff] }
  0xb9   :  { %11382 = vst [vmem:[#allocation11_spill] sm:$0xff] %v6115_v42  ;;  %v865_v53 = vmul.f32 %v6129_v36, %v5971_v59  ;;  %v6136_v42 = vld [vmem:[%s10822_s4 + $0xa8] sm:$0xff] }
  0xba   :  { %11383 = vst [vmem:[#allocation12_spill] sm:$0xff] %v6122_v58  ;;  %v866_v61 = vmul.f32 %v6136_v42, %v5971_v59  ;;  %v6143_v58 = vld [vmem:[%s10822_s4 + $0xb0] sm:$0xff]  ;;  %v6252_v32 = vadd.f32 %v864_v48, %v5956_v7  ;;  %v11421_v5 = vld [vmem:[#allocation34_spill] sm:$0xff] }
  0xbb   :  { %11384 = vst [vmem:[#allocation13_spill] sm:$0xff] %v6129_v36  ;;  %v867_v50 = vmul.f32 %v6143_v58, %v5971_v59  ;;  %v6150_v36 = vld [vmem:[%s10822_s4 + $0xb8] sm:$0xff] }
  0xbc   :  { %11385 = vst [vmem:[#allocation14_spill] sm:$0xff] %v6136_v42  ;;  %v868_v1 = vmul.f32 %v6150_v36, %v5971_v59  ;;  %v6157_v42 = vld [vmem:[%s10822_s4 + $0xc0] sm:$0xff]  ;;  %v6258_v43 = vadd.f32 %v866_v61, %v5962_v63  ;;  %v11402_v63 = vld [vmem:[#allocation20_spill] sm:$0xff] }
  0xbd   :  { %11386 = vst [vmem:[#allocation15_spill] sm:$0xff] %v6143_v58  ;;  %v869_v62 = vmul.f32 %v6157_v42, %v5971_v59  ;;  %v6164_v58 = vld [vmem:[%s10822_s4 + $0xc8] sm:$0xff]  ;;  %v11423_v8 = vld [vmem:[#allocation36_spill] sm:$0xff]  ;;  %v11424_v17 = vld [vmem:[#allocation37_spill] sm:$0xff] }
  0xbe   :  { %11387 = vst [vmem:[#allocation16_spill] sm:$0xff] %v6150_v36  ;;  %v870_v40 = vmul.f32 %v6164_v58, %v5971_v59  ;;  %v6171_v36 = vld [vmem:[%s10822_s4 + $0xd0] sm:$0xff]  ;;  %v6264_v6 = vadd.f32 %v868_v1, %v5968_v11  ;;  %v11406_v11 = vld [vmem:[#allocation22_spill] sm:$0xff] }
  0xbf   :  { %11388 = vst [vmem:[#allocation17_spill] sm:$0xff] %v6157_v42  ;;  %v871_v46 = vmul.f32 %v6171_v36, %v5971_v59  ;;  %v6178_v42 = vld [vmem:[%s10822_s4 + $0xd8] sm:$0xff]  ;;  %v6267_v30 = vadd.f32 %v869_v62, %v5974_v21  ;;  %v11408_v21 = vld [vmem:[#allocation23_spill] sm:$0xff] }
  0xc0   :  { %11389 = vst [vmem:[#allocation18_spill] sm:$0xff] %v6164_v58  ;;  %v872_v54 = vmul.f32 %v6178_v42, %v5971_v59  ;;  %v6185_v58 = vld [vmem:[%s10822_s4 + $0xe0] sm:$0xff] }
  0xc1   :  { %11390 = vst [vmem:[#allocation19_spill] sm:$0xff] %v6171_v36  ;;  %v873_v57 = vmul.f32 %v6185_v58, %v5971_v59  ;;  %v6192_v36 = vld [vmem:[%s10822_s4 + $0xe8] sm:$0xff]  ;;  %v6273_v7 = vadd.f32 %v871_v46, %v5980_v15  ;;  %v11412_v15 = vld [vmem:[#allocation25_spill] sm:$0xff] }
  0xc2   :  { %11391 = vst [vmem:[#allocation72_spill] sm:$0xff] %v6178_v42  ;;  %v874_v29 = vmul.f32 %v6192_v36, %v5971_v59  ;;  %v11395_v42 = vld [vmem:[#allocation46_spill] sm:$0xff] }
  0xc3   :  { %11392 = vst [vmem:[#allocation73_spill] sm:$0xff] %v6185_v58  ;;  %v876_v22 = vmul.f32 %v5971_v59, %v11395_v42  ;;  %v6207_v58 = vadd.f32 %v849_v3, %v5911_v31  ;;  %v6219_v59 = vadd.f32 %v853_v12, %v5923_v19  ;;  %v6228_v31 = vadd.f32 %v856_v23, %v5932_v9  ;;  %v11417_v12 = vld [vmem:[#allocation30_spill] sm:$0xff]  ;;  %v11420_v23 = vld [vmem:[#allocation33_spill] sm:$0xff] }
  0xc4   :  { %11393 = vst [vmem:[#allocation74_spill] sm:$0xff] %v6192_v36  ;;  %v6213_v36 = vadd.f32 %v851_v41, %v5917_v35  ;;  %v6234_v35 = vadd.f32 %v858_v60, %v5938_v34  ;;  %v6240_v19 = vadd.f32 %v860_v52, %v5944_v25  ;;  %v6249_v9 = vadd.f32 %v863_v38, %v5953_v45  ;;  %v11411_v41 = vld [vmem:[#allocation24_spill] sm:$0xff]  ;;  %v11422_v60 = vld [vmem:[#allocation35_spill] sm:$0xff] }
  0xc5   :  { %v6255_v34 = vadd.f32 %v865_v53, %v5959_v0  ;;  %v6261_v25 = vadd.f32 %v867_v50, %v5965_v56  ;;  %11397 = vst [vmem:[#allocation75_spill] sm:$0xff] %v6264_v6  ;;  %v6270_v45 = vadd.f32 %v870_v40, %v5977_v44  ;;  %v6276_v0 = vadd.f32 %v872_v54, %v5983_v51  ;;  %v11404_v56 = vld [vmem:[#allocation21_spill] sm:$0xff]  ;;  %v11410_v44 = vld [vmem:[#allocation27_spill] sm:$0xff]  ;;  %v11413_v51 = vld [vmem:[#allocation26_spill] sm:$0xff] }
  0xc6   :  { %11398 = vst [vmem:[#allocation76_spill] sm:$0xff] %v6267_v30  ;;  %v6279_v16 = vadd.f32 %v873_v57, %v11402_v63  ;;  %v6282_v4 = vadd.f32 %v874_v29, %v11404_v56  ;;  %v6285_v3 = vadd.f32 %v875_v33, %v11406_v11  ;;  %v6288_v27 = vadd.f32 %v876_v22, %v11408_v21  ;;  %v11414_v54 = vld [vmem:[#allocation28_spill] sm:$0xff]  ;;  %v11415_v33 = vld [vmem:[#allocation29_spill] sm:$0xff]  ;;  %v11416_v22 = vld [vmem:[#allocation39_spill] sm:$0xff] }
  0xc7   :  { %11396 = vst [vmem:[#allocation46_spill] sm:$0xff] %v6261_v25  ;;  %v908_v40 = vmul.f32 %v11411_v41, %v11410_v44  ;;  %v6294_v46 = vmul.f32 %v11412_v15, %v11410_v44  ;;  %v910_v57 = vmul.f32 %v11413_v51, %v11410_v44  ;;  %v6300_v29 = vmul.f32 %v11414_v54, %v11410_v44  ;;  %v11425_v63 = vld [vmem:[#allocation38_spill] sm:$0xff]  ;;  %v11432_v15 = vld [vmem:[#allocation16_spill] sm:$0xff] }
  0xc8   :  { %11399 = vst [vmem:[#allocation77_spill] sm:$0xff] %v6270_v45  ;;  %v912_v37 = vmul.f32 %v11415_v33, %v11410_v44  ;;  %v6306_v62 = vmul.f32 %v11416_v22, %v11410_v44  ;;  %v914_v1 = vmul.f32 %v11417_v12, %v11410_v44  ;;  %v6312_v50 = vmul.f32 %v11418_v47, %v11410_v44  ;;  %v11426_v11 = vld [vmem:[#allocation10_spill] sm:$0xff] }
  0xc9   :  { %11400 = vst [vmem:[#allocation78_spill] sm:$0xff] %v6273_v7  ;;  %v916_v61 = vmul.f32 %v11419_v28, %v11410_v44  ;;  %v6318_v53 = vmul.f32 %v11420_v23, %v11410_v44  ;;  %v918_v48 = vmul.f32 %v11421_v5, %v11410_v44  ;;  %v6324_v38 = vmul.f32 %v11422_v60, %v11410_v44  ;;  %v11427_v5 = vld [vmem:[#allocation11_spill] sm:$0xff]  ;;  %v11428_v60 = vld [vmem:[#allocation12_spill] sm:$0xff] }
  0xca   :  { %11401 = vst [vmem:[#allocation79_spill] sm:$0xff] %v6276_v0  ;;  %v920_v52 = vmul.f32 %v11423_v8, %v11410_v44  ;;  %v6330_v55 = vmul.f32 %v11424_v17, %v11410_v44  ;;  %v922_v56 = vmul.f32 %v11425_v63, %v11410_v44  ;;  %v6336_v21 = vmul.f32 %v11426_v11, %v11410_v44  ;;  %v11429_v8 = vld [vmem:[#allocation13_spill] sm:$0xff]  ;;  %v11430_v17 = vld [vmem:[#allocation14_spill] sm:$0xff]  ;;  %v11431_v63 = vld [vmem:[#allocation15_spill] sm:$0xff] }
  0xcb   :  { %11403 = vst [vmem:[#allocation20_spill] sm:$0xff] %v6279_v16  ;;  %v924_v23 = vmul.f32 %v11427_v5, %v11410_v44  ;;  %v6342_v28 = vmul.f32 %v11428_v60, %v11410_v44  ;;  %v926_v47 = vmul.f32 %v11429_v8, %v11410_v44  ;;  %v6348_v12 = vmul.f32 %v11430_v17, %v11410_v44  ;;  %v11433_v8 = vld [vmem:[#allocation17_spill] sm:$0xff] }
  0xcc   :  { %11405 = vst [vmem:[#allocation21_spill] sm:$0xff] %v6282_v4  ;;  %v928_v22 = vmul.f32 %v11431_v63, %v11410_v44  ;;  %v968_v33 = vrot.slane %v908_v40, 1  ;;  %v969_v11 = vrot.slane %v6294_v46, 1  ;;  %v971_v54 = vrot.slane %v910_v57, 1  ;;  %v11435_v40 = vld [vmem:[#allocation19_spill] sm:$0xff]  ;;  %v11436_v57 = vld [vmem:[#allocation72_spill] sm:$0xff] }
  0xcd   :  { %11407 = vst [vmem:[#allocation22_spill] sm:$0xff] %v6285_v3  ;;  %v972_v5 = vrot.slane %v6300_v29, 1  ;;  %v974_v51 = vrot.slane %v912_v37, 1  ;;  %v975_v60 = vrot.slane %v6306_v62, 1  ;;  %v6357_v41 = vmul.f32 %v11432_v15, %v11410_v44  ;;  %v11437_v37 = vld [vmem:[#allocation73_spill] sm:$0xff]  ;;  %v11438_v15 = vld [vmem:[#allocation74_spill] sm:$0xff] }
  0xce   :  { %11409 = vst [vmem:[#allocation23_spill] sm:$0xff] %v6288_v27  ;;  %v930_v17 = vmul.f32 %v11433_v8, %v11410_v44  ;;  %v11434_v27 = vld [vmem:[#allocation18_spill] sm:$0xff]  ;;  %v932_v46 = vmul.f32 %v11435_v40, %v11410_v44  ;;  %v6369_v29 = vmul.f32 %v11436_v57, %v11410_v44  ;;  %v934_v62 = vmul.f32 %v11437_v37, %v11410_v44  ;;  %v11439_v4 = vld [vmem:[#allocation45_spill] sm:$0xff] }
  0xcf   :  { %v6363_v3 = vmul.f32 %v11434_v27, %v11410_v44  ;;  %v6375_v63 = vmul.f32 %v11438_v15, %v11410_v44  ;;  %v936_v8 = vmul.f32 %v11410_v44, %v11439_v4  ;;  %v6381_v27 = vmul.f32 %v11410_v44, %v11395_v42 }
  0xd0   :  { %v970_v40 = vsel %vm255_vm0, %v968_v33, %v969_v11  ;;  %v977_v16 = vrot.slane %v914_v1, 1  ;;  %v978_v57 = vrot.slane %v6312_v50, 1  ;;  %v973_v0 = vsel %vm255_vm0, %v971_v54, %v972_v5 }
  0xd1   :  { %v976_v37 = vsel %vm255_vm0, %v974_v51, %v975_v60  ;;  %v980_v7 = vrot.slane %v916_v61, 1  ;;  %v981_v15 = vrot.slane %v6318_v53, 1  ;;  %v983_v45 = vrot.slane %v918_v48, 1 }
  0xd2   :  { %v984_v30 = vrot.slane %v6324_v38, 1  ;;  %v986_v4 = vrot.slane %v920_v52, 1  ;;  %v987_v6 = vrot.slane %v6330_v55, 1  ;;  %v989_v42 = vrot.slane %v922_v56, 1 }
  0xd3   :  { %v990_v44 = vrot.slane %v6336_v21, 1  ;;  %v992_v33 = vrot.slane %v924_v23, 1  ;;  %v993_v1 = vrot.slane %v6342_v28, 1  ;;  %v995_v50 = vrot.slane %v926_v47, 1 }
  0xd4   :  { %v996_v54 = vrot.slane %v6348_v12, 1  ;;  %v998_v25 = vrot.slane %v928_v22, 1  ;;  %v999_v51 = vrot.slane %v6357_v41, 1  ;;  %v1001_v61 = vrot.slane %v930_v17, 1 }
  0xd5   :  { %v1002_v53 = vrot.slane %v6363_v3, 1  ;;  %v1004_v48 = vrot.slane %v932_v46, 1  ;;  %v1005_v38 = vrot.slane %v6369_v29, 1  ;;  %v1007_v52 = vrot.slane %v934_v62, 1 }
  0xd6   :  { %v1008_v55 = vrot.slane %v6375_v63, 1  ;;  %v1010_v56 = vrot.slane %v936_v8, 1  ;;  %v1011_v23 = vrot.slane %v6381_v27, 1  ;;  %v979_v28 = vsel %vm255_vm0, %v977_v16, %v978_v57 }
  0xd7   :  { %v982_v47 = vsel %vm255_vm0, %v980_v7, %v981_v15  ;;  %v985_v22 = vsel %vm255_vm0, %v983_v45, %v984_v30  ;;  %v988_v41 = vsel %vm255_vm0, %v986_v4, %v987_v6  ;;  %v991_v12 = vsel %vm255_vm0, %v989_v42, %v990_v44 }
  0xd8   :  { %v994_v3 = vsel %vm255_vm0, %v992_v33, %v993_v1  ;;  %v997_v17 = vsel %vm255_vm0, %v995_v50, %v996_v54  ;;  %v1000_v21 = vsel %vm255_vm0, %v998_v25, %v999_v51  ;;  %v1003_v8 = vsel %vm255_vm0, %v1001_v61, %v1002_v53 }
  0xd9   :  { %v1006_v27 = vsel %vm255_vm0, %v1004_v48, %v1005_v38  ;;  %v1043_v16 = vadd.f32 %v970_v40, %v6201_v26  ;;  %v1044_v7 = vadd.f32 %v969_v11, %v6204_v49  ;;  %v1009_v45 = vsel %vm255_vm0, %v1007_v52, %v1008_v55 }
  0xda   :  { %v1012_v63 = vsel %vm255_vm0, %v1010_v56, %v1011_v23  ;;  %v1045_v46 = vadd.f32 %v973_v0, %v6207_v58  ;;  %v1046_v29 = vadd.f32 %v972_v5, %v6210_v20  ;;  %v1047_v62 = vadd.f32 %v976_v37, %v6213_v36  ;;  %v11442_v0 = vld [vmem:[#allocation76_spill] sm:$0xff]  ;;  %v11445_v5 = vld [vmem:[#allocation79_spill] sm:$0xff] }
  0xdb   :  { %v1048_v25 = vadd.f32 %v975_v60, %v6216_v2  ;;  %v1049_v4 = vadd.f32 %v979_v28, %v6219_v59  ;;  %v1050_v42 = vadd.f32 %v978_v57, %v6222_v13  ;;  %v1051_v26 = vadd.f32 %v982_v47, %v6225_v14  ;;  %v11446_v60 = vld [vmem:[#allocation20_spill] sm:$0xff]  ;;  %v11447_v57 = vld [vmem:[#allocation21_spill] sm:$0xff] }
  0xdc   :  { %v1052_v49 = vadd.f32 %v981_v15, %v6228_v31  ;;  %v1053_v11 = vadd.f32 %v985_v22, %v6231_v24  ;;  %v1054_v40 = vadd.f32 %v984_v30, %v6234_v35  ;;  %v1055_v58 = vadd.f32 %v988_v41, %v6237_v18  ;;  %v11440_v24 = vld [vmem:[#allocation46_spill] sm:$0xff]  ;;  %v11441_v30 = vld [vmem:[#allocation75_spill] sm:$0xff] }
  0xdd   :  { %v1056_v20 = vadd.f32 %v987_v6, %v6240_v19  ;;  %v1057_v36 = vadd.f32 %v991_v12, %v6243_v10  ;;  %v1058_v2 = vadd.f32 %v990_v44, %v6246_v39  ;;  %v1059_v59 = vadd.f32 %v994_v3, %v6249_v9  ;;  %v11443_v6 = vld [vmem:[#allocation77_spill] sm:$0xff]  ;;  %v11444_v39 = vld [vmem:[#allocation78_spill] sm:$0xff]  ;;  %v11449_v44 = vld [vmem:[#allocation23_spill] sm:$0xff] }
  0xde   :  { %v1060_v13 = vadd.f32 %v993_v1, %v6252_v32  ;;  %v1061_v14 = vadd.f32 %v997_v17, %v6255_v34  ;;  %v1062_v31 = vadd.f32 %v996_v54, %v6258_v43  ;;  %v1063_v35 = vadd.f32 %v1000_v21, %v11440_v24  ;;  %v11448_v43 = vld [vmem:[#allocation22_spill] sm:$0xff] }
  0xdf   :  { %v1064_v18 = vadd.f32 %v999_v51, %v11441_v30  ;;  %v1065_v19 = vadd.f32 %v1003_v8, %v11442_v0  ;;  %v1066_v10 = vadd.f32 %v1002_v53, %v11443_v6  ;;  %v1067_v15 = vadd.f32 %v1006_v27, %v11444_v39 }
  0xe0   :  { %v1068_v9 = vadd.f32 %v1005_v38, %v11445_v5  ;;  %v1069_v32 = vadd.f32 %v1009_v45, %v11446_v60  ;;  %v1070_v34 = vadd.f32 %v1008_v55, %v11447_v57  ;;  %v1071_v37 = vadd.f32 %v1012_v63, %v11448_v43 }
  0xe1   :  { %v1072_v33 = vadd.f32 %v1011_v23, %v11449_v44  ;;  %v6446_v1 = vmax.f32 %v1043_v16, 0.0  ;;  %v6448_v50 = vmax.f32 %v1044_v7, 0.0  ;;  %v6450_v54 = vmax.f32 %v1045_v46, 0.0 }
  0xe2   :  { %v6452_v51 = vmax.f32 %v1046_v29, 0.0  ;;  %v6454_v61 = vmax.f32 %v1047_v62, 0.0  ;;  %v6456_v53 = vmax.f32 %v1048_v25, 0.0  ;;  %v6458_v48 = vmax.f32 %v1049_v4, 0.0 }
  0xe3   :  { %11450 = vst [vmem:[#allocation27_spill] sm:$0xff] %v6446_v1  ;;  %v6460_v38 = vmax.f32 %v1050_v42, 0.0  ;;  %v6462_v52 = vmax.f32 %v1051_v26, 0.0  ;;  %v6464_v55 = vmax.f32 %v1052_v49, 0.0  ;;  %v6466_v56 = vmax.f32 %v1053_v11, 0.0  ;;  %v6513_v26 = vld [vmem:[%s10822_s4] sm:$0xff] }
  0xe4   :  { %11451 = vst [vmem:[#allocation45_spill] sm:$0xff] %v6448_v50  ;;  %v6468_v23 = vmax.f32 %v1054_v40, 0.0  ;;  %v6470_v28 = vmax.f32 %v1055_v58, 0.0  ;;  %v6472_v47 = vmax.f32 %v1056_v20, 0.0  ;;  %v6474_v22 = vmax.f32 %v1057_v36, 0.0  ;;  %v4764_v40 = vld [vmem:[%s10822_s4 + $0x8] sm:$0xff] }
  0xe5   :  { %11452 = vst [vmem:[#allocation46_spill] sm:$0xff] %v6450_v54  ;;  %v6476_v41 = vmax.f32 %v1058_v2, 0.0  ;;  %v6478_v12 = vmax.f32 %v1059_v59, 0.0  ;;  %v6480_v3 = vmax.f32 %v1060_v13, 0.0  ;;  %v6482_v17 = vmax.f32 %v1061_v14, 0.0  ;;  %v11480_v20 = vld [vmem:[#allocation24_spill] sm:$0xff] }
  0xe6   :  { %11453 = vst [vmem:[#allocation75_spill] sm:$0xff] %v6452_v51  ;;  %v6484_v21 = vmax.f32 %v1062_v31, 0.0  ;;  %v6486_v8 = vmax.f32 %v1063_v35, 0.0  ;;  %v1104_v27 = vstv %s6426_s21  ;;  %v6489_v16 = vmax.f32 %v1064_v18, 0.0  ;;  %v11481_v2 = vld [vmem:[#allocation25_spill] sm:$0xff]  ;;  %v11482_v13 = vld [vmem:[#allocation26_spill] sm:$0xff] }
  0xe7   :  { %11454 = vst [vmem:[#allocation76_spill] sm:$0xff] %v6454_v61  ;;  %v6491_v7 = vmax.f32 %v1065_v19, 0.0  ;;  %v6493_v45 = vmax.f32 %v1066_v10, 0.0  ;;  %v6495_v63 = vmax.f32 %v1067_v15, 0.0  ;;  %v6497_v46 = vmax.f32 %v1068_v9, 0.0  ;;  %v11483_v31 = vld [vmem:[#allocation28_spill] sm:$0xff] }
  0xe8   :  { %11455 = vst [vmem:[#allocation77_spill] sm:$0xff] %v6456_v53  ;;  %v6499_v29 = vmax.f32 %v1069_v32, 0.0  ;;  %v6501_v62 = vmax.f32 %v1070_v34, 0.0  ;;  %v6503_v25 = vmax.f32 %v1071_v37, 0.0  ;;  %v6505_v4 = vmax.f32 %v1072_v33, 0.0  ;;  %v11484_v35 = vld [vmem:[#allocation29_spill] sm:$0xff] }
  0xe9   :  { %11456 = vst [vmem:[#allocation78_spill] sm:$0xff] %v6458_v48  ;;  %v6508_v42 = vstv %s6442_s23  ;;  %v1105_v49 = vmul.f32 %v6513_v26, %v1104_v27  ;;  %v6517_v11 = vstv %s6436_s22  ;;  %v1106_v58 = vmul.f32 %v4764_v40, %v1104_v27  ;;  %v11485_v18 = vld [vmem:[#allocation39_spill] sm:$0xff]  ;;  %v11486_v19 = vld [vmem:[#allocation30_spill] sm:$0xff]  ;;  %v11488_v15 = vld [vmem:[#allocation32_spill] sm:$0xff]  ;;  %s9076_s21 = sld [smem:[#allocation7 + $0x86]] }
  0xea   :  { %11457 = vst [vmem:[#allocation79_spill] sm:$0xff] %v6460_v38  ;;  %v1107_v36 = vmul.f32 %v11480_v20, %v1104_v27  ;;  %v1108_v59 = vmul.f32 %v11481_v2, %v1104_v27  ;;  %v1109_v14 = vmul.f32 %v11482_v13, %v1104_v27  ;;  %v1110_v24 = vmul.f32 %v11483_v31, %v1104_v27  ;;  %v11487_v10 = vld [vmem:[#allocation31_spill] sm:$0xff]  ;;  %v11489_v9 = vld [vmem:[#allocation33_spill] sm:$0xff]  ;;  %v11490_v32 = vld [vmem:[#allocation34_spill] sm:$0xff]  ;;  %s9088_s22 = sld [smem:[#allocation7 + $0x87]] }
  0xeb   :  { %11458 = vst [vmem:[#allocation20_spill] sm:$0xff] %v6462_v52  ;;  %v1111_v30 = vmul.f32 %v11484_v35, %v1104_v27  ;;  %v1112_v0 = vmul.f32 %v11485_v18, %v1104_v27  ;;  %v1113_v6 = vmul.f32 %v11486_v19, %v1104_v27  ;;  %v1114_v39 = vmul.f32 %v11487_v10, %v1104_v27  ;;  %v11491_v34 = vld [vmem:[#allocation35_spill] sm:$0xff]  ;;  %v11492_v37 = vld [vmem:[#allocation36_spill] sm:$0xff]  ;;  %v11493_v33 = vld [vmem:[#allocation37_spill] sm:$0xff]  ;;  %s9294_s23 = sld [smem:[#allocation7 + $0x88]] }
  0xec   :  { %11459 = vst [vmem:[#allocation21_spill] sm:$0xff] %v6464_v55  ;;  %v1115_v5 = vmul.f32 %v11488_v15, %v1104_v27  ;;  %v1116_v60 = vmul.f32 %v11489_v9, %v1104_v27  ;;  %v1117_v57 = vmul.f32 %v11490_v32, %v1104_v27  ;;  %v1118_v43 = vmul.f32 %v11491_v34, %v1104_v27  ;;  %v11504_v52 = vld [vmem:[#allocation19_spill] sm:$0xff]  ;;  %v11505_v48 = vld [vmem:[#allocation72_spill] sm:$0xff]  ;;  %v11506_v61 = vld [vmem:[#allocation73_spill] sm:$0xff] }
  0xed   :  { %11460 = vst [vmem:[#allocation22_spill] sm:$0xff] %v6466_v56  ;;  %v1119_v44 = vmul.f32 %v11492_v37, %v1104_v27  ;;  %v11503_v56 = vld [vmem:[#allocation18_spill] sm:$0xff]  ;;  %v1131_v38 = vmul.f32 %v11504_v52, %v1104_v27  ;;  %v1132_v53 = vmul.f32 %v11505_v48, %v1104_v27  ;;  %v1133_v51 = vmul.f32 %v11506_v61, %v1104_v27 }
  0xee   :  { %11461 = vst [vmem:[#allocation23_spill] sm:$0xff] %v6468_v23  ;;  %v1130_v55 = vmul.f32 %v11503_v56, %v1104_v27  ;;  %v11507_v54 = vld [vmem:[#allocation74_spill] sm:$0xff]  ;;  %v6551_v1 = vadd.f32 %v1105_v49, %v6508_v42  ;;  %v6563_v52 = vadd.f32 %v1109_v14, %v6508_v42  ;;  %v6566_v48 = vadd.f32 %v1110_v24, %v6508_v42 }
  0xef   :  { %11462 = vst [vmem:[#allocation80_spill] sm:$0xff] %v6470_v28  ;;  %v11502_v28 = vld [vmem:[#allocation17_spill] sm:$0xff]  ;;  %v1134_v50 = vmul.f32 %v11507_v54, %v1104_v27  ;;  %v6572_v49 = vadd.f32 %v1112_v0, %v6508_v42  ;;  %v6584_v14 = vadd.f32 %v1116_v60, %v6508_v42  ;;  %v6587_v24 = vadd.f32 %v1117_v57, %v6508_v42 }
  0xf0   :  { %11463 = vst [vmem:[#allocation81_spill] sm:$0xff] %v6472_v47  ;;  %v1129_v23 = vmul.f32 %v11502_v28, %v1104_v27  ;;  %v6560_v28 = vadd.f32 %v1108_v59, %v6508_v42  ;;  %v6581_v59 = vadd.f32 %v1115_v5, %v6508_v42  ;;  %v6593_v0 = vadd.f32 %v1119_v44, %v6508_v42 }
  0xf1   :  { %11464 = vst [vmem:[#allocation82_spill] sm:$0xff] %v6474_v22  ;;  %v11501_v22 = vld [vmem:[#allocation16_spill] sm:$0xff] }
  0xf2   :  { %11465 = vst [vmem:[#allocation83_spill] sm:$0xff] %v6476_v41  ;;  %v1128_v47 = vmul.f32 %v11501_v22, %v1104_v27  ;;  %v6557_v22 = vadd.f32 %v1107_v36, %v6508_v42  ;;  %v6578_v36 = vadd.f32 %v1114_v39, %v6508_v42 }
  0xf3   :  { %11466 = vst [vmem:[#allocation84_spill] sm:$0xff] %v6478_v12  ;;  %v11500_v12 = vld [vmem:[#allocation15_spill] sm:$0xff] }
  0xf4   :  { %11467 = vst [vmem:[#allocation85_spill] sm:$0xff] %v6480_v3  ;;  %v1127_v41 = vmul.f32 %v11500_v12, %v1104_v27 }
  0xf5   :  { %11468 = vst [vmem:[#allocation86_spill] sm:$0xff] %v6482_v17  ;;  %v11499_v17 = vld [vmem:[#allocation14_spill] sm:$0xff] }
  0xf6   :  { %11469 = vst [vmem:[#allocation87_spill] sm:$0xff] %v6484_v21  ;;  %v1126_v3 = vmul.f32 %v11499_v17, %v1104_v27  ;;  %v6554_v17 = vadd.f32 %v1106_v58, %v6508_v42  ;;  %v6575_v58 = vadd.f32 %v1113_v6, %v6508_v42 }
  0xf7   :  { %11470 = vst [vmem:[#allocation88_spill] sm:$0xff] %v6486_v8  ;;  %v11498_v8 = vld [vmem:[#allocation13_spill] sm:$0xff] }
  0xf8   :  { %11471 = vst [vmem:[#allocation89_spill] sm:$0xff] %v6489_v16  ;;  %v1125_v21 = vmul.f32 %v11498_v8, %v1104_v27  ;;  %v6614_v44 = vadd.f32 %v1126_v3, %v6508_v42  ;;  %v6635_v3 = vadd.f32 %v1133_v51, %v6508_v42  ;;  %v1170_v51 = vmul.f32 %v11482_v13, %v6517_v11 }
  0xf9   :  { %11472 = vst [vmem:[#allocation90_spill] sm:$0xff] %v6491_v7  ;;  %v11497_v7 = vld [vmem:[#allocation12_spill] sm:$0xff]  ;;  %v1176_v13 = vmul.f32 %v11488_v15, %v6517_v11 }
  0xfa   :  { %11473 = vst [vmem:[#allocation91_spill] sm:$0xff] %v6493_v45  ;;  %v1124_v16 = vmul.f32 %v11497_v7, %v1104_v27 }
  0xfb   :  { %11474 = vst [vmem:[#allocation92_spill] sm:$0xff] %v6495_v63  ;;  %v11496_v63 = vld [vmem:[#allocation11_spill] sm:$0xff] }
  0xfc   :  { %11475 = vst [vmem:[#allocation93_spill] sm:$0xff] %v6497_v46  ;;  %v1123_v45 = vmul.f32 %v11496_v63, %v1104_v27  ;;  %v6608_v57 = vadd.f32 %v1124_v16, %v6508_v42  ;;  %v6629_v16 = vadd.f32 %v1131_v38, %v6508_v42  ;;  %v6649_v38 = vmul.f32 %v11481_v2, %v6517_v11 }
  0xfd   :  { %11476 = vst [vmem:[#allocation94_spill] sm:$0xff] %v6499_v29  ;;  %v11495_v29 = vld [vmem:[#allocation10_spill] sm:$0xff] }
  0xfe   :  { %11477 = vst [vmem:[#allocation95_spill] sm:$0xff] %v6501_v62  ;;  %v1122_v46 = vmul.f32 %v11495_v29, %v1104_v27  ;;  %v6605_v60 = vadd.f32 %v1123_v45, %v6508_v42  ;;  %v6626_v45 = vadd.f32 %v1130_v55, %v6508_v42  ;;  %v1168_v55 = vmul.f32 %v11480_v20, %v6517_v11  ;;  %v11518_v20 = vld [vmem:[#allocation14_spill] sm:$0xff] }
  0xff   :  { %11478 = vst [vmem:[#allocation96_spill] sm:$0xff] %v6503_v25  ;;  %v11494_v25 = vld [vmem:[#allocation38_spill] sm:$0xff] }
 0x100   :  { %11479 = vst [vmem:[#allocation97_spill] sm:$0xff] %v6505_v4  ;;  %v1120_v4 = vmul.f32 %v11493_v33, %v1104_v27  ;;  %v1121_v62 = vmul.f32 %v11494_v25, %v1104_v27  ;;  %v6569_v27 = vadd.f32 %v1111_v30, %v6508_v42  ;;  %v6590_v30 = vadd.f32 %v1118_v43, %v6508_v42 }
 0x101   :  { %v6602_v5 = vadd.f32 %v1122_v46, %v6508_v42  ;;  %v6611_v43 = vadd.f32 %v1125_v21, %v6508_v42  ;;  %11509 = vst [vmem:[#allocation99_spill] sm:$0xff] %v6614_v44  ;;  %v6623_v46 = vadd.f32 %v1129_v23, %v6508_v42  ;;  %v6632_v21 = vadd.f32 %v1132_v53, %v6508_v42 }
 0x102   :  { %v6596_v6 = vadd.f32 %v1120_v4, %v6508_v42  ;;  %v6599_v39 = vadd.f32 %v1121_v62, %v6508_v42  ;;  %v6617_v4 = vadd.f32 %v1127_v41, %v6508_v42  ;;  %v6620_v62 = vadd.f32 %v1128_v47, %v6508_v42  ;;  %11513 = vst [vmem:[#allocation103_spill] sm:$0xff] %v6626_v45 }
 0x103   :  { %11508 = vst [vmem:[#allocation98_spill] sm:$0xff] %v6611_v43  ;;  %v6638_v41 = vadd.f32 %v1134_v50, %v6508_v42  ;;  %v1166_v47 = vmul.f32 %v6513_v26, %v6517_v11  ;;  %v6643_v23 = vmul.f32 %v4764_v40, %v6517_v11  ;;  %v6655_v50 = vmul.f32 %v11483_v31, %v6517_v11 }
 0x104   :  { %11510 = vst [vmem:[#allocation100_spill] sm:$0xff] %v6617_v4  ;;  %v1172_v53 = vmul.f32 %v11484_v35, %v6517_v11  ;;  %v6661_v42 = vmul.f32 %v11485_v18, %v6517_v11  ;;  %v1174_v26 = vmul.f32 %v11486_v19, %v6517_v11  ;;  %v6667_v40 = vmul.f32 %v11487_v10, %v6517_v11 }
 0x105   :  { %11511 = vst [vmem:[#allocation101_spill] sm:$0xff] %v6620_v62  ;;  %v6673_v31 = vmul.f32 %v11489_v9, %v6517_v11  ;;  %v1178_v35 = vmul.f32 %v11490_v32, %v6517_v11  ;;  %v6679_v18 = vmul.f32 %v11491_v34, %v6517_v11  ;;  %v1180_v19 = vmul.f32 %v11492_v37, %v6517_v11 }
 0x106   :  { %11512 = vst [vmem:[#allocation102_spill] sm:$0xff] %v6623_v46  ;;  %v6685_v10 = vmul.f32 %v11493_v33, %v6517_v11  ;;  %v1182_v15 = vmul.f32 %v11494_v25, %v6517_v11  ;;  %v6691_v9 = vmul.f32 %v11495_v29, %v6517_v11  ;;  %v1184_v32 = vmul.f32 %v11496_v63, %v6517_v11 }
 0x107   :  { %11514 = vst [vmem:[#allocation104_spill] sm:$0xff] %v6629_v16  ;;  %v1226_v2 = vrot.slane %v1166_v47, 1  ;;  %v1227_v34 = vrot.slane %v6643_v23, 1  ;;  %v6698_v37 = vmul.f32 %v11497_v7, %v6517_v11  ;;  %v1186_v33 = vmul.f32 %v11498_v8, %v6517_v11  ;;  %v11520_v47 = vld [vmem:[#allocation17_spill] sm:$0xff]  ;;  %v11521_v8 = vld [vmem:[#allocation19_spill] sm:$0xff] }
 0x108   :  { %11515 = vst [vmem:[#allocation105_spill] sm:$0xff] %v6632_v21  ;;  %v6704_v25 = vmul.f32 %v11518_v20, %v6517_v11  ;;  %v1188_v29 = vmul.f32 %v11500_v12, %v6517_v11  ;;  %v1190_v23 = vmul.f32 %v11520_v47, %v6517_v11  ;;  %v6716_v7 = vmul.f32 %v11503_v56, %v6517_v11  ;;  %v11522_v20 = vld [vmem:[#allocation72_spill] sm:$0xff] }
 0x109   :  { %11516 = vst [vmem:[#allocation106_spill] sm:$0xff] %v6635_v3  ;;  %v1192_v3 = vmul.f32 %v11521_v8, %v6517_v11  ;;  %v6722_v21 = vmul.f32 %v11522_v20, %v6517_v11  ;;  %v1194_v12 = vmul.f32 %v11506_v61, %v6517_v11  ;;  %v1229_v16 = vrot.slane %v1168_v55, 1 }
 0x10a   :  { %11517 = vst [vmem:[#allocation107_spill] sm:$0xff] %v6638_v41  ;;  %v11519_v41 = vld [vmem:[#allocation16_spill] sm:$0xff]  ;;  %v1228_v47 = vsel %vm255_vm0, %v1226_v2, %v1227_v34  ;;  %v1230_v56 = vrot.slane %v6649_v38, 1  ;;  %v1232_v45 = vrot.slane %v1170_v51, 1  ;;  %v1233_v46 = vrot.slane %v6655_v50, 1 }
 0x10b   :  { %v6710_v63 = vmul.f32 %v11519_v41, %v6517_v11  ;;  %v6728_v41 = vmul.f32 %v11507_v54, %v6517_v11  ;;  %v1235_v8 = vrot.slane %v1172_v53, 1  ;;  %v1236_v62 = vrot.slane %v6661_v42, 1 }
 0x10c   :  { %v1238_v20 = vrot.slane %v1174_v26, 1  ;;  %v1239_v4 = vrot.slane %v6667_v40, 1  ;;  %v1241_v44 = vrot.slane %v1176_v13, 1  ;;  %v1242_v61 = vrot.slane %v6673_v31, 1 }
 0x10d   :  { %v1244_v43 = vrot.slane %v1178_v35, 1  ;;  %v1245_v11 = vrot.slane %v6679_v18, 1  ;;  %v1247_v55 = vrot.slane %v1180_v19, 1  ;;  %v1248_v2 = vrot.slane %v6685_v10, 1 }
 0x10e   :  { %v1250_v54 = vrot.slane %v1182_v15, 1  ;;  %v1251_v38 = vrot.slane %v6691_v9, 1  ;;  %v1253_v51 = vrot.slane %v1184_v32, 1  ;;  %v1254_v50 = vrot.slane %v6698_v37, 1 }
 0x10f   :  { %v1256_v53 = vrot.slane %v1186_v33, 1  ;;  %v1257_v42 = vrot.slane %v6704_v25, 1  ;;  %v1259_v26 = vrot.slane %v1188_v29, 1  ;;  %v1260_v13 = vrot.slane %v6710_v63, 1 }
 0x110   :  { %v1262_v40 = vrot.slane %v1190_v23, 1  ;;  %v1263_v31 = vrot.slane %v6716_v7, 1  ;;  %v1231_v35 = vsel %vm255_vm0, %v1229_v16, %v1230_v56  ;;  %v1234_v18 = vsel %vm255_vm0, %v1232_v45, %v1233_v46 }
 0x111   :  { %v1265_v19 = vrot.slane %v1192_v3, 1  ;;  %v1266_v10 = vrot.slane %v6722_v21, 1  ;;  %v1237_v15 = vsel %vm255_vm0, %v1235_v8, %v1236_v62  ;;  %v1240_v9 = vsel %vm255_vm0, %v1238_v20, %v1239_v4 }
 0x112   :  { %v1268_v25 = vrot.slane %v1194_v12, 1  ;;  %v1269_v29 = vrot.slane %v6728_v41, 1  ;;  %v1243_v63 = vsel %vm255_vm0, %v1241_v44, %v1242_v61  ;;  %v1246_v7 = vsel %vm255_vm0, %v1244_v43, %v1245_v11 }
 0x113   :  { %v1249_v32 = vsel %vm255_vm0, %v1247_v55, %v1248_v2  ;;  %v1252_v37 = vsel %vm255_vm0, %v1250_v54, %v1251_v38  ;;  %v1255_v33 = vsel %vm255_vm0, %v1253_v51, %v1254_v50  ;;  %v1258_v45 = vsel %vm255_vm0, %v1256_v53, %v1257_v42  ;;  %v11532_v55 = vld [vmem:[#allocation105_spill] sm:$0xff] }
 0x114   :  { %v1261_v16 = vsel %vm255_vm0, %v1259_v26, %v1260_v13  ;;  %v1264_v8 = vsel %vm255_vm0, %v1262_v40, %v1263_v31  ;;  %v1267_v12 = vsel %vm255_vm0, %v1265_v19, %v1266_v10  ;;  %v6763_v20 = vadd.f32 %v1228_v47, %v6551_v1 }
 0x115   :  { %v6766_v43 = vadd.f32 %v1227_v34, %v6554_v17  ;;  %v6769_v54 = vadd.f32 %v1231_v35, %v6557_v22  ;;  %v1270_v44 = vsel %vm255_vm0, %v1268_v25, %v1269_v29  ;;  %v6773_v21 = vadd.f32 %v1230_v56, %v6560_v28 }
 0x116   :  { %v6776_v3 = vadd.f32 %v1234_v18, %v6563_v52  ;;  %v6779_v41 = vadd.f32 %v1233_v46, %v6566_v48  ;;  %v6782_v1 = vadd.f32 %v1237_v15, %v6569_v27  ;;  %v6785_v17 = vadd.f32 %v1236_v62, %v6572_v49  ;;  %v11526_v62 = vld [vmem:[#allocation101_spill] sm:$0xff]  ;;  %v11542_v18 = vld [vmem:[#allocation26_spill] sm:$0xff] }
 0x117   :  { %v6788_v22 = vadd.f32 %v1240_v9, %v6575_v58  ;;  %v6791_v34 = vadd.f32 %v1239_v4, %v6578_v36  ;;  %v6794_v56 = vadd.f32 %v1243_v63, %v6581_v59  ;;  %v6797_v52 = vadd.f32 %v1242_v61, %v6584_v14  ;;  %v11523_v14 = vld [vmem:[#allocation98_spill] sm:$0xff]  ;;  %v11525_v4 = vld [vmem:[#allocation100_spill] sm:$0xff]  ;;  %v11544_v9 = vld [vmem:[#allocation29_spill] sm:$0xff] }
 0x118   :  { %v6800_v48 = vadd.f32 %v1246_v7, %v6587_v24  ;;  %v6803_v28 = vadd.f32 %v1245_v11, %v6590_v30  ;;  %v6806_v27 = vadd.f32 %v1249_v32, %v6593_v0  ;;  %v6809_v49 = vadd.f32 %v1248_v2, %v6596_v6  ;;  %v11524_v0 = vld [vmem:[#allocation99_spill] sm:$0xff]  ;;  %v11546_v7 = vld [vmem:[#allocation30_spill] sm:$0xff] }
 0x119   :  { %v6812_v58 = vadd.f32 %v1252_v37, %v6599_v39  ;;  %v6815_v36 = vadd.f32 %v1251_v38, %v6602_v5  ;;  %v6818_v61 = vadd.f32 %v1255_v33, %v6605_v60  ;;  %v6821_v59 = vadd.f32 %v1254_v50, %v6608_v57  ;;  %v11527_v5 = vld [vmem:[#allocation102_spill] sm:$0xff]  ;;  %v11528_v60 = vld [vmem:[#allocation103_spill] sm:$0xff]  ;;  %v11530_v57 = vld [vmem:[#allocation104_spill] sm:$0xff] }
 0x11a   :  { %v6824_v24 = vadd.f32 %v1258_v45, %v11523_v14  ;;  %v1331_v30 = vstv %s6746_s29  ;;  %v6828_v6 = vadd.f32 %v1257_v42, %v11524_v0  ;;  %v6831_v39 = vadd.f32 %v1261_v16, %v11525_v4  ;;  %v11534_v38 = vld [vmem:[#allocation106_spill] sm:$0xff]  ;;  %v11536_v50 = vld [vmem:[#allocation107_spill] sm:$0xff]  ;;  %v11538_v42 = vld [vmem:[#allocation24_spill] sm:$0xff]  ;;  %s9843_s29 = sld [smem:[#allocation7 + $0x104]] }
 0x11b   :  { %v6834_v46 = vadd.f32 %v1260_v13, %v11526_v62  ;;  %v6837_v47 = vadd.f32 %v1264_v8, %v11527_v5  ;;  %v6840_v23 = vadd.f32 %v1263_v31, %v11528_v60  ;;  %v6843_v11 = vadd.f32 %v1267_v12, %v11530_v57  ;;  %v11541_v31 = vld [vmem:[#allocation25_spill] sm:$0xff]  ;;  %v11545_v63 = vld [vmem:[#allocation39_spill] sm:$0xff]  ;;  %v11548_v45 = vld [vmem:[#allocation32_spill] sm:$0xff] }
 0x11c   :  { %v6846_v2 = vadd.f32 %v1266_v10, %v11532_v55  ;;  %v6849_v51 = vadd.f32 %v1270_v44, %v11534_v38  ;;  %v6852_v53 = vadd.f32 %v1269_v29, %v11536_v50  ;;  %v1332_v26 = vmul.f32 %v11538_v42, %v1331_v30  ;;  %v11543_v10 = vld [vmem:[#allocation28_spill] sm:$0xff]  ;;  %v11547_v37 = vld [vmem:[#allocation31_spill] sm:$0xff]  ;;  %v11549_v8 = vld [vmem:[#allocation33_spill] sm:$0xff] }
 0x11d   :  { %11529 = vst [vmem:[#allocation98_spill] sm:$0xff] %v6840_v23  ;;  %v6856_v13 = vstv %s6759_s1  ;;  %v6861_v40 = vstv %s10821_s3  ;;  %v1333_v35 = vmul.f32 %v11541_v31, %v1331_v30  ;;  %v1334_v19 = vmul.f32 %v11542_v18, %v1331_v30  ;;  %v11550_v44 = vld [vmem:[#allocation34_spill] sm:$0xff]  ;;  %v11551_v0 = vld [vmem:[#allocation35_spill] sm:$0xff]  ;;  %v11552_v62 = vld [vmem:[#allocation36_spill] sm:$0xff]  ;;  %s10050_s1 = sld [smem:[#allocation7 + $0x105]] }
 0x11e   :  { %11531 = vst [vmem:[#allocation99_spill] sm:$0xff] %v6843_v11  ;;  %v1335_v15 = vmul.f32 %v11543_v10, %v1331_v30  ;;  %v1336_v25 = vmul.f32 %v11544_v9, %v1331_v30  ;;  %v1337_v29 = vmul.f32 %v11545_v63, %v1331_v30  ;;  %v1338_v32 = vmul.f32 %v11546_v7, %v1331_v30  ;;  %v11553_v60 = vld [vmem:[#allocation37_spill] sm:$0xff]  ;;  %v11554_v55 = vld [vmem:[#allocation38_spill] sm:$0xff]  ;;  %v11556_v63 = vld [vmem:[#allocation11_spill] sm:$0xff]  ;;  %s10416_s3 = sld [smem:[#allocation7 + $0x108]] }
 0x11f   :  { %11533 = vst [vmem:[#allocation100_spill] sm:$0xff] %v6846_v2  ;;  %v1339_v33 = vmul.f32 %v11547_v37, %v1331_v30  ;;  %v1340_v16 = vmul.f32 %v11548_v45, %v1331_v30  ;;  %v1341_v12 = vmul.f32 %v11549_v8, %v1331_v30  ;;  %v1342_v14 = vmul.f32 %v11550_v44, %v1331_v30  ;;  %v11555_v50 = vld [vmem:[#allocation10_spill] sm:$0xff]  ;;  %v11557_v9 = vld [vmem:[#allocation12_spill] sm:$0xff]  ;;  %v11558_v10 = vld [vmem:[#allocation13_spill] sm:$0xff] }
 0x120   :  { %11535 = vst [vmem:[#allocation101_spill] sm:$0xff] %v6849_v51  ;;  %v1343_v4 = vmul.f32 %v11551_v0, %v1331_v30  ;;  %v1344_v5 = vmul.f32 %v11552_v62, %v1331_v30  ;;  %v1345_v57 = vmul.f32 %v11553_v60, %v1331_v30  ;;  %v1346_v38 = vmul.f32 %v11554_v55, %v1331_v30  ;;  %v11559_v18 = vld [vmem:[#allocation14_spill] sm:$0xff]  ;;  %v11560_v31 = vld [vmem:[#allocation15_spill] sm:$0xff]  ;;  %v11561_v42 = vld [vmem:[#allocation16_spill] sm:$0xff] }
 0x121   :  { %11537 = vst [vmem:[#allocation102_spill] sm:$0xff] %v6852_v53  ;;  %v1348_v7 = vmul.f32 %v11556_v63, %v1331_v30  ;;  %v1349_v37 = vmul.f32 %v11557_v9, %v1331_v30  ;;  %v1350_v45 = vmul.f32 %v11558_v10, %v1331_v30  ;;  %v1351_v8 = vmul.f32 %v11559_v18, %v1331_v30  ;;  %v11563_v53 = vld [vmem:[#allocation18_spill] sm:$0xff]  ;;  %v11564_v51 = vld [vmem:[#allocation19_spill] sm:$0xff]  ;;  %v11565_v2 = vld [vmem:[#allocation72_spill] sm:$0xff] }
 0x122   :  { %11539 = vst [vmem:[#allocation103_spill] sm:$0xff] %v6856_v13  ;;  %v1352_v44 = vmul.f32 %v11560_v31, %v1331_v30  ;;  %v1353_v0 = vmul.f32 %v11561_v42, %v1331_v30  ;;  %v11562_v13 = vld [vmem:[#allocation17_spill] sm:$0xff]  ;;  %v1355_v60 = vmul.f32 %v11563_v53, %v1331_v30  ;;  %v1356_v55 = vmul.f32 %v11564_v51, %v1331_v30  ;;  %v11567_v23 = vld [vmem:[#allocation74_spill] sm:$0xff]  ;;  %v6893_v18 = vld [vmem:[%s10822_s4 + $0xf0] sm:$0xff] }
 0x123   :  { %11540 = vst [vmem:[#allocation104_spill] sm:$0xff] %v6861_v40  ;;  %v1347_v40 = vmul.f32 %v11555_v50, %v1331_v30  ;;  %v1354_v62 = vmul.f32 %v11562_v13, %v1331_v30  ;;  %v1357_v50 = vmul.f32 %v11565_v2, %v1331_v30  ;;  %v11566_v11 = vld [vmem:[#allocation73_spill] sm:$0xff]  ;;  %v1359_v9 = vmul.f32 %v11567_v23, %v1331_v30 }
 0x124   :  { %v1358_v63 = vmul.f32 %v11566_v11, %v1331_v30  ;;  %11568 = vst [vmem:[#allocation105_spill] sm:$0xff] %v6893_v18  ;;  %v1360_v31 = vmul.f32 %v6893_v18, %v1331_v30  ;;  %v6899_v13 = vld [vmem:[%s10822_s4 + $0xf8] sm:$0xff]  ;;  %v6903_v2 = vadd.f32 %v1332_v26, %v6763_v20  ;;  %v6906_v11 = vadd.f32 %v1333_v35, %v6766_v43  ;;  %s7126_s4 = sld [smem:[#allocation7]] }
 0x125   :  { %v1361_v51 = vmul.f32 %v6899_v13, %v1331_v30  ;;  %v6909_v23 = vadd.f32 %v1334_v19, %v6769_v54  ;;  %v6912_v53 = vadd.f32 %v1335_v15, %v6773_v21  ;;  %v6915_v18 = vadd.f32 %v1336_v25, %v6776_v3  ;;  %v11585_v25 = vld [vmem:[#allocation24_spill] sm:$0xff] }
 0x126   :  { %v6918_v42 = vadd.f32 %v1337_v29, %v6779_v41  ;;  %v6921_v30 = vadd.f32 %v1338_v32, %v6782_v1  ;;  %v6924_v20 = vadd.f32 %v1339_v33, %v6785_v17  ;;  %v6927_v43 = vadd.f32 %v1340_v16, %v6788_v22  ;;  %v11587_v32 = vld [vmem:[#allocation26_spill] sm:$0xff] }
 0x127   :  { %v6930_v54 = vadd.f32 %v1341_v12, %v6791_v34  ;;  %v6933_v21 = vadd.f32 %v1342_v14, %v6794_v56  ;;  %v6936_v3 = vadd.f32 %v1343_v4, %v6797_v52  ;;  %v6939_v41 = vadd.f32 %v1344_v5, %v6800_v48  ;;  %v11591_v16 = vld [vmem:[#allocation30_spill] sm:$0xff]  ;;  %v11592_v12 = vld [vmem:[#allocation31_spill] sm:$0xff]  ;;  %v11593_v14 = vld [vmem:[#allocation32_spill] sm:$0xff] }
 0x128   :  { %v6942_v1 = vadd.f32 %v1345_v57, %v6803_v28  ;;  %v6945_v17 = vadd.f32 %v1346_v38, %v6806_v27  ;;  %v6948_v22 = vadd.f32 %v1347_v40, %v6809_v49  ;;  %v6951_v34 = vadd.f32 %v1348_v7, %v6812_v58  ;;  %v11594_v4 = vld [vmem:[#allocation33_spill] sm:$0xff]  ;;  %v11595_v5 = vld [vmem:[#allocation34_spill] sm:$0xff]  ;;  %v11596_v57 = vld [vmem:[#allocation35_spill] sm:$0xff] }
 0x129   :  { %v6954_v56 = vadd.f32 %v1349_v37, %v6815_v36  ;;  %v6957_v52 = vadd.f32 %v1350_v45, %v6818_v61  ;;  %v6960_v48 = vadd.f32 %v1351_v8, %v6821_v59  ;;  %v6963_v28 = vadd.f32 %v1352_v44, %v6824_v24  ;;  %v11574_v61 = vld [vmem:[#allocation98_spill] sm:$0xff]  ;;  %v11576_v59 = vld [vmem:[#allocation99_spill] sm:$0xff]  ;;  %v11578_v24 = vld [vmem:[#allocation100_spill] sm:$0xff] }
 0x12a   :  { %v6966_v27 = vadd.f32 %v1353_v0, %v6828_v6  ;;  %v6969_v49 = vadd.f32 %v1354_v62, %v6831_v39  ;;  %v6972_v58 = vadd.f32 %v1355_v60, %v6834_v46  ;;  %v6975_v36 = vadd.f32 %v1356_v55, %v6837_v47  ;;  %v11580_v6 = vld [vmem:[#allocation101_spill] sm:$0xff]  ;;  %v11582_v39 = vld [vmem:[#allocation102_spill] sm:$0xff]  ;;  %v11584_v46 = vld [vmem:[#allocation103_spill] sm:$0xff] }
 0x12b   :  { %11569 = vst [vmem:[#allocation106_spill] sm:$0xff] %v6963_v28  ;;  %v6978_v26 = vadd.f32 %v1357_v50, %v11574_v61  ;;  %v6981_v40 = vadd.f32 %v1358_v63, %v11576_v59  ;;  %v6984_v35 = vadd.f32 %v1359_v9, %v11578_v24  ;;  %v6987_v19 = vadd.f32 %v1360_v31, %v11580_v6  ;;  %v11586_v47 = vld [vmem:[#allocation25_spill] sm:$0xff]  ;;  %v11588_v37 = vld [vmem:[#allocation28_spill] sm:$0xff]  ;;  %v11599_v24 = vld [vmem:[#allocation38_spill] sm:$0xff] }
 0x12c   :  { %11570 = vst [vmem:[#allocation107_spill] sm:$0xff] %v6966_v27  ;;  %v6990_v15 = vadd.f32 %v1361_v51, %v11582_v39  ;;  %v1393_v29 = vmul.f32 %v11585_v25, %v11584_v46  ;;  %v6996_v7 = vmul.f32 %v11586_v47, %v11584_v46  ;;  %v1395_v63 = vmul.f32 %v11587_v32, %v11584_v46  ;;  %v11589_v31 = vld [vmem:[#allocation29_spill] sm:$0xff]  ;;  %v11590_v51 = vld [vmem:[#allocation39_spill] sm:$0xff]  ;;  %v11597_v38 = vld [vmem:[#allocation36_spill] sm:$0xff] }
 0x12d   :  { %11571 = vst [vmem:[#allocation13_spill] sm:$0xff] %v6969_v49  ;;  %v7002_v9 = vmul.f32 %v11588_v37, %v11584_v46  ;;  %v1397_v33 = vmul.f32 %v11589_v31, %v11584_v46  ;;  %v7008_v45 = vmul.f32 %v11590_v51, %v11584_v46  ;;  %v1399_v8 = vmul.f32 %v11591_v16, %v11584_v46  ;;  %v11598_v61 = vld [vmem:[#allocation37_spill] sm:$0xff]  ;;  %v11600_v39 = vld [vmem:[#allocation10_spill] sm:$0xff]  ;;  %v11601_v47 = vld [vmem:[#allocation11_spill] sm:$0xff] }
 0x12e   :  { %11572 = vst [vmem:[#allocation108_spill] sm:$0xff] %v6972_v58  ;;  %v7014_v44 = vmul.f32 %v11592_v12, %v11584_v46  ;;  %v1401_v0 = vmul.f32 %v11593_v14, %v11584_v46  ;;  %v7020_v62 = vmul.f32 %v11594_v4, %v11584_v46  ;;  %v1403_v60 = vmul.f32 %v11595_v5, %v11584_v46  ;;  %v11602_v37 = vld [vmem:[#allocation12_spill] sm:$0xff]  ;;  %v11603_v14 = vld [vmem:[#allocation14_spill] sm:$0xff]  ;;  %v11604_v5 = vld [vmem:[#allocation15_spill] sm:$0xff] }
 0x12f   :  { %11573 = vst [vmem:[#allocation109_spill] sm:$0xff] %v6975_v36  ;;  %v7026_v55 = vmul.f32 %v11596_v57, %v11584_v46  ;;  %v1405_v50 = vmul.f32 %v11597_v38, %v11584_v46  ;;  %v7032_v59 = vmul.f32 %v11598_v61, %v11584_v46  ;;  %v1407_v6 = vmul.f32 %v11599_v24, %v11584_v46  ;;  %v11605_v38 = vld [vmem:[#allocation16_spill] sm:$0xff]  ;;  %v11606_v24 = vld [vmem:[#allocation17_spill] sm:$0xff] }
 0x130   :  { %11575 = vst [vmem:[#allocation98_spill] sm:$0xff] %v6978_v26  ;;  %v7038_v25 = vmul.f32 %v11600_v39, %v11584_v46  ;;  %v1409_v32 = vmul.f32 %v11601_v47, %v11584_v46  ;;  %v7044_v31 = vmul.f32 %v11602_v37, %v11584_v46  ;;  %v1411_v51 = vmul.f32 %v11558_v10, %v11584_v46  ;;  %v11607_v47 = vld [vmem:[#allocation18_spill] sm:$0xff]  ;;  %v11609_v37 = vld [vmem:[#allocation72_spill] sm:$0xff] }
 0x131   :  { %11577 = vst [vmem:[#allocation99_spill] sm:$0xff] %v6981_v40  ;;  %v1453_v16 = vrot.slane %v1393_v29, 1  ;;  %v1454_v12 = vrot.slane %v6996_v7, 1  ;;  %v7051_v4 = vmul.f32 %v11603_v14, %v11584_v46  ;;  %v1413_v57 = vmul.f32 %v11604_v5, %v11584_v46  ;;  %v11608_v29 = vld [vmem:[#allocation19_spill] sm:$0xff]  ;;  %v11610_v5 = vld [vmem:[#allocation73_spill] sm:$0xff] }
 0x132   :  { %11579 = vst [vmem:[#allocation100_spill] sm:$0xff] %v6984_v35  ;;  %v7057_v61 = vmul.f32 %v11605_v38, %v11584_v46  ;;  %v1415_v39 = vmul.f32 %v11606_v24, %v11584_v46  ;;  %v7063_v10 = vmul.f32 %v11607_v47, %v11584_v46  ;;  %v1417_v7 = vmul.f32 %v11608_v29, %v11584_v46  ;;  %v11611_v38 = vld [vmem:[#allocation74_spill] sm:$0xff]  ;;  %v11612_v24 = vld [vmem:[#allocation105_spill] sm:$0xff] }
 0x133   :  { %11581 = vst [vmem:[#allocation101_spill] sm:$0xff] %v6987_v19  ;;  %v7069_v14 = vmul.f32 %v11609_v37, %v11584_v46  ;;  %v7075_v19 = vmul.f32 %v11611_v38, %v11584_v46  ;;  %v1421_v35 = vmul.f32 %v11612_v24, %v11584_v46  ;;  %v7081_v47 = vmul.f32 %v6899_v13, %v11584_v46 }
 0x134   :  { %11583 = vst [vmem:[#allocation102_spill] sm:$0xff] %v6990_v15  ;;  %v1419_v15 = vmul.f32 %v11610_v5, %v11584_v46  ;;  %v1456_v40 = vrot.slane %v1395_v63, 1  ;;  %v1455_v29 = vsel %vm255_vm0, %v1453_v16, %v1454_v12  ;;  %v1457_v37 = vrot.slane %v7002_v9, 1 }
 0x135   :  { %v1459_v26 = vrot.slane %v1397_v33, 1  ;;  %v1460_v36 = vrot.slane %v7008_v45, 1  ;;  %v1462_v5 = vrot.slane %v1399_v8, 1  ;;  %v1463_v58 = vrot.slane %v7014_v44, 1 }
 0x136   :  { %v1465_v38 = vrot.slane %v1401_v0, 1  ;;  %v1466_v49 = vrot.slane %v7020_v62, 1  ;;  %v1468_v27 = vrot.slane %v1403_v60, 1  ;;  %v1469_v24 = vrot.slane %v7026_v55, 1 }
 0x137   :  { %v1471_v28 = vrot.slane %v1405_v50, 1  ;;  %v1472_v13 = vrot.slane %v7032_v59, 1  ;;  %v1474_v46 = vrot.slane %v1407_v6, 1  ;;  %v1475_v63 = vrot.slane %v7038_v25, 1 }
 0x138   :  { %v1477_v16 = vrot.slane %v1409_v32, 1  ;;  %v1478_v9 = vrot.slane %v7044_v31, 1  ;;  %v1480_v33 = vrot.slane %v1411_v51, 1  ;;  %v1481_v45 = vrot.slane %v7051_v4, 1 }
 0x139   :  { %v1483_v8 = vrot.slane %v1413_v57, 1  ;;  %v1484_v44 = vrot.slane %v7057_v61, 1  ;;  %v1486_v0 = vrot.slane %v1415_v39, 1  ;;  %v1487_v62 = vrot.slane %v7063_v10, 1 }
 0x13a   :  { %v1489_v60 = vrot.slane %v1417_v7, 1  ;;  %v1490_v55 = vrot.slane %v7069_v14, 1  ;;  %v1458_v50 = vsel %vm255_vm0, %v1456_v40, %v1457_v37  ;;  %v1461_v59 = vsel %vm255_vm0, %v1459_v26, %v1460_v36 }
 0x13b   :  { %v1492_v6 = vrot.slane %v1419_v15, 1  ;;  %v1493_v25 = vrot.slane %v7075_v19, 1  ;;  %v1464_v32 = vsel %vm255_vm0, %v1462_v5, %v1463_v58  ;;  %v1467_v31 = vsel %vm255_vm0, %v1465_v38, %v1466_v49 }
 0x13c   :  { %v1495_v51 = vrot.slane %v1421_v35, 1  ;;  %v1496_v4 = vrot.slane %v7081_v47, 1  ;;  %v1470_v57 = vsel %vm255_vm0, %v1468_v27, %v1469_v24  ;;  %v1473_v61 = vsel %vm255_vm0, %v1471_v28, %v1472_v13 }
 0x13d   :  { %v1476_v39 = vsel %vm255_vm0, %v1474_v46, %v1475_v63  ;;  %v1479_v40 = vsel %vm255_vm0, %v1477_v16, %v1478_v9  ;;  %v1482_v26 = vsel %vm255_vm0, %v1480_v33, %v1481_v45  ;;  %v1485_v15 = vsel %vm255_vm0, %v1483_v8, %v1484_v44  ;;  %v11622_v8 = vld [vmem:[#allocation102_spill] sm:$0xff] }
 0x13e   :  { %v1488_v19 = vsel %vm255_vm0, %v1486_v0, %v1487_v62  ;;  %v1491_v10 = vsel %vm255_vm0, %v1489_v60, %v1490_v55  ;;  %v1494_v35 = vsel %vm255_vm0, %v1492_v6, %v1493_v25  ;;  %v1528_v7 = vadd.f32 %v1455_v29, %v6903_v2 }
 0x13f   :  { %v1529_v27 = vadd.f32 %v1454_v12, %v6906_v11  ;;  %v1530_v28 = vadd.f32 %v1458_v50, %v6909_v23  ;;  %v1497_v14 = vsel %vm255_vm0, %v1495_v51, %v1496_v4  ;;  %v1531_v47 = vadd.f32 %v1457_v37, %v6912_v53  ;;  %v11617_v37 = vld [vmem:[#allocation109_spill] sm:$0xff] }
 0x140   :  { %v1532_v5 = vadd.f32 %v1461_v59, %v6915_v18  ;;  %v1533_v38 = vadd.f32 %v1460_v36, %v6918_v42  ;;  %v1534_v46 = vadd.f32 %v1464_v32, %v6921_v30  ;;  %v1535_v16 = vadd.f32 %v1463_v58, %v6924_v20  ;;  %v11615_v58 = vld [vmem:[#allocation13_spill] sm:$0xff]  ;;  %v11616_v36 = vld [vmem:[#allocation108_spill] sm:$0xff] }
 0x141   :  { %v1536_v33 = vadd.f32 %v1467_v31, %v6927_v43  ;;  %v1537_v2 = vadd.f32 %v1466_v49, %v6930_v54  ;;  %v1538_v11 = vadd.f32 %v1470_v57, %v6933_v21  ;;  %v1539_v23 = vadd.f32 %v1469_v24, %v6936_v3  ;;  %v11613_v21 = vld [vmem:[#allocation106_spill] sm:$0xff]  ;;  %v11614_v49 = vld [vmem:[#allocation107_spill] sm:$0xff] }
 0x142   :  { %v1540_v12 = vadd.f32 %v1473_v61, %v6939_v41  ;;  %v1541_v53 = vadd.f32 %v1472_v13, %v6942_v1  ;;  %v1542_v42 = vadd.f32 %v1476_v39, %v6945_v17  ;;  %v1543_v18 = vadd.f32 %v1475_v63, %v6948_v22  ;;  %v11618_v24 = vld [vmem:[#allocation98_spill] sm:$0xff]  ;;  %v11619_v13 = vld [vmem:[#allocation99_spill] sm:$0xff]  ;;  %v11620_v63 = vld [vmem:[#allocation100_spill] sm:$0xff] }
 0x143   :  { %v1544_v30 = vadd.f32 %v1479_v40, %v6951_v34  ;;  %v1545_v20 = vadd.f32 %v1478_v9, %v6954_v56  ;;  %v1546_v43 = vadd.f32 %v1482_v26, %v6957_v52  ;;  %v1547_v54 = vadd.f32 %v1481_v45, %v6960_v48  ;;  %v11621_v9 = vld [vmem:[#allocation101_spill] sm:$0xff] }
 0x144   :  { %v1548_v3 = vadd.f32 %v1485_v15, %v11613_v21  ;;  %v1549_v41 = vadd.f32 %v1484_v44, %v11614_v49  ;;  %v1550_v1 = vadd.f32 %v1488_v19, %v11615_v58  ;;  %v1551_v29 = vadd.f32 %v1487_v62, %v11616_v36 }
 0x145   :  { %v1552_v17 = vadd.f32 %v1491_v10, %v11617_v37  ;;  %v1553_v22 = vadd.f32 %v1490_v55, %v11618_v24  ;;  %v1554_v34 = vadd.f32 %v1494_v35, %v11619_v13  ;;  %v1555_v56 = vadd.f32 %v1493_v25, %v11620_v63 }
 0x146   :  { %v1556_v52 = vadd.f32 %v1497_v14, %v11621_v9  ;;  %v1557_v48 = vadd.f32 %v1496_v4, %v11622_v8  ;;  %v7144_v45 = vmax.f32 %v1528_v7, 0.0  ;;  %v7146_v0 = vmax.f32 %v1529_v27, 0.0 }
 0x147   :  { %v7148_v44 = vmax.f32 %v1530_v28, 0.0  ;;  %v7150_v60 = vmax.f32 %v1531_v47, 0.0  ;;  %v7152_v62 = vmax.f32 %v1532_v5, 0.0  ;;  %v7154_v55 = vmax.f32 %v1533_v38, 0.0 }
 0x148   :  { %11623 = vst [vmem:[#allocation103_spill] sm:$0xff] %v7144_v45  ;;  %v7156_v50 = vmax.f32 %v1534_v46, 0.0  ;;  %v7158_v59 = vmax.f32 %v1535_v16, 0.0  ;;  %v7160_v6 = vmax.f32 %v1536_v33, 0.0  ;;  %v7162_v25 = vmax.f32 %v1537_v2, 0.0  ;;  %v11653_v16 = vld [vmem:[#allocation44_spill] sm:$0xff] }
 0x149   :  { %11624 = vst [vmem:[#allocation24_spill] sm:$0xff] %v7146_v0  ;;  %v7164_v32 = vmax.f32 %v1538_v11, 0.0  ;;  %v7166_v31 = vmax.f32 %v1539_v23, 0.0  ;;  %v7168_v51 = vmax.f32 %v1540_v12, 0.0  ;;  %v7170_v4 = vmax.f32 %v1541_v53, 0.0  ;;  %v11654_v2 = vld [vmem:[#allocation42_spill] sm:$0xff] }
 0x14a   :  { %11625 = vst [vmem:[#allocation25_spill] sm:$0xff] %v7148_v44  ;;  %v7172_v57 = vmax.f32 %v1542_v42, 0.0  ;;  %v7174_v61 = vmax.f32 %v1543_v18, 0.0  ;;  %v7176_v39 = vmax.f32 %v1544_v30, 0.0  ;;  %v7178_v40 = vmax.f32 %v1545_v20, 0.0  ;;  %v11655_v23 = vld [vmem:[#allocation47_spill] sm:$0xff] }
 0x14b   :  { %11626 = vst [vmem:[#allocation26_spill] sm:$0xff] %v7150_v60  ;;  %v7180_v26 = vmax.f32 %v1546_v43, 0.0  ;;  %v1589_v15 = vstv %s7126_s4  ;;  %v7183_v19 = vmax.f32 %v1547_v54, 0.0  ;;  %v7185_v10 = vmax.f32 %v1548_v3, 0.0  ;;  %v11656_v53 = vld [vmem:[#allocation48_spill] sm:$0xff]  ;;  %v11657_v18 = vld [vmem:[#allocation49_spill] sm:$0xff] }
 0x14c   :  { %11627 = vst [vmem:[#allocation28_spill] sm:$0xff] %v7152_v62  ;;  %v7187_v35 = vmax.f32 %v1549_v41, 0.0  ;;  %v7189_v7 = vmax.f32 %v1550_v1, 0.0  ;;  %v7191_v27 = vmax.f32 %v1551_v29, 0.0  ;;  %v7193_v28 = vmax.f32 %v1552_v17, 0.0  ;;  %v11658_v20 = vld [vmem:[#allocation50_spill] sm:$0xff] }
 0x14d   :  { %11628 = vst [vmem:[#allocation29_spill] sm:$0xff] %v7154_v55  ;;  %v7195_v14 = vmax.f32 %v1553_v22, 0.0  ;;  %v7197_v47 = vmax.f32 %v1554_v34, 0.0  ;;  %v7199_v5 = vmax.f32 %v1555_v56, 0.0  ;;  %v7201_v38 = vmax.f32 %v1556_v52, 0.0  ;;  %v11659_v54 = vld [vmem:[#allocation51_spill] sm:$0xff] }
 0x14e   :  { %11629 = vst [vmem:[#allocation39_spill] sm:$0xff] %v7156_v50  ;;  %v7203_v46 = vmax.f32 %v1557_v48, 0.0  ;;  %v1590_v33 = vmul.f32 %v1589_v15, %v11653_v16  ;;  %v1591_v11 = vmul.f32 %v1589_v15, %v11654_v2  ;;  %v1592_v12 = vmul.f32 %v1589_v15, %v11655_v23  ;;  %v11660_v3 = vld [vmem:[#allocation52_spill] sm:$0xff]  ;;  %v11661_v41 = vld [vmem:[#allocation53_spill] sm:$0xff]  ;;  %v11664_v17 = vld [vmem:[#allocation43_spill] sm:$0xff] }
 0x14f   :  { %11630 = vst [vmem:[#allocation30_spill] sm:$0xff] %v7158_v59  ;;  %v1593_v42 = vmul.f32 %v1589_v15, %v11656_v53  ;;  %v1594_v30 = vmul.f32 %v1589_v15, %v11657_v18  ;;  %v1595_v43 = vmul.f32 %v1589_v15, %v11658_v20  ;;  %v1596_v21 = vmul.f32 %v1589_v15, %v11659_v54  ;;  %v11662_v1 = vld [vmem:[#allocation40_spill] sm:$0xff]  ;;  %v11663_v29 = vld [vmem:[#allocation41_spill] sm:$0xff]  ;;  %v11665_v22 = vld [vmem:[#allocation54_spill] sm:$0xff] }
 0x150   :  { %11631 = vst [vmem:[#allocation31_spill] sm:$0xff] %v7160_v6  ;;  %v1597_v49 = vmul.f32 %v1589_v15, %v11660_v3  ;;  %v1598_v58 = vmul.f32 %v1589_v15, %v11661_v41  ;;  %v1599_v36 = vmul.f32 %v1589_v15, %v11662_v1  ;;  %v1600_v37 = vmul.f32 %v1589_v15, %v11663_v29  ;;  %v11666_v34 = vld [vmem:[#allocation55_spill] sm:$0xff]  ;;  %v11667_v56 = vld [vmem:[#allocation56_spill] sm:$0xff]  ;;  %v11668_v52 = vld [vmem:[#allocation57_spill] sm:$0xff] }
 0x151   :  { %11632 = vst [vmem:[#allocation32_spill] sm:$0xff] %v7162_v25  ;;  %v1601_v24 = vmul.f32 %v1589_v15, %v11664_v17  ;;  %v1602_v13 = vmul.f32 %v1589_v15, %v11665_v22  ;;  %v1603_v63 = vmul.f32 %v1589_v15, %v11666_v34  ;;  %v1604_v9 = vmul.f32 %v1589_v15, %v11667_v56  ;;  %v11669_v48 = vld [vmem:[#allocation58_spill] sm:$0xff] }
 0x152   :  { %11633 = vst [vmem:[#allocation33_spill] sm:$0xff] %v7164_v32  ;;  %v1605_v8 = vmul.f32 %v1589_v15, %v11668_v52  ;;  %v11679_v32 = vld [vmem:[#allocation104_spill] sm:$0xff] }
 0x153   :  { %11634 = vst [vmem:[#allocation34_spill] sm:$0xff] %v7166_v31  ;;  %v7234_v25 = vadd.f32 %v1590_v33, %v11679_v32  ;;  %v7237_v6 = vadd.f32 %v1591_v11, %v11679_v32  ;;  %v7240_v59 = vadd.f32 %v1592_v12, %v11679_v32  ;;  %v7243_v50 = vadd.f32 %v1593_v42, %v11679_v32 }
 0x154   :  { %11635 = vst [vmem:[#allocation35_spill] sm:$0xff] %v7168_v51  ;;  %v11678_v51 = vld [vmem:[#allocation67_spill] sm:$0xff]  ;;  %v7246_v55 = vadd.f32 %v1594_v30, %v11679_v32  ;;  %v7249_v62 = vadd.f32 %v1595_v43, %v11679_v32  ;;  %v7255_v33 = vadd.f32 %v1597_v49, %v11679_v32  ;;  %v7258_v11 = vadd.f32 %v1598_v58, %v11679_v32 }
 0x155   :  { %11636 = vst [vmem:[#allocation36_spill] sm:$0xff] %v7170_v4  ;;  %v1615_v31 = vmul.f32 %v1589_v15, %v11678_v51  ;;  %v7261_v12 = vadd.f32 %v1599_v36, %v11679_v32  ;;  %v7264_v42 = vadd.f32 %v1600_v37, %v11679_v32  ;;  %v7267_v30 = vadd.f32 %v1601_v24, %v11679_v32 }
 0x156   :  { %11637 = vst [vmem:[#allocation37_spill] sm:$0xff] %v7172_v57  ;;  %v11677_v57 = vld [vmem:[#allocation66_spill] sm:$0xff]  ;;  %v7270_v43 = vadd.f32 %v1602_v13, %v11679_v32  ;;  %v7276_v49 = vadd.f32 %v1604_v9, %v11679_v32  ;;  %v7279_v58 = vadd.f32 %v1605_v8, %v11679_v32  ;;  %v1642_v24 = vstv %s7214_s9 }
 0x157   :  { %11638 = vst [vmem:[#allocation38_spill] sm:$0xff] %v7174_v61  ;;  %v1614_v4 = vmul.f32 %v1589_v15, %v11677_v57  ;;  %v7318_v44 = vmul.f32 %v1642_v24, %v11656_v53  ;;  %v7330_v0 = vmul.f32 %v1642_v24, %v11662_v1  ;;  %v1653_v45 = vmul.f32 %v1642_v24, %v11663_v29 }
 0x158   :  { %11639 = vst [vmem:[#allocation10_spill] sm:$0xff] %v7176_v39  ;;  %v11676_v39 = vld [vmem:[#allocation65_spill] sm:$0xff]  ;;  %v7334_v53 = vmul.f32 %v1642_v24, %v11664_v17  ;;  %v1659_v1 = vmul.f32 %v1642_v24, %v11669_v48 }
 0x159   :  { %11640 = vst [vmem:[#allocation11_spill] sm:$0xff] %v7178_v40  ;;  %v1613_v61 = vmul.f32 %v1589_v15, %v11676_v39 }
 0x15a   :  { %11641 = vst [vmem:[#allocation12_spill] sm:$0xff] %v7180_v26  ;;  %v11675_v26 = vld [vmem:[#allocation64_spill] sm:$0xff] }
 0x15b   :  { %11642 = vst [vmem:[#allocation14_spill] sm:$0xff] %v7183_v19  ;;  %v1612_v40 = vmul.f32 %v1589_v15, %v11675_v26 }
 0x15c   :  { %11643 = vst [vmem:[#allocation15_spill] sm:$0xff] %v7185_v10  ;;  %v11674_v10 = vld [vmem:[#allocation63_spill] sm:$0xff] }
 0x15d   :  { %11644 = vst [vmem:[#allocation16_spill] sm:$0xff] %v7187_v35  ;;  %v1611_v19 = vmul.f32 %v1589_v15, %v11674_v10  ;;  %v7301_v8 = vadd.f32 %v1612_v40, %v11679_v32  ;;  %v1647_v40 = vmul.f32 %v1642_v24, %v11657_v18  ;;  %v1655_v18 = vmul.f32 %v1642_v24, %v11665_v22 }
 0x15e   :  { %11645 = vst [vmem:[#allocation17_spill] sm:$0xff] %v7189_v7  ;;  %v11673_v7 = vld [vmem:[#allocation62_spill] sm:$0xff]  ;;  %v7356_v22 = vmul.f32 %v1642_v24, %v11674_v10 }
 0x15f   :  { %11646 = vst [vmem:[#allocation18_spill] sm:$0xff] %v7191_v27  ;;  %v1610_v35 = vmul.f32 %v1589_v15, %v11673_v7  ;;  %v7298_v9 = vadd.f32 %v1611_v19, %v11679_v32  ;;  %v1645_v19 = vmul.f32 %v1642_v24, %v11655_v23 }
 0x160   :  { %11647 = vst [vmem:[#allocation19_spill] sm:$0xff] %v7193_v28  ;;  %v11672_v28 = vld [vmem:[#allocation61_spill] sm:$0xff] }
 0x161   :  { %11648 = vst [vmem:[#allocation72_spill] sm:$0xff] %v7195_v14  ;;  %v1609_v27 = vmul.f32 %v1589_v15, %v11672_v28  ;;  %v7352_v29 = vmul.f32 %v1642_v24, %v11672_v28  ;;  %v1698_v28 = vrot.slane %v1645_v19, 1 }
 0x162   :  { %11649 = vst [vmem:[#allocation73_spill] sm:$0xff] %v7197_v47  ;;  %v11671_v47 = vld [vmem:[#allocation60_spill] sm:$0xff] }
 0x163   :  { %11650 = vst [vmem:[#allocation74_spill] sm:$0xff] %v7199_v5  ;;  %v1608_v14 = vmul.f32 %v1589_v15, %v11671_v47  ;;  %v7292_v13 = vadd.f32 %v1609_v27, %v11679_v32  ;;  %v1643_v27 = vmul.f32 %v1642_v24, %v11653_v16  ;;  %v1661_v17 = vmul.f32 %v1642_v24, %v11671_v47 }
 0x164   :  { %11651 = vst [vmem:[#allocation105_spill] sm:$0xff] %v7201_v38  ;;  %v11670_v38 = vld [vmem:[#allocation59_spill] sm:$0xff] }
 0x165   :  { %11652 = vst [vmem:[#allocation106_spill] sm:$0xff] %v7203_v46  ;;  %v1606_v46 = vmul.f32 %v1589_v15, %v11669_v48  ;;  %v1607_v5 = vmul.f32 %v1589_v15, %v11670_v38  ;;  %v7252_v15 = vadd.f32 %v1596_v21, %v11679_v32  ;;  %v7273_v21 = vadd.f32 %v1603_v63, %v11679_v32 }
 0x166   :  { %v7289_v60 = vadd.f32 %v1608_v14, %v11679_v32  ;;  %v7295_v63 = vadd.f32 %v1610_v35, %v11679_v32  ;;  %v7310_v14 = vadd.f32 %v1615_v31, %v11679_v32  ;;  %v7314_v35 = vmul.f32 %v1642_v24, %v11654_v2 }
 0x167   :  { %v7282_v36 = vadd.f32 %v1606_v46, %v11679_v32  ;;  %v7285_v37 = vadd.f32 %v1607_v5, %v11679_v32  ;;  %v7304_v46 = vadd.f32 %v1613_v61, %v11679_v32  ;;  %v7307_v5 = vadd.f32 %v1614_v4, %v11679_v32 }
 0x168   :  { %11680 = vst [vmem:[#allocation107_spill] sm:$0xff] %v7310_v14  ;;  %v7322_v61 = vmul.f32 %v1642_v24, %v11658_v20  ;;  %v1649_v4 = vmul.f32 %v1642_v24, %v11659_v54  ;;  %v7326_v32 = vmul.f32 %v1642_v24, %v11660_v3  ;;  %v1651_v31 = vmul.f32 %v1642_v24, %v11661_v41 }
 0x169   :  { %v7338_v20 = vmul.f32 %v1642_v24, %v11666_v34  ;;  %v1657_v54 = vmul.f32 %v1642_v24, %v11667_v56  ;;  %v7342_v3 = vmul.f32 %v1642_v24, %v11668_v52  ;;  %v7348_v41 = vmul.f32 %v1642_v24, %v11670_v38 }
 0x16a   :  { %v1663_v34 = vmul.f32 %v1642_v24, %v11673_v7  ;;  %v1665_v52 = vmul.f32 %v1642_v24, %v11675_v26  ;;  %v7360_v56 = vmul.f32 %v1642_v24, %v11676_v39  ;;  %v1667_v48 = vmul.f32 %v1642_v24, %v11677_v57 }
 0x16b   :  { %v7364_v38 = vmul.f32 %v1642_v24, %v11678_v51  ;;  %v1695_v23 = vrot.slane %v1643_v27, 1  ;;  %v1696_v47 = vrot.slane %v7314_v35, 1  ;;  %v1699_v2 = vrot.slane %v7318_v44, 1 }
 0x16c   :  { %v1701_v7 = vrot.slane %v1647_v40, 1  ;;  %v1702_v10 = vrot.slane %v7322_v61, 1  ;;  %v1704_v16 = vrot.slane %v1649_v4, 1  ;;  %v1705_v26 = vrot.slane %v7326_v32, 1 }
 0x16d   :  { %v1707_v14 = vrot.slane %v1651_v31, 1  ;;  %v1708_v39 = vrot.slane %v7330_v0, 1  ;;  %v1710_v57 = vrot.slane %v1653_v45, 1  ;;  %v1711_v24 = vrot.slane %v7334_v53, 1 }
 0x16e   :  { %v1713_v51 = vrot.slane %v1655_v18, 1  ;;  %v1714_v27 = vrot.slane %v7338_v20, 1  ;;  %v1716_v35 = vrot.slane %v1657_v54, 1  ;;  %v1717_v19 = vrot.slane %v7342_v3, 1 }
 0x16f   :  { %v1719_v44 = vrot.slane %v1659_v1, 1  ;;  %v1720_v40 = vrot.slane %v7348_v41, 1  ;;  %v1722_v61 = vrot.slane %v1661_v17, 1  ;;  %v1723_v4 = vrot.slane %v7352_v29, 1 }
 0x170   :  { %v1725_v32 = vrot.slane %v1663_v34, 1  ;;  %v1726_v31 = vrot.slane %v7356_v22, 1  ;;  %v1697_v0 = vsel %vm255_vm0, %v1695_v23, %v1696_v47  ;;  %v1728_v45 = vrot.slane %v1665_v52, 1 }
 0x171   :  { %v1729_v53 = vrot.slane %v7360_v56, 1  ;;  %v7380_v18 = vstv %s7344_s10  ;;  %v1700_v20 = vsel %vm255_vm0, %v1698_v28, %v1699_v2  ;;  %v1703_v54 = vsel %vm255_vm0, %v1701_v7, %v1702_v10 }
 0x172   :  { %v1731_v3 = vrot.slane %v1667_v48, 1  ;;  %v1732_v41 = vrot.slane %v7364_v38, 1  ;;  %v1706_v1 = vsel %vm255_vm0, %v1704_v16, %v1705_v26  ;;  %v1709_v29 = vsel %vm255_vm0, %v1707_v14, %v1708_v39 }
 0x173   :  { %v1712_v17 = vsel %vm255_vm0, %v1710_v57, %v1711_v24  ;;  %v1715_v23 = vsel %vm255_vm0, %v1713_v51, %v1714_v27  ;;  %v1718_v22 = vsel %vm255_vm0, %v1716_v35, %v1717_v19  ;;  %v1721_v34 = vsel %vm255_vm0, %v1719_v44, %v1720_v40 }
 0x174   :  { %v1724_v56 = vsel %vm255_vm0, %v1722_v61, %v1723_v4  ;;  %v1727_v28 = vsel %vm255_vm0, %v1725_v32, %v1726_v31  ;;  %v1730_v7 = vsel %vm255_vm0, %v1728_v45, %v1729_v53  ;;  %v7395_v38 = vadd.f32 %v1697_v0, %v7234_v25  ;;  %v11694_v45 = vld [vmem:[#allocation41_spill] sm:$0xff] }
 0x175   :  { %v7398_v16 = vadd.f32 %v1696_v47, %v7237_v6  ;;  %v7401_v57 = vadd.f32 %v1700_v20, %v7240_v59  ;;  %v1733_v51 = vsel %vm255_vm0, %v1731_v3, %v1732_v41  ;;  %v7405_v52 = vadd.f32 %v1699_v2, %v7243_v50  ;;  %v11695_v20 = vld [vmem:[#allocation43_spill] sm:$0xff]  ;;  %v11696_v3 = vld [vmem:[#allocation54_spill] sm:$0xff] }
 0x176   :  { %v7408_v48 = vadd.f32 %v1703_v54, %v7246_v55  ;;  %v7411_v14 = vadd.f32 %v1702_v10, %v7249_v62  ;;  %v7414_v25 = vadd.f32 %v1706_v1, %v7252_v15  ;;  %v7417_v6 = vadd.f32 %v1705_v26, %v7255_v33  ;;  %v11697_v1 = vld [vmem:[#allocation55_spill] sm:$0xff] }
 0x177   :  { %v7420_v59 = vadd.f32 %v1709_v29, %v7258_v11  ;;  %v7423_v47 = vadd.f32 %v1708_v39, %v7261_v12  ;;  %v7426_v50 = vadd.f32 %v1712_v17, %v7264_v42  ;;  %v7429_v55 = vadd.f32 %v1711_v24, %v7267_v30  ;;  %v11688_v24 = vld [vmem:[#allocation49_spill] sm:$0xff]  ;;  %v11698_v17 = vld [vmem:[#allocation56_spill] sm:$0xff] }
 0x178   :  { %v7432_v62 = vadd.f32 %v1715_v23, %v7270_v43  ;;  %v7435_v10 = vadd.f32 %v1714_v27, %v7273_v21  ;;  %v7438_v26 = vadd.f32 %v1718_v22, %v7276_v49  ;;  %v7441_v2 = vadd.f32 %v1717_v19, %v7279_v58  ;;  %v11684_v58 = vld [vmem:[#allocation44_spill] sm:$0xff]  ;;  %v11689_v27 = vld [vmem:[#allocation50_spill] sm:$0xff]  ;;  %v11690_v19 = vld [vmem:[#allocation51_spill] sm:$0xff] }
 0x179   :  { %v7444_v39 = vadd.f32 %v1721_v34, %v7282_v36  ;;  %v7447_v15 = vadd.f32 %v1720_v40, %v7285_v37  ;;  %v7450_v33 = vadd.f32 %v1724_v56, %v7289_v60  ;;  %v7453_v11 = vadd.f32 %v1723_v4, %v7292_v13  ;;  %v11682_v60 = vld [vmem:[#allocation107_spill] sm:$0xff]  ;;  %v11685_v37 = vld [vmem:[#allocation42_spill] sm:$0xff]  ;;  %v11691_v40 = vld [vmem:[#allocation52_spill] sm:$0xff] }
 0x17a   :  { %v7456_v12 = vadd.f32 %v1727_v28, %v7295_v63  ;;  %v7459_v42 = vadd.f32 %v1726_v31, %v7298_v9  ;;  %v7462_v30 = vadd.f32 %v1730_v7, %v7301_v8  ;;  %v7465_v43 = vadd.f32 %v1729_v53, %v7304_v46  ;;  %v11686_v63 = vld [vmem:[#allocation47_spill] sm:$0xff]  ;;  %v11687_v8 = vld [vmem:[#allocation48_spill] sm:$0xff]  ;;  %v11692_v4 = vld [vmem:[#allocation53_spill] sm:$0xff] }
 0x17b   :  { %v7468_v21 = vadd.f32 %v1733_v51, %v7307_v5  ;;  %v7471_v49 = vadd.f32 %v1732_v41, %v11682_v60  ;;  %v1787_v36 = vmul.f32 %v7380_v18, %v11684_v58  ;;  %v7477_v13 = vmul.f32 %v7380_v18, %v11685_v37  ;;  %v11693_v31 = vld [vmem:[#allocation40_spill] sm:$0xff]  ;;  %v11699_v22 = vld [vmem:[#allocation57_spill] sm:$0xff]  ;;  %v11700_v56 = vld [vmem:[#allocation58_spill] sm:$0xff] }
 0x17c   :  { %v1789_v9 = vmul.f32 %v7380_v18, %v11686_v63  ;;  %v7483_v46 = vmul.f32 %v7380_v18, %v11687_v8  ;;  %v1791_v5 = vmul.f32 %v7380_v18, %v11688_v24  ;;  %v7489_v35 = vmul.f32 %v7380_v18, %v11689_v27  ;;  %v11701_v7 = vld [vmem:[#allocation59_spill] sm:$0xff]  ;;  %v11702_v60 = vld [vmem:[#allocation60_spill] sm:$0xff]  ;;  %v11703_v37 = vld [vmem:[#allocation61_spill] sm:$0xff] }
 0x17d   :  { %11681 = vst [vmem:[#allocation13_spill] sm:$0xff] %v7468_v21  ;;  %v1793_v44 = vmul.f32 %v7380_v18, %v11690_v19  ;;  %v7495_v61 = vmul.f32 %v7380_v18, %v11691_v40  ;;  %v1795_v32 = vmul.f32 %v7380_v18, %v11692_v4  ;;  %v7501_v0 = vmul.f32 %v7380_v18, %v11693_v31  ;;  %v11707_v31 = vld [vmem:[#allocation65_spill] sm:$0xff]  ;;  %v11708_v4 = vld [vmem:[#allocation66_spill] sm:$0xff]  ;;  %v11709_v40 = vld [vmem:[#allocation67_spill] sm:$0xff] }
 0x17e   :  { %11683 = vst [vmem:[#allocation108_spill] sm:$0xff] %v7471_v49  ;;  %v1797_v53 = vmul.f32 %v7380_v18, %v11694_v45  ;;  %v7507_v54 = vmul.f32 %v7380_v18, %v11695_v20  ;;  %v1799_v41 = vmul.f32 %v7380_v18, %v11696_v3  ;;  %v7513_v29 = vmul.f32 %v7380_v18, %v11697_v1  ;;  %v11704_v3 = vld [vmem:[#allocation62_spill] sm:$0xff]  ;;  %v11705_v20 = vld [vmem:[#allocation63_spill] sm:$0xff]  ;;  %v11706_v45 = vld [vmem:[#allocation64_spill] sm:$0xff] }
 0x17f   :  { %v1801_v23 = vmul.f32 %v7380_v18, %v11698_v17  ;;  %v7519_v34 = vmul.f32 %v7380_v18, %v11699_v22  ;;  %v1803_v28 = vmul.f32 %v7380_v18, %v11700_v56  ;;  %v7525_v51 = vmul.f32 %v7380_v18, %v11701_v7 }
 0x180   :  { %v1805_v58 = vmul.f32 %v7380_v18, %v11702_v60  ;;  %v7531_v1 = vmul.f32 %v7380_v18, %v11703_v37  ;;  %v1807_v17 = vmul.f32 %v7380_v18, %v11704_v3  ;;  %v7537_v22 = vmul.f32 %v7380_v18, %v11705_v20 }
 0x181   :  { %v1809_v56 = vmul.f32 %v7380_v18, %v11706_v45  ;;  %v7543_v7 = vmul.f32 %v7380_v18, %v11707_v31  ;;  %v1811_v60 = vmul.f32 %v7380_v18, %v11708_v4  ;;  %v7549_v37 = vmul.f32 %v7380_v18, %v11709_v40 }
 0x182   :  { %v1840_v19 = vrot.slane %v1787_v36, 2  ;;  %v1841_v3 = vrot.slane %v7477_v13, 2  ;;  %v1843_v27 = vrot.slane %v1789_v9, 2  ;;  %v1844_v20 = vrot.slane %v7483_v46, 2 }
 0x183   :  { %v1846_v24 = vrot.slane %v1791_v5, 2  ;;  %v1847_v45 = vrot.slane %v7489_v35, 2  ;;  %v1849_v8 = vrot.slane %v1793_v44, 2  ;;  %v1850_v31 = vrot.slane %v7495_v61, 2 }
 0x184   :  { %v1852_v63 = vrot.slane %v1795_v32, 2  ;;  %v1853_v49 = vrot.slane %v7501_v0, 2  ;;  %v1855_v4 = vrot.slane %v1797_v53, 2  ;;  %v1856_v21 = vrot.slane %v7507_v54, 2 }
 0x185   :  { %v1858_v18 = vrot.slane %v1799_v41, 2  ;;  %v1859_v36 = vrot.slane %v7513_v29, 2  ;;  %v1861_v40 = vrot.slane %v1801_v23, 2  ;;  %v1862_v13 = vrot.slane %v7519_v34, 2 }
 0x186   :  { %v1864_v9 = vrot.slane %v1803_v28, 2  ;;  %v1865_v46 = vrot.slane %v7525_v51, 2  ;;  %v1867_v5 = vrot.slane %v1805_v58, 2  ;;  %v1868_v35 = vrot.slane %v7531_v1, 2 }
 0x187   :  { %v1870_v44 = vrot.slane %v1807_v17, 2  ;;  %v1871_v61 = vrot.slane %v7537_v22, 2  ;;  %v1842_v32 = vsel %vm1839_vm1, %v1840_v19, %v1841_v3  ;;  %v1845_v0 = vsel %vm1839_vm1, %v1843_v27, %v1844_v20 }
 0x188   :  { %v1873_v53 = vrot.slane %v1809_v56, 2  ;;  %v1874_v54 = vrot.slane %v7543_v7, 2  ;;  %v1848_v41 = vsel %vm1839_vm1, %v1846_v24, %v1847_v45  ;;  %v1851_v29 = vsel %vm1839_vm1, %v1849_v8, %v1850_v31 }
 0x189   :  { %v1876_v23 = vrot.slane %v1811_v60, 2  ;;  %v1877_v34 = vrot.slane %v7549_v37, 2  ;;  %v1854_v1 = vsel %vm1839_vm1, %v1852_v63, %v1853_v49  ;;  %v1857_v17 = vsel %vm1839_vm1, %v1855_v4, %v1856_v21 }
 0x18a   :  { %v1860_v22 = vsel %vm1839_vm1, %v1858_v18, %v1859_v36  ;;  %v1863_v19 = vsel %vm1839_vm1, %v1861_v40, %v1862_v13  ;;  %v1866_v27 = vsel %vm1839_vm1, %v1864_v9, %v1865_v46  ;;  %v1869_v56 = vsel %vm1839_vm1, %v1867_v5, %v1868_v35 }
 0x18b   :  { %v1872_v24 = vsel %vm1839_vm1, %v1870_v44, %v1871_v61  ;;  %v1905_v8 = vadd.f32 %v1842_v32, %v7395_v38  ;;  %v1875_v28 = vsel %vm1839_vm1, %v1873_v53, %v1874_v54  ;;  %v1906_v63 = vadd.f32 %v1841_v3, %v7398_v16 }
 0x18c   :  { %v1907_v4 = vadd.f32 %v1845_v0, %v7401_v57  ;;  %v1908_v7 = vadd.f32 %v1844_v20, %v7405_v52  ;;  %v1878_v40 = vsel %vm1839_vm1, %v1876_v23, %v1877_v34  ;;  %v1909_v51 = vadd.f32 %v1848_v41, %v7408_v48  ;;  %v11722_v0 = vld [vmem:[#allocation43_spill] sm:$0xff] }
 0x18d   :  { %v1910_v60 = vadd.f32 %v1847_v45, %v7411_v14  ;;  %v1911_v58 = vadd.f32 %v1851_v29, %v7414_v25  ;;  %v1912_v37 = vadd.f32 %v1850_v31, %v7417_v6  ;;  %v1913_v38 = vadd.f32 %v1854_v1, %v7420_v59  ;;  %v11714_v45 = vld [vmem:[#allocation48_spill] sm:$0xff]  ;;  %v11724_v29 = vld [vmem:[#allocation55_spill] sm:$0xff] }
 0x18e   :  { %v1914_v18 = vadd.f32 %v1853_v49, %v7423_v47  ;;  %v1915_v16 = vadd.f32 %v1857_v17, %v7426_v50  ;;  %v1916_v57 = vadd.f32 %v1856_v21, %v7429_v55  ;;  %v1917_v52 = vadd.f32 %v1860_v22, %v7432_v62  ;;  %v11710_v21 = vld [vmem:[#allocation13_spill] sm:$0xff] }
 0x18f   :  { %v1918_v20 = vadd.f32 %v1859_v36, %v7435_v10  ;;  %v1919_v48 = vadd.f32 %v1863_v19, %v7438_v26  ;;  %v1920_v14 = vadd.f32 %v1862_v13, %v7441_v2  ;;  %v1921_v25 = vadd.f32 %v1866_v27, %v7444_v39  ;;  %v11711_v2 = vld [vmem:[#allocation108_spill] sm:$0xff]  ;;  %v11713_v39 = vld [vmem:[#allocation47_spill] sm:$0xff]  ;;  %v11726_v17 = vld [vmem:[#allocation57_spill] sm:$0xff] }
 0x190   :  { %v1922_v6 = vadd.f32 %v1865_v46, %v7447_v15  ;;  %v1931_v59 = vstv %s7562_s11  ;;  %v1923_v47 = vadd.f32 %v1869_v56, %v7450_v33  ;;  %v1924_v50 = vadd.f32 %v1868_v35, %v7453_v11  ;;  %v11715_v33 = vld [vmem:[#allocation49_spill] sm:$0xff]  ;;  %v11720_v35 = vld [vmem:[#allocation40_spill] sm:$0xff]  ;;  %v11727_v19 = vld [vmem:[#allocation58_spill] sm:$0xff] }
 0x191   :  { %v1925_v55 = vadd.f32 %v1872_v24, %v7456_v12  ;;  %v1926_v62 = vadd.f32 %v1871_v61, %v7459_v42  ;;  %v1927_v10 = vadd.f32 %v1875_v28, %v7462_v30  ;;  %v1928_v26 = vadd.f32 %v1874_v54, %v7465_v43  ;;  %v11716_v12 = vld [vmem:[#allocation50_spill] sm:$0xff]  ;;  %v11717_v42 = vld [vmem:[#allocation51_spill] sm:$0xff]  ;;  %v11718_v30 = vld [vmem:[#allocation52_spill] sm:$0xff] }
 0x192   :  { %v1929_v49 = vadd.f32 %v1878_v40, %v11710_v21  ;;  %v7608_v31 = vadd.f32 %v1877_v34, %v11711_v2  ;;  %v1932_v15 = vmul.f32 %v1931_v59, %v11713_v39  ;;  %v1933_v3 = vmul.f32 %v1931_v59, %v11714_v45  ;;  %v11719_v43 = vld [vmem:[#allocation53_spill] sm:$0xff]  ;;  %v11723_v54 = vld [vmem:[#allocation54_spill] sm:$0xff]  ;;  %v11725_v34 = vld [vmem:[#allocation56_spill] sm:$0xff] }
 0x193   :  { %v1934_v36 = vmul.f32 %v1931_v59, %v11715_v33  ;;  %v7614_v11 = vstv %s7574_s12  ;;  %v1935_v13 = vmul.f32 %v1931_v59, %v11716_v12  ;;  %v1936_v9 = vmul.f32 %v1931_v59, %v11717_v42  ;;  %v11721_v61 = vld [vmem:[#allocation41_spill] sm:$0xff]  ;;  %v11728_v56 = vld [vmem:[#allocation59_spill] sm:$0xff]  ;;  %v11729_v28 = vld [vmem:[#allocation60_spill] sm:$0xff] }
 0x194   :  { %11712 = vst [vmem:[#allocation109_spill] sm:$0xff] %v7608_v31  ;;  %v1937_v46 = vmul.f32 %v1931_v59, %v11718_v30  ;;  %v1938_v5 = vmul.f32 %v1931_v59, %v11719_v43  ;;  %v1939_v44 = vmul.f32 %v1931_v59, %v11720_v35  ;;  %v1940_v32 = vmul.f32 %v1931_v59, %v11721_v61  ;;  %v11730_v21 = vld [vmem:[#allocation61_spill] sm:$0xff]  ;;  %v11731_v31 = vld [vmem:[#allocation62_spill] sm:$0xff]  ;;  %v11732_v35 = vld [vmem:[#allocation63_spill] sm:$0xff] }
 0x195   :  { %v1941_v53 = vmul.f32 %v1931_v59, %v11722_v0  ;;  %v1942_v41 = vmul.f32 %v1931_v59, %v11723_v54  ;;  %v1943_v23 = vmul.f32 %v1931_v59, %v11724_v29  ;;  %v1944_v1 = vmul.f32 %v1931_v59, %v11725_v34  ;;  %v11733_v43 = vld [vmem:[#allocation64_spill] sm:$0xff]  ;;  %v11734_v30 = vld [vmem:[#allocation65_spill] sm:$0xff]  ;;  %v11735_v42 = vld [vmem:[#allocation66_spill] sm:$0xff] }
 0x196   :  { %v1945_v22 = vmul.f32 %v1931_v59, %v11726_v17  ;;  %v1946_v27 = vmul.f32 %v1931_v59, %v11727_v19  ;;  %v1947_v24 = vmul.f32 %v1931_v59, %v11728_v56  ;;  %v1948_v40 = vmul.f32 %v1931_v59, %v11729_v28  ;;  %v11736_v12 = vld [vmem:[#allocation67_spill] sm:$0xff]  ;;  %v11737_v33 = vld [vmem:[#allocation68_spill] sm:$0xff]  ;;  %v11738_v45 = vld [vmem:[#allocation69_spill] sm:$0xff] }
 0x197   :  { %v1949_v2 = vmul.f32 %v1931_v59, %v11730_v21  ;;  %v1950_v61 = vmul.f32 %v1931_v59, %v11731_v31  ;;  %v1951_v0 = vmul.f32 %v1931_v59, %v11732_v35  ;;  %v1952_v54 = vmul.f32 %v1931_v59, %v11733_v43 }
 0x198   :  { %v1953_v29 = vmul.f32 %v1931_v59, %v11734_v30  ;;  %v1954_v34 = vmul.f32 %v1931_v59, %v11735_v42  ;;  %v1955_v17 = vmul.f32 %v1931_v59, %v11736_v12  ;;  %v1956_v19 = vmul.f32 %v1931_v59, %v11737_v33 }
 0x199   :  { %v7639_v56 = vmul.f32 %v1931_v59, %v11738_v45  ;;  %v7641_v28 = vadd.f32 %v1932_v15, %v1905_v8  ;;  %v7643_v21 = vadd.f32 %v1933_v3, %v1906_v63  ;;  %v7645_v31 = vadd.f32 %v1934_v36, %v1907_v4  ;;  %v11745_v15 = vld [vmem:[#allocation52_spill] sm:$0xff]  ;;  %v11746_v3 = vld [vmem:[#allocation53_spill] sm:$0xff] }
 0x19a   :  { %v7647_v35 = vadd.f32 %v1935_v13, %v1908_v7  ;;  %v7649_v43 = vadd.f32 %v1936_v9, %v1909_v51  ;;  %v7651_v30 = vadd.f32 %v1937_v46, %v1910_v60  ;;  %v7653_v42 = vadd.f32 %v1938_v5, %v1911_v58  ;;  %v11747_v13 = vld [vmem:[#allocation40_spill] sm:$0xff]  ;;  %v11748_v46 = vld [vmem:[#allocation41_spill] sm:$0xff] }
 0x19b   :  { %v7655_v12 = vadd.f32 %v1939_v44, %v1912_v37  ;;  %v7657_v33 = vadd.f32 %v1940_v32, %v1913_v38  ;;  %v7659_v59 = vadd.f32 %v1941_v53, %v1914_v18  ;;  %v7661_v8 = vadd.f32 %v1942_v41, %v1915_v16  ;;  %v11749_v44 = vld [vmem:[#allocation43_spill] sm:$0xff]  ;;  %v11750_v32 = vld [vmem:[#allocation54_spill] sm:$0xff]  ;;  %v11752_v41 = vld [vmem:[#allocation56_spill] sm:$0xff] }
 0x19c   :  { %v7663_v63 = vadd.f32 %v1943_v23, %v1916_v57  ;;  %v7665_v4 = vadd.f32 %v1944_v1, %v1917_v52  ;;  %v7667_v7 = vadd.f32 %v1945_v22, %v1918_v20  ;;  %v7669_v51 = vadd.f32 %v1946_v27, %v1919_v48  ;;  %v11751_v53 = vld [vmem:[#allocation55_spill] sm:$0xff]  ;;  %v11753_v23 = vld [vmem:[#allocation57_spill] sm:$0xff]  ;;  %v11754_v1 = vld [vmem:[#allocation58_spill] sm:$0xff] }
 0x19d   :  { %v7671_v60 = vadd.f32 %v1947_v24, %v1920_v14  ;;  %v7673_v58 = vadd.f32 %v1948_v40, %v1921_v25  ;;  %v7675_v37 = vadd.f32 %v1949_v2, %v1922_v6  ;;  %v7677_v38 = vadd.f32 %v1950_v61, %v1923_v47  ;;  %v11741_v25 = vld [vmem:[#allocation48_spill] sm:$0xff]  ;;  %v11742_v47 = vld [vmem:[#allocation49_spill] sm:$0xff]  ;;  %v11755_v22 = vld [vmem:[#allocation59_spill] sm:$0xff] }
 0x19e   :  { %v7679_v18 = vadd.f32 %v1951_v0, %v1924_v50  ;;  %v7681_v16 = vadd.f32 %v1952_v54, %v1925_v55  ;;  %v7683_v57 = vadd.f32 %v1953_v29, %v1926_v62  ;;  %v7685_v52 = vadd.f32 %v1954_v34, %v1927_v10  ;;  %v11743_v55 = vld [vmem:[#allocation50_spill] sm:$0xff]  ;;  %v11744_v10 = vld [vmem:[#allocation51_spill] sm:$0xff]  ;;  %v11756_v27 = vld [vmem:[#allocation60_spill] sm:$0xff] }
 0x19f   :  { %v7687_v20 = vadd.f32 %v1955_v17, %v1928_v26  ;;  %v7689_v48 = vadd.f32 %v1956_v19, %v1929_v49  ;;  %v1985_v14 = vmul.f32 %v7614_v11, %v11713_v39  ;;  %v7695_v6 = vmul.f32 %v7614_v11, %v11741_v25  ;;  %v11757_v40 = vld [vmem:[#allocation61_spill] sm:$0xff] }
 0x1a0   :  { %v1987_v50 = vmul.f32 %v7614_v11, %v11742_v47  ;;  %v7701_v62 = vmul.f32 %v7614_v11, %v11743_v55  ;;  %v1989_v26 = vmul.f32 %v7614_v11, %v11744_v10  ;;  %v7707_v49 = vmul.f32 %v7614_v11, %v11745_v15  ;;  %v11764_v15 = vld [vmem:[#allocation68_spill] sm:$0xff] }
 0x1a1   :  { %11739 = vst [vmem:[#allocation98_spill] sm:$0xff] %v7687_v20  ;;  %v1991_v36 = vmul.f32 %v7614_v11, %v11746_v3  ;;  %v7713_v9 = vmul.f32 %v7614_v11, %v11747_v13  ;;  %v1993_v5 = vmul.f32 %v7614_v11, %v11748_v46  ;;  %v7719_v61 = vmul.f32 %v7614_v11, %v11749_v44  ;;  %v11760_v44 = vld [vmem:[#allocation64_spill] sm:$0xff]  ;;  %v11761_v46 = vld [vmem:[#allocation65_spill] sm:$0xff]  ;;  %v11762_v13 = vld [vmem:[#allocation66_spill] sm:$0xff] }
 0x1a2   :  { %11740 = vst [vmem:[#allocation99_spill] sm:$0xff] %v7689_v48  ;;  %v1995_v0 = vmul.f32 %v7614_v11, %v11750_v32  ;;  %v7725_v54 = vmul.f32 %v7614_v11, %v11751_v53  ;;  %v1997_v29 = vmul.f32 %v7614_v11, %v11752_v41  ;;  %v7731_v34 = vmul.f32 %v7614_v11, %v11753_v23  ;;  %v11758_v53 = vld [vmem:[#allocation62_spill] sm:$0xff]  ;;  %v11759_v32 = vld [vmem:[#allocation63_spill] sm:$0xff] }
 0x1a3   :  { %v1999_v17 = vmul.f32 %v7614_v11, %v11754_v1  ;;  %v7737_v19 = vmul.f32 %v7614_v11, %v11755_v22  ;;  %v2001_v24 = vmul.f32 %v7614_v11, %v11756_v27  ;;  %v7743_v2 = vmul.f32 %v7614_v11, %v11757_v40  ;;  %v11763_v3 = vld [vmem:[#allocation67_spill] sm:$0xff] }
 0x1a4   :  { %v2003_v41 = vmul.f32 %v7614_v11, %v11758_v53  ;;  %v7749_v23 = vmul.f32 %v7614_v11, %v11759_v32  ;;  %v2005_v1 = vmul.f32 %v7614_v11, %v11760_v44  ;;  %v7755_v22 = vmul.f32 %v7614_v11, %v11761_v46 }
 0x1a5   :  { %v2007_v27 = vmul.f32 %v7614_v11, %v11762_v13  ;;  %v7761_v40 = vmul.f32 %v7614_v11, %v11763_v3  ;;  %v2009_v53 = vmul.f32 %v7614_v11, %v11764_v15  ;;  %v7767_v32 = vmul.f32 %v7614_v11, %v11738_v45 }
 0x1a6   :  { %v2037_v10 = vrot.slane %v1985_v14, 1  ;;  %v2038_v44 = vrot.slane %v7695_v6, 1  ;;  %v2040_v55 = vrot.slane %v1987_v50, 1  ;;  %v2041_v46 = vrot.slane %v7701_v62, 1 }
 0x1a7   :  { %v2043_v47 = vrot.slane %v1989_v26, 1  ;;  %v2044_v13 = vrot.slane %v7707_v49, 1  ;;  %v2046_v25 = vrot.slane %v1991_v36, 1  ;;  %v2047_v3 = vrot.slane %v7713_v9, 1 }
 0x1a8   :  { %v2049_v39 = vrot.slane %v1993_v5, 1  ;;  %v2050_v48 = vrot.slane %v7719_v61, 1  ;;  %v2052_v15 = vrot.slane %v1995_v0, 1  ;;  %v2053_v20 = vrot.slane %v7725_v54, 1  ;;  %v11765_v5 = vld [vmem:[#allocation109_spill] sm:$0xff] }
 0x1a9   :  { %v2055_v11 = vrot.slane %v1997_v29, 1  ;;  %v2056_v14 = vrot.slane %v7731_v34, 1  ;;  %v2058_v45 = vrot.slane %v1999_v17, 1  ;;  %v2059_v6 = vrot.slane %v7737_v19, 1 }
 0x1aa   :  { %v2061_v50 = vrot.slane %v2001_v24, 1  ;;  %v2062_v62 = vrot.slane %v7743_v2, 1  ;;  %v2064_v26 = vrot.slane %v2003_v41, 1  ;;  %v2065_v49 = vrot.slane %v7749_v23, 1 }
 0x1ab   :  { %v2067_v36 = vrot.slane %v2005_v1, 1  ;;  %v2068_v9 = vrot.slane %v7755_v22, 1  ;;  %v7784_v61 = vadd.f32 %v7639_v56, %v11765_v5  ;;  %v2039_v0 = vsel %vm255_vm0, %v2037_v10, %v2038_v44  ;;  %v11779_v5 = vld [vmem:[#allocation41_spill] sm:$0xff] }
 0x1ac   :  { %v2070_v54 = vrot.slane %v2007_v27, 1  ;;  %v2071_v29 = vrot.slane %v7761_v40, 1  ;;  %v2042_v34 = vsel %vm255_vm0, %v2040_v55, %v2041_v46  ;;  %v2045_v41 = vsel %vm255_vm0, %v2043_v47, %v2044_v13 }
 0x1ad   :  { %v2073_v17 = vrot.slane %v2009_v53, 1  ;;  %v11090_v23 = vrot.slane %v7767_v32, 1  ;;  %v2048_v1 = vsel %vm255_vm0, %v2046_v25, %v2047_v3  ;;  %v2051_v22 = vsel %vm255_vm0, %v2049_v39, %v2050_v48 }
 0x1ae   :  { %v2054_v19 = vsel %vm255_vm0, %v2052_v15, %v2053_v20  ;;  %v2057_v56 = vsel %vm255_vm0, %v2055_v11, %v2056_v14  ;;  %v2060_v10 = vsel %vm255_vm0, %v2058_v45, %v2059_v6  ;;  %v2063_v27 = vsel %vm255_vm0, %v2061_v50, %v2062_v62  ;;  %v11773_v11 = vld [vmem:[#allocation49_spill] sm:$0xff] }
 0x1af   :  { %v2066_v24 = vsel %vm255_vm0, %v2064_v26, %v2065_v49  ;;  %v2069_v55 = vsel %vm255_vm0, %v2067_v36, %v2068_v9  ;;  %v2072_v47 = vsel %vm255_vm0, %v2070_v54, %v2071_v29  ;;  %v7801_v53 = vadd.f32 %v2039_v0, %v7641_v28  ;;  %v11777_v26 = vld [vmem:[#allocation53_spill] sm:$0xff]  ;;  %v11778_v36 = vld [vmem:[#allocation40_spill] sm:$0xff]  ;;  %v11780_v54 = vld [vmem:[#allocation43_spill] sm:$0xff] }
 0x1b0   :  { %v7804_v25 = vadd.f32 %v2038_v44, %v7643_v21  ;;  %v7807_v39 = vadd.f32 %v2042_v34, %v7645_v31  ;;  %v2075_v45 = vsel %vm255_vm0, %v2073_v17, %v11090_v23  ;;  %v7813_v15 = vadd.f32 %v2041_v46, %v7647_v35  ;;  %v11772_v46 = vld [vmem:[#allocation48_spill] sm:$0xff]  ;;  %v11781_v34 = vld [vmem:[#allocation54_spill] sm:$0xff]  ;;  %v11782_v17 = vld [vmem:[#allocation55_spill] sm:$0xff] }
 0x1b1   :  { %v7816_v40 = vadd.f32 %v2045_v41, %v7649_v43  ;;  %v7819_v28 = vadd.f32 %v2044_v13, %v7651_v30  ;;  %v7822_v21 = vadd.f32 %v2048_v1, %v7653_v42  ;;  %v7825_v31 = vadd.f32 %v2047_v3, %v7655_v12 }
 0x1b2   :  { %v7828_v44 = vadd.f32 %v2051_v22, %v7657_v33  ;;  %v7831_v2 = vadd.f32 %v2050_v48, %v7659_v59  ;;  %v7834_v35 = vadd.f32 %v2054_v19, %v7661_v8  ;;  %v7837_v43 = vadd.f32 %v2053_v20, %v7663_v63  ;;  %v11783_v22 = vld [vmem:[#allocation56_spill] sm:$0xff] }
 0x1b3   :  { %v7840_v30 = vadd.f32 %v2057_v56, %v7665_v4  ;;  %v7843_v42 = vadd.f32 %v2056_v14, %v7667_v7  ;;  %v7846_v12 = vadd.f32 %v2060_v10, %v7669_v51  ;;  %v7849_v33 = vadd.f32 %v2059_v6, %v7671_v60  ;;  %v11774_v14 = vld [vmem:[#allocation50_spill] sm:$0xff]  ;;  %v11784_v56 = vld [vmem:[#allocation57_spill] sm:$0xff] }
 0x1b4   :  { %v7852_v59 = vadd.f32 %v2063_v27, %v7673_v58  ;;  %v2128_v8 = vstv %s7780_s28  ;;  %v7856_v48 = vadd.f32 %v2062_v62, %v7675_v37  ;;  %v7859_v63 = vadd.f32 %v2066_v24, %v7677_v38  ;;  %v11767_v58 = vld [vmem:[#allocation98_spill] sm:$0xff]  ;;  %v11769_v37 = vld [vmem:[#allocation99_spill] sm:$0xff] }
 0x1b5   :  { %v7862_v4 = vadd.f32 %v2065_v49, %v7679_v18  ;;  %v7865_v7 = vadd.f32 %v2069_v55, %v7681_v16  ;;  %v7868_v51 = vadd.f32 %v2068_v9, %v7683_v57  ;;  %v7871_v60 = vadd.f32 %v2072_v47, %v7685_v52  ;;  %v11771_v38 = vld [vmem:[#allocation47_spill] sm:$0xff]  ;;  %v11776_v52 = vld [vmem:[#allocation52_spill] sm:$0xff]  ;;  %v11785_v27 = vld [vmem:[#allocation58_spill] sm:$0xff] }
 0x1b6   :  { %v7874_v20 = vadd.f32 %v2071_v29, %v11767_v58  ;;  %v7877_v3 = vadd.f32 %v2075_v45, %v11769_v37  ;;  %v2129_v13 = vmul.f32 %v2128_v8, %v11771_v38  ;;  %v7881_v18 = vmul.f32 %v2128_v8, %v11772_v46  ;;  %v11775_v57 = vld [vmem:[#allocation51_spill] sm:$0xff]  ;;  %v11787_v45 = vld [vmem:[#allocation60_spill] sm:$0xff]  ;;  %v11788_v37 = vld [vmem:[#allocation61_spill] sm:$0xff] }
 0x1b7   :  { %11766 = vst [vmem:[#allocation100_spill] sm:$0xff] %v7871_v60  ;;  %v2131_v16 = vmul.f32 %v2128_v8, %v11773_v11  ;;  %v7885_v6 = vmul.f32 %v2128_v8, %v11774_v14  ;;  %v2133_v50 = vmul.f32 %v2128_v8, %v11775_v57  ;;  %v7889_v62 = vmul.f32 %v2128_v8, %v11776_v52  ;;  %v11786_v55 = vld [vmem:[#allocation59_spill] sm:$0xff]  ;;  %v11789_v46 = vld [vmem:[#allocation62_spill] sm:$0xff]  ;;  %v11795_v52 = vld [vmem:[#allocation68_spill] sm:$0xff] }
 0x1b8   :  { %11768 = vst [vmem:[#allocation101_spill] sm:$0xff] %v7874_v20  ;;  %v2135_v49 = vmul.f32 %v2128_v8, %v11777_v26  ;;  %v7893_v9 = vmul.f32 %v2128_v8, %v11778_v36  ;;  %v2137_v0 = vmul.f32 %v2128_v8, %v11779_v5  ;;  %v7897_v29 = vmul.f32 %v2128_v8, %v11780_v54  ;;  %v11791_v54 = vld [vmem:[#allocation64_spill] sm:$0xff]  ;;  %v11792_v5 = vld [vmem:[#allocation65_spill] sm:$0xff]  ;;  %v11793_v36 = vld [vmem:[#allocation66_spill] sm:$0xff] }
 0x1b9   :  { %11770 = vst [vmem:[#allocation102_spill] sm:$0xff] %v7877_v3  ;;  %v2139_v41 = vmul.f32 %v2128_v8, %v11781_v34  ;;  %v7901_v1 = vmul.f32 %v2128_v8, %v11782_v17  ;;  %v2141_v19 = vmul.f32 %v2128_v8, %v11783_v22  ;;  %v7905_v10 = vmul.f32 %v2128_v8, %v11784_v56  ;;  %v11790_v34 = vld [vmem:[#allocation63_spill] sm:$0xff]  ;;  %v11796_v57 = vld [vmem:[#allocation69_spill] sm:$0xff] }
 0x1ba   :  { %v2143_v24 = vmul.f32 %v2128_v8, %v11785_v27  ;;  %v7909_v47 = vmul.f32 %v2128_v8, %v11786_v55  ;;  %v2145_v58 = vmul.f32 %v2128_v8, %v11787_v45  ;;  %v7913_v38 = vmul.f32 %v2128_v8, %v11788_v37  ;;  %v11794_v26 = vld [vmem:[#allocation67_spill] sm:$0xff] }
 0x1bb   :  { %v2147_v23 = vmul.f32 %v2128_v8, %v11789_v46  ;;  %v7917_v17 = vmul.f32 %v2128_v8, %v11790_v34  ;;  %v2149_v22 = vmul.f32 %v2128_v8, %v11791_v54  ;;  %v7921_v56 = vmul.f32 %v2128_v8, %v11792_v5 }
 0x1bc   :  { %v2151_v27 = vmul.f32 %v2128_v8, %v11793_v36  ;;  %v7925_v55 = vmul.f32 %v2128_v8, %v11794_v26  ;;  %v2153_v45 = vmul.f32 %v2128_v8, %v11795_v52  ;;  %v7929_v37 = vmul.f32 %v2128_v8, %v11796_v57 }
 0x1bd   :  { %v2181_v14 = vrot.slane %v2129_v13, 2  ;;  %v2182_v46 = vrot.slane %v7881_v18, 2  ;;  %v2184_v34 = vrot.slane %v2131_v16, 2  ;;  %v2185_v11 = vrot.slane %v7885_v6, 2 }
 0x1be   :  { %v2187_v54 = vrot.slane %v2133_v50, 2  ;;  %v2188_v5 = vrot.slane %v7889_v62, 2  ;;  %v2190_v3 = vrot.slane %v2135_v49, 2  ;;  %v2191_v36 = vrot.slane %v7893_v9, 2 }
 0x1bf   :  { %v2193_v20 = vrot.slane %v2137_v0, 2  ;;  %v2194_v26 = vrot.slane %v7897_v29, 2  ;;  %v2196_v60 = vrot.slane %v2139_v41, 2  ;;  %v2197_v52 = vrot.slane %v7901_v1, 2 }
 0x1c0   :  { %v2199_v8 = vrot.slane %v2141_v19, 2  ;;  %v2200_v13 = vrot.slane %v7905_v10, 2  ;;  %v2202_v57 = vrot.slane %v2143_v24, 2  ;;  %v2203_v18 = vrot.slane %v7909_v47, 2 }
 0x1c1   :  { %v2205_v16 = vrot.slane %v2145_v58, 2  ;;  %v2206_v6 = vrot.slane %v7913_v38, 2  ;;  %v2208_v50 = vrot.slane %v2147_v23, 2  ;;  %v2209_v62 = vrot.slane %v7917_v17, 2 }
 0x1c2   :  { %v2211_v49 = vrot.slane %v2149_v22, 2  ;;  %v2212_v9 = vrot.slane %v7921_v56, 2  ;;  %v11797_v0 = vrot.slane %v7767_v32, 1  ;;  %v2183_v41 = vsel %vm1839_vm1, %v2181_v14, %v2182_v46 }
 0x1c3   :  { %v2214_v1 = vrot.slane %v2151_v27, 2  ;;  %v2215_v19 = vrot.slane %v7925_v55, 2  ;;  %v2186_v10 = vsel %vm1839_vm1, %v2184_v34, %v2185_v11  ;;  %v2189_v23 = vsel %vm1839_vm1, %v2187_v54, %v2188_v5 }
 0x1c4   :  { %v2127_v29 = vadd.f32 %v11797_v0, %v7784_v61  ;;  %v2217_v24 = vrot.slane %v2153_v45, 2  ;;  %v2218_v17 = vrot.slane %v7929_v37, 2  ;;  %v2192_v22 = vsel %vm1839_vm1, %v2190_v3, %v2191_v36 }
 0x1c5   :  { %v2195_v56 = vsel %vm1839_vm1, %v2193_v20, %v2194_v26  ;;  %v2198_v47 = vsel %vm1839_vm1, %v2196_v60, %v2197_v52  ;;  %v2201_v32 = vsel %vm1839_vm1, %v2199_v8, %v2200_v13  ;;  %v2204_v61 = vsel %vm1839_vm1, %v2202_v57, %v2203_v18 }
 0x1c6   :  { %v2207_v14 = vsel %vm1839_vm1, %v2205_v16, %v2206_v6  ;;  %v2210_v27 = vsel %vm1839_vm1, %v2208_v50, %v2209_v62  ;;  %v2213_v34 = vsel %vm1839_vm1, %v2211_v49, %v2212_v9  ;;  %v2216_v54 = vsel %vm1839_vm1, %v2214_v1, %v2215_v19  ;;  %v11810_v1 = vld [vmem:[#allocation55_spill] sm:$0xff] }
 0x1c7   :  { %v2246_v55 = vadd.f32 %v2183_v41, %v7801_v53  ;;  %v2247_v3 = vadd.f32 %v2182_v46, %v7804_v25  ;;  %v2248_v20 = vadd.f32 %v2186_v10, %v7807_v39  ;;  %v2219_v60 = vsel %vm1839_vm1, %v2217_v24, %v2218_v17  ;;  %v11809_v41 = vld [vmem:[#allocation54_spill] sm:$0xff]  ;;  %v11811_v10 = vld [vmem:[#allocation56_spill] sm:$0xff]  ;;  %v11812_v24 = vld [vmem:[#allocation57_spill] sm:$0xff] }
 0x1c8   :  { %v2249_v45 = vadd.f32 %v2185_v11, %v7813_v15  ;;  %v2250_v57 = vadd.f32 %v2189_v23, %v7816_v40  ;;  %v2251_v58 = vadd.f32 %v2188_v5, %v7819_v28  ;;  %v2252_v37 = vadd.f32 %v2192_v22, %v7822_v21  ;;  %v11801_v5 = vld [vmem:[#allocation49_spill] sm:$0xff]  ;;  %v11813_v22 = vld [vmem:[#allocation58_spill] sm:$0xff] }
 0x1c9   :  { %v2253_v38 = vadd.f32 %v2191_v36, %v7825_v31  ;;  %v2254_v8 = vadd.f32 %v2195_v56, %v7828_v44  ;;  %v2255_v53 = vadd.f32 %v2194_v26, %v7831_v2  ;;  %v2256_v25 = vadd.f32 %v2198_v47, %v7834_v35  ;;  %v11814_v47 = vld [vmem:[#allocation59_spill] sm:$0xff] }
 0x1ca   :  { %v2257_v39 = vadd.f32 %v2197_v52, %v7837_v43  ;;  %v2258_v46 = vadd.f32 %v2201_v32, %v7840_v30  ;;  %v2259_v15 = vadd.f32 %v2200_v13, %v7843_v42  ;;  %v2260_v40 = vadd.f32 %v2204_v61, %v7846_v12  ;;  %v11798_v30 = vld [vmem:[#allocation100_spill] sm:$0xff]  ;;  %v11799_v42 = vld [vmem:[#allocation101_spill] sm:$0xff]  ;;  %v11800_v12 = vld [vmem:[#allocation102_spill] sm:$0xff] }
 0x1cb   :  { %v2261_v28 = vadd.f32 %v2203_v18, %v7849_v33  ;;  %v2262_v21 = vadd.f32 %v2207_v14, %v7852_v59  ;;  %v2272_v11 = vstv %s7942_s2  ;;  %v2263_v31 = vadd.f32 %v2206_v6, %v7856_v48  ;;  %v11802_v13 = vld [vmem:[#allocation50_spill] sm:$0xff]  ;;  %v11803_v48 = vld [vmem:[#allocation51_spill] sm:$0xff]  ;;  %v11815_v61 = vld [vmem:[#allocation60_spill] sm:$0xff] }
 0x1cc   :  { %v2264_v44 = vadd.f32 %v2210_v27, %v7859_v63  ;;  %v2265_v2 = vadd.f32 %v2209_v62, %v7862_v4  ;;  %v2266_v35 = vadd.f32 %v2213_v34, %v7865_v7  ;;  %v2267_v43 = vadd.f32 %v2212_v9, %v7868_v51  ;;  %v11804_v63 = vld [vmem:[#allocation52_spill] sm:$0xff]  ;;  %v11805_v4 = vld [vmem:[#allocation53_spill] sm:$0xff]  ;;  %v11808_v9 = vld [vmem:[#allocation43_spill] sm:$0xff] }
 0x1cd   :  { %v2268_v52 = vadd.f32 %v2216_v54, %v11798_v30  ;;  %v2269_v26 = vadd.f32 %v2215_v19, %v11799_v42  ;;  %v2270_v36 = vadd.f32 %v2219_v60, %v11800_v12  ;;  %v2271_v33 = vadd.f32 %v2218_v17, %v2127_v29  ;;  %v11806_v7 = vld [vmem:[#allocation40_spill] sm:$0xff]  ;;  %v11807_v51 = vld [vmem:[#allocation41_spill] sm:$0xff]  ;;  %v11817_v54 = vld [vmem:[#allocation62_spill] sm:$0xff] }
 0x1ce   :  { %v2273_v59 = vmul.f32 %v2272_v11, %v11801_v5  ;;  %v2274_v18 = vmul.f32 %v2272_v11, %v11802_v13  ;;  %v2275_v16 = vmul.f32 %v2272_v11, %v11803_v48  ;;  %v2276_v6 = vmul.f32 %v2272_v11, %v11804_v63  ;;  %v11816_v27 = vld [vmem:[#allocation61_spill] sm:$0xff]  ;;  %v11818_v30 = vld [vmem:[#allocation63_spill] sm:$0xff]  ;;  %v11819_v12 = vld [vmem:[#allocation64_spill] sm:$0xff] }
 0x1cf   :  { %v2277_v50 = vmul.f32 %v2272_v11, %v11805_v4  ;;  %v2278_v62 = vmul.f32 %v2272_v11, %v11806_v7  ;;  %v2279_v49 = vmul.f32 %v2272_v11, %v11807_v51  ;;  %v2280_v0 = vmul.f32 %v2272_v11, %v11808_v9  ;;  %v11820_v9 = vld [vmem:[#allocation65_spill] sm:$0xff]  ;;  %v11821_v51 = vld [vmem:[#allocation66_spill] sm:$0xff]  ;;  %v11822_v7 = vld [vmem:[#allocation67_spill] sm:$0xff] }
 0x1d0   :  { %v2281_v29 = vmul.f32 %v2272_v11, %v11809_v41  ;;  %v2282_v19 = vmul.f32 %v2272_v11, %v11810_v1  ;;  %v2283_v23 = vmul.f32 %v2272_v11, %v11811_v10  ;;  %v2284_v17 = vmul.f32 %v2272_v11, %v11812_v24  ;;  %v11823_v4 = vld [vmem:[#allocation68_spill] sm:$0xff]  ;;  %v11824_v63 = vld [vmem:[#allocation69_spill] sm:$0xff]  ;;  %v11825_v48 = vld [vmem:[#allocation70_spill] sm:$0xff] }
 0x1d1   :  { %v2285_v56 = vmul.f32 %v2272_v11, %v11813_v22  ;;  %v2286_v32 = vmul.f32 %v2272_v11, %v11814_v47  ;;  %v2287_v14 = vmul.f32 %v2272_v11, %v11815_v61  ;;  %v2288_v34 = vmul.f32 %v2272_v11, %v11816_v27  ;;  %v11826_v13 = vld [vmem:[#allocation71_spill] sm:$0xff] }
 0x1d2   :  { %v2289_v60 = vmul.f32 %v2272_v11, %v11817_v54  ;;  %v2290_v42 = vmul.f32 %v2272_v11, %v11818_v30  ;;  %v2291_v41 = vmul.f32 %v2272_v11, %v11819_v12  ;;  %v2292_v1 = vmul.f32 %v2272_v11, %v11820_v9 }
 0x1d3   :  { %v2293_v10 = vmul.f32 %v2272_v11, %v11821_v51  ;;  %v2294_v24 = vmul.f32 %v2272_v11, %v11822_v7  ;;  %v2295_v22 = vmul.f32 %v2272_v11, %v11823_v4  ;;  %v2296_v47 = vmul.f32 %v2272_v11, %v11824_v63 }
 0x1d4   :  { %v2297_v61 = vmul.f32 %v2272_v11, %v11825_v48  ;;  %v2298_v27 = vmul.f32 %v2272_v11, %v11826_v13  ;;  %v8016_v5 = vadd.f32 %v2273_v59, %v2246_v55  ;;  %v8018_v30 = vadd.f32 %v2274_v18, %v2247_v3 }
 0x1d5   :  { %v8020_v12 = vadd.f32 %v2275_v16, %v2248_v20  ;;  %v8022_v9 = vadd.f32 %v2276_v6, %v2249_v45  ;;  %v8024_v51 = vadd.f32 %v2277_v50, %v2250_v57  ;;  %v8026_v7 = vadd.f32 %v2278_v62, %v2251_v58  ;;  %v11832_v6 = vld [vmem:[#allocation52_spill] sm:$0xff] }
 0x1d6   :  { %v8028_v4 = vadd.f32 %v2279_v49, %v2252_v37  ;;  %v8030_v63 = vadd.f32 %v2280_v0, %v2253_v38  ;;  %v8032_v48 = vadd.f32 %v2281_v29, %v2254_v8  ;;  %v8034_v11 = vadd.f32 %v2282_v19, %v2255_v53  ;;  %v11836_v49 = vld [vmem:[#allocation43_spill] sm:$0xff]  ;;  %v11837_v0 = vld [vmem:[#allocation54_spill] sm:$0xff]  ;;  %v11839_v19 = vld [vmem:[#allocation56_spill] sm:$0xff] }
 0x1d7   :  { %v8036_v55 = vadd.f32 %v2283_v23, %v2256_v25  ;;  %v8038_v3 = vadd.f32 %v2284_v17, %v2257_v39  ;;  %v8040_v20 = vadd.f32 %v2285_v56, %v2258_v46  ;;  %v8042_v45 = vadd.f32 %v2286_v32, %v2259_v15  ;;  %v11838_v29 = vld [vmem:[#allocation55_spill] sm:$0xff]  ;;  %v11840_v23 = vld [vmem:[#allocation57_spill] sm:$0xff]  ;;  %v11841_v17 = vld [vmem:[#allocation58_spill] sm:$0xff] }
 0x1d8   :  { %v8044_v57 = vadd.f32 %v2287_v14, %v2260_v40  ;;  %v8046_v58 = vadd.f32 %v2288_v34, %v2261_v28  ;;  %v2325_v37 = vstv %s7995_s13  ;;  %v8049_v59 = vadd.f32 %v2289_v60, %v2262_v21  ;;  %v11829_v21 = vld [vmem:[#allocation49_spill] sm:$0xff]  ;;  %v11842_v56 = vld [vmem:[#allocation59_spill] sm:$0xff]  ;;  %v11843_v32 = vld [vmem:[#allocation60_spill] sm:$0xff] }
 0x1d9   :  { %v8051_v38 = vadd.f32 %v2290_v42, %v2263_v31  ;;  %v8053_v8 = vadd.f32 %v2291_v41, %v2264_v44  ;;  %v8055_v53 = vadd.f32 %v2292_v1, %v2265_v2  ;;  %v8057_v25 = vadd.f32 %v2293_v10, %v2266_v35  ;;  %v11830_v31 = vld [vmem:[#allocation50_spill] sm:$0xff]  ;;  %v11831_v44 = vld [vmem:[#allocation51_spill] sm:$0xff]  ;;  %v11844_v14 = vld [vmem:[#allocation61_spill] sm:$0xff] }
 0x1da   :  { %v8059_v39 = vadd.f32 %v2294_v24, %v2267_v43  ;;  %v8061_v46 = vadd.f32 %v2295_v22, %v2268_v52  ;;  %v8063_v15 = vadd.f32 %v2296_v47, %v2269_v26  ;;  %v8065_v40 = vadd.f32 %v2297_v61, %v2270_v36  ;;  %v11833_v43 = vld [vmem:[#allocation53_spill] sm:$0xff]  ;;  %v11834_v52 = vld [vmem:[#allocation40_spill] sm:$0xff]  ;;  %v11845_v60 = vld [vmem:[#allocation63_spill] sm:$0xff] }
 0x1db   :  { %v8067_v28 = vadd.f32 %v2298_v27, %v2271_v33  ;;  %v2326_v18 = vmul.f32 %v2325_v37, %v11829_v21  ;;  %v8071_v16 = vmul.f32 %v2325_v37, %v11830_v31  ;;  %v2328_v2 = vmul.f32 %v2325_v37, %v11831_v44  ;;  %v11835_v26 = vld [vmem:[#allocation41_spill] sm:$0xff] }
 0x1dc   :  { %11827 = vst [vmem:[#allocation104_spill] sm:$0xff] %v8065_v40  ;;  %v8075_v35 = vmul.f32 %v2325_v37, %v11832_v6  ;;  %v2330_v50 = vmul.f32 %v2325_v37, %v11833_v43  ;;  %v8079_v62 = vmul.f32 %v2325_v37, %v11834_v52  ;;  %v2332_v36 = vmul.f32 %v2325_v37, %v11835_v26  ;;  %v11851_v52 = vld [vmem:[#allocation69_spill] sm:$0xff] }
 0x1dd   :  { %11828 = vst [vmem:[#allocation107_spill] sm:$0xff] %v8067_v28  ;;  %v8083_v33 = vmul.f32 %v2325_v37, %v11836_v49  ;;  %v2334_v41 = vmul.f32 %v2325_v37, %v11837_v0  ;;  %v8087_v1 = vmul.f32 %v2325_v37, %v11838_v29  ;;  %v2336_v10 = vmul.f32 %v2325_v37, %v11839_v19  ;;  %v11846_v19 = vld [vmem:[#allocation64_spill] sm:$0xff]  ;;  %v11847_v29 = vld [vmem:[#allocation65_spill] sm:$0xff]  ;;  %v11849_v49 = vld [vmem:[#allocation67_spill] sm:$0xff] }
 0x1de   :  { %v8091_v24 = vmul.f32 %v2325_v37, %v11840_v23  ;;  %v2338_v22 = vmul.f32 %v2325_v37, %v11841_v17  ;;  %v8095_v47 = vmul.f32 %v2325_v37, %v11842_v56  ;;  %v2340_v61 = vmul.f32 %v2325_v37, %v11843_v32  ;;  %v11848_v17 = vld [vmem:[#allocation66_spill] sm:$0xff]  ;;  %v11850_v32 = vld [vmem:[#allocation68_spill] sm:$0xff] }
 0x1df   :  { %v8099_v27 = vmul.f32 %v2325_v37, %v11844_v14  ;;  %v2342_v34 = vmul.f32 %v2325_v37, %v11817_v54  ;;  %v8103_v42 = vmul.f32 %v2325_v37, %v11845_v60  ;;  %v2344_v23 = vmul.f32 %v2325_v37, %v11846_v19  ;;  %v11852_v54 = vld [vmem:[#allocation70_spill] sm:$0xff] }
 0x1e0   :  { %v8109_v0 = vmul.f32 %v2325_v37, %v11847_v29  ;;  %v2346_v56 = vmul.f32 %v2325_v37, %v11848_v17  ;;  %v8113_v26 = vmul.f32 %v2325_v37, %v11849_v49  ;;  %v2348_v14 = vmul.f32 %v2325_v37, %v11850_v32 }
 0x1e1   :  { %v8117_v43 = vmul.f32 %v2325_v37, %v11851_v52  ;;  %v2350_v60 = vmul.f32 %v2325_v37, %v11852_v54  ;;  %v8121_v6 = vmul.f32 %v2325_v37, %v11826_v13  ;;  %v2378_v44 = vrot.slane %v2326_v18, 1 }
 0x1e2   :  { %v2379_v19 = vrot.slane %v8071_v16, 1  ;;  %v2381_v29 = vrot.slane %v2328_v2, 1  ;;  %v2382_v31 = vrot.slane %v8075_v35, 1  ;;  %v2384_v17 = vrot.slane %v2330_v50, 1 }
 0x1e3   :  { %v2385_v49 = vrot.slane %v8079_v62, 1  ;;  %v2387_v21 = vrot.slane %v2332_v36, 1  ;;  %v2388_v32 = vrot.slane %v8083_v33, 1  ;;  %v2390_v28 = vrot.slane %v2334_v41, 1 }
 0x1e4   :  { %v2391_v52 = vrot.slane %v8087_v1, 1  ;;  %v2393_v40 = vrot.slane %v2336_v10, 1  ;;  %v2394_v54 = vrot.slane %v8091_v24, 1  ;;  %v2396_v37 = vrot.slane %v2338_v22, 1 }
 0x1e5   :  { %v2397_v18 = vrot.slane %v8095_v47, 1  ;;  %v2399_v16 = vrot.slane %v2340_v61, 1  ;;  %v2400_v2 = vrot.slane %v8099_v27, 1  ;;  %v2402_v35 = vrot.slane %v2342_v34, 1 }
 0x1e6   :  { %v2403_v50 = vrot.slane %v8103_v42, 1  ;;  %v2405_v62 = vrot.slane %v2344_v23, 1  ;;  %v2406_v36 = vrot.slane %v8109_v0, 1  ;;  %v2408_v33 = vrot.slane %v2346_v56, 1 }
 0x1e7   :  { %v2409_v41 = vrot.slane %v8113_v26, 1  ;;  %v2411_v1 = vrot.slane %v2348_v14, 1  ;;  %v2412_v10 = vrot.slane %v8117_v43, 1  ;;  %v2380_v24 = vsel %vm255_vm0, %v2378_v44, %v2379_v19 }
 0x1e8   :  { %v2414_v22 = vrot.slane %v2350_v60, 1  ;;  %v2415_v47 = vrot.slane %v8121_v6, 1  ;;  %v8138_v61 = vstv %s8105_s14  ;;  %v2383_v27 = vsel %vm255_vm0, %v2381_v29, %v2382_v31 }
 0x1e9   :  { %v2386_v34 = vsel %vm255_vm0, %v2384_v17, %v2385_v49  ;;  %v2389_v23 = vsel %vm255_vm0, %v2387_v21, %v2388_v32  ;;  %v2392_v0 = vsel %vm255_vm0, %v2390_v28, %v2391_v52  ;;  %v2395_v26 = vsel %vm255_vm0, %v2393_v40, %v2394_v54 }
 0x1ea   :  { %v2398_v56 = vsel %vm255_vm0, %v2396_v37, %v2397_v18  ;;  %v2401_v43 = vsel %vm255_vm0, %v2399_v16, %v2400_v2  ;;  %v2404_v44 = vsel %vm255_vm0, %v2402_v35, %v2403_v50  ;;  %v2407_v6 = vsel %vm255_vm0, %v2405_v62, %v2406_v36 }
 0x1eb   :  { %v2410_v14 = vsel %vm255_vm0, %v2408_v33, %v2409_v41  ;;  %v2413_v29 = vsel %vm255_vm0, %v2411_v1, %v2412_v10  ;;  %v8152_v17 = vadd.f32 %v2380_v24, %v8016_v5  ;;  %v2416_v21 = vsel %vm255_vm0, %v2414_v22, %v2415_v47  ;;  %v11867_v22 = vld [vmem:[#allocation56_spill] sm:$0xff] }
 0x1ec   :  { %v8156_v28 = vadd.f32 %v2379_v19, %v8018_v30  ;;  %v8159_v40 = vadd.f32 %v2383_v27, %v8020_v12  ;;  %v8162_v60 = vadd.f32 %v2382_v31, %v8022_v9  ;;  %v8165_v42 = vadd.f32 %v2386_v34, %v8024_v51  ;;  %v11860_v19 = vld [vmem:[#allocation52_spill] sm:$0xff]  ;;  %v11868_v27 = vld [vmem:[#allocation57_spill] sm:$0xff] }
 0x1ed   :  { %v8168_v37 = vadd.f32 %v2385_v49, %v8026_v7  ;;  %v8171_v5 = vadd.f32 %v2389_v23, %v8028_v4  ;;  %v8174_v16 = vadd.f32 %v2388_v32, %v8030_v63  ;;  %v8177_v30 = vadd.f32 %v2392_v0, %v8032_v48  ;;  %v11861_v32 = vld [vmem:[#allocation53_spill] sm:$0xff]  ;;  %v11869_v23 = vld [vmem:[#allocation58_spill] sm:$0xff] }
 0x1ee   :  { %v8180_v12 = vadd.f32 %v2391_v52, %v8034_v11  ;;  %v8183_v9 = vadd.f32 %v2395_v26, %v8036_v55  ;;  %v8186_v51 = vadd.f32 %v2394_v54, %v8038_v3  ;;  %v8189_v7 = vadd.f32 %v2398_v56, %v8040_v20  ;;  %v11870_v26 = vld [vmem:[#allocation59_spill] sm:$0xff] }
 0x1ef   :  { %v8192_v4 = vadd.f32 %v2397_v18, %v8042_v45  ;;  %v8195_v63 = vadd.f32 %v2401_v43, %v8044_v57  ;;  %v8198_v48 = vadd.f32 %v2400_v2, %v8046_v58  ;;  %v8201_v11 = vadd.f32 %v2404_v44, %v8049_v59  ;;  %v11853_v59 = vld [vmem:[#allocation104_spill] sm:$0xff] }
 0x1f0   :  { %v8204_v55 = vadd.f32 %v2403_v50, %v8051_v38  ;;  %v8207_v54 = vadd.f32 %v2407_v6, %v8053_v8  ;;  %v8210_v3 = vadd.f32 %v2406_v36, %v8055_v53  ;;  %v8213_v20 = vadd.f32 %v2410_v14, %v8057_v25  ;;  %v11855_v8 = vld [vmem:[#allocation107_spill] sm:$0xff]  ;;  %v11857_v53 = vld [vmem:[#allocation49_spill] sm:$0xff]  ;;  %v11858_v25 = vld [vmem:[#allocation50_spill] sm:$0xff] }
 0x1f1   :  { %v8216_v45 = vadd.f32 %v2409_v41, %v8059_v39  ;;  %v8219_v57 = vadd.f32 %v2413_v29, %v8061_v46  ;;  %v8222_v58 = vadd.f32 %v2412_v10, %v8063_v15  ;;  %v8225_v38 = vadd.f32 %v2416_v21, %v11853_v59  ;;  %v11859_v39 = vld [vmem:[#allocation51_spill] sm:$0xff]  ;;  %v11862_v2 = vld [vmem:[#allocation40_spill] sm:$0xff]  ;;  %v11863_v50 = vld [vmem:[#allocation41_spill] sm:$0xff] }
 0x1f2   :  { %v8228_v31 = vadd.f32 %v2415_v47, %v11855_v8  ;;  %v2470_v52 = vmul.f32 %v8138_v61, %v11857_v53  ;;  %v8234_v49 = vmul.f32 %v8138_v61, %v11858_v25  ;;  %v2472_v46 = vmul.f32 %v8138_v61, %v11859_v39  ;;  %v11864_v36 = vld [vmem:[#allocation43_spill] sm:$0xff]  ;;  %v11865_v41 = vld [vmem:[#allocation54_spill] sm:$0xff]  ;;  %v11871_v43 = vld [vmem:[#allocation60_spill] sm:$0xff] }
 0x1f3   :  { %11854 = vst [vmem:[#allocation44_spill] sm:$0xff] %v8225_v38  ;;  %v8240_v15 = vmul.f32 %v8138_v61, %v11860_v19  ;;  %v2474_v18 = vmul.f32 %v8138_v61, %v11861_v32  ;;  %v8246_v35 = vmul.f32 %v8138_v61, %v11862_v2  ;;  %v2476_v62 = vmul.f32 %v8138_v61, %v11863_v50  ;;  %v11866_v10 = vld [vmem:[#allocation55_spill] sm:$0xff]  ;;  %v11872_v6 = vld [vmem:[#allocation61_spill] sm:$0xff]  ;;  %v11873_v29 = vld [vmem:[#allocation62_spill] sm:$0xff] }
 0x1f4   :  { %11856 = vst [vmem:[#allocation42_spill] sm:$0xff] %v8228_v31  ;;  %v8252_v33 = vmul.f32 %v8138_v61, %v11864_v36  ;;  %v2478_v1 = vmul.f32 %v8138_v61, %v11865_v41  ;;  %v8258_v24 = vmul.f32 %v8138_v61, %v11866_v10  ;;  %v2480_v47 = vmul.f32 %v8138_v61, %v11867_v22  ;;  %v11874_v59 = vld [vmem:[#allocation63_spill] sm:$0xff]  ;;  %v11875_v53 = vld [vmem:[#allocation64_spill] sm:$0xff]  ;;  %v11876_v39 = vld [vmem:[#allocation65_spill] sm:$0xff] }
 0x1f5   :  { %v8264_v34 = vmul.f32 %v8138_v61, %v11868_v27  ;;  %v2482_v0 = vmul.f32 %v8138_v61, %v11869_v23  ;;  %v8270_v56 = vmul.f32 %v8138_v61, %v11870_v26  ;;  %v2484_v44 = vmul.f32 %v8138_v61, %v11871_v43  ;;  %v11877_v32 = vld [vmem:[#allocation66_spill] sm:$0xff]  ;;  %v11878_v50 = vld [vmem:[#allocation67_spill] sm:$0xff]  ;;  %v11879_v41 = vld [vmem:[#allocation68_spill] sm:$0xff] }
 0x1f6   :  { %v8276_v14 = vmul.f32 %v8138_v61, %v11872_v6  ;;  %v2486_v21 = vmul.f32 %v8138_v61, %v11873_v29  ;;  %v8282_v8 = vmul.f32 %v8138_v61, %v11874_v59  ;;  %v2488_v25 = vmul.f32 %v8138_v61, %v11875_v53  ;;  %v11880_v22 = vld [vmem:[#allocation69_spill] sm:$0xff]  ;;  %v11881_v23 = vld [vmem:[#allocation70_spill] sm:$0xff] }
 0x1f7   :  { %v8288_v19 = vmul.f32 %v8138_v61, %v11876_v39  ;;  %v2490_v2 = vmul.f32 %v8138_v61, %v11877_v32  ;;  %v8294_v36 = vmul.f32 %v8138_v61, %v11878_v50  ;;  %v2492_v10 = vmul.f32 %v8138_v61, %v11879_v41 }
 0x1f8   :  { %v8300_v27 = vmul.f32 %v8138_v61, %v11880_v22  ;;  %v2494_v26 = vmul.f32 %v8138_v61, %v11881_v23  ;;  %v8306_v43 = vmul.f32 %v8138_v61, %v11826_v13  ;;  %v2522_v6 = vrot.slane %v2470_v52, 2 }
 0x1f9   :  { %v2523_v29 = vrot.slane %v8234_v49, 2  ;;  %v2525_v59 = vrot.slane %v2472_v46, 2  ;;  %v2526_v53 = vrot.slane %v8240_v15, 2  ;;  %v2528_v39 = vrot.slane %v2474_v18, 2 }
 0x1fa   :  { %v2529_v32 = vrot.slane %v8246_v35, 2  ;;  %v2531_v50 = vrot.slane %v2476_v62, 2  ;;  %v2532_v41 = vrot.slane %v8252_v33, 2  ;;  %v2534_v22 = vrot.slane %v2478_v1, 2 }
 0x1fb   :  { %v2535_v31 = vrot.slane %v8258_v24, 2  ;;  %v2537_v23 = vrot.slane %v2480_v47, 2  ;;  %v2538_v38 = vrot.slane %v8264_v34, 2  ;;  %v2540_v13 = vrot.slane %v2482_v0, 2 }
 0x1fc   :  { %v2541_v61 = vrot.slane %v8270_v56, 2  ;;  %v2543_v52 = vrot.slane %v2484_v44, 2  ;;  %v2544_v49 = vrot.slane %v8276_v14, 2  ;;  %v2546_v46 = vrot.slane %v2486_v21, 2 }
 0x1fd   :  { %v2547_v15 = vrot.slane %v8282_v8, 2  ;;  %v2549_v18 = vrot.slane %v2488_v25, 2  ;;  %v2550_v35 = vrot.slane %v8288_v19, 2  ;;  %v2552_v62 = vrot.slane %v2490_v2, 2 }
 0x1fe   :  { %v2553_v33 = vrot.slane %v8294_v36, 2  ;;  %v2555_v1 = vrot.slane %v2492_v10, 2  ;;  %v2556_v24 = vrot.slane %v8300_v27, 2  ;;  %v2524_v47 = vsel %vm1839_vm1, %v2522_v6, %v2523_v29 }
 0x1ff   :  { %v2527_v34 = vsel %vm1839_vm1, %v2525_v59, %v2526_v53  ;;  %v2558_v0 = vrot.slane %v2494_v26, 2  ;;  %v2559_v56 = vrot.slane %v8306_v43, 2  ;;  %v2530_v44 = vsel %vm1839_vm1, %v2528_v39, %v2529_v32 }
 0x200   :  { %v2533_v14 = vsel %vm1839_vm1, %v2531_v50, %v2532_v41  ;;  %v2536_v21 = vsel %vm1839_vm1, %v2534_v22, %v2535_v31  ;;  %v2539_v8 = vsel %vm1839_vm1, %v2537_v23, %v2538_v38  ;;  %v2542_v25 = vsel %vm1839_vm1, %v2540_v13, %v2541_v61 }
 0x201   :  { %v2545_v19 = vsel %vm1839_vm1, %v2543_v52, %v2544_v49  ;;  %v2548_v2 = vsel %vm1839_vm1, %v2546_v46, %v2547_v15  ;;  %v2551_v36 = vsel %vm1839_vm1, %v2549_v18, %v2550_v35  ;;  %v2554_v10 = vsel %vm1839_vm1, %v2552_v62, %v2553_v33 }
 0x202   :  { %v2557_v27 = vsel %vm1839_vm1, %v2555_v1, %v2556_v24  ;;  %v2587_v26 = vadd.f32 %v2524_v47, %v8152_v17  ;;  %v2588_v43 = vadd.f32 %v2523_v29, %v8156_v28  ;;  %v2560_v6 = vsel %vm1839_vm1, %v2558_v0, %v2559_v56 }
 0x203   :  { %v2589_v59 = vadd.f32 %v2527_v34, %v8159_v40  ;;  %v2590_v39 = vadd.f32 %v2526_v53, %v8162_v60  ;;  %v2591_v50 = vadd.f32 %v2530_v44, %v8165_v42  ;;  %v2592_v22 = vadd.f32 %v2529_v32, %v8168_v37  ;;  %v11895_v34 = vld [vmem:[#allocation22_spill] sm:$0xff] }
 0x204   :  { %v2593_v23 = vadd.f32 %v2533_v14, %v8171_v5  ;;  %v2594_v13 = vadd.f32 %v2532_v41, %v8174_v16  ;;  %v2595_v52 = vadd.f32 %v2536_v21, %v8177_v30  ;;  %v2596_v17 = vadd.f32 %v2535_v31, %v8180_v12  ;;  %v11897_v14 = vld [vmem:[#allocation80_spill] sm:$0xff] }
 0x205   :  { %v2597_v28 = vadd.f32 %v2539_v8, %v8183_v9  ;;  %v2598_v29 = vadd.f32 %v2538_v38, %v8186_v51  ;;  %v2599_v40 = vadd.f32 %v2542_v25, %v8189_v7  ;;  %v2600_v60 = vadd.f32 %v2541_v61, %v8192_v4  ;;  %v11898_v8 = vld [vmem:[#allocation81_spill] sm:$0xff] }
 0x206   :  { %v2601_v42 = vadd.f32 %v2545_v19, %v8195_v63  ;;  %v2602_v37 = vadd.f32 %v2544_v49, %v8198_v48  ;;  %v2613_v5 = vstv %s8318_s15  ;;  %v2603_v16 = vadd.f32 %v2548_v2, %v8201_v11  ;;  %v11882_v63 = vld [vmem:[#allocation44_spill] sm:$0xff]  ;;  %v11883_v48 = vld [vmem:[#allocation42_spill] sm:$0xff]  ;;  %v11885_v11 = vld [vmem:[#allocation27_spill] sm:$0xff] }
 0x207   :  { %v2604_v30 = vadd.f32 %v2547_v15, %v8204_v55  ;;  %v2605_v12 = vadd.f32 %v2551_v36, %v8207_v54  ;;  %v2606_v9 = vadd.f32 %v2550_v35, %v8210_v3  ;;  %v2607_v51 = vadd.f32 %v2554_v10, %v8213_v20  ;;  %v11886_v54 = vld [vmem:[#allocation45_spill] sm:$0xff]  ;;  %v11887_v3 = vld [vmem:[#allocation46_spill] sm:$0xff]  ;;  %v11888_v20 = vld [vmem:[#allocation75_spill] sm:$0xff] }
 0x208   :  { %v2608_v7 = vadd.f32 %v2553_v33, %v8216_v45  ;;  %v2609_v38 = vadd.f32 %v2557_v27, %v8219_v57  ;;  %v2610_v4 = vadd.f32 %v2556_v24, %v8222_v58  ;;  %v2611_v31 = vadd.f32 %v2560_v6, %v11882_v63  ;;  %v11889_v45 = vld [vmem:[#allocation76_spill] sm:$0xff]  ;;  %v11890_v57 = vld [vmem:[#allocation77_spill] sm:$0xff]  ;;  %v11891_v58 = vld [vmem:[#allocation78_spill] sm:$0xff] }
 0x209   :  { %v8365_v53 = vadd.f32 %v2559_v56, %v11883_v48  ;;  %v2614_v32 = vmul.f32 %v2613_v5, %v11885_v11  ;;  %v8369_v55 = vstv %s8329_s16  ;;  %v2615_v41 = vmul.f32 %v2613_v5, %v11886_v54  ;;  %v11892_v35 = vld [vmem:[#allocation79_spill] sm:$0xff]  ;;  %v11893_v33 = vld [vmem:[#allocation20_spill] sm:$0xff]  ;;  %v11894_v24 = vld [vmem:[#allocation21_spill] sm:$0xff] }
 0x20a   :  { %v2616_v61 = vmul.f32 %v2613_v5, %v11887_v3  ;;  %v2617_v49 = vmul.f32 %v2613_v5, %v11888_v20  ;;  %v2618_v46 = vmul.f32 %v2613_v5, %v11889_v45  ;;  %v2619_v15 = vmul.f32 %v2613_v5, %v11890_v57  ;;  %v11896_v56 = vld [vmem:[#allocation23_spill] sm:$0xff]  ;;  %v11899_v19 = vld [vmem:[#allocation82_spill] sm:$0xff]  ;;  %v11901_v27 = vld [vmem:[#allocation84_spill] sm:$0xff] }
 0x20b   :  { %11884 = vst [vmem:[#allocation13_spill] sm:$0xff] %v8365_v53  ;;  %v2620_v18 = vmul.f32 %v2613_v5, %v11891_v58  ;;  %v2621_v62 = vmul.f32 %v2613_v5, %v11892_v35  ;;  %v2622_v1 = vmul.f32 %v2613_v5, %v11893_v33  ;;  %v2623_v47 = vmul.f32 %v2613_v5, %v11894_v24  ;;  %v11900_v36 = vld [vmem:[#allocation83_spill] sm:$0xff]  ;;  %v11902_v63 = vld [vmem:[#allocation85_spill] sm:$0xff]  ;;  %v11903_v53 = vld [vmem:[#allocation86_spill] sm:$0xff] }
 0x20c   :  { %v2624_v0 = vmul.f32 %v2613_v5, %v11895_v34  ;;  %v2625_v44 = vmul.f32 %v2613_v5, %v11896_v56  ;;  %v2626_v21 = vmul.f32 %v2613_v5, %v11897_v14  ;;  %v2627_v25 = vmul.f32 %v2613_v5, %v11898_v8  ;;  %v11904_v35 = vld [vmem:[#allocation87_spill] sm:$0xff]  ;;  %v11905_v58 = vld [vmem:[#allocation88_spill] sm:$0xff]  ;;  %v11906_v57 = vld [vmem:[#allocation89_spill] sm:$0xff] }
 0x20d   :  { %v2628_v2 = vmul.f32 %v2613_v5, %v11899_v19  ;;  %v2629_v10 = vmul.f32 %v2613_v5, %v11900_v36  ;;  %v2630_v6 = vmul.f32 %v2613_v5, %v11901_v27  ;;  %v2631_v48 = vmul.f32 %v2613_v5, %v11902_v63  ;;  %v11907_v45 = vld [vmem:[#allocation90_spill] sm:$0xff]  ;;  %v11908_v20 = vld [vmem:[#allocation91_spill] sm:$0xff]  ;;  %v11909_v3 = vld [vmem:[#allocation92_spill] sm:$0xff] }
 0x20e   :  { %v2632_v33 = vmul.f32 %v2613_v5, %v11903_v53  ;;  %v2633_v24 = vmul.f32 %v2613_v5, %v11904_v35  ;;  %v2634_v34 = vmul.f32 %v2613_v5, %v11905_v58  ;;  %v2635_v56 = vmul.f32 %v2613_v5, %v11906_v57  ;;  %v11910_v54 = vld [vmem:[#allocation93_spill] sm:$0xff] }
 0x20f   :  { %v2636_v14 = vmul.f32 %v2613_v5, %v11907_v45  ;;  %v2637_v8 = vmul.f32 %v2613_v5, %v11908_v20  ;;  %v2638_v19 = vmul.f32 %v2613_v5, %v11909_v3  ;;  %v8396_v36 = vmul.f32 %v2613_v5, %v11910_v54 }
 0x210   :  { %v8398_v27 = vadd.f32 %v2614_v32, %v2587_v26  ;;  %v8400_v63 = vadd.f32 %v2615_v41, %v2588_v43  ;;  %v8402_v53 = vadd.f32 %v2616_v61, %v2589_v59  ;;  %v8404_v35 = vadd.f32 %v2617_v49, %v2590_v39  ;;  %v11917_v32 = vld [vmem:[#allocation77_spill] sm:$0xff]  ;;  %v11918_v41 = vld [vmem:[#allocation78_spill] sm:$0xff]  ;;  %v11919_v49 = vld [vmem:[#allocation79_spill] sm:$0xff] }
 0x211   :  { %v8406_v58 = vadd.f32 %v2618_v46, %v2591_v50  ;;  %v8408_v57 = vadd.f32 %v2619_v15, %v2592_v22  ;;  %v8410_v45 = vadd.f32 %v2620_v18, %v2593_v23  ;;  %v8412_v20 = vadd.f32 %v2621_v62, %v2594_v13  ;;  %v11920_v15 = vld [vmem:[#allocation20_spill] sm:$0xff]  ;;  %v11921_v62 = vld [vmem:[#allocation21_spill] sm:$0xff] }
 0x212   :  { %v8414_v3 = vadd.f32 %v2622_v1, %v2595_v52  ;;  %v8416_v5 = vadd.f32 %v2623_v47, %v2596_v17  ;;  %v8418_v26 = vadd.f32 %v2624_v0, %v2597_v28  ;;  %v8420_v43 = vadd.f32 %v2625_v44, %v2598_v29  ;;  %v11922_v1 = vld [vmem:[#allocation22_spill] sm:$0xff]  ;;  %v11923_v47 = vld [vmem:[#allocation23_spill] sm:$0xff]  ;;  %v11924_v0 = vld [vmem:[#allocation80_spill] sm:$0xff] }
 0x213   :  { %v8422_v59 = vadd.f32 %v2626_v21, %v2599_v40  ;;  %v8424_v39 = vadd.f32 %v2627_v25, %v2600_v60  ;;  %v8426_v50 = vadd.f32 %v2628_v2, %v2601_v42  ;;  %v8428_v22 = vadd.f32 %v2629_v10, %v2602_v37  ;;  %v11925_v44 = vld [vmem:[#allocation81_spill] sm:$0xff]  ;;  %v11926_v21 = vld [vmem:[#allocation82_spill] sm:$0xff]  ;;  %v11927_v25 = vld [vmem:[#allocation83_spill] sm:$0xff] }
 0x214   :  { %v8430_v23 = vadd.f32 %v2630_v6, %v2603_v16  ;;  %v8432_v13 = vadd.f32 %v2631_v48, %v2604_v30  ;;  %v8434_v52 = vadd.f32 %v2632_v33, %v2605_v12  ;;  %v8436_v17 = vadd.f32 %v2633_v24, %v2606_v9  ;;  %v11913_v16 = vld [vmem:[#allocation45_spill] sm:$0xff]  ;;  %v11914_v12 = vld [vmem:[#allocation46_spill] sm:$0xff]  ;;  %v11928_v2 = vld [vmem:[#allocation84_spill] sm:$0xff] }
 0x215   :  { %v8438_v28 = vadd.f32 %v2634_v34, %v2607_v51  ;;  %v8440_v29 = vadd.f32 %v2635_v56, %v2608_v7  ;;  %v8442_v40 = vadd.f32 %v2636_v14, %v2609_v38  ;;  %v8444_v60 = vadd.f32 %v2637_v8, %v2610_v4  ;;  %v11915_v51 = vld [vmem:[#allocation75_spill] sm:$0xff]  ;;  %v11916_v38 = vld [vmem:[#allocation76_spill] sm:$0xff]  ;;  %v11929_v6 = vld [vmem:[#allocation85_spill] sm:$0xff] }
 0x216   :  { %v8446_v42 = vadd.f32 %v2638_v19, %v2611_v31  ;;  %v2667_v37 = vmul.f32 %v8369_v55, %v11885_v11  ;;  %v8452_v30 = vmul.f32 %v8369_v55, %v11913_v16  ;;  %v2669_v9 = vmul.f32 %v8369_v55, %v11914_v12 }
 0x217   :  { %11911 = vst [vmem:[#allocation108_spill] sm:$0xff] %v8444_v60  ;;  %v8458_v7 = vmul.f32 %v8369_v55, %v11915_v51  ;;  %v2671_v4 = vmul.f32 %v8369_v55, %v11916_v38  ;;  %v8464_v31 = vmul.f32 %v8369_v55, %v11917_v32  ;;  %v2673_v61 = vmul.f32 %v8369_v55, %v11918_v41  ;;  %v11935_v41 = vld [vmem:[#allocation91_spill] sm:$0xff]  ;;  %v11936_v32 = vld [vmem:[#allocation92_spill] sm:$0xff] }
 0x218   :  { %11912 = vst [vmem:[#allocation109_spill] sm:$0xff] %v8446_v42  ;;  %v8470_v46 = vmul.f32 %v8369_v55, %v11919_v49  ;;  %v2675_v18 = vmul.f32 %v8369_v55, %v11920_v15  ;;  %v8476_v33 = vmul.f32 %v8369_v55, %v11921_v62  ;;  %v2677_v24 = vmul.f32 %v8369_v55, %v11922_v1  ;;  %v11931_v1 = vld [vmem:[#allocation87_spill] sm:$0xff]  ;;  %v11932_v62 = vld [vmem:[#allocation88_spill] sm:$0xff]  ;;  %v11933_v15 = vld [vmem:[#allocation89_spill] sm:$0xff] }
 0x219   :  { %v8482_v34 = vmul.f32 %v8369_v55, %v11923_v47  ;;  %v2679_v56 = vmul.f32 %v8369_v55, %v11924_v0  ;;  %v8488_v14 = vmul.f32 %v8369_v55, %v11925_v44  ;;  %v2681_v8 = vmul.f32 %v8369_v55, %v11926_v21  ;;  %v11930_v47 = vld [vmem:[#allocation86_spill] sm:$0xff] }
 0x21a   :  { %v8494_v19 = vmul.f32 %v8369_v55, %v11927_v25  ;;  %v2683_v10 = vmul.f32 %v8369_v55, %v11928_v2  ;;  %v8500_v48 = vmul.f32 %v8369_v55, %v11929_v6  ;;  %v2685_v0 = vmul.f32 %v8369_v55, %v11930_v47  ;;  %v11934_v49 = vld [vmem:[#allocation90_spill] sm:$0xff] }
 0x21b   :  { %v8506_v44 = vmul.f32 %v8369_v55, %v11931_v1  ;;  %v2687_v21 = vmul.f32 %v8369_v55, %v11932_v62  ;;  %v8512_v25 = vmul.f32 %v8369_v55, %v11933_v15  ;;  %v2689_v2 = vmul.f32 %v8369_v55, %v11934_v49 }
 0x21c   :  { %v8518_v6 = vmul.f32 %v8369_v55, %v11935_v41  ;;  %v2691_v47 = vmul.f32 %v8369_v55, %v11936_v32  ;;  %v8524_v1 = vmul.f32 %v8369_v55, %v11910_v54  ;;  %v2719_v38 = vrot.slane %v2667_v37, 1 }
 0x21d   :  { %v2720_v62 = vrot.slane %v8452_v30, 1  ;;  %v2722_v51 = vrot.slane %v2669_v9, 1  ;;  %v2723_v15 = vrot.slane %v8458_v7, 1  ;;  %v2725_v12 = vrot.slane %v2671_v4, 1 }
 0x21e   :  { %v2726_v49 = vrot.slane %v8464_v31, 1  ;;  %v2728_v16 = vrot.slane %v2673_v61, 1  ;;  %v2729_v41 = vrot.slane %v8470_v46, 1  ;;  %v2731_v11 = vrot.slane %v2675_v18, 1 }
 0x21f   :  { %v2732_v42 = vrot.slane %v8476_v33, 1  ;;  %v2734_v32 = vrot.slane %v2677_v24, 1  ;;  %v2735_v60 = vrot.slane %v8482_v34, 1  ;;  %v2737_v55 = vrot.slane %v2679_v56, 1  ;;  %v11937_v24 = vld [vmem:[#allocation13_spill] sm:$0xff] }
 0x220   :  { %v2738_v37 = vrot.slane %v8488_v14, 1  ;;  %v2740_v54 = vrot.slane %v2681_v8, 1  ;;  %v2741_v30 = vrot.slane %v8494_v19, 1  ;;  %v2743_v9 = vrot.slane %v2683_v10, 1 }
 0x221   :  { %v2744_v7 = vrot.slane %v8500_v48, 1  ;;  %v2746_v4 = vrot.slane %v2685_v0, 1  ;;  %v2747_v31 = vrot.slane %v8506_v44, 1  ;;  %v2749_v61 = vrot.slane %v2687_v21, 1 }
 0x222   :  { %v2750_v46 = vrot.slane %v8512_v25, 1  ;;  %v2752_v18 = vrot.slane %v2689_v2, 1  ;;  %v2753_v33 = vrot.slane %v8518_v6, 1  ;;  %v8542_v34 = vadd.f32 %v8396_v36, %v11937_v24  ;;  %v11952_v24 = vld [vmem:[#allocation21_spill] sm:$0xff] }
 0x223   :  { %v2721_v56 = vsel %vm255_vm0, %v2719_v38, %v2720_v62  ;;  %v2755_v14 = vrot.slane %v2691_v47, 1  ;;  %v11094_v8 = vrot.slane %v8524_v1, 1  ;;  %v2724_v0 = vsel %vm255_vm0, %v2722_v51, %v2723_v15 }
 0x224   :  { %v2727_v44 = vsel %vm255_vm0, %v2725_v12, %v2726_v49  ;;  %v2730_v21 = vsel %vm255_vm0, %v2728_v16, %v2729_v41  ;;  %v2733_v25 = vsel %vm255_vm0, %v2731_v11, %v2732_v42  ;;  %v2736_v19 = vsel %vm255_vm0, %v2734_v32, %v2735_v60 }
 0x225   :  { %v2739_v2 = vsel %vm255_vm0, %v2737_v55, %v2738_v37  ;;  %v2742_v36 = vsel %vm255_vm0, %v2740_v54, %v2741_v30  ;;  %v2745_v10 = vsel %vm255_vm0, %v2743_v9, %v2744_v7  ;;  %v2748_v38 = vsel %vm255_vm0, %v2746_v4, %v2747_v31  ;;  %v11949_v4 = vld [vmem:[#allocation78_spill] sm:$0xff] }
 0x226   :  { %v2751_v47 = vsel %vm255_vm0, %v2749_v61, %v2750_v46  ;;  %v2754_v51 = vsel %vm255_vm0, %v2752_v18, %v2753_v33  ;;  %v8558_v12 = vadd.f32 %v2721_v56, %v8398_v27  ;;  %v2757_v11 = vsel %vm255_vm0, %v2755_v14, %v11094_v8  ;;  %v11950_v61 = vld [vmem:[#allocation79_spill] sm:$0xff]  ;;  %v11951_v18 = vld [vmem:[#allocation20_spill] sm:$0xff]  ;;  %v11953_v14 = vld [vmem:[#allocation22_spill] sm:$0xff] }
 0x227   :  { %v8564_v16 = vadd.f32 %v2720_v62, %v8400_v63  ;;  %v8567_v54 = vadd.f32 %v2724_v0, %v8402_v53  ;;  %v8570_v32 = vadd.f32 %v2723_v15, %v8404_v35  ;;  %v8573_v6 = vadd.f32 %v2727_v44, %v8406_v58  ;;  %v11944_v15 = vld [vmem:[#allocation45_spill] sm:$0xff]  ;;  %v11945_v62 = vld [vmem:[#allocation46_spill] sm:$0xff]  ;;  %v11954_v44 = vld [vmem:[#allocation23_spill] sm:$0xff] }
 0x228   :  { %v8576_v27 = vadd.f32 %v2726_v49, %v8408_v57  ;;  %v8579_v48 = vadd.f32 %v2730_v21, %v8410_v45  ;;  %v8582_v55 = vadd.f32 %v2729_v41, %v8412_v20  ;;  %v8585_v63 = vadd.f32 %v2733_v25, %v8414_v3  ;;  %v11955_v25 = vld [vmem:[#allocation80_spill] sm:$0xff] }
 0x229   :  { %v8588_v53 = vadd.f32 %v2732_v42, %v8416_v5  ;;  %v8591_v35 = vadd.f32 %v2736_v19, %v8418_v26  ;;  %v8594_v58 = vadd.f32 %v2735_v60, %v8420_v43  ;;  %v8597_v57 = vadd.f32 %v2739_v2, %v8422_v59  ;;  %v11956_v2 = vld [vmem:[#allocation81_spill] sm:$0xff] }
 0x22a   :  { %v8600_v45 = vadd.f32 %v2738_v37, %v8424_v39  ;;  %v8603_v20 = vadd.f32 %v2742_v36, %v8426_v50  ;;  %v2810_v3 = vstv %s8536_s17  ;;  %v8607_v41 = vadd.f32 %v2741_v30, %v8428_v22  ;;  %v11946_v37 = vld [vmem:[#allocation75_spill] sm:$0xff] }
 0x22b   :  { %v8610_v5 = vadd.f32 %v2745_v10, %v8430_v23  ;;  %v8613_v26 = vadd.f32 %v2744_v7, %v8432_v13  ;;  %v8616_v43 = vadd.f32 %v2748_v38, %v8434_v52  ;;  %v8619_v59 = vadd.f32 %v2747_v31, %v8436_v17  ;;  %v11939_v23 = vld [vmem:[#allocation108_spill] sm:$0xff]  ;;  %v11941_v13 = vld [vmem:[#allocation109_spill] sm:$0xff]  ;;  %v11943_v52 = vld [vmem:[#allocation27_spill] sm:$0xff] }
 0x22c   :  { %v8622_v39 = vadd.f32 %v2751_v47, %v8438_v28  ;;  %v8625_v50 = vadd.f32 %v2750_v46, %v8440_v29  ;;  %v8628_v22 = vadd.f32 %v2754_v51, %v8442_v40  ;;  %v8631_v60 = vadd.f32 %v2753_v33, %v11939_v23  ;;  %v11947_v29 = vld [vmem:[#allocation76_spill] sm:$0xff]  ;;  %v11948_v40 = vld [vmem:[#allocation77_spill] sm:$0xff]  ;;  %v11957_v10 = vld [vmem:[#allocation82_spill] sm:$0xff] }
 0x22d   :  { %v8634_v42 = vadd.f32 %v2757_v11, %v11941_v13  ;;  %v2811_v49 = vmul.f32 %v2810_v3, %v11943_v52  ;;  %v8638_v17 = vmul.f32 %v2810_v3, %v11944_v15  ;;  %v2813_v28 = vmul.f32 %v2810_v3, %v11945_v62  ;;  %v11958_v47 = vld [vmem:[#allocation83_spill] sm:$0xff]  ;;  %v11959_v11 = vld [vmem:[#allocation84_spill] sm:$0xff]  ;;  %v11960_v13 = vld [vmem:[#allocation85_spill] sm:$0xff] }
 0x22e   :  { %11938 = vst [vmem:[#allocation98_spill] sm:$0xff] %v8628_v22  ;;  %v8642_v30 = vmul.f32 %v2810_v3, %v11946_v37  ;;  %v2815_v9 = vmul.f32 %v2810_v3, %v11947_v29  ;;  %v8646_v7 = vmul.f32 %v2810_v3, %v11948_v40  ;;  %v2817_v31 = vmul.f32 %v2810_v3, %v11949_v4  ;;  %v11961_v15 = vld [vmem:[#allocation86_spill] sm:$0xff]  ;;  %v11966_v4 = vld [vmem:[#allocation91_spill] sm:$0xff]  ;;  %v11967_v40 = vld [vmem:[#allocation92_spill] sm:$0xff] }
 0x22f   :  { %11940 = vst [vmem:[#allocation99_spill] sm:$0xff] %v8631_v60  ;;  %v8650_v46 = vmul.f32 %v2810_v3, %v11950_v61  ;;  %v2819_v33 = vmul.f32 %v2810_v3, %v11951_v18  ;;  %v8654_v56 = vmul.f32 %v2810_v3, %v11952_v24  ;;  %v2821_v0 = vmul.f32 %v2810_v3, %v11953_v14  ;;  %v11962_v14 = vld [vmem:[#allocation87_spill] sm:$0xff]  ;;  %v11963_v24 = vld [vmem:[#allocation88_spill] sm:$0xff]  ;;  %v11964_v18 = vld [vmem:[#allocation89_spill] sm:$0xff] }
 0x230   :  { %11942 = vst [vmem:[#allocation47_spill] sm:$0xff] %v8634_v42  ;;  %v8658_v21 = vmul.f32 %v2810_v3, %v11954_v44  ;;  %v2823_v19 = vmul.f32 %v2810_v3, %v11955_v25  ;;  %v8662_v36 = vmul.f32 %v2810_v3, %v11956_v2  ;;  %v2825_v38 = vmul.f32 %v2810_v3, %v11957_v10  ;;  %v11965_v61 = vld [vmem:[#allocation90_spill] sm:$0xff]  ;;  %v11968_v29 = vld [vmem:[#allocation93_spill] sm:$0xff] }
 0x231   :  { %v8666_v51 = vmul.f32 %v2810_v3, %v11958_v47  ;;  %v2827_v23 = vmul.f32 %v2810_v3, %v11959_v11  ;;  %v8670_v52 = vmul.f32 %v2810_v3, %v11960_v13  ;;  %v2829_v8 = vmul.f32 %v2810_v3, %v11961_v15 }
 0x232   :  { %v8674_v44 = vmul.f32 %v2810_v3, %v11962_v14  ;;  %v2831_v25 = vmul.f32 %v2810_v3, %v11963_v24  ;;  %v8678_v2 = vmul.f32 %v2810_v3, %v11964_v18  ;;  %v2833_v10 = vmul.f32 %v2810_v3, %v11965_v61 }
 0x233   :  { %v8682_v47 = vmul.f32 %v2810_v3, %v11966_v4  ;;  %v2835_v11 = vmul.f32 %v2810_v3, %v11967_v40  ;;  %v8686_v13 = vmul.f32 %v2810_v3, %v11968_v29  ;;  %v2863_v37 = vrot.slane %v2811_v49, 2 }
 0x234   :  { %v2864_v15 = vrot.slane %v8638_v17, 2  ;;  %v2866_v14 = vrot.slane %v2813_v28, 2  ;;  %v2867_v62 = vrot.slane %v8642_v30, 2  ;;  %v2869_v24 = vrot.slane %v2815_v9, 2 }
 0x235   :  { %v2870_v18 = vrot.slane %v8646_v7, 2  ;;  %v2872_v42 = vrot.slane %v2817_v31, 2  ;;  %v2873_v61 = vrot.slane %v8650_v46, 2  ;;  %v2875_v60 = vrot.slane %v2819_v33, 2 }
 0x236   :  { %v2876_v4 = vrot.slane %v8654_v56, 2  ;;  %v2878_v22 = vrot.slane %v2821_v0, 2  ;;  %v2879_v40 = vrot.slane %v8658_v21, 2  ;;  %v2881_v3 = vrot.slane %v2823_v19, 2 }
 0x237   :  { %v2882_v49 = vrot.slane %v8662_v36, 2  ;;  %v2884_v29 = vrot.slane %v2825_v38, 2  ;;  %v2885_v17 = vrot.slane %v8666_v51, 2  ;;  %v2887_v28 = vrot.slane %v2827_v23, 2 }
 0x238   :  { %v2888_v30 = vrot.slane %v8670_v52, 2  ;;  %v2890_v9 = vrot.slane %v2829_v8, 2  ;;  %v2891_v7 = vrot.slane %v8674_v44, 2  ;;  %v2893_v31 = vrot.slane %v2831_v25, 2 }
 0x239   :  { %v2894_v46 = vrot.slane %v8678_v2, 2  ;;  %v2896_v33 = vrot.slane %v2833_v10, 2  ;;  %v2897_v56 = vrot.slane %v8682_v47, 2  ;;  %v11969_v0 = vrot.slane %v8524_v1, 1 }
 0x23a   :  { %v2865_v19 = vsel %vm1839_vm1, %v2863_v37, %v2864_v15  ;;  %v2899_v36 = vrot.slane %v2835_v11, 2  ;;  %v2900_v38 = vrot.slane %v8686_v13, 2  ;;  %v2868_v8 = vsel %vm1839_vm1, %v2866_v14, %v2867_v62 }
 0x23b   :  { %v2809_v21 = vadd.f32 %v11969_v0, %v8542_v34  ;;  %v2871_v44 = vsel %vm1839_vm1, %v2869_v24, %v2870_v18  ;;  %v2874_v25 = vsel %vm1839_vm1, %v2872_v42, %v2873_v61  ;;  %v2877_v2 = vsel %vm1839_vm1, %v2875_v60, %v2876_v4 }
 0x23c   :  { %v2880_v10 = vsel %vm1839_vm1, %v2878_v22, %v2879_v40  ;;  %v2883_v47 = vsel %vm1839_vm1, %v2881_v3, %v2882_v49  ;;  %v2886_v1 = vsel %vm1839_vm1, %v2884_v29, %v2885_v17  ;;  %v2889_v34 = vsel %vm1839_vm1, %v2887_v28, %v2888_v30 }
 0x23d   :  { %v2892_v37 = vsel %vm1839_vm1, %v2890_v9, %v2891_v7  ;;  %v2895_v51 = vsel %vm1839_vm1, %v2893_v31, %v2894_v46  ;;  %v2898_v14 = vsel %vm1839_vm1, %v2896_v33, %v2897_v56  ;;  %v2928_v24 = vadd.f32 %v2865_v19, %v8558_v12 }
 0x23e   :  { %v2901_v42 = vsel %vm1839_vm1, %v2899_v36, %v2900_v38  ;;  %v2929_v60 = vadd.f32 %v2864_v15, %v8564_v16  ;;  %v2930_v22 = vadd.f32 %v2868_v8, %v8567_v54  ;;  %v2931_v11 = vadd.f32 %v2867_v62, %v8570_v32  ;;  %v11983_v36 = vld [vmem:[#allocation80_spill] sm:$0xff]  ;;  %v11984_v8 = vld [vmem:[#allocation81_spill] sm:$0xff] }
 0x23f   :  { %v2932_v29 = vadd.f32 %v2871_v44, %v8573_v6  ;;  %v2933_v23 = vadd.f32 %v2870_v18, %v8576_v27  ;;  %v2934_v13 = vadd.f32 %v2874_v25, %v8579_v48  ;;  %v2935_v52 = vadd.f32 %v2873_v61, %v8582_v55  ;;  %v11985_v25 = vld [vmem:[#allocation82_spill] sm:$0xff] }
 0x240   :  { %v2936_v3 = vadd.f32 %v2877_v2, %v8585_v63  ;;  %v2937_v12 = vadd.f32 %v2876_v4, %v8588_v53  ;;  %v2938_v28 = vadd.f32 %v2880_v10, %v8591_v35  ;;  %v2939_v16 = vadd.f32 %v2879_v40, %v8594_v58  ;;  %v11986_v10 = vld [vmem:[#allocation83_spill] sm:$0xff] }
 0x241   :  { %v2940_v54 = vadd.f32 %v2883_v47, %v8597_v57  ;;  %v2941_v32 = vadd.f32 %v2882_v49, %v8600_v45  ;;  %v2942_v6 = vadd.f32 %v2886_v1, %v8603_v20  ;;  %v2954_v62 = vstv %s8698_s18  ;;  %v11970_v57 = vld [vmem:[#allocation98_spill] sm:$0xff]  ;;  %v11971_v45 = vld [vmem:[#allocation99_spill] sm:$0xff]  ;;  %v11987_v1 = vld [vmem:[#allocation84_spill] sm:$0xff] }
 0x242   :  { %v2943_v27 = vadd.f32 %v2885_v17, %v8607_v41  ;;  %v2944_v48 = vadd.f32 %v2889_v34, %v8610_v5  ;;  %v2945_v55 = vadd.f32 %v2888_v30, %v8613_v26  ;;  %v2946_v63 = vadd.f32 %v2892_v37, %v8616_v43  ;;  %v11972_v20 = vld [vmem:[#allocation47_spill] sm:$0xff]  ;;  %v11973_v41 = vld [vmem:[#allocation46_spill] sm:$0xff]  ;;  %v11975_v26 = vld [vmem:[#allocation76_spill] sm:$0xff] }
 0x243   :  { %v2947_v53 = vadd.f32 %v2891_v7, %v8619_v59  ;;  %v2948_v35 = vadd.f32 %v2895_v51, %v8622_v39  ;;  %v2949_v58 = vadd.f32 %v2894_v46, %v8625_v50  ;;  %v2950_v40 = vadd.f32 %v2898_v14, %v11970_v57  ;;  %v11974_v5 = vld [vmem:[#allocation75_spill] sm:$0xff]  ;;  %v11976_v43 = vld [vmem:[#allocation77_spill] sm:$0xff]  ;;  %v11977_v59 = vld [vmem:[#allocation78_spill] sm:$0xff] }
 0x244   :  { %v2951_v4 = vadd.f32 %v2897_v56, %v11971_v45  ;;  %v2952_v61 = vadd.f32 %v2901_v42, %v11972_v20  ;;  %v2953_v18 = vadd.f32 %v2900_v38, %v2809_v21  ;;  %v2955_v15 = vmul.f32 %v2954_v62, %v11973_v41  ;;  %v11978_v39 = vld [vmem:[#allocation79_spill] sm:$0xff]  ;;  %v11979_v50 = vld [vmem:[#allocation20_spill] sm:$0xff]  ;;  %v11980_v46 = vld [vmem:[#allocation21_spill] sm:$0xff] }
 0x245   :  { %v2956_v49 = vmul.f32 %v2954_v62, %v11974_v5  ;;  %v2957_v17 = vmul.f32 %v2954_v62, %v11975_v26  ;;  %v2958_v30 = vmul.f32 %v2954_v62, %v11976_v43  ;;  %v2959_v9 = vmul.f32 %v2954_v62, %v11977_v59  ;;  %v11981_v56 = vld [vmem:[#allocation22_spill] sm:$0xff]  ;;  %v11982_v21 = vld [vmem:[#allocation23_spill] sm:$0xff]  ;;  %v11988_v37 = vld [vmem:[#allocation85_spill] sm:$0xff] }
 0x246   :  { %v2960_v7 = vmul.f32 %v2954_v62, %v11978_v39  ;;  %v2961_v31 = vmul.f32 %v2954_v62, %v11979_v50  ;;  %v2962_v33 = vmul.f32 %v2954_v62, %v11980_v46  ;;  %v2963_v0 = vmul.f32 %v2954_v62, %v11981_v56  ;;  %v11989_v14 = vld [vmem:[#allocation86_spill] sm:$0xff]  ;;  %v11990_v57 = vld [vmem:[#allocation87_spill] sm:$0xff]  ;;  %v11991_v20 = vld [vmem:[#allocation88_spill] sm:$0xff] }
 0x247   :  { %v2964_v19 = vmul.f32 %v2954_v62, %v11982_v21  ;;  %v2965_v38 = vmul.f32 %v2954_v62, %v11983_v36  ;;  %v2966_v44 = vmul.f32 %v2954_v62, %v11984_v8  ;;  %v2967_v2 = vmul.f32 %v2954_v62, %v11985_v25  ;;  %v11992_v46 = vld [vmem:[#allocation89_spill] sm:$0xff]  ;;  %v11993_v50 = vld [vmem:[#allocation90_spill] sm:$0xff]  ;;  %v11994_v39 = vld [vmem:[#allocation91_spill] sm:$0xff] }
 0x248   :  { %v2968_v47 = vmul.f32 %v2954_v62, %v11986_v10  ;;  %v2969_v34 = vmul.f32 %v2954_v62, %v11987_v1  ;;  %v2970_v51 = vmul.f32 %v2954_v62, %v11988_v37  ;;  %v2971_v42 = vmul.f32 %v2954_v62, %v11989_v14  ;;  %v11995_v59 = vld [vmem:[#allocation92_spill] sm:$0xff]  ;;  %v11996_v43 = vld [vmem:[#allocation93_spill] sm:$0xff]  ;;  %v11997_v26 = vld [vmem:[#allocation94_spill] sm:$0xff] }
 0x249   :  { %v2972_v45 = vmul.f32 %v2954_v62, %v11990_v57  ;;  %v2973_v56 = vmul.f32 %v2954_v62, %v11991_v20  ;;  %v2974_v21 = vmul.f32 %v2954_v62, %v11992_v46  ;;  %v2975_v36 = vmul.f32 %v2954_v62, %v11993_v50  ;;  %v11998_v5 = vld [vmem:[#allocation95_spill] sm:$0xff] }
 0x24a   :  { %v2976_v8 = vmul.f32 %v2954_v62, %v11994_v39  ;;  %v2977_v25 = vmul.f32 %v2954_v62, %v11995_v59  ;;  %v2978_v10 = vmul.f32 %v2954_v62, %v11996_v43  ;;  %v2979_v1 = vmul.f32 %v2954_v62, %v11997_v26 }
 0x24b   :  { %v2980_v37 = vmul.f32 %v2954_v62, %v11998_v5  ;;  %v8773_v41 = vadd.f32 %v2955_v15, %v2928_v24  ;;  %v8775_v14 = vadd.f32 %v2956_v49, %v2929_v60  ;;  %v8777_v57 = vadd.f32 %v2957_v17, %v2930_v22  ;;  %v12001_v49 = vld [vmem:[#allocation75_spill] sm:$0xff] }
 0x24c   :  { %v8779_v46 = vadd.f32 %v2958_v30, %v2931_v11  ;;  %v8781_v50 = vadd.f32 %v2959_v9, %v2932_v29  ;;  %v8783_v39 = vadd.f32 %v2960_v7, %v2933_v23  ;;  %v8785_v59 = vadd.f32 %v2961_v31, %v2934_v13  ;;  %v12003_v30 = vld [vmem:[#allocation77_spill] sm:$0xff] }
 0x24d   :  { %v8787_v43 = vadd.f32 %v2962_v33, %v2935_v52  ;;  %v8789_v26 = vadd.f32 %v2963_v0, %v2936_v3  ;;  %v8791_v62 = vadd.f32 %v2964_v19, %v2937_v12  ;;  %v8793_v24 = vadd.f32 %v2965_v38, %v2938_v28  ;;  %v12007_v31 = vld [vmem:[#allocation21_spill] sm:$0xff]  ;;  %v12008_v33 = vld [vmem:[#allocation22_spill] sm:$0xff]  ;;  %v12009_v0 = vld [vmem:[#allocation23_spill] sm:$0xff] }
 0x24e   :  { %v8795_v60 = vadd.f32 %v2966_v44, %v2939_v16  ;;  %v8797_v22 = vadd.f32 %v2967_v2, %v2940_v54  ;;  %v8799_v11 = vadd.f32 %v2968_v47, %v2941_v32  ;;  %v8801_v29 = vadd.f32 %v2969_v34, %v2942_v6  ;;  %v12010_v19 = vld [vmem:[#allocation80_spill] sm:$0xff]  ;;  %v12011_v38 = vld [vmem:[#allocation81_spill] sm:$0xff]  ;;  %v12012_v44 = vld [vmem:[#allocation82_spill] sm:$0xff] }
 0x24f   :  { %v8803_v23 = vadd.f32 %v2970_v51, %v2943_v27  ;;  %v8805_v13 = vadd.f32 %v2971_v42, %v2944_v48  ;;  %v8807_v52 = vadd.f32 %v2972_v45, %v2945_v55  ;;  %v3007_v3 = vstv %s8754_s19  ;;  %v12000_v48 = vld [vmem:[#allocation46_spill] sm:$0xff]  ;;  %v12013_v2 = vld [vmem:[#allocation83_spill] sm:$0xff]  ;;  %v12014_v47 = vld [vmem:[#allocation84_spill] sm:$0xff] }
 0x250   :  { %v8810_v15 = vadd.f32 %v2973_v56, %v2946_v63  ;;  %v8812_v12 = vadd.f32 %v2974_v21, %v2947_v53  ;;  %v8814_v28 = vadd.f32 %v2975_v36, %v2948_v35  ;;  %v8816_v16 = vadd.f32 %v2976_v8, %v2949_v58  ;;  %v12002_v63 = vld [vmem:[#allocation76_spill] sm:$0xff]  ;;  %v12004_v58 = vld [vmem:[#allocation78_spill] sm:$0xff]  ;;  %v12015_v34 = vld [vmem:[#allocation85_spill] sm:$0xff] }
 0x251   :  { %v8818_v54 = vadd.f32 %v2977_v25, %v2950_v40  ;;  %v8820_v32 = vadd.f32 %v2978_v10, %v2951_v4  ;;  %v8822_v6 = vadd.f32 %v2979_v1, %v2952_v61  ;;  %v8824_v27 = vadd.f32 %v2980_v37, %v2953_v18  ;;  %v12005_v40 = vld [vmem:[#allocation79_spill] sm:$0xff]  ;;  %v12006_v4 = vld [vmem:[#allocation20_spill] sm:$0xff]  ;;  %v12016_v51 = vld [vmem:[#allocation86_spill] sm:$0xff] }
 0x252   :  { %v3008_v55 = vmul.f32 %v3007_v3, %v12000_v48  ;;  %v8828_v17 = vmul.f32 %v3007_v3, %v12001_v49  ;;  %v3010_v53 = vmul.f32 %v3007_v3, %v12002_v63  ;;  %v8832_v35 = vmul.f32 %v3007_v3, %v12003_v30  ;;  %v12017_v45 = vld [vmem:[#allocation87_spill] sm:$0xff]  ;;  %v12023_v30 = vld [vmem:[#allocation94_spill] sm:$0xff] }
 0x253   :  { %11999 = vst [vmem:[#allocation48_spill] sm:$0xff] %v8824_v27  ;;  %v3012_v9 = vmul.f32 %v3007_v3, %v12004_v58  ;;  %v8836_v7 = vmul.f32 %v3007_v3, %v12005_v40  ;;  %v3014_v61 = vmul.f32 %v3007_v3, %v12006_v4  ;;  %v8840_v18 = vmul.f32 %v3007_v3, %v12007_v31  ;;  %v12020_v31 = vld [vmem:[#allocation91_spill] sm:$0xff]  ;;  %v12022_v40 = vld [vmem:[#allocation93_spill] sm:$0xff] }
 0x254   :  { %v3016_v56 = vmul.f32 %v3007_v3, %v12008_v33  ;;  %v8844_v21 = vmul.f32 %v3007_v3, %v12009_v0  ;;  %v3018_v36 = vmul.f32 %v3007_v3, %v12010_v19  ;;  %v8848_v8 = vmul.f32 %v3007_v3, %v12011_v38  ;;  %v12018_v19 = vld [vmem:[#allocation89_spill] sm:$0xff] }
 0x255   :  { %v3020_v25 = vmul.f32 %v3007_v3, %v12012_v44  ;;  %v8852_v10 = vmul.f32 %v3007_v3, %v12013_v2  ;;  %v3022_v1 = vmul.f32 %v3007_v3, %v12014_v47  ;;  %v8856_v37 = vmul.f32 %v3007_v3, %v12015_v34  ;;  %v12019_v44 = vld [vmem:[#allocation90_spill] sm:$0xff]  ;;  %v12021_v47 = vld [vmem:[#allocation92_spill] sm:$0xff] }
 0x256   :  { %v3024_v42 = vmul.f32 %v3007_v3, %v12016_v51  ;;  %v8862_v0 = vmul.f32 %v3007_v3, %v12017_v45  ;;  %v3026_v38 = vmul.f32 %v3007_v3, %v11991_v20  ;;  %v8866_v33 = vmul.f32 %v3007_v3, %v12018_v19 }
 0x257   :  { %v3028_v2 = vmul.f32 %v3007_v3, %v12019_v44  ;;  %v8870_v4 = vmul.f32 %v3007_v3, %v12020_v31  ;;  %v3030_v34 = vmul.f32 %v3007_v3, %v12021_v47  ;;  %v8874_v58 = vmul.f32 %v3007_v3, %v12022_v40 }
 0x258   :  { %v3032_v51 = vmul.f32 %v3007_v3, %v12023_v30  ;;  %v8878_v45 = vmul.f32 %v3007_v3, %v11998_v5  ;;  %v3060_v63 = vrot.slane %v3008_v55, 1  ;;  %v3061_v20 = vrot.slane %v8828_v17, 1 }
 0x259   :  { %v3063_v19 = vrot.slane %v3010_v53, 1  ;;  %v3064_v49 = vrot.slane %v8832_v35, 1  ;;  %v3066_v44 = vrot.slane %v3012_v9, 1  ;;  %v3067_v31 = vrot.slane %v8836_v7, 1 }
 0x25a   :  { %v3069_v48 = vrot.slane %v3014_v61, 1  ;;  %v3070_v47 = vrot.slane %v8840_v18, 1  ;;  %v3072_v27 = vrot.slane %v3016_v56, 1  ;;  %v3073_v40 = vrot.slane %v8844_v21, 1 }
 0x25b   :  { %v3075_v30 = vrot.slane %v3018_v36, 1  ;;  %v3076_v3 = vrot.slane %v8848_v8, 1  ;;  %v3078_v5 = vrot.slane %v3020_v25, 1  ;;  %v3079_v55 = vrot.slane %v8852_v10, 1 }
 0x25c   :  { %v3081_v17 = vrot.slane %v3022_v1, 1  ;;  %v3082_v53 = vrot.slane %v8856_v37, 1  ;;  %v3084_v35 = vrot.slane %v3024_v42, 1  ;;  %v3085_v9 = vrot.slane %v8862_v0, 1 }
 0x25d   :  { %v3087_v7 = vrot.slane %v3026_v38, 1  ;;  %v3088_v61 = vrot.slane %v8866_v33, 1  ;;  %v3090_v18 = vrot.slane %v3028_v2, 1  ;;  %v3091_v56 = vrot.slane %v8870_v4, 1 }
 0x25e   :  { %v3062_v21 = vsel %vm255_vm0, %v3060_v63, %v3061_v20  ;;  %v3093_v36 = vrot.slane %v3030_v34, 1  ;;  %v3094_v8 = vrot.slane %v8874_v58, 1  ;;  %v8894_v25 = vstv %s8858_s20 }
 0x25f   :  { %v3065_v10 = vsel %vm255_vm0, %v3063_v19, %v3064_v49  ;;  %v3068_v1 = vsel %vm255_vm0, %v3066_v44, %v3067_v31  ;;  %v3096_v37 = vrot.slane %v3032_v51, 1  ;;  %v3097_v0 = vrot.slane %v8878_v45, 1 }
 0x260   :  { %v3071_v38 = vsel %vm255_vm0, %v3069_v48, %v3070_v47  ;;  %v3074_v33 = vsel %vm255_vm0, %v3072_v27, %v3073_v40  ;;  %v3077_v4 = vsel %vm255_vm0, %v3075_v30, %v3076_v3  ;;  %v3080_v63 = vsel %vm255_vm0, %v3078_v5, %v3079_v55 }
 0x261   :  { %v3083_v2 = vsel %vm255_vm0, %v3081_v17, %v3082_v53  ;;  %v3086_v58 = vsel %vm255_vm0, %v3084_v35, %v3085_v9  ;;  %v3089_v34 = vsel %vm255_vm0, %v3087_v7, %v3088_v61  ;;  %v3092_v19 = vsel %vm255_vm0, %v3090_v18, %v3091_v56 }
 0x262   :  { %v3095_v44 = vsel %vm255_vm0, %v3093_v36, %v3094_v8  ;;  %v8909_v51 = vadd.f32 %v3062_v21, %v8773_v41  ;;  %v8912_v48 = vadd.f32 %v3061_v20, %v8775_v14  ;;  %v8915_v27 = vadd.f32 %v3065_v10, %v8777_v57  ;;  %v12037_v36 = vld [vmem:[#allocation80_spill] sm:$0xff]  ;;  %v12038_v10 = vld [vmem:[#allocation81_spill] sm:$0xff] }
 0x263   :  { %v3098_v5 = vsel %vm255_vm0, %v3096_v37, %v3097_v0  ;;  %v8919_v30 = vadd.f32 %v3064_v49, %v8779_v46  ;;  %v8922_v42 = vadd.f32 %v3068_v1, %v8781_v50  ;;  %v8925_v45 = vadd.f32 %v3067_v31, %v8783_v39  ;;  %v12039_v37 = vld [vmem:[#allocation82_spill] sm:$0xff] }
 0x264   :  { %v8928_v41 = vadd.f32 %v3071_v38, %v8785_v59  ;;  %v8931_v14 = vadd.f32 %v3070_v47, %v8787_v43  ;;  %v8934_v57 = vadd.f32 %v3074_v33, %v8789_v26  ;;  %v8937_v20 = vadd.f32 %v3073_v40, %v8791_v62  ;;  %v12030_v47 = vld [vmem:[#allocation77_spill] sm:$0xff]  ;;  %v12040_v38 = vld [vmem:[#allocation83_spill] sm:$0xff] }
 0x265   :  { %v8940_v46 = vadd.f32 %v3077_v4, %v8793_v24  ;;  %v8943_v50 = vadd.f32 %v3076_v3, %v8795_v60  ;;  %v8946_v39 = vadd.f32 %v3080_v63, %v8797_v22  ;;  %v8949_v59 = vadd.f32 %v3079_v55, %v8799_v11  ;;  %v12031_v3 = vld [vmem:[#allocation78_spill] sm:$0xff]  ;;  %v12032_v55 = vld [vmem:[#allocation79_spill] sm:$0xff]  ;;  %v12041_v4 = vld [vmem:[#allocation84_spill] sm:$0xff] }
 0x266   :  { %v8952_v43 = vadd.f32 %v3083_v2, %v8801_v29  ;;  %v8955_v26 = vadd.f32 %v3082_v53, %v8803_v23  ;;  %v8958_v62 = vadd.f32 %v3086_v58, %v8805_v13  ;;  %v8961_v24 = vadd.f32 %v3085_v9, %v8807_v52  ;;  %v12033_v53 = vld [vmem:[#allocation20_spill] sm:$0xff]  ;;  %v12034_v9 = vld [vmem:[#allocation21_spill] sm:$0xff] }
 0x267   :  { %v8964_v60 = vadd.f32 %v3089_v34, %v8810_v15  ;;  %v8967_v22 = vadd.f32 %v3088_v61, %v8812_v12  ;;  %v8970_v11 = vadd.f32 %v3092_v19, %v8814_v28  ;;  %v8973_v29 = vadd.f32 %v3091_v56, %v8816_v16  ;;  %v12025_v15 = vld [vmem:[#allocation48_spill] sm:$0xff]  ;;  %v12027_v12 = vld [vmem:[#allocation46_spill] sm:$0xff]  ;;  %v12028_v28 = vld [vmem:[#allocation75_spill] sm:$0xff] }
 0x268   :  { %v8976_v23 = vadd.f32 %v3095_v44, %v8818_v54  ;;  %v8979_v13 = vadd.f32 %v3094_v8, %v8820_v32  ;;  %v8982_v52 = vadd.f32 %v3098_v5, %v8822_v6  ;;  %v8985_v49 = vadd.f32 %v3097_v0, %v12025_v15  ;;  %v12029_v16 = vld [vmem:[#allocation76_spill] sm:$0xff]  ;;  %v12035_v61 = vld [vmem:[#allocation22_spill] sm:$0xff]  ;;  %v12036_v56 = vld [vmem:[#allocation23_spill] sm:$0xff] }
 0x269   :  { %v3152_v40 = vmul.f32 %v8894_v25, %v12027_v12  ;;  %v8991_v31 = vmul.f32 %v8894_v25, %v12028_v28  ;;  %v3154_v54 = vmul.f32 %v8894_v25, %v12029_v16  ;;  %v8997_v32 = vmul.f32 %v8894_v25, %v12030_v47  ;;  %v12042_v2 = vld [vmem:[#allocation85_spill] sm:$0xff]  ;;  %v12043_v34 = vld [vmem:[#allocation86_spill] sm:$0xff]  ;;  %v12044_v44 = vld [vmem:[#allocation87_spill] sm:$0xff] }
 0x26a   :  { %12024 = vst [vmem:[#allocation100_spill] sm:$0xff] %v8982_v52  ;;  %v3156_v6 = vmul.f32 %v8894_v25, %v12031_v3  ;;  %v9003_v17 = vmul.f32 %v8894_v25, %v12032_v55  ;;  %v3158_v35 = vmul.f32 %v8894_v25, %v12033_v53  ;;  %v9009_v7 = vmul.f32 %v8894_v25, %v12034_v9  ;;  %v12045_v15 = vld [vmem:[#allocation88_spill] sm:$0xff]  ;;  %v12046_v28 = vld [vmem:[#allocation89_spill] sm:$0xff]  ;;  %v12052_v9 = vld [vmem:[#allocation95_spill] sm:$0xff] }
 0x26b   :  { %12026 = vst [vmem:[#allocation101_spill] sm:$0xff] %v8985_v49  ;;  %v3160_v18 = vmul.f32 %v8894_v25, %v12035_v61  ;;  %v9015_v21 = vmul.f32 %v8894_v25, %v12036_v56  ;;  %v3162_v8 = vmul.f32 %v8894_v25, %v12037_v36  ;;  %v9021_v1 = vmul.f32 %v8894_v25, %v12038_v10  ;;  %v12048_v10 = vld [vmem:[#allocation91_spill] sm:$0xff]  ;;  %v12049_v36 = vld [vmem:[#allocation92_spill] sm:$0xff]  ;;  %v12050_v56 = vld [vmem:[#allocation93_spill] sm:$0xff] }
 0x26c   :  { %v3164_v0 = vmul.f32 %v8894_v25, %v12039_v37  ;;  %v9027_v33 = vmul.f32 %v8894_v25, %v12040_v38  ;;  %v3166_v63 = vmul.f32 %v8894_v25, %v12041_v4  ;;  %v9033_v58 = vmul.f32 %v8894_v25, %v12042_v2  ;;  %v12047_v37 = vld [vmem:[#allocation90_spill] sm:$0xff] }
 0x26d   :  { %v3168_v19 = vmul.f32 %v8894_v25, %v12043_v34  ;;  %v9039_v5 = vmul.f32 %v8894_v25, %v12044_v44  ;;  %v3170_v12 = vmul.f32 %v8894_v25, %v12045_v15  ;;  %v9045_v38 = vmul.f32 %v8894_v25, %v12046_v28  ;;  %v12051_v61 = vld [vmem:[#allocation94_spill] sm:$0xff] }
 0x26e   :  { %v3172_v4 = vmul.f32 %v8894_v25, %v12047_v37  ;;  %v9051_v2 = vmul.f32 %v8894_v25, %v12048_v10  ;;  %v3174_v34 = vmul.f32 %v8894_v25, %v12049_v36  ;;  %v9057_v44 = vmul.f32 %v8894_v25, %v12050_v56 }
 0x26f   :  { %v3176_v15 = vmul.f32 %v8894_v25, %v12051_v61  ;;  %v9063_v28 = vmul.f32 %v8894_v25, %v12052_v9  ;;  %v3204_v53 = vrot.slane %v3152_v40, 2  ;;  %v3205_v37 = vrot.slane %v8991_v31, 2 }
 0x270   :  { %v3207_v55 = vrot.slane %v3154_v54, 2  ;;  %v3208_v10 = vrot.slane %v8997_v32, 2  ;;  %v3210_v3 = vrot.slane %v3156_v6, 2  ;;  %v3211_v36 = vrot.slane %v9003_v17, 2 }
 0x271   :  { %v3213_v47 = vrot.slane %v3158_v35, 2  ;;  %v3214_v56 = vrot.slane %v9009_v7, 2  ;;  %v3216_v16 = vrot.slane %v3160_v18, 2  ;;  %v3217_v49 = vrot.slane %v9015_v21, 2 }
 0x272   :  { %v3219_v61 = vrot.slane %v3162_v8, 2  ;;  %v3220_v52 = vrot.slane %v9021_v1, 2  ;;  %v3222_v25 = vrot.slane %v3164_v0, 2  ;;  %v3223_v40 = vrot.slane %v9027_v33, 2 }
 0x273   :  { %v3225_v9 = vrot.slane %v3166_v63, 2  ;;  %v3226_v31 = vrot.slane %v9033_v58, 2  ;;  %v3228_v54 = vrot.slane %v3168_v19, 2  ;;  %v3229_v32 = vrot.slane %v9039_v5, 2 }
 0x274   :  { %v3231_v6 = vrot.slane %v3170_v12, 2  ;;  %v3232_v17 = vrot.slane %v9045_v38, 2  ;;  %v3234_v35 = vrot.slane %v3172_v4, 2  ;;  %v3235_v7 = vrot.slane %v9051_v2, 2 }
 0x275   :  { %v3206_v18 = vsel %vm1839_vm1, %v3204_v53, %v3205_v37  ;;  %v3209_v21 = vsel %vm1839_vm1, %v3207_v55, %v3208_v10  ;;  %v3237_v8 = vrot.slane %v3174_v34, 2  ;;  %v3238_v1 = vrot.slane %v9057_v44, 2 }
 0x276   :  { %v3212_v0 = vsel %vm1839_vm1, %v3210_v3, %v3211_v36  ;;  %v3215_v33 = vsel %vm1839_vm1, %v3213_v47, %v3214_v56  ;;  %v3240_v63 = vrot.slane %v3176_v15, 2  ;;  %v3241_v58 = vrot.slane %v9063_v28, 2 }
 0x277   :  { %v3218_v38 = vsel %vm1839_vm1, %v3216_v16, %v3217_v49  ;;  %v3221_v4 = vsel %vm1839_vm1, %v3219_v61, %v3220_v52  ;;  %v3224_v2 = vsel %vm1839_vm1, %v3222_v25, %v3223_v40  ;;  %v3227_v53 = vsel %vm1839_vm1, %v3225_v9, %v3226_v31 }
 0x278   :  { %v3230_v55 = vsel %vm1839_vm1, %v3228_v54, %v3229_v32  ;;  %v3233_v34 = vsel %vm1839_vm1, %v3231_v6, %v3232_v17  ;;  %v3236_v3 = vsel %vm1839_vm1, %v3234_v35, %v3235_v7  ;;  %v3269_v47 = vadd.f32 %v3206_v18, %v8909_v51 }
 0x279   :  { %v3239_v19 = vsel %vm1839_vm1, %v3237_v8, %v3238_v1  ;;  %v3270_v16 = vadd.f32 %v3205_v37, %v8912_v48  ;;  %v3271_v61 = vadd.f32 %v3209_v21, %v8915_v27  ;;  %v3272_v44 = vadd.f32 %v3208_v10, %v8919_v30  ;;  %v12065_v21 = vld [vmem:[#allocation81_spill] sm:$0xff] }
 0x27a   :  { %v3242_v9 = vsel %vm1839_vm1, %v3240_v63, %v3241_v58  ;;  %v3273_v5 = vadd.f32 %v3212_v0, %v8922_v42  ;;  %v3274_v15 = vadd.f32 %v3211_v36, %v8925_v45  ;;  %v3275_v12 = vadd.f32 %v3215_v33, %v8928_v41  ;;  %v12057_v36 = vld [vmem:[#allocation77_spill] sm:$0xff]  ;;  %v12067_v33 = vld [vmem:[#allocation83_spill] sm:$0xff] }
 0x27b   :  { %v3276_v28 = vadd.f32 %v3214_v56, %v8931_v14  ;;  %v3277_v51 = vadd.f32 %v3218_v38, %v8934_v57  ;;  %v3278_v25 = vadd.f32 %v3217_v49, %v8937_v20  ;;  %v3279_v48 = vadd.f32 %v3221_v4, %v8940_v46  ;;  %v12069_v4 = vld [vmem:[#allocation85_spill] sm:$0xff] }
 0x27c   :  { %v3280_v27 = vadd.f32 %v3220_v52, %v8943_v50  ;;  %v3281_v30 = vadd.f32 %v3224_v2, %v8946_v39  ;;  %v3282_v10 = vadd.f32 %v3223_v40, %v8949_v59  ;;  %v3283_v42 = vadd.f32 %v3227_v53, %v8952_v43  ;;  %v12053_v52 = vld [vmem:[#allocation100_spill] sm:$0xff]  ;;  %v12070_v53 = vld [vmem:[#allocation86_spill] sm:$0xff] }
 0x27d   :  { %v3284_v45 = vadd.f32 %v3226_v31, %v8955_v26  ;;  %v3285_v41 = vadd.f32 %v3230_v55, %v8958_v62  ;;  %v3286_v14 = vadd.f32 %v3229_v32, %v8961_v24  ;;  %v3295_v57 = vstv %s9076_s21  ;;  %v12054_v26 = vld [vmem:[#allocation101_spill] sm:$0xff]  ;;  %v12056_v62 = vld [vmem:[#allocation76_spill] sm:$0xff] }
 0x27e   :  { %v3287_v20 = vadd.f32 %v3233_v34, %v8964_v60  ;;  %v3288_v46 = vadd.f32 %v3232_v17, %v8967_v22  ;;  %v3289_v50 = vadd.f32 %v3236_v3, %v8970_v11  ;;  %v3290_v39 = vadd.f32 %v3235_v7, %v8973_v29  ;;  %v12058_v60 = vld [vmem:[#allocation78_spill] sm:$0xff]  ;;  %v12059_v11 = vld [vmem:[#allocation79_spill] sm:$0xff]  ;;  %v12060_v29 = vld [vmem:[#allocation20_spill] sm:$0xff] }
 0x27f   :  { %v3291_v59 = vadd.f32 %v3239_v19, %v8976_v23  ;;  %v3292_v43 = vadd.f32 %v3238_v1, %v8979_v13  ;;  %v3293_v49 = vadd.f32 %v3242_v9, %v12053_v52  ;;  %v9122_v56 = vadd.f32 %v3241_v58, %v12054_v26  ;;  %v12061_v23 = vld [vmem:[#allocation21_spill] sm:$0xff]  ;;  %v12062_v13 = vld [vmem:[#allocation22_spill] sm:$0xff]  ;;  %v12063_v17 = vld [vmem:[#allocation23_spill] sm:$0xff] }
 0x280   :  { %v3296_v24 = vmul.f32 %v3295_v57, %v12056_v62  ;;  %v3297_v37 = vmul.f32 %v3295_v57, %v12057_v36  ;;  %v3298_v40 = vmul.f32 %v3295_v57, %v12058_v60  ;;  %v9128_v22 = vstv %s9088_s22  ;;  %v12064_v7 = vld [vmem:[#allocation80_spill] sm:$0xff]  ;;  %v12066_v1 = vld [vmem:[#allocation82_spill] sm:$0xff]  ;;  %v12071_v34 = vld [vmem:[#allocation87_spill] sm:$0xff] }
 0x281   :  { %12055 = vst [vmem:[#allocation102_spill] sm:$0xff] %v9122_v56  ;;  %v3299_v31 = vmul.f32 %v3295_v57, %v12059_v11  ;;  %v3300_v54 = vmul.f32 %v3295_v57, %v12060_v29  ;;  %v3301_v32 = vmul.f32 %v3295_v57, %v12061_v23  ;;  %v3302_v6 = vmul.f32 %v3295_v57, %v12062_v13  ;;  %v12068_v58 = vld [vmem:[#allocation84_spill] sm:$0xff]  ;;  %v12073_v52 = vld [vmem:[#allocation89_spill] sm:$0xff]  ;;  %v12074_v56 = vld [vmem:[#allocation90_spill] sm:$0xff] }
 0x282   :  { %v3303_v35 = vmul.f32 %v3295_v57, %v12063_v17  ;;  %v3304_v18 = vmul.f32 %v3295_v57, %v12064_v7  ;;  %v3305_v8 = vmul.f32 %v3295_v57, %v12065_v21  ;;  %v3306_v0 = vmul.f32 %v3295_v57, %v12066_v1  ;;  %v12072_v19 = vld [vmem:[#allocation88_spill] sm:$0xff]  ;;  %v12075_v17 = vld [vmem:[#allocation91_spill] sm:$0xff]  ;;  %v12077_v23 = vld [vmem:[#allocation93_spill] sm:$0xff] }
 0x283   :  { %v3307_v63 = vmul.f32 %v3295_v57, %v12067_v33  ;;  %v3308_v38 = vmul.f32 %v3295_v57, %v12068_v58  ;;  %v3309_v2 = vmul.f32 %v3295_v57, %v12069_v4  ;;  %v3310_v55 = vmul.f32 %v3295_v57, %v12070_v53  ;;  %v12076_v13 = vld [vmem:[#allocation92_spill] sm:$0xff]  ;;  %v12078_v29 = vld [vmem:[#allocation94_spill] sm:$0xff]  ;;  %v12079_v11 = vld [vmem:[#allocation95_spill] sm:$0xff] }
 0x284   :  { %v3311_v3 = vmul.f32 %v3295_v57, %v12071_v34  ;;  %v3312_v9 = vmul.f32 %v3295_v57, %v12072_v19  ;;  %v3313_v26 = vmul.f32 %v3295_v57, %v12073_v52  ;;  %v3314_v7 = vmul.f32 %v3295_v57, %v12074_v56  ;;  %v12080_v60 = vld [vmem:[#allocation96_spill] sm:$0xff]  ;;  %v12081_v36 = vld [vmem:[#allocation97_spill] sm:$0xff] }
 0x285   :  { %v3315_v21 = vmul.f32 %v3295_v57, %v12075_v17  ;;  %v3316_v1 = vmul.f32 %v3295_v57, %v12076_v13  ;;  %v3317_v33 = vmul.f32 %v3295_v57, %v12077_v23  ;;  %v3318_v58 = vmul.f32 %v3295_v57, %v12078_v29 }
 0x286   :  { %v3319_v4 = vmul.f32 %v3295_v57, %v12079_v11  ;;  %v3320_v53 = vmul.f32 %v3295_v57, %v12080_v60  ;;  %v9153_v34 = vmul.f32 %v3295_v57, %v12081_v36  ;;  %v9155_v19 = vadd.f32 %v3296_v24, %v3269_v47  ;;  %v12088_v24 = vld [vmem:[#allocation21_spill] sm:$0xff] }
 0x287   :  { %v9157_v52 = vadd.f32 %v3297_v37, %v3270_v16  ;;  %v9159_v56 = vadd.f32 %v3298_v40, %v3271_v61  ;;  %v9161_v17 = vadd.f32 %v3299_v31, %v3272_v44  ;;  %v9163_v13 = vadd.f32 %v3300_v54, %v3273_v5  ;;  %v12089_v37 = vld [vmem:[#allocation22_spill] sm:$0xff]  ;;  %v12090_v31 = vld [vmem:[#allocation23_spill] sm:$0xff] }
 0x288   :  { %v9165_v23 = vadd.f32 %v3301_v32, %v3274_v15  ;;  %v9167_v29 = vadd.f32 %v3302_v6, %v3275_v12  ;;  %v9169_v11 = vadd.f32 %v3303_v35, %v3276_v28  ;;  %v9171_v60 = vadd.f32 %v3304_v18, %v3277_v51  ;;  %v12091_v32 = vld [vmem:[#allocation80_spill] sm:$0xff]  ;;  %v12092_v35 = vld [vmem:[#allocation81_spill] sm:$0xff]  ;;  %v12093_v18 = vld [vmem:[#allocation82_spill] sm:$0xff] }
 0x289   :  { %v9173_v57 = vadd.f32 %v3305_v8, %v3278_v25  ;;  %v9175_v47 = vadd.f32 %v3306_v0, %v3279_v48  ;;  %v9177_v16 = vadd.f32 %v3307_v63, %v3280_v27  ;;  %v9179_v61 = vadd.f32 %v3308_v38, %v3281_v30  ;;  %v12094_v8 = vld [vmem:[#allocation83_spill] sm:$0xff]  ;;  %v12095_v0 = vld [vmem:[#allocation84_spill] sm:$0xff]  ;;  %v12096_v63 = vld [vmem:[#allocation85_spill] sm:$0xff] }
 0x28a   :  { %v9181_v44 = vadd.f32 %v3309_v2, %v3282_v10  ;;  %v9183_v5 = vadd.f32 %v3310_v55, %v3283_v42  ;;  %v9185_v15 = vadd.f32 %v3311_v3, %v3284_v45  ;;  %v9187_v12 = vadd.f32 %v3312_v9, %v3285_v41  ;;  %v12084_v41 = vld [vmem:[#allocation77_spill] sm:$0xff]  ;;  %v12097_v38 = vld [vmem:[#allocation86_spill] sm:$0xff]  ;;  %v12098_v2 = vld [vmem:[#allocation87_spill] sm:$0xff] }
 0x28b   :  { %v9189_v28 = vadd.f32 %v3313_v26, %v3286_v14  ;;  %v9191_v51 = vadd.f32 %v3314_v7, %v3287_v20  ;;  %v9193_v25 = vadd.f32 %v3315_v21, %v3288_v46  ;;  %v9195_v48 = vadd.f32 %v3316_v1, %v3289_v50  ;;  %v12085_v20 = vld [vmem:[#allocation78_spill] sm:$0xff]  ;;  %v12086_v50 = vld [vmem:[#allocation79_spill] sm:$0xff]  ;;  %v12099_v55 = vld [vmem:[#allocation88_spill] sm:$0xff] }
 0x28c   :  { %v9197_v27 = vadd.f32 %v3317_v33, %v3290_v39  ;;  %v9199_v30 = vadd.f32 %v3318_v58, %v3291_v59  ;;  %v9201_v10 = vadd.f32 %v3319_v4, %v3292_v43  ;;  %v9203_v42 = vadd.f32 %v3320_v53, %v3293_v49  ;;  %v12087_v59 = vld [vmem:[#allocation20_spill] sm:$0xff]  ;;  %v12100_v9 = vld [vmem:[#allocation89_spill] sm:$0xff] }
 0x28d   :  { %v3349_v45 = vmul.f32 %v9128_v22, %v12056_v62  ;;  %v9209_v14 = vmul.f32 %v9128_v22, %v12084_v41  ;;  %v3351_v46 = vmul.f32 %v9128_v22, %v12085_v20  ;;  %v9215_v39 = vmul.f32 %v9128_v22, %v12086_v50 }
 0x28e   :  { %12082 = vst [vmem:[#allocation71_spill] sm:$0xff] %v9201_v10  ;;  %v3353_v43 = vmul.f32 %v9128_v22, %v12087_v59  ;;  %v9221_v49 = vmul.f32 %v9128_v22, %v12088_v24  ;;  %v3355_v40 = vmul.f32 %v9128_v22, %v12089_v37  ;;  %v9227_v54 = vmul.f32 %v9128_v22, %v12090_v31  ;;  %v12105_v31 = vld [vmem:[#allocation94_spill] sm:$0xff]  ;;  %v12106_v37 = vld [vmem:[#allocation95_spill] sm:$0xff]  ;;  %v12107_v24 = vld [vmem:[#allocation96_spill] sm:$0xff] }
 0x28f   :  { %12083 = vst [vmem:[#allocation104_spill] sm:$0xff] %v9203_v42  ;;  %v3357_v6 = vmul.f32 %v9128_v22, %v12091_v32  ;;  %v9233_v7 = vmul.f32 %v9128_v22, %v12092_v35  ;;  %v3359_v21 = vmul.f32 %v9128_v22, %v12093_v18  ;;  %v9239_v1 = vmul.f32 %v9128_v22, %v12094_v8  ;;  %v12101_v8 = vld [vmem:[#allocation90_spill] sm:$0xff]  ;;  %v12102_v18 = vld [vmem:[#allocation91_spill] sm:$0xff]  ;;  %v12103_v35 = vld [vmem:[#allocation92_spill] sm:$0xff] }
 0x290   :  { %v3361_v33 = vmul.f32 %v9128_v22, %v12095_v0  ;;  %v9245_v58 = vmul.f32 %v9128_v22, %v12096_v63  ;;  %v3363_v4 = vmul.f32 %v9128_v22, %v12097_v38  ;;  %v9251_v53 = vmul.f32 %v9128_v22, %v12098_v2  ;;  %v12104_v32 = vld [vmem:[#allocation93_spill] sm:$0xff] }
 0x291   :  { %v3365_v3 = vmul.f32 %v9128_v22, %v12099_v55  ;;  %v9257_v26 = vmul.f32 %v9128_v22, %v12100_v9  ;;  %v3367_v0 = vmul.f32 %v9128_v22, %v12101_v8  ;;  %v9263_v63 = vmul.f32 %v9128_v22, %v12102_v18 }
 0x292   :  { %v3369_v38 = vmul.f32 %v9128_v22, %v12103_v35  ;;  %v9269_v2 = vmul.f32 %v9128_v22, %v12104_v32  ;;  %v3371_v55 = vmul.f32 %v9128_v22, %v12105_v31  ;;  %v9275_v9 = vmul.f32 %v9128_v22, %v12106_v37 }
 0x293   :  { %v3373_v8 = vmul.f32 %v9128_v22, %v12107_v24  ;;  %v9281_v18 = vmul.f32 %v9128_v22, %v12081_v36  ;;  %v3401_v59 = vrot.slane %v3349_v45, 1  ;;  %v3402_v35 = vrot.slane %v9209_v14, 1 }
 0x294   :  { %v3404_v50 = vrot.slane %v3351_v46, 1  ;;  %v3405_v32 = vrot.slane %v9215_v39, 1  ;;  %v3407_v20 = vrot.slane %v3353_v43, 1  ;;  %v3408_v31 = vrot.slane %v9221_v49, 1 }
 0x295   :  { %v3410_v41 = vrot.slane %v3355_v40, 1  ;;  %v3411_v37 = vrot.slane %v9227_v54, 1  ;;  %v3413_v62 = vrot.slane %v3357_v6, 1  ;;  %v3414_v42 = vrot.slane %v9233_v7, 1  ;;  %v12108_v6 = vld [vmem:[#allocation102_spill] sm:$0xff] }
 0x296   :  { %v3416_v24 = vrot.slane %v3359_v21, 1  ;;  %v3417_v10 = vrot.slane %v9239_v1, 1  ;;  %v3419_v22 = vrot.slane %v3361_v33, 1  ;;  %v3420_v45 = vrot.slane %v9245_v58, 1 }
 0x297   :  { %v3422_v36 = vrot.slane %v3363_v4, 1  ;;  %v3423_v14 = vrot.slane %v9251_v53, 1  ;;  %v3425_v46 = vrot.slane %v3365_v3, 1  ;;  %v3426_v39 = vrot.slane %v9257_v26, 1 }
 0x298   :  { %v3428_v43 = vrot.slane %v3367_v0, 1  ;;  %v3429_v49 = vrot.slane %v9263_v63, 1  ;;  %v3431_v40 = vrot.slane %v3369_v38, 1  ;;  %v3432_v54 = vrot.slane %v9269_v2, 1 }
 0x299   :  { %v9298_v7 = vadd.f32 %v9153_v34, %v12108_v6  ;;  %v3403_v21 = vsel %vm255_vm0, %v3401_v59, %v3402_v35  ;;  %v3434_v1 = vrot.slane %v3371_v55, 1  ;;  %v3435_v33 = vrot.slane %v9275_v9, 1  ;;  %v12122_v6 = vld [vmem:[#allocation80_spill] sm:$0xff] }
 0x29a   :  { %v3406_v58 = vsel %vm255_vm0, %v3404_v50, %v3405_v32  ;;  %v3409_v0 = vsel %vm255_vm0, %v3407_v20, %v3408_v31  ;;  %v3437_v4 = vrot.slane %v3373_v8, 1  ;;  %v11099_v63 = vrot.slane %v9281_v18, 1 }
 0x29b   :  { %v3412_v38 = vsel %vm255_vm0, %v3410_v41, %v3411_v37  ;;  %v3415_v2 = vsel %vm255_vm0, %v3413_v62, %v3414_v42  ;;  %v3418_v53 = vsel %vm255_vm0, %v3416_v24, %v3417_v10  ;;  %v3421_v34 = vsel %vm255_vm0, %v3419_v22, %v3420_v45  ;;  %v12116_v22 = vld [vmem:[#allocation78_spill] sm:$0xff] }
 0x29c   :  { %v3424_v59 = vsel %vm255_vm0, %v3422_v36, %v3423_v14  ;;  %v3427_v55 = vsel %vm255_vm0, %v3425_v46, %v3426_v39  ;;  %v3430_v3 = vsel %vm255_vm0, %v3428_v43, %v3429_v49  ;;  %v3433_v50 = vsel %vm255_vm0, %v3431_v40, %v3432_v54  ;;  %v12120_v43 = vld [vmem:[#allocation22_spill] sm:$0xff]  ;;  %v12121_v40 = vld [vmem:[#allocation23_spill] sm:$0xff] }
 0x29d   :  { %v3436_v20 = vsel %vm255_vm0, %v3434_v1, %v3435_v33  ;;  %v9315_v8 = vadd.f32 %v3403_v21, %v9155_v19  ;;  %v9318_v41 = vadd.f32 %v3402_v35, %v9157_v52  ;;  %v9321_v62 = vadd.f32 %v3406_v58, %v9159_v56  ;;  %v12123_v1 = vld [vmem:[#allocation81_spill] sm:$0xff]  ;;  %v12124_v58 = vld [vmem:[#allocation82_spill] sm:$0xff] }
 0x29e   :  { %v3439_v36 = vsel %vm255_vm0, %v3437_v4, %v11099_v63  ;;  %v9327_v24 = vadd.f32 %v3405_v32, %v9161_v17  ;;  %v9330_v9 = vadd.f32 %v3409_v0, %v9163_v13  ;;  %v9333_v19 = vadd.f32 %v3408_v31, %v9165_v23  ;;  %v12115_v32 = vld [vmem:[#allocation77_spill] sm:$0xff]  ;;  %v12125_v4 = vld [vmem:[#allocation83_spill] sm:$0xff] }
 0x29f   :  { %v9336_v52 = vadd.f32 %v3412_v38, %v9167_v29  ;;  %v9339_v56 = vadd.f32 %v3411_v37, %v9169_v11  ;;  %v9342_v35 = vadd.f32 %v3415_v2, %v9171_v60  ;;  %v9345_v26 = vadd.f32 %v3414_v42, %v9173_v57  ;;  %v12126_v2 = vld [vmem:[#allocation84_spill] sm:$0xff] }
 0x2a0   :  { %v9348_v17 = vadd.f32 %v3418_v53, %v9175_v47  ;;  %v9351_v13 = vadd.f32 %v3417_v10, %v9177_v16  ;;  %v9354_v23 = vadd.f32 %v3421_v34, %v9179_v61  ;;  %v9357_v29 = vadd.f32 %v3420_v45, %v9181_v44  ;;  %v12117_v45 = vld [vmem:[#allocation79_spill] sm:$0xff]  ;;  %v12127_v34 = vld [vmem:[#allocation85_spill] sm:$0xff] }
 0x2a1   :  { %v9360_v11 = vadd.f32 %v3424_v59, %v9183_v5  ;;  %v9363_v60 = vadd.f32 %v3423_v14, %v9185_v15  ;;  %v9366_v57 = vadd.f32 %v3427_v55, %v9187_v12  ;;  %v3492_v47 = vstv %s9294_s23  ;;  %v12110_v12 = vld [vmem:[#allocation71_spill] sm:$0xff]  ;;  %v12128_v55 = vld [vmem:[#allocation86_spill] sm:$0xff] }
 0x2a2   :  { %v9370_v42 = vadd.f32 %v3426_v39, %v9189_v28  ;;  %v9373_v16 = vadd.f32 %v3430_v3, %v9191_v51  ;;  %v9376_v61 = vadd.f32 %v3429_v49, %v9193_v25  ;;  %v9379_v44 = vadd.f32 %v3433_v50, %v9195_v48  ;;  %v12112_v28 = vld [vmem:[#allocation104_spill] sm:$0xff]  ;;  %v12129_v50 = vld [vmem:[#allocation87_spill] sm:$0xff] }
 0x2a3   :  { %v9382_v5 = vadd.f32 %v3432_v54, %v9197_v27  ;;  %v9385_v15 = vadd.f32 %v3436_v20, %v9199_v30  ;;  %v9388_v10 = vadd.f32 %v3435_v33, %v12110_v12  ;;  %v9391_v37 = vadd.f32 %v3439_v36, %v12112_v28  ;;  %v12114_v51 = vld [vmem:[#allocation76_spill] sm:$0xff]  ;;  %v12119_v30 = vld [vmem:[#allocation21_spill] sm:$0xff] }
 0x2a4   :  { %v3493_v31 = vmul.f32 %v3492_v47, %v12114_v51  ;;  %v9395_v25 = vmul.f32 %v3492_v47, %v12115_v32  ;;  %v3495_v48 = vmul.f32 %v3492_v47, %v12116_v22  ;;  %v9399_v14 = vmul.f32 %v3492_v47, %v12117_v45  ;;  %v12118_v27 = vld [vmem:[#allocation20_spill] sm:$0xff]  ;;  %v12131_v28 = vld [vmem:[#allocation89_spill] sm:$0xff]  ;;  %v12132_v32 = vld [vmem:[#allocation90_spill] sm:$0xff] }
 0x2a5   :  { %12109 = vst [vmem:[#allocation107_spill] sm:$0xff] %v9385_v15  ;;  %v3497_v46 = vmul.f32 %v3492_v47, %v12118_v27  ;;  %v9403_v39 = vmul.f32 %v3492_v47, %v12119_v30  ;;  %v3499_v49 = vmul.f32 %v3492_v47, %v12120_v43  ;;  %v9407_v54 = vmul.f32 %v3492_v47, %v12121_v40  ;;  %v12130_v36 = vld [vmem:[#allocation88_spill] sm:$0xff]  ;;  %v12133_v45 = vld [vmem:[#allocation91_spill] sm:$0xff]  ;;  %v12135_v40 = vld [vmem:[#allocation93_spill] sm:$0xff] }
 0x2a6   :  { %12111 = vst [vmem:[#allocation49_spill] sm:$0xff] %v9388_v10  ;;  %v3501_v21 = vmul.f32 %v3492_v47, %v12122_v6  ;;  %v9411_v33 = vmul.f32 %v3492_v47, %v12123_v1  ;;  %v3503_v0 = vmul.f32 %v3492_v47, %v12124_v58  ;;  %v9415_v38 = vmul.f32 %v3492_v47, %v12125_v4  ;;  %v12134_v30 = vld [vmem:[#allocation92_spill] sm:$0xff]  ;;  %v12136_v1 = vld [vmem:[#allocation94_spill] sm:$0xff]  ;;  %v12137_v4 = vld [vmem:[#allocation95_spill] sm:$0xff] }
 0x2a7   :  { %12113 = vst [vmem:[#allocation50_spill] sm:$0xff] %v9391_v37  ;;  %v3505_v53 = vmul.f32 %v3492_v47, %v12126_v2  ;;  %v9419_v59 = vmul.f32 %v3492_v47, %v12127_v34  ;;  %v3507_v3 = vmul.f32 %v3492_v47, %v12128_v55  ;;  %v9423_v20 = vmul.f32 %v3492_v47, %v12129_v50  ;;  %v12138_v34 = vld [vmem:[#allocation96_spill] sm:$0xff]  ;;  %v12139_v50 = vld [vmem:[#allocation97_spill] sm:$0xff] }
 0x2a8   :  { %v3509_v12 = vmul.f32 %v3492_v47, %v12130_v36  ;;  %v9427_v51 = vmul.f32 %v3492_v47, %v12131_v28  ;;  %v3511_v22 = vmul.f32 %v3492_v47, %v12132_v32  ;;  %v9431_v27 = vmul.f32 %v3492_v47, %v12133_v45 }
 0x2a9   :  { %v3513_v43 = vmul.f32 %v3492_v47, %v12134_v30  ;;  %v9435_v6 = vmul.f32 %v3492_v47, %v12135_v40  ;;  %v3515_v58 = vmul.f32 %v3492_v47, %v12136_v1  ;;  %v9439_v2 = vmul.f32 %v3492_v47, %v12137_v4 }
 0x2aa   :  { %v3517_v55 = vmul.f32 %v3492_v47, %v12138_v34  ;;  %v9443_v36 = vmul.f32 %v3492_v47, %v12139_v50  ;;  %v3545_v28 = vrot.slane %v3493_v31, 2  ;;  %v3546_v32 = vrot.slane %v9395_v25, 2 }
 0x2ab   :  { %v3548_v45 = vrot.slane %v3495_v48, 2  ;;  %v3549_v63 = vrot.slane %v9399_v14, 2  ;;  %v3551_v30 = vrot.slane %v3497_v46, 2  ;;  %v3552_v40 = vrot.slane %v9403_v39, 2 }
 0x2ac   :  { %v3554_v37 = vrot.slane %v3499_v49, 2  ;;  %v3555_v1 = vrot.slane %v9407_v54, 2  ;;  %v3557_v10 = vrot.slane %v3501_v21, 2  ;;  %v3558_v4 = vrot.slane %v9411_v33, 2 }
 0x2ad   :  { %v3560_v15 = vrot.slane %v3503_v0, 2  ;;  %v3561_v34 = vrot.slane %v9415_v38, 2  ;;  %v3563_v47 = vrot.slane %v3505_v53, 2  ;;  %v3564_v31 = vrot.slane %v9419_v59, 2 }
 0x2ae   :  { %v3566_v50 = vrot.slane %v3507_v3, 2  ;;  %v3567_v25 = vrot.slane %v9423_v20, 2  ;;  %v3569_v48 = vrot.slane %v3509_v12, 2  ;;  %v3570_v14 = vrot.slane %v9427_v51, 2 }
 0x2af   :  { %v3572_v46 = vrot.slane %v3511_v22, 2  ;;  %v3573_v39 = vrot.slane %v9431_v27, 2  ;;  %v3575_v49 = vrot.slane %v3513_v43, 2  ;;  %v3576_v54 = vrot.slane %v9435_v6, 2 }
 0x2b0   :  { %v12140_v21 = vrot.slane %v9281_v18, 1  ;;  %v3547_v0 = vsel %vm1839_vm1, %v3545_v28, %v3546_v32  ;;  %v3578_v38 = vrot.slane %v3515_v58, 2  ;;  %v3579_v53 = vrot.slane %v9439_v2, 2 }
 0x2b1   :  { %v3550_v59 = vsel %vm1839_vm1, %v3548_v45, %v3549_v63  ;;  %v3553_v3 = vsel %vm1839_vm1, %v3551_v30, %v3552_v40  ;;  %v3581_v20 = vrot.slane %v3517_v55, 2  ;;  %v3582_v12 = vrot.slane %v9443_v36, 2 }
 0x2b2   :  { %v3491_v33 = vadd.f32 %v12140_v21, %v9298_v7  ;;  %v3556_v51 = vsel %vm1839_vm1, %v3554_v37, %v3555_v1  ;;  %v3559_v22 = vsel %vm1839_vm1, %v3557_v10, %v3558_v4  ;;  %v3562_v27 = vsel %vm1839_vm1, %v3560_v15, %v3561_v34 }
 0x2b3   :  { %v3565_v18 = vsel %vm1839_vm1, %v3563_v47, %v3564_v31  ;;  %v3568_v7 = vsel %vm1839_vm1, %v3566_v50, %v3567_v25  ;;  %v3571_v43 = vsel %vm1839_vm1, %v3569_v48, %v3570_v14  ;;  %v3574_v6 = vsel %vm1839_vm1, %v3572_v46, %v3573_v39 }
 0x2b4   :  { %v3577_v58 = vsel %vm1839_vm1, %v3575_v49, %v3576_v54  ;;  %v3580_v2 = vsel %vm1839_vm1, %v3578_v38, %v3579_v53  ;;  %v3610_v55 = vadd.f32 %v3547_v0, %v9315_v8  ;;  %v3611_v37 = vadd.f32 %v3546_v32, %v9318_v41  ;;  %v12152_v0 = vld [vmem:[#allocation31_spill] sm:$0xff]  ;;  %v12153_v38 = vld [vmem:[#allocation32_spill] sm:$0xff] }
 0x2b5   :  { %v3612_v10 = vadd.f32 %v3550_v59, %v9321_v62  ;;  %v3583_v15 = vsel %vm1839_vm1, %v3581_v20, %v3582_v12  ;;  %v3613_v36 = vadd.f32 %v3549_v63, %v9327_v24  ;;  %v3614_v28 = vadd.f32 %v3553_v3, %v9330_v9  ;;  %v12154_v59 = vld [vmem:[#allocation33_spill] sm:$0xff]  ;;  %v12155_v20 = vld [vmem:[#allocation34_spill] sm:$0xff] }
 0x2b6   :  { %v3615_v45 = vadd.f32 %v3552_v40, %v9333_v19  ;;  %v3616_v30 = vadd.f32 %v3556_v51, %v9336_v52  ;;  %v3617_v47 = vadd.f32 %v3555_v1, %v9339_v56  ;;  %v3618_v50 = vadd.f32 %v3559_v22, %v9342_v35  ;;  %v12156_v51 = vld [vmem:[#allocation35_spill] sm:$0xff] }
 0x2b7   :  { %v3619_v8 = vadd.f32 %v3558_v4, %v9345_v26  ;;  %v3620_v41 = vadd.f32 %v3562_v27, %v9348_v17  ;;  %v3621_v62 = vadd.f32 %v3561_v34, %v9351_v13  ;;  %v3622_v32 = vadd.f32 %v3565_v18, %v9354_v23  ;;  %v12141_v23 = vld [vmem:[#allocation107_spill] sm:$0xff]  ;;  %v12157_v27 = vld [vmem:[#allocation36_spill] sm:$0xff] }
 0x2b8   :  { %v3623_v63 = vadd.f32 %v3564_v31, %v9357_v29  ;;  %v3624_v24 = vadd.f32 %v3568_v7, %v9360_v11  ;;  %v3625_v9 = vadd.f32 %v3567_v25, %v9363_v60  ;;  %v3626_v19 = vadd.f32 %v3571_v43, %v9366_v57  ;;  %v12142_v29 = vld [vmem:[#allocation49_spill] sm:$0xff]  ;;  %v12143_v11 = vld [vmem:[#allocation50_spill] sm:$0xff]  ;;  %v12144_v34 = vld [vmem:[#allocation103_spill] sm:$0xff] }
 0x2b9   :  { %v3636_v52 = vstv %s9456_s24  ;;  %v3627_v56 = vadd.f32 %v3570_v14, %v9370_v42  ;;  %v3628_v35 = vadd.f32 %v3574_v6, %v9373_v16  ;;  %v3629_v26 = vadd.f32 %v3573_v39, %v9376_v61  ;;  %v12145_v31 = vld [vmem:[#allocation24_spill] sm:$0xff]  ;;  %v12146_v42 = vld [vmem:[#allocation25_spill] sm:$0xff]  ;;  %v12147_v16 = vld [vmem:[#allocation26_spill] sm:$0xff] }
 0x2ba   :  { %v3630_v17 = vadd.f32 %v3577_v58, %v9379_v44  ;;  %v3631_v13 = vadd.f32 %v3576_v54, %v9382_v5  ;;  %v3632_v40 = vadd.f32 %v3580_v2, %v12141_v23  ;;  %v3633_v1 = vadd.f32 %v3579_v53, %v12142_v29  ;;  %v12148_v61 = vld [vmem:[#allocation28_spill] sm:$0xff]  ;;  %v12149_v44 = vld [vmem:[#allocation29_spill] sm:$0xff]  ;;  %v12150_v5 = vld [vmem:[#allocation39_spill] sm:$0xff] }
 0x2bb   :  { %v3634_v4 = vadd.f32 %v3583_v15, %v12143_v11  ;;  %v3635_v60 = vadd.f32 %v3582_v12, %v3491_v33  ;;  %v3637_v57 = vmul.f32 %v3636_v52, %v12144_v34  ;;  %v3638_v25 = vmul.f32 %v3636_v52, %v12145_v31  ;;  %v12151_v54 = vld [vmem:[#allocation30_spill] sm:$0xff]  ;;  %v12158_v7 = vld [vmem:[#allocation37_spill] sm:$0xff]  ;;  %v12161_v23 = vld [vmem:[#allocation11_spill] sm:$0xff] }
 0x2bc   :  { %v3639_v48 = vmul.f32 %v3636_v52, %v12146_v42  ;;  %v3640_v14 = vmul.f32 %v3636_v52, %v12147_v16  ;;  %v3641_v46 = vmul.f32 %v3636_v52, %v12148_v61  ;;  %v3642_v39 = vmul.f32 %v3636_v52, %v12149_v44  ;;  %v12159_v6 = vld [vmem:[#allocation38_spill] sm:$0xff]  ;;  %v12162_v11 = vld [vmem:[#allocation12_spill] sm:$0xff]  ;;  %v12166_v61 = vld [vmem:[#allocation17_spill] sm:$0xff] }
 0x2bd   :  { %v3643_v49 = vmul.f32 %v3636_v52, %v12150_v5  ;;  %v3644_v21 = vmul.f32 %v3636_v52, %v12151_v54  ;;  %v3645_v33 = vmul.f32 %v3636_v52, %v12152_v0  ;;  %v3646_v53 = vmul.f32 %v3636_v52, %v12153_v38  ;;  %v12160_v2 = vld [vmem:[#allocation10_spill] sm:$0xff]  ;;  %v12164_v5 = vld [vmem:[#allocation15_spill] sm:$0xff]  ;;  %v12165_v44 = vld [vmem:[#allocation16_spill] sm:$0xff] }
 0x2be   :  { %v3647_v3 = vmul.f32 %v3636_v52, %v12154_v59  ;;  %v3648_v12 = vmul.f32 %v3636_v52, %v12155_v20  ;;  %v3649_v22 = vmul.f32 %v3636_v52, %v12156_v51  ;;  %v3650_v18 = vmul.f32 %v3636_v52, %v12157_v27  ;;  %v12163_v54 = vld [vmem:[#allocation14_spill] sm:$0xff]  ;;  %v12168_v42 = vld [vmem:[#allocation19_spill] sm:$0xff]  ;;  %v12169_v31 = vld [vmem:[#allocation72_spill] sm:$0xff] }
 0x2bf   :  { %v3651_v43 = vmul.f32 %v3636_v52, %v12158_v7  ;;  %v3652_v58 = vmul.f32 %v3636_v52, %v12159_v6  ;;  %v3653_v15 = vmul.f32 %v3636_v52, %v12160_v2  ;;  %v3654_v29 = vmul.f32 %v3636_v52, %v12161_v23  ;;  %v12167_v16 = vld [vmem:[#allocation18_spill] sm:$0xff] }
 0x2c0   :  { %v3655_v0 = vmul.f32 %v3636_v52, %v12162_v11  ;;  %v3656_v38 = vmul.f32 %v3636_v52, %v12163_v54  ;;  %v3657_v59 = vmul.f32 %v3636_v52, %v12164_v5  ;;  %v3658_v20 = vmul.f32 %v3636_v52, %v12165_v44 }
 0x2c1   :  { %v3659_v51 = vmul.f32 %v3636_v52, %v12166_v61  ;;  %v3660_v27 = vmul.f32 %v3636_v52, %v12167_v16  ;;  %v3661_v7 = vmul.f32 %v3636_v52, %v12168_v42  ;;  %v3662_v6 = vmul.f32 %v3636_v52, %v12169_v31 }
 0x2c2   :  { %v9530_v34 = vadd.f32 %v3637_v57, %v3610_v55  ;;  %v9532_v23 = vadd.f32 %v3638_v25, %v3611_v37  ;;  %v9534_v11 = vadd.f32 %v3639_v48, %v3612_v10  ;;  %v9536_v54 = vadd.f32 %v3640_v14, %v3613_v36  ;;  %v12175_v14 = vld [vmem:[#allocation26_spill] sm:$0xff] }
 0x2c3   :  { %v9538_v5 = vadd.f32 %v3641_v46, %v3614_v28  ;;  %v9540_v44 = vadd.f32 %v3642_v39, %v3615_v45  ;;  %v9542_v61 = vadd.f32 %v3643_v49, %v3616_v30  ;;  %v9544_v16 = vadd.f32 %v3644_v21, %v3617_v47  ;;  %v12179_v49 = vld [vmem:[#allocation30_spill] sm:$0xff]  ;;  %v12180_v21 = vld [vmem:[#allocation31_spill] sm:$0xff] }
 0x2c4   :  { %v9546_v42 = vadd.f32 %v3645_v33, %v3618_v50  ;;  %v9548_v52 = vadd.f32 %v3646_v53, %v3619_v8  ;;  %v9550_v55 = vadd.f32 %v3647_v3, %v3620_v41  ;;  %v9552_v37 = vadd.f32 %v3648_v12, %v3621_v62  ;;  %v12181_v33 = vld [vmem:[#allocation32_spill] sm:$0xff]  ;;  %v12182_v53 = vld [vmem:[#allocation33_spill] sm:$0xff]  ;;  %v12183_v3 = vld [vmem:[#allocation34_spill] sm:$0xff] }
 0x2c5   :  { %v9554_v10 = vadd.f32 %v3649_v22, %v3622_v32  ;;  %v9556_v36 = vadd.f32 %v3650_v18, %v3623_v63  ;;  %v9558_v28 = vadd.f32 %v3651_v43, %v3624_v24  ;;  %v9560_v45 = vadd.f32 %v3652_v58, %v3625_v9  ;;  %v12184_v12 = vld [vmem:[#allocation35_spill] sm:$0xff]  ;;  %v12185_v22 = vld [vmem:[#allocation36_spill] sm:$0xff]  ;;  %v12186_v18 = vld [vmem:[#allocation37_spill] sm:$0xff] }
 0x2c6   :  { %v3689_v30 = vstv %s9509_s25  ;;  %v9563_v57 = vadd.f32 %v3653_v15, %v3626_v19  ;;  %v9565_v47 = vadd.f32 %v3654_v29, %v3627_v56  ;;  %v9567_v50 = vadd.f32 %v3655_v0, %v3628_v35  ;;  %v12172_v19 = vld [vmem:[#allocation103_spill] sm:$0xff]  ;;  %v12173_v56 = vld [vmem:[#allocation24_spill] sm:$0xff]  ;;  %v12174_v35 = vld [vmem:[#allocation25_spill] sm:$0xff] }
 0x2c7   :  { %v9569_v8 = vadd.f32 %v3656_v38, %v3629_v26  ;;  %v9571_v41 = vadd.f32 %v3657_v59, %v3630_v17  ;;  %v9573_v62 = vadd.f32 %v3658_v20, %v3631_v13  ;;  %v9575_v32 = vadd.f32 %v3659_v51, %v3632_v40  ;;  %v12176_v13 = vld [vmem:[#allocation28_spill] sm:$0xff]  ;;  %v12177_v40 = vld [vmem:[#allocation29_spill] sm:$0xff]  ;;  %v12187_v43 = vld [vmem:[#allocation38_spill] sm:$0xff] }
 0x2c8   :  { %v9577_v63 = vadd.f32 %v3660_v27, %v3633_v1  ;;  %v9579_v24 = vadd.f32 %v3661_v7, %v3634_v4  ;;  %v9581_v9 = vadd.f32 %v3662_v6, %v3635_v60  ;;  %v3690_v25 = vmul.f32 %v3689_v30, %v12172_v19  ;;  %v12178_v1 = vld [vmem:[#allocation39_spill] sm:$0xff] }
 0x2c9   :  { %v9585_v48 = vmul.f32 %v3689_v30, %v12173_v56  ;;  %v3692_v26 = vmul.f32 %v3689_v30, %v12174_v35  ;;  %v9589_v17 = vmul.f32 %v3689_v30, %v12175_v14  ;;  %v3694_v46 = vmul.f32 %v3689_v30, %v12176_v13  ;;  %v12188_v15 = vld [vmem:[#allocation11_spill] sm:$0xff] }
 0x2ca   :  { %12170 = vst [vmem:[#allocation51_spill] sm:$0xff] %v9579_v24  ;;  %v9593_v39 = vmul.f32 %v3689_v30, %v12177_v40  ;;  %v3696_v4 = vmul.f32 %v3689_v30, %v12178_v1  ;;  %v9597_v60 = vmul.f32 %v3689_v30, %v12179_v49  ;;  %v3698_v0 = vmul.f32 %v3689_v30, %v12180_v21  ;;  %v12192_v49 = vld [vmem:[#allocation16_spill] sm:$0xff]  ;;  %v12194_v40 = vld [vmem:[#allocation18_spill] sm:$0xff] }
 0x2cb   :  { %12171 = vst [vmem:[#allocation52_spill] sm:$0xff] %v9581_v9  ;;  %v9601_v38 = vmul.f32 %v3689_v30, %v12181_v33  ;;  %v3700_v59 = vmul.f32 %v3689_v30, %v12182_v53  ;;  %v9605_v20 = vmul.f32 %v3689_v30, %v12183_v3  ;;  %v3702_v51 = vmul.f32 %v3689_v30, %v12184_v12  ;;  %v12189_v53 = vld [vmem:[#allocation12_spill] sm:$0xff]  ;;  %v12190_v33 = vld [vmem:[#allocation14_spill] sm:$0xff]  ;;  %v12191_v12 = vld [vmem:[#allocation15_spill] sm:$0xff] }
 0x2cc   :  { %v9609_v27 = vmul.f32 %v3689_v30, %v12185_v22  ;;  %v3704_v7 = vmul.f32 %v3689_v30, %v12186_v18  ;;  %v9613_v6 = vmul.f32 %v3689_v30, %v12187_v43  ;;  %v3706_v58 = vmul.f32 %v3689_v30, %v12160_v2  ;;  %v12193_v18 = vld [vmem:[#allocation17_spill] sm:$0xff]  ;;  %v12195_v2 = vld [vmem:[#allocation19_spill] sm:$0xff] }
 0x2cd   :  { %v9617_v29 = vmul.f32 %v3689_v30, %v12188_v15  ;;  %v3708_v3 = vmul.f32 %v3689_v30, %v12189_v53  ;;  %v9623_v21 = vmul.f32 %v3689_v30, %v12190_v33  ;;  %v3710_v22 = vmul.f32 %v3689_v30, %v12191_v12 }
 0x2ce   :  { %v9627_v1 = vmul.f32 %v3689_v30, %v12192_v49  ;;  %v3712_v43 = vmul.f32 %v3689_v30, %v12193_v18  ;;  %v9631_v13 = vmul.f32 %v3689_v30, %v12194_v40  ;;  %v3714_v15 = vmul.f32 %v3689_v30, %v12195_v2 }
 0x2cf   :  { %v9635_v14 = vmul.f32 %v3689_v30, %v12169_v31  ;;  %v3742_v35 = vrot.slane %v3690_v25, 1  ;;  %v3743_v53 = vrot.slane %v9585_v48, 1  ;;  %v3745_v33 = vrot.slane %v3692_v26, 1 }
 0x2d0   :  { %v3746_v56 = vrot.slane %v9589_v17, 1  ;;  %v3748_v12 = vrot.slane %v3694_v46, 1  ;;  %v3749_v49 = vrot.slane %v9593_v39, 1  ;;  %v3751_v19 = vrot.slane %v3696_v4, 1 }
 0x2d1   :  { %v3752_v18 = vrot.slane %v9597_v60, 1  ;;  %v3754_v9 = vrot.slane %v3698_v0, 1  ;;  %v3755_v40 = vrot.slane %v9601_v38, 1  ;;  %v3757_v24 = vrot.slane %v3700_v59, 1 }
 0x2d2   :  { %v3758_v2 = vrot.slane %v9605_v20, 1  ;;  %v3760_v30 = vrot.slane %v3702_v51, 1  ;;  %v3761_v25 = vrot.slane %v9609_v27, 1  ;;  %v3763_v48 = vrot.slane %v3704_v7, 1 }
 0x2d3   :  { %v3764_v26 = vrot.slane %v9613_v6, 1  ;;  %v3766_v17 = vrot.slane %v3706_v58, 1  ;;  %v3767_v46 = vrot.slane %v9617_v29, 1  ;;  %v3769_v39 = vrot.slane %v3708_v3, 1 }
 0x2d4   :  { %v3770_v4 = vrot.slane %v9623_v21, 1  ;;  %v3772_v60 = vrot.slane %v3710_v22, 1  ;;  %v3773_v0 = vrot.slane %v9627_v1, 1  ;;  %v3775_v38 = vrot.slane %v3712_v43, 1 }
 0x2d5   :  { %v3776_v59 = vrot.slane %v9631_v13, 1  ;;  %v3744_v20 = vsel %vm255_vm0, %v3742_v35, %v3743_v53  ;;  %v3778_v51 = vrot.slane %v3714_v15, 1  ;;  %v3779_v27 = vrot.slane %v9635_v14, 1 }
 0x2d6   :  { %v9652_v7 = vstv %s9619_s26  ;;  %v3747_v6 = vsel %vm255_vm0, %v3745_v33, %v3746_v56  ;;  %v3750_v58 = vsel %vm255_vm0, %v3748_v12, %v3749_v49  ;;  %v3753_v3 = vsel %vm255_vm0, %v3751_v19, %v3752_v18 }
 0x2d7   :  { %v3756_v21 = vsel %vm255_vm0, %v3754_v9, %v3755_v40  ;;  %v3759_v1 = vsel %vm255_vm0, %v3757_v24, %v3758_v2  ;;  %v3762_v22 = vsel %vm255_vm0, %v3760_v30, %v3761_v25  ;;  %v3765_v13 = vsel %vm255_vm0, %v3763_v48, %v3764_v26 }
 0x2d8   :  { %v3768_v35 = vsel %vm255_vm0, %v3766_v17, %v3767_v46  ;;  %v3771_v14 = vsel %vm255_vm0, %v3769_v39, %v3770_v4  ;;  %v3774_v43 = vsel %vm255_vm0, %v3772_v60, %v3773_v0  ;;  %v3777_v33 = vsel %vm255_vm0, %v3775_v38, %v3776_v59 }
 0x2d9   :  { %v9666_v12 = vadd.f32 %v3744_v20, %v9530_v34  ;;  %v3780_v19 = vsel %vm255_vm0, %v3778_v51, %v3779_v27  ;;  %v9670_v9 = vadd.f32 %v3743_v53, %v9532_v23  ;;  %v9673_v24 = vadd.f32 %v3747_v6, %v9534_v11  ;;  %v12203_v53 = vld [vmem:[#allocation26_spill] sm:$0xff]  ;;  %v12210_v51 = vld [vmem:[#allocation33_spill] sm:$0xff] }
 0x2da   :  { %v9676_v15 = vadd.f32 %v3746_v56, %v9536_v54  ;;  %v9679_v29 = vadd.f32 %v3750_v58, %v9538_v5  ;;  %v9682_v30 = vadd.f32 %v3749_v49, %v9540_v44  ;;  %v9685_v34 = vadd.f32 %v3753_v3, %v9542_v61  ;;  %v12211_v6 = vld [vmem:[#allocation34_spill] sm:$0xff]  ;;  %v12212_v3 = vld [vmem:[#allocation35_spill] sm:$0xff] }
 0x2db   :  { %v9688_v48 = vadd.f32 %v3752_v18, %v9544_v16  ;;  %v9691_v23 = vadd.f32 %v3756_v21, %v9546_v42  ;;  %v9694_v11 = vadd.f32 %v3755_v40, %v9548_v52  ;;  %v9697_v54 = vadd.f32 %v3759_v1, %v9550_v55  ;;  %v12204_v18 = vld [vmem:[#allocation28_spill] sm:$0xff] }
 0x2dc   :  { %v9700_v5 = vadd.f32 %v3758_v2, %v9552_v37  ;;  %v9703_v44 = vadd.f32 %v3762_v22, %v9554_v10  ;;  %v9706_v61 = vadd.f32 %v3761_v25, %v9556_v36  ;;  %v9709_v16 = vadd.f32 %v3765_v13, %v9558_v28  ;;  %v12213_v1 = vld [vmem:[#allocation36_spill] sm:$0xff]  ;;  %v12214_v13 = vld [vmem:[#allocation37_spill] sm:$0xff] }
 0x2dd   :  { %v9712_v42 = vadd.f32 %v3764_v26, %v9560_v45  ;;  %v9715_v52 = vadd.f32 %v3768_v35, %v9563_v57  ;;  %v9718_v55 = vadd.f32 %v3767_v46, %v9565_v47  ;;  %v9721_v2 = vadd.f32 %v3771_v14, %v9567_v50  ;;  %v12196_v57 = vld [vmem:[#allocation51_spill] sm:$0xff]  ;;  %v12198_v50 = vld [vmem:[#allocation52_spill] sm:$0xff]  ;;  %v12205_v26 = vld [vmem:[#allocation29_spill] sm:$0xff] }
 0x2de   :  { %v9724_v37 = vadd.f32 %v3770_v4, %v9569_v8  ;;  %v9727_v10 = vadd.f32 %v3774_v43, %v9571_v41  ;;  %v9730_v36 = vadd.f32 %v3773_v0, %v9573_v62  ;;  %v9733_v28 = vadd.f32 %v3777_v33, %v9575_v32  ;;  %v12200_v8 = vld [vmem:[#allocation103_spill] sm:$0xff]  ;;  %v12201_v41 = vld [vmem:[#allocation24_spill] sm:$0xff]  ;;  %v12202_v62 = vld [vmem:[#allocation25_spill] sm:$0xff] }
 0x2df   :  { %v9736_v45 = vadd.f32 %v3776_v59, %v9577_v63  ;;  %v9739_v47 = vadd.f32 %v3780_v19, %v12196_v57  ;;  %v9742_v56 = vadd.f32 %v3779_v27, %v12198_v50  ;;  %v3834_v40 = vmul.f32 %v9652_v7, %v12200_v8  ;;  %v12206_v46 = vld [vmem:[#allocation39_spill] sm:$0xff]  ;;  %v12207_v4 = vld [vmem:[#allocation30_spill] sm:$0xff]  ;;  %v12209_v59 = vld [vmem:[#allocation32_spill] sm:$0xff] }
 0x2e0   :  { %v9748_v49 = vmul.f32 %v9652_v7, %v12201_v41  ;;  %v3836_v32 = vmul.f32 %v9652_v7, %v12202_v62  ;;  %v9754_v63 = vmul.f32 %v9652_v7, %v12203_v53  ;;  %v3838_v25 = vmul.f32 %v9652_v7, %v12204_v18  ;;  %v12208_v0 = vld [vmem:[#allocation31_spill] sm:$0xff]  ;;  %v12215_v14 = vld [vmem:[#allocation38_spill] sm:$0xff]  ;;  %v12218_v8 = vld [vmem:[#allocation12_spill] sm:$0xff] }
 0x2e1   :  { %12197 = vst [vmem:[#allocation53_spill] sm:$0xff] %v9739_v47  ;;  %v9760_v17 = vmul.f32 %v9652_v7, %v12205_v26  ;;  %v3840_v39 = vmul.f32 %v9652_v7, %v12206_v46  ;;  %v9766_v60 = vmul.f32 %v9652_v7, %v12207_v4  ;;  %v3842_v38 = vmul.f32 %v9652_v7, %v12208_v0  ;;  %v12216_v33 = vld [vmem:[#allocation10_spill] sm:$0xff]  ;;  %v12217_v57 = vld [vmem:[#allocation11_spill] sm:$0xff] }
 0x2e2   :  { %12199 = vst [vmem:[#allocation40_spill] sm:$0xff] %v9742_v56  ;;  %v9772_v20 = vmul.f32 %v9652_v7, %v12209_v59  ;;  %v3844_v27 = vmul.f32 %v9652_v7, %v12210_v51  ;;  %v9778_v58 = vmul.f32 %v9652_v7, %v12211_v6  ;;  %v3846_v21 = vmul.f32 %v9652_v7, %v12212_v3  ;;  %v12219_v3 = vld [vmem:[#allocation14_spill] sm:$0xff]  ;;  %v12220_v6 = vld [vmem:[#allocation15_spill] sm:$0xff]  ;;  %v12221_v51 = vld [vmem:[#allocation16_spill] sm:$0xff] }
 0x2e3   :  { %v9784_v22 = vmul.f32 %v9652_v7, %v12213_v1  ;;  %v3848_v35 = vmul.f32 %v9652_v7, %v12214_v13  ;;  %v9790_v43 = vmul.f32 %v9652_v7, %v12215_v14  ;;  %v3850_v19 = vmul.f32 %v9652_v7, %v12216_v33  ;;  %v12222_v59 = vld [vmem:[#allocation17_spill] sm:$0xff]  ;;  %v12223_v0 = vld [vmem:[#allocation18_spill] sm:$0xff]  ;;  %v12224_v4 = vld [vmem:[#allocation19_spill] sm:$0xff] }
 0x2e4   :  { %v9796_v50 = vmul.f32 %v9652_v7, %v12217_v57  ;;  %v3852_v41 = vmul.f32 %v9652_v7, %v12218_v8  ;;  %v9802_v1 = vmul.f32 %v9652_v7, %v12219_v3  ;;  %v3854_v13 = vmul.f32 %v9652_v7, %v12220_v6 }
 0x2e5   :  { %v9808_v14 = vmul.f32 %v9652_v7, %v12221_v51  ;;  %v3856_v33 = vmul.f32 %v9652_v7, %v12222_v59  ;;  %v9814_v57 = vmul.f32 %v9652_v7, %v12223_v0  ;;  %v3858_v8 = vmul.f32 %v9652_v7, %v12224_v4 }
 0x2e6   :  { %v9820_v3 = vmul.f32 %v9652_v7, %v12169_v31  ;;  %v3886_v46 = vrot.slane %v3834_v40, 2  ;;  %v3887_v6 = vrot.slane %v9748_v49, 2  ;;  %v3889_v26 = vrot.slane %v3836_v32, 2 }
 0x2e7   :  { %v3890_v51 = vrot.slane %v9754_v63, 2  ;;  %v3892_v18 = vrot.slane %v3838_v25, 2  ;;  %v3893_v59 = vrot.slane %v9760_v17, 2  ;;  %v3895_v53 = vrot.slane %v3840_v39, 2 }
 0x2e8   :  { %v3896_v0 = vrot.slane %v9766_v60, 2  ;;  %v3898_v62 = vrot.slane %v3842_v38, 2  ;;  %v3899_v56 = vrot.slane %v9772_v20, 2  ;;  %v3901_v4 = vrot.slane %v3844_v27, 2 }
 0x2e9   :  { %v3902_v47 = vrot.slane %v9778_v58, 2  ;;  %v3904_v7 = vrot.slane %v3846_v21, 2  ;;  %v3905_v40 = vrot.slane %v9784_v22, 2  ;;  %v3907_v31 = vrot.slane %v3848_v35, 2 }
 0x2ea   :  { %v3908_v49 = vrot.slane %v9790_v43, 2  ;;  %v3910_v32 = vrot.slane %v3850_v19, 2  ;;  %v3911_v63 = vrot.slane %v9796_v50, 2  ;;  %v3913_v25 = vrot.slane %v3852_v41, 2 }
 0x2eb   :  { %v3914_v17 = vrot.slane %v9802_v1, 2  ;;  %v3916_v39 = vrot.slane %v3854_v13, 2  ;;  %v3917_v60 = vrot.slane %v9808_v14, 2  ;;  %v3919_v38 = vrot.slane %v3856_v33, 2 }
 0x2ec   :  { %v3920_v20 = vrot.slane %v9814_v57, 2  ;;  %v3888_v27 = vsel %vm1839_vm1, %v3886_v46, %v3887_v6  ;;  %v3891_v58 = vsel %vm1839_vm1, %v3889_v26, %v3890_v51  ;;  %v3922_v21 = vrot.slane %v3858_v8, 2 }
 0x2ed   :  { %v3923_v22 = vrot.slane %v9820_v3, 2  ;;  %v3894_v35 = vsel %vm1839_vm1, %v3892_v18, %v3893_v59  ;;  %v3897_v43 = vsel %vm1839_vm1, %v3895_v53, %v3896_v0  ;;  %v3900_v1 = vsel %vm1839_vm1, %v3898_v62, %v3899_v56 }
 0x2ee   :  { %v3903_v13 = vsel %vm1839_vm1, %v3901_v4, %v3902_v47  ;;  %v3906_v14 = vsel %vm1839_vm1, %v3904_v7, %v3905_v40  ;;  %v3909_v33 = vsel %vm1839_vm1, %v3907_v31, %v3908_v49  ;;  %v3912_v46 = vsel %vm1839_vm1, %v3910_v32, %v3911_v63 }
 0x2ef   :  { %v3915_v26 = vsel %vm1839_vm1, %v3913_v25, %v3914_v17  ;;  %v3918_v3 = vsel %vm1839_vm1, %v3916_v39, %v3917_v60  ;;  %v3921_v18 = vsel %vm1839_vm1, %v3919_v38, %v3920_v20  ;;  %v3951_v53 = vadd.f32 %v3888_v27, %v9666_v12 }
 0x2f0   :  { %v3952_v62 = vadd.f32 %v3887_v6, %v9670_v9  ;;  %v3924_v4 = vsel %vm1839_vm1, %v3922_v21, %v3923_v22  ;;  %v3953_v19 = vadd.f32 %v3891_v58, %v9673_v24  ;;  %v3954_v57 = vadd.f32 %v3890_v51, %v9676_v15  ;;  %v12238_v58 = vld [vmem:[#allocation35_spill] sm:$0xff] }
 0x2f1   :  { %v3955_v31 = vadd.f32 %v3894_v35, %v9679_v29  ;;  %v3956_v50 = vadd.f32 %v3893_v59, %v9682_v30  ;;  %v3957_v8 = vadd.f32 %v3897_v43, %v9685_v34  ;;  %v3958_v41 = vadd.f32 %v3896_v0, %v9688_v48  ;;  %v12240_v43 = vld [vmem:[#allocation37_spill] sm:$0xff] }
 0x2f2   :  { %v3959_v7 = vadd.f32 %v3900_v1, %v9691_v23  ;;  %v3960_v12 = vadd.f32 %v3899_v56, %v9694_v11  ;;  %v3961_v9 = vadd.f32 %v3903_v13, %v9697_v54  ;;  %v3962_v6 = vadd.f32 %v3902_v47, %v9700_v5  ;;  %v12241_v13 = vld [vmem:[#allocation38_spill] sm:$0xff] }
 0x2f3   :  { %v3963_v24 = vadd.f32 %v3906_v14, %v9703_v44  ;;  %v3964_v15 = vadd.f32 %v3905_v40, %v9706_v61  ;;  %v3965_v29 = vadd.f32 %v3909_v33, %v9709_v16  ;;  %v3966_v30 = vadd.f32 %v3908_v49, %v9712_v42  ;;  %v12225_v16 = vld [vmem:[#allocation53_spill] sm:$0xff]  ;;  %v12226_v42 = vld [vmem:[#allocation40_spill] sm:$0xff]  ;;  %v12242_v33 = vld [vmem:[#allocation10_spill] sm:$0xff] }
 0x2f4   :  { %v3977_v34 = vstv %s9832_s27  ;;  %v3967_v48 = vadd.f32 %v3912_v46, %v9715_v52  ;;  %v3968_v23 = vadd.f32 %v3911_v63, %v9718_v55  ;;  %v3969_v11 = vadd.f32 %v3915_v26, %v9721_v2  ;;  %v12228_v52 = vld [vmem:[#allocation25_spill] sm:$0xff]  ;;  %v12229_v2 = vld [vmem:[#allocation26_spill] sm:$0xff]  ;;  %v12243_v26 = vld [vmem:[#allocation11_spill] sm:$0xff] }
 0x2f5   :  { %v3970_v54 = vadd.f32 %v3914_v17, %v9724_v37  ;;  %v3971_v5 = vadd.f32 %v3918_v3, %v9727_v10  ;;  %v3972_v44 = vadd.f32 %v3917_v60, %v9730_v36  ;;  %v3973_v47 = vadd.f32 %v3921_v18, %v9733_v28  ;;  %v12230_v37 = vld [vmem:[#allocation28_spill] sm:$0xff]  ;;  %v12231_v10 = vld [vmem:[#allocation29_spill] sm:$0xff]  ;;  %v12232_v36 = vld [vmem:[#allocation39_spill] sm:$0xff] }
 0x2f6   :  { %v3974_v61 = vadd.f32 %v3920_v20, %v9736_v45  ;;  %v3975_v56 = vadd.f32 %v3924_v4, %v12225_v16  ;;  %v9879_v0 = vadd.f32 %v3923_v22, %v12226_v42  ;;  %v3978_v59 = vmul.f32 %v3977_v34, %v12228_v52  ;;  %v12233_v28 = vld [vmem:[#allocation30_spill] sm:$0xff]  ;;  %v12234_v45 = vld [vmem:[#allocation31_spill] sm:$0xff]  ;;  %v12235_v17 = vld [vmem:[#allocation32_spill] sm:$0xff] }
 0x2f7   :  { %v9883_v55 = vstv %s9843_s29  ;;  %v3979_v51 = vmul.f32 %v3977_v34, %v12229_v2  ;;  %v3980_v40 = vmul.f32 %v3977_v34, %v12230_v37  ;;  %v3981_v49 = vmul.f32 %v3977_v34, %v12231_v10  ;;  %v12236_v60 = vld [vmem:[#allocation33_spill] sm:$0xff]  ;;  %v12237_v20 = vld [vmem:[#allocation34_spill] sm:$0xff]  ;;  %v12239_v22 = vld [vmem:[#allocation36_spill] sm:$0xff] }
 0x2f8   :  { %12227 = vst [vmem:[#allocation41_spill] sm:$0xff] %v9879_v0  ;;  %v3982_v32 = vmul.f32 %v3977_v34, %v12232_v36  ;;  %v3983_v63 = vmul.f32 %v3977_v34, %v12233_v28  ;;  %v3984_v25 = vmul.f32 %v3977_v34, %v12234_v45  ;;  %v3985_v39 = vmul.f32 %v3977_v34, %v12235_v17  ;;  %v12244_v18 = vld [vmem:[#allocation12_spill] sm:$0xff]  ;;  %v12245_v16 = vld [vmem:[#allocation14_spill] sm:$0xff]  ;;  %v12246_v0 = vld [vmem:[#allocation15_spill] sm:$0xff] }
 0x2f9   :  { %v3986_v38 = vmul.f32 %v3977_v34, %v12236_v60  ;;  %v3987_v27 = vmul.f32 %v3977_v34, %v12237_v20  ;;  %v3988_v21 = vmul.f32 %v3977_v34, %v12238_v58  ;;  %v3989_v35 = vmul.f32 %v3977_v34, %v12239_v22  ;;  %v12247_v17 = vld [vmem:[#allocation16_spill] sm:$0xff]  ;;  %v12248_v45 = vld [vmem:[#allocation17_spill] sm:$0xff]  ;;  %v12249_v28 = vld [vmem:[#allocation18_spill] sm:$0xff] }
 0x2fa   :  { %v3990_v1 = vmul.f32 %v3977_v34, %v12240_v43  ;;  %v3991_v14 = vmul.f32 %v3977_v34, %v12241_v13  ;;  %v3992_v46 = vmul.f32 %v3977_v34, %v12242_v33  ;;  %v3993_v3 = vmul.f32 %v3977_v34, %v12243_v26  ;;  %v12250_v36 = vld [vmem:[#allocation19_spill] sm:$0xff]  ;;  %v12251_v10 = vld [vmem:[#allocation72_spill] sm:$0xff]  ;;  %v12252_v37 = vld [vmem:[#allocation73_spill] sm:$0xff] }
 0x2fb   :  { %v3994_v4 = vmul.f32 %v3977_v34, %v12244_v18  ;;  %v3995_v42 = vmul.f32 %v3977_v34, %v12245_v16  ;;  %v3996_v60 = vmul.f32 %v3977_v34, %v12246_v0  ;;  %v3997_v20 = vmul.f32 %v3977_v34, %v12247_v17  ;;  %v12253_v2 = vld [vmem:[#allocation74_spill] sm:$0xff] }
 0x2fc   :  { %v3998_v58 = vmul.f32 %v3977_v34, %v12248_v45  ;;  %v3999_v22 = vmul.f32 %v3977_v34, %v12249_v28  ;;  %v4000_v43 = vmul.f32 %v3977_v34, %v12250_v36  ;;  %v4001_v13 = vmul.f32 %v3977_v34, %v12251_v10 }
 0x2fd   :  { %v4002_v33 = vmul.f32 %v3977_v34, %v12252_v37  ;;  %v9910_v26 = vmul.f32 %v3977_v34, %v12253_v2  ;;  %v9912_v18 = vadd.f32 %v3978_v59, %v3951_v53  ;;  %v9914_v16 = vadd.f32 %v3979_v51, %v3952_v62  ;;  %v12260_v59 = vld [vmem:[#allocation30_spill] sm:$0xff]  ;;  %v12261_v51 = vld [vmem:[#allocation31_spill] sm:$0xff] }
 0x2fe   :  { %v9916_v0 = vadd.f32 %v3980_v40, %v3953_v19  ;;  %v9918_v17 = vadd.f32 %v3981_v49, %v3954_v57  ;;  %v9920_v45 = vadd.f32 %v3982_v32, %v3955_v31  ;;  %v9922_v28 = vadd.f32 %v3983_v63, %v3956_v50  ;;  %v12262_v49 = vld [vmem:[#allocation32_spill] sm:$0xff]  ;;  %v12263_v63 = vld [vmem:[#allocation33_spill] sm:$0xff] }
 0x2ff   :  { %v9924_v36 = vadd.f32 %v3984_v25, %v3957_v8  ;;  %v9926_v10 = vadd.f32 %v3985_v39, %v3958_v41  ;;  %v9928_v37 = vadd.f32 %v3986_v38, %v3959_v7  ;;  %v9930_v34 = vadd.f32 %v3987_v27, %v3960_v12  ;;  %v12264_v39 = vld [vmem:[#allocation34_spill] sm:$0xff]  ;;  %v12265_v38 = vld [vmem:[#allocation35_spill] sm:$0xff]  ;;  %v12266_v27 = vld [vmem:[#allocation36_spill] sm:$0xff] }
 0x300   :  { %v9932_v53 = vadd.f32 %v3988_v21, %v3961_v9  ;;  %v9934_v62 = vadd.f32 %v3989_v35, %v3962_v6  ;;  %v9936_v19 = vadd.f32 %v3990_v1, %v3963_v24  ;;  %v9938_v57 = vadd.f32 %v3991_v14, %v3964_v15  ;;  %v12267_v21 = vld [vmem:[#allocation37_spill] sm:$0xff]  ;;  %v12268_v35 = vld [vmem:[#allocation38_spill] sm:$0xff]  ;;  %v12270_v14 = vld [vmem:[#allocation11_spill] sm:$0xff] }
 0x301   :  { %v9940_v31 = vadd.f32 %v3992_v46, %v3965_v29  ;;  %v9942_v50 = vadd.f32 %v3993_v3, %v3966_v30  ;;  %v9944_v8 = vadd.f32 %v3994_v4, %v3967_v48  ;;  %v9946_v41 = vadd.f32 %v3995_v42, %v3968_v23  ;;  %v12256_v48 = vld [vmem:[#allocation26_spill] sm:$0xff]  ;;  %v12271_v46 = vld [vmem:[#allocation12_spill] sm:$0xff] }
 0x302   :  { %v9948_v7 = vadd.f32 %v3996_v60, %v3969_v11  ;;  %v9950_v12 = vadd.f32 %v3997_v20, %v3970_v54  ;;  %v9952_v9 = vadd.f32 %v3998_v58, %v3971_v5  ;;  %v9954_v6 = vadd.f32 %v3999_v22, %v3972_v44  ;;  %v12257_v11 = vld [vmem:[#allocation28_spill] sm:$0xff]  ;;  %v12258_v5 = vld [vmem:[#allocation29_spill] sm:$0xff]  ;;  %v12269_v1 = vld [vmem:[#allocation10_spill] sm:$0xff] }
 0x303   :  { %v9956_v24 = vadd.f32 %v4000_v43, %v3973_v47  ;;  %v9958_v15 = vadd.f32 %v4001_v13, %v3974_v61  ;;  %v9960_v29 = vadd.f32 %v4002_v33, %v3975_v56  ;;  %v4031_v30 = vmul.f32 %v9883_v55, %v12228_v52  ;;  %v12259_v47 = vld [vmem:[#allocation39_spill] sm:$0xff]  ;;  %v12272_v4 = vld [vmem:[#allocation14_spill] sm:$0xff] }
 0x304   :  { %v9966_v23 = vmul.f32 %v9883_v55, %v12256_v48  ;;  %v4033_v54 = vmul.f32 %v9883_v55, %v12257_v11  ;;  %v9972_v44 = vmul.f32 %v9883_v55, %v12258_v5  ;;  %v4035_v61 = vmul.f32 %v9883_v55, %v12259_v47 }
 0x305   :  { %12254 = vst [vmem:[#allocation43_spill] sm:$0xff] %v9958_v15  ;;  %v9978_v56 = vmul.f32 %v9883_v55, %v12260_v59  ;;  %v4037_v40 = vmul.f32 %v9883_v55, %v12261_v51  ;;  %v9984_v32 = vmul.f32 %v9883_v55, %v12262_v49  ;;  %v4039_v25 = vmul.f32 %v9883_v55, %v12263_v63  ;;  %v12276_v63 = vld [vmem:[#allocation18_spill] sm:$0xff]  ;;  %v12277_v49 = vld [vmem:[#allocation19_spill] sm:$0xff]  ;;  %v12278_v51 = vld [vmem:[#allocation72_spill] sm:$0xff] }
 0x306   :  { %12255 = vst [vmem:[#allocation54_spill] sm:$0xff] %v9960_v29  ;;  %v9990_v60 = vmul.f32 %v9883_v55, %v12264_v39  ;;  %v4041_v20 = vmul.f32 %v9883_v55, %v12265_v38  ;;  %v9996_v58 = vmul.f32 %v9883_v55, %v12266_v27  ;;  %v4043_v22 = vmul.f32 %v9883_v55, %v12267_v21  ;;  %v12273_v27 = vld [vmem:[#allocation15_spill] sm:$0xff]  ;;  %v12274_v38 = vld [vmem:[#allocation16_spill] sm:$0xff]  ;;  %v12275_v39 = vld [vmem:[#allocation17_spill] sm:$0xff] }
 0x307   :  { %v10002_v43 = vmul.f32 %v9883_v55, %v12268_v35  ;;  %v4045_v13 = vmul.f32 %v9883_v55, %v12269_v1  ;;  %v10008_v33 = vmul.f32 %v9883_v55, %v12270_v14  ;;  %v4047_v3 = vmul.f32 %v9883_v55, %v12271_v46  ;;  %v12279_v59 = vld [vmem:[#allocation73_spill] sm:$0xff] }
 0x308   :  { %v10014_v42 = vmul.f32 %v9883_v55, %v12272_v4  ;;  %v4049_v21 = vmul.f32 %v9883_v55, %v12273_v27  ;;  %v10020_v35 = vmul.f32 %v9883_v55, %v12274_v38  ;;  %v4051_v1 = vmul.f32 %v9883_v55, %v12275_v39 }
 0x309   :  { %v10026_v14 = vmul.f32 %v9883_v55, %v12276_v63  ;;  %v4053_v46 = vmul.f32 %v9883_v55, %v12277_v49  ;;  %v10032_v4 = vmul.f32 %v9883_v55, %v12278_v51  ;;  %v4055_v27 = vmul.f32 %v9883_v55, %v12279_v59 }
 0x30a   :  { %v10038_v38 = vmul.f32 %v9883_v55, %v12253_v2  ;;  %v4083_v47 = vrot.slane %v4031_v30, 1  ;;  %v4084_v39 = vrot.slane %v9966_v23, 1  ;;  %v4086_v5 = vrot.slane %v4033_v54, 1 }
 0x30b   :  { %v4087_v63 = vrot.slane %v9972_v44, 1  ;;  %v4089_v11 = vrot.slane %v4035_v61, 1  ;;  %v4090_v49 = vrot.slane %v9978_v56, 1  ;;  %v4092_v48 = vrot.slane %v4037_v40, 1 }
 0x30c   :  { %v4093_v51 = vrot.slane %v9984_v32, 1  ;;  %v4095_v52 = vrot.slane %v4039_v25, 1  ;;  %v4096_v29 = vrot.slane %v9990_v60, 1  ;;  %v4098_v59 = vrot.slane %v4041_v20, 1  ;;  %v12280_v20 = vld [vmem:[#allocation41_spill] sm:$0xff] }
 0x30d   :  { %v4099_v15 = vrot.slane %v9996_v58, 1  ;;  %v4101_v55 = vrot.slane %v4043_v22, 1  ;;  %v4102_v30 = vrot.slane %v10002_v43, 1  ;;  %v4104_v2 = vrot.slane %v4045_v13, 1 }
 0x30e   :  { %v4105_v23 = vrot.slane %v10008_v33, 1  ;;  %v4107_v54 = vrot.slane %v4047_v3, 1  ;;  %v4108_v44 = vrot.slane %v10014_v42, 1  ;;  %v4110_v61 = vrot.slane %v4049_v21, 1 }
 0x30f   :  { %v4111_v56 = vrot.slane %v10020_v35, 1  ;;  %v4113_v40 = vrot.slane %v4051_v1, 1  ;;  %v4114_v32 = vrot.slane %v10026_v14, 1  ;;  %v4116_v25 = vrot.slane %v4053_v46, 1 }
 0x310   :  { %v4117_v60 = vrot.slane %v10032_v4, 1  ;;  %v10056_v58 = vadd.f32 %v9910_v26, %v12280_v20  ;;  %v4085_v22 = vsel %vm255_vm0, %v4083_v47, %v4084_v39  ;;  %v4119_v43 = vrot.slane %v4055_v27, 1  ;;  %v12295_v20 = vld [vmem:[#allocation34_spill] sm:$0xff] }
 0x311   :  { %v11104_v13 = vrot.slane %v10038_v38, 1  ;;  %v4088_v21 = vsel %vm255_vm0, %v4086_v5, %v4087_v63  ;;  %v4091_v35 = vsel %vm255_vm0, %v4089_v11, %v4090_v49  ;;  %v4094_v1 = vsel %vm255_vm0, %v4092_v48, %v4093_v51 }
 0x312   :  { %v4097_v14 = vsel %vm255_vm0, %v4095_v52, %v4096_v29  ;;  %v4100_v33 = vsel %vm255_vm0, %v4098_v59, %v4099_v15  ;;  %v4103_v46 = vsel %vm255_vm0, %v4101_v55, %v4102_v30  ;;  %v4106_v26 = vsel %vm255_vm0, %v4104_v2, %v4105_v23 }
 0x313   :  { %v4109_v3 = vsel %vm255_vm0, %v4107_v54, %v4108_v44  ;;  %v4112_v47 = vsel %vm255_vm0, %v4110_v61, %v4111_v56  ;;  %v4115_v27 = vsel %vm255_vm0, %v4113_v40, %v4114_v32  ;;  %v4118_v5 = vsel %vm255_vm0, %v4116_v25, %v4117_v60  ;;  %v12292_v61 = vld [vmem:[#allocation31_spill] sm:$0xff]  ;;  %v12293_v40 = vld [vmem:[#allocation32_spill] sm:$0xff]  ;;  %v12294_v25 = vld [vmem:[#allocation33_spill] sm:$0xff] }
 0x314   :  { %v10072_v11 = vadd.f32 %v4085_v22, %v9912_v18  ;;  %v4121_v52 = vsel %vm255_vm0, %v4119_v43, %v11104_v13  ;;  %v10078_v48 = vadd.f32 %v4084_v39, %v9914_v16  ;;  %v10081_v2 = vadd.f32 %v4088_v21, %v9916_v0  ;;  %v12288_v39 = vld [vmem:[#allocation28_spill] sm:$0xff]  ;;  %v12296_v43 = vld [vmem:[#allocation35_spill] sm:$0xff] }
 0x315   :  { %v10084_v59 = vadd.f32 %v4087_v63, %v9918_v17  ;;  %v10087_v4 = vadd.f32 %v4091_v35, %v9920_v45  ;;  %v10090_v18 = vadd.f32 %v4090_v49, %v9922_v28  ;;  %v10093_v42 = vadd.f32 %v4094_v1, %v9924_v36  ;;  %v12287_v63 = vld [vmem:[#allocation26_spill] sm:$0xff]  ;;  %v12297_v35 = vld [vmem:[#allocation36_spill] sm:$0xff] }
 0x316   :  { %v10096_v55 = vadd.f32 %v4093_v51, %v9926_v10  ;;  %v10099_v16 = vadd.f32 %v4097_v14, %v9928_v37  ;;  %v10102_v0 = vadd.f32 %v4096_v29, %v9930_v34  ;;  %v10105_v17 = vadd.f32 %v4100_v33, %v9932_v53  ;;  %v12298_v14 = vld [vmem:[#allocation37_spill] sm:$0xff] }
 0x317   :  { %v10108_v45 = vadd.f32 %v4099_v15, %v9934_v62  ;;  %v10111_v28 = vadd.f32 %v4103_v46, %v9936_v19  ;;  %v10114_v36 = vadd.f32 %v4102_v30, %v9938_v57  ;;  %v10117_v10 = vadd.f32 %v4106_v26, %v9940_v31  ;;  %v12289_v30 = vld [vmem:[#allocation29_spill] sm:$0xff]  ;;  %v12299_v46 = vld [vmem:[#allocation38_spill] sm:$0xff] }
 0x318   :  { %v4174_v37 = vstv %s10050_s1  ;;  %v10121_v51 = vadd.f32 %v4105_v23, %v9942_v50  ;;  %v10124_v34 = vadd.f32 %v4109_v3, %v9944_v8  ;;  %v10127_v53 = vadd.f32 %v4108_v44, %v9946_v41  ;;  %v12282_v8 = vld [vmem:[#allocation43_spill] sm:$0xff]  ;;  %v12284_v41 = vld [vmem:[#allocation54_spill] sm:$0xff] }
 0x319   :  { %v10130_v62 = vadd.f32 %v4112_v47, %v9948_v7  ;;  %v10133_v19 = vadd.f32 %v4111_v56, %v9950_v12  ;;  %v10136_v57 = vadd.f32 %v4115_v27, %v9952_v9  ;;  %v10139_v31 = vadd.f32 %v4114_v32, %v9954_v6  ;;  %v12286_v7 = vld [vmem:[#allocation25_spill] sm:$0xff]  ;;  %v12290_v6 = vld [vmem:[#allocation39_spill] sm:$0xff]  ;;  %v12300_v3 = vld [vmem:[#allocation10_spill] sm:$0xff] }
 0x31a   :  { %v10142_v50 = vadd.f32 %v4118_v5, %v9956_v24  ;;  %v10145_v15 = vadd.f32 %v4117_v60, %v12282_v8  ;;  %v10148_v29 = vadd.f32 %v4121_v52, %v12284_v41  ;;  %v4175_v49 = vmul.f32 %v4174_v37, %v12286_v7  ;;  %v12291_v24 = vld [vmem:[#allocation30_spill] sm:$0xff]  ;;  %v12301_v27 = vld [vmem:[#allocation11_spill] sm:$0xff]  ;;  %v12302_v52 = vld [vmem:[#allocation12_spill] sm:$0xff] }
 0x31b   :  { %v10152_v12 = vmul.f32 %v4174_v37, %v12287_v63  ;;  %v4177_v9 = vmul.f32 %v4174_v37, %v12288_v39  ;;  %v10156_v23 = vmul.f32 %v4174_v37, %v12289_v30  ;;  %v4179_v54 = vmul.f32 %v4174_v37, %v12290_v6  ;;  %v12303_v41 = vld [vmem:[#allocation14_spill] sm:$0xff]  ;;  %v12304_v63 = vld [vmem:[#allocation15_spill] sm:$0xff] }
 0x31c   :  { %12281 = vst [vmem:[#allocation55_spill] sm:$0xff] %v10142_v50  ;;  %v10160_v44 = vmul.f32 %v4174_v37, %v12291_v24  ;;  %v4181_v56 = vmul.f32 %v4174_v37, %v12292_v61  ;;  %v10164_v32 = vmul.f32 %v4174_v37, %v12293_v40  ;;  %v4183_v60 = vmul.f32 %v4174_v37, %v12294_v25  ;;  %v12307_v25 = vld [vmem:[#allocation18_spill] sm:$0xff]  ;;  %v12308_v40 = vld [vmem:[#allocation19_spill] sm:$0xff]  ;;  %v12309_v61 = vld [vmem:[#allocation72_spill] sm:$0xff] }
 0x31d   :  { %12283 = vst [vmem:[#allocation56_spill] sm:$0xff] %v10145_v15  ;;  %v10168_v22 = vmul.f32 %v4174_v37, %v12295_v20  ;;  %v4185_v21 = vmul.f32 %v4174_v37, %v12296_v43  ;;  %v10172_v1 = vmul.f32 %v4174_v37, %v12297_v35  ;;  %v4187_v33 = vmul.f32 %v4174_v37, %v12298_v14  ;;  %v12305_v43 = vld [vmem:[#allocation16_spill] sm:$0xff]  ;;  %v12306_v20 = vld [vmem:[#allocation17_spill] sm:$0xff]  ;;  %v12311_v6 = vld [vmem:[#allocation74_spill] sm:$0xff] }
 0x31e   :  { %12285 = vst [vmem:[#allocation57_spill] sm:$0xff] %v10148_v29  ;;  %v10176_v26 = vmul.f32 %v4174_v37, %v12299_v46  ;;  %v4189_v47 = vmul.f32 %v4174_v37, %v12300_v3  ;;  %v10180_v5 = vmul.f32 %v4174_v37, %v12301_v27  ;;  %v4191_v8 = vmul.f32 %v4174_v37, %v12302_v52  ;;  %v12310_v24 = vld [vmem:[#allocation73_spill] sm:$0xff] }
 0x31f   :  { %v10184_v7 = vmul.f32 %v4174_v37, %v12303_v41  ;;  %v4193_v13 = vmul.f32 %v4174_v37, %v12304_v63  ;;  %v10188_v35 = vmul.f32 %v4174_v37, %v12305_v43  ;;  %v4195_v14 = vmul.f32 %v4174_v37, %v12306_v20 }
 0x320   :  { %v10192_v46 = vmul.f32 %v4174_v37, %v12307_v25  ;;  %v4197_v3 = vmul.f32 %v4174_v37, %v12308_v40  ;;  %v10196_v27 = vmul.f32 %v4174_v37, %v12309_v61  ;;  %v4199_v52 = vmul.f32 %v4174_v37, %v12310_v24 }
 0x321   :  { %v10200_v41 = vmul.f32 %v4174_v37, %v12311_v6  ;;  %v4227_v30 = vrot.slane %v4175_v49, 2  ;;  %v4228_v63 = vrot.slane %v10152_v12, 2  ;;  %v4230_v43 = vrot.slane %v4177_v9, 2 }
 0x322   :  { %v4231_v39 = vrot.slane %v10156_v23, 2  ;;  %v4233_v20 = vrot.slane %v4179_v54, 2  ;;  %v4234_v25 = vrot.slane %v10160_v44, 2  ;;  %v4236_v29 = vrot.slane %v4181_v56, 2 }
 0x323   :  { %v4237_v40 = vrot.slane %v10164_v32, 2  ;;  %v4239_v15 = vrot.slane %v4183_v60, 2  ;;  %v4240_v61 = vrot.slane %v10168_v22, 2  ;;  %v4242_v50 = vrot.slane %v4185_v21, 2 }
 0x324   :  { %v4243_v24 = vrot.slane %v10172_v1, 2  ;;  %v4245_v37 = vrot.slane %v4187_v33, 2  ;;  %v4246_v49 = vrot.slane %v10176_v26, 2  ;;  %v4248_v6 = vrot.slane %v4189_v47, 2 }
 0x325   :  { %v4249_v12 = vrot.slane %v10180_v5, 2  ;;  %v4251_v9 = vrot.slane %v4191_v8, 2  ;;  %v4252_v23 = vrot.slane %v10184_v7, 2  ;;  %v4254_v54 = vrot.slane %v4193_v13, 2 }
 0x326   :  { %v4255_v44 = vrot.slane %v10188_v35, 2  ;;  %v4257_v56 = vrot.slane %v4195_v14, 2  ;;  %v4258_v32 = vrot.slane %v10192_v46, 2  ;;  %v4260_v60 = vrot.slane %v4197_v3, 2 }
 0x327   :  { %v4261_v22 = vrot.slane %v10196_v27, 2  ;;  %v12312_v21 = vrot.slane %v10038_v38, 1  ;;  %v4229_v33 = vsel %vm1839_vm1, %v4227_v30, %v4228_v63  ;;  %v4263_v26 = vrot.slane %v4199_v52, 2 }
 0x328   :  { %v4264_v47 = vrot.slane %v10200_v41, 2  ;;  %v4232_v13 = vsel %vm1839_vm1, %v4230_v43, %v4231_v39  ;;  %v4235_v35 = vsel %vm1839_vm1, %v4233_v20, %v4234_v25  ;;  %v4238_v14 = vsel %vm1839_vm1, %v4236_v29, %v4237_v40 }
 0x329   :  { %v4173_v1 = vadd.f32 %v12312_v21, %v10056_v58  ;;  %v4241_v46 = vsel %vm1839_vm1, %v4239_v15, %v4240_v61  ;;  %v4244_v3 = vsel %vm1839_vm1, %v4242_v50, %v4243_v24  ;;  %v4247_v27 = vsel %vm1839_vm1, %v4245_v37, %v4246_v49 }
 0x32a   :  { %v4250_v38 = vsel %vm1839_vm1, %v4248_v6, %v4249_v12  ;;  %v4253_v58 = vsel %vm1839_vm1, %v4251_v9, %v4252_v23  ;;  %v4256_v30 = vsel %vm1839_vm1, %v4254_v54, %v4255_v44  ;;  %v4259_v5 = vsel %vm1839_vm1, %v4257_v56, %v4258_v32 }
 0x32b   :  { %v4262_v43 = vsel %vm1839_vm1, %v4260_v60, %v4261_v22  ;;  %v4292_v20 = vadd.f32 %v4229_v33, %v10072_v11  ;;  %v4265_v29 = vsel %vm1839_vm1, %v4263_v26, %v4264_v47  ;;  %v4293_v15 = vadd.f32 %v4228_v63, %v10078_v48  ;;  %v12331_v63 = vld [vmem:[#allocation39_spill] sm:$0xff]  ;;  %v12343_v26 = vld [vmem:[#allocation37_spill] sm:$0xff] }
 0x32c   :  { %v4294_v50 = vadd.f32 %v4232_v13, %v10081_v2  ;;  %v10237_v52 = vadd.f32 %v4231_v39, %v10084_v59  ;;  %v4296_v6 = vadd.f32 %v4235_v35, %v10087_v4  ;;  %v10241_v8 = vadd.f32 %v4234_v25, %v10090_v18  ;;  %v12325_v39 = vld [vmem:[#allocation56_spill] sm:$0xff]  ;;  %v12330_v25 = vld [vmem:[#allocation29_spill] sm:$0xff]  ;;  %v12344_v13 = vld [vmem:[#allocation38_spill] sm:$0xff] }
 0x32d   :  { %v4298_v41 = vadd.f32 %v4238_v14, %v10093_v42  ;;  %v10245_v7 = vadd.f32 %v4237_v40, %v10096_v55  ;;  %v4300_v11 = vadd.f32 %v4241_v46, %v10099_v16  ;;  %v10249_v37 = vadd.f32 %v4240_v61, %v10102_v0  ;;  %v12346_v14 = vld [vmem:[#allocation10_spill] sm:$0xff] }
 0x32e   :  { %12313 = vst [vmem:[#allocation58_spill] sm:$0xff] %v10237_v52  ;;  %v4302_v48 = vadd.f32 %v4244_v3, %v10105_v17  ;;  %v10253_v2 = vadd.f32 %v4243_v24, %v10108_v45  ;;  %v4304_v59 = vadd.f32 %v4247_v27, %v10111_v28  ;;  %v10257_v4 = vadd.f32 %v4246_v49, %v10114_v36  ;;  %v12347_v3 = vld [vmem:[#allocation11_spill] sm:$0xff] }
 0x32f   :  { %12314 = vst [vmem:[#allocation59_spill] sm:$0xff] %v10241_v8  ;;  %v4306_v18 = vadd.f32 %v4250_v38, %v10117_v10  ;;  %v10261_v42 = vstv %s10212_s30  ;;  %v10264_v55 = vadd.f32 %v4249_v12, %v10121_v51  ;;  %v4308_v16 = vadd.f32 %v4253_v58, %v10124_v34  ;;  %v12324_v10 = vld [vmem:[#allocation55_spill] sm:$0xff]  ;;  %v12327_v34 = vld [vmem:[#allocation57_spill] sm:$0xff]  ;;  %v12349_v38 = vld [vmem:[#allocation12_spill] sm:$0xff] }
 0x330   :  { %12315 = vst [vmem:[#allocation60_spill] sm:$0xff] %v10245_v7  ;;  %v10268_v0 = vadd.f32 %v4252_v23, %v10127_v53  ;;  %v4310_v17 = vadd.f32 %v4256_v30, %v10130_v62  ;;  %v10274_v45 = vadd.f32 %v4255_v44, %v10133_v19  ;;  %v4312_v28 = vadd.f32 %v4259_v5, %v10136_v57  ;;  %v12329_v62 = vld [vmem:[#allocation28_spill] sm:$0xff]  ;;  %v12334_v12 = vld [vmem:[#allocation31_spill] sm:$0xff]  ;;  %v12337_v44 = vld [vmem:[#allocation33_spill] sm:$0xff] }
 0x331   :  { %12316 = vst [vmem:[#allocation61_spill] sm:$0xff] %v10249_v37  ;;  %v10278_v36 = vadd.f32 %v4258_v32, %v10139_v31  ;;  %v4314_v51 = vadd.f32 %v4262_v43, %v12324_v10  ;;  %v10282_v24 = vadd.f32 %v4261_v22, %v12325_v39  ;;  %v4316_v53 = vadd.f32 %v4265_v29, %v12327_v34  ;;  %v12332_v31 = vld [vmem:[#allocation30_spill] sm:$0xff]  ;;  %v12335_v23 = vld [vmem:[#allocation32_spill] sm:$0xff]  ;;  %v12340_v22 = vld [vmem:[#allocation35_spill] sm:$0xff] }
 0x332   :  { %12317 = vst [vmem:[#allocation62_spill] sm:$0xff] %v10253_v2  ;;  %v10285_v61 = vadd.f32 %v4264_v47, %v4173_v1  ;;  %v4319_v40 = vmul.f32 %v10261_v42, %v12329_v62  ;;  %v4320_v19 = vmul.f32 %v10261_v42, %v12330_v25  ;;  %v4321_v57 = vmul.f32 %v10261_v42, %v12331_v63  ;;  %v12338_v32 = vld [vmem:[#allocation34_spill] sm:$0xff]  ;;  %v12341_v1 = vld [vmem:[#allocation36_spill] sm:$0xff]  ;;  %v12352_v43 = vld [vmem:[#allocation15_spill] sm:$0xff] }
 0x333   :  { %12318 = vst [vmem:[#allocation63_spill] sm:$0xff] %v10257_v4  ;;  %v10295_v49 = vmul.f32 %v10261_v42, %v12332_v31  ;;  %v4323_v9 = vmul.f32 %v10261_v42, %v12334_v12  ;;  %v10301_v54 = vmul.f32 %v10261_v42, %v12335_v23  ;;  %v4325_v56 = vmul.f32 %v10261_v42, %v12337_v44  ;;  %v12350_v30 = vld [vmem:[#allocation14_spill] sm:$0xff]  ;;  %v12353_v10 = vld [vmem:[#allocation17_spill] sm:$0xff]  ;;  %v12354_v34 = vld [vmem:[#allocation19_spill] sm:$0xff] }
 0x334   :  { %12319 = vst [vmem:[#allocation64_spill] sm:$0xff] %v10261_v42  ;;  %v10307_v60 = vmul.f32 %v10261_v42, %v12338_v32  ;;  %v4327_v21 = vmul.f32 %v10261_v42, %v12340_v22  ;;  %v10313_v33 = vmul.f32 %v10261_v42, %v12341_v1  ;;  %v4329_v47 = vmul.f32 %v10261_v42, %v12343_v26 }
 0x335   :  { %12320 = vst [vmem:[#allocation65_spill] sm:$0xff] %v10264_v55  ;;  %v10319_v35 = vmul.f32 %v10261_v42, %v12344_v13  ;;  %v4331_v46 = vmul.f32 %v10261_v42, %v12346_v14  ;;  %v10325_v27 = vmul.f32 %v10261_v42, %v12347_v3  ;;  %v4333_v58 = vmul.f32 %v10261_v42, %v12349_v38  ;;  %v12357_v55 = vld [vmem:[#allocation16_spill] sm:$0xff] }
 0x336   :  { %12321 = vst [vmem:[#allocation66_spill] sm:$0xff] %v10268_v0  ;;  %v10331_v5 = vmul.f32 %v10261_v42, %v12350_v30  ;;  %v4335_v29 = vmul.f32 %v10261_v42, %v12352_v43  ;;  %v4337_v39 = vmul.f32 %v10261_v42, %v12353_v10  ;;  %v10349_v4 = vadd.f32 %v4320_v19, %v4293_v15 }
 0x337   :  { %12322 = vst [vmem:[#allocation67_spill] sm:$0xff] %v10274_v45  ;;  %v12356_v45 = vld [vmem:[#allocation105_spill] sm:$0xff]  ;;  %v10353_v2 = vadd.f32 %v4323_v9, %v4296_v6  ;;  %v10357_v37 = vadd.f32 %v4327_v21, %v4300_v11  ;;  %v10360_v7 = vadd.f32 %v4329_v47, %v4302_v48  ;;  %v10364_v8 = vadd.f32 %v4333_v58, %v4306_v18  ;;  %v12364_v47 = vld [vmem:[#allocation18_spill] sm:$0xff] }
 0x338   :  { %12323 = vst [vmem:[#allocation68_spill] sm:$0xff] %v10278_v36  ;;  %v4343_v0 = vmul.f32 %v10261_v42, %v12356_v45 }
 0x339   :  { %12326 = vst [vmem:[#allocation69_spill] sm:$0xff] %v10282_v24  ;;  %v12355_v24 = vld [vmem:[#allocation73_spill] sm:$0xff] }
 0x33a   :  { %12328 = vst [vmem:[#allocation70_spill] sm:$0xff] %v10285_v61  ;;  %v4339_v61 = vmul.f32 %v10261_v42, %v12354_v34  ;;  %v4341_v36 = vmul.f32 %v10261_v42, %v12355_v24  ;;  %v10374_v6 = vadd.f32 %v4343_v0, %v4316_v53 }
 0x33b   :  { %12333 = vst [vmem:[#allocation44_spill] sm:$0xff] %v10295_v49 }
 0x33c   :  { %12336 = vst [vmem:[#allocation42_spill] sm:$0xff] %v10301_v54  ;;  %v10362_v54 = vadd.f32 %v4331_v46, %v4304_v59  ;;  %v10370_v15 = vadd.f32 %v4339_v61, %v4312_v28 }
 0x33d   :  { %12339 = vst [vmem:[#allocation13_spill] sm:$0xff] %v10307_v60  ;;  %v4371_v60 = vstv %s10271_s0 }
 0x33e   :  { %12342 = vst [vmem:[#allocation108_spill] sm:$0xff] %v10313_v33  ;;  %v10355_v33 = vadd.f32 %v4325_v56, %v4298_v41  ;;  %v4372_v41 = vmul.f32 %v4371_v60, %v12329_v62  ;;  %v10378_v11 = vmul.f32 %v4371_v60, %v12330_v25  ;;  %v4374_v48 = vmul.f32 %v4371_v60, %v12331_v63 }
 0x33f   :  { %12345 = vst [vmem:[#allocation109_spill] sm:$0xff] %v10319_v35  ;;  %v10351_v35 = vadd.f32 %v4321_v57, %v4294_v50  ;;  %v10372_v50 = vadd.f32 %v4341_v36, %v4314_v51  ;;  %v10382_v59 = vmul.f32 %v4371_v60, %v12332_v31  ;;  %v4376_v18 = vmul.f32 %v4371_v60, %v12334_v12 }
 0x340   :  { %12348 = vst [vmem:[#allocation27_spill] sm:$0xff] %v10325_v27  ;;  %v10345_v27 = vmul.f32 %v10261_v42, %v12357_v55  ;;  %v10390_v0 = vmul.f32 %v4371_v60, %v12338_v32  ;;  %v4380_v28 = vmul.f32 %v4371_v60, %v12340_v22  ;;  %v10394_v36 = vmul.f32 %v4371_v60, %v12341_v1 }
 0x341   :  { %12351 = vst [vmem:[#allocation45_spill] sm:$0xff] %v10331_v5  ;;  %v10347_v5 = vadd.f32 %v4319_v40, %v4292_v20  ;;  %v10368_v20 = vadd.f32 %v4337_v39, %v4310_v17  ;;  %v4378_v17 = vmul.f32 %v4371_v60, %v12337_v44  ;;  %v4382_v51 = vmul.f32 %v4371_v60, %v12343_v26 }
 0x342   :  { %12358 = vst [vmem:[#allocation98_spill] sm:$0xff] %v10345_v27  ;;  %v10366_v27 = vadd.f32 %v4335_v29, %v4308_v16  ;;  %v10386_v16 = vmul.f32 %v4371_v60, %v12335_v23  ;;  %v10398_v53 = vmul.f32 %v4371_v60, %v12344_v13  ;;  %v4384_v61 = vmul.f32 %v4371_v60, %v12346_v14  ;;  %v12366_v29 = vld [vmem:[#allocation72_spill] sm:$0xff] }
 0x343   :  { %12359 = vst [vmem:[#allocation99_spill] sm:$0xff] %v10349_v4  ;;  %v10402_v40 = vmul.f32 %v4371_v60, %v12347_v3  ;;  %v4386_v19 = vmul.f32 %v4371_v60, %v12349_v38  ;;  %v10406_v57 = vmul.f32 %v4371_v60, %v12350_v30  ;;  %v4388_v9 = vmul.f32 %v4371_v60, %v12352_v43  ;;  %v12368_v4 = vld [vmem:[#allocation74_spill] sm:$0xff] }
 0x344   :  { %12360 = vst [vmem:[#allocation47_spill] sm:$0xff] %v10370_v15  ;;  %v10410_v56 = vmul.f32 %v4371_v60, %v12357_v55  ;;  %v4390_v21 = vmul.f32 %v4371_v60, %v12353_v10  ;;  %v10414_v46 = vmul.f32 %v4371_v60, %v12364_v47  ;;  %v4392_v58 = vmul.f32 %v4371_v60, %v12354_v34  ;;  %v12370_v15 = vld [vmem:[#allocation106_spill] sm:$0xff] }
 0x345   :  { %12361 = vst [vmem:[#allocation48_spill] sm:$0xff] %v10372_v50  ;;  %v10420_v39 = vmul.f32 %v4371_v60, %v12366_v29  ;;  %v4394_v42 = vmul.f32 %v4371_v60, %v12355_v24  ;;  %v4396_v50 = vmul.f32 %v4371_v60, %v12356_v45  ;;  %v10428_v49 = vmul.f32 %v4371_v60, %v12370_v15 }
 0x346   :  { %12362 = vst [vmem:[#allocation46_spill] sm:$0xff] %v10374_v6  ;;  %v10424_v6 = vmul.f32 %v4371_v60, %v12368_v4  ;;  %v4424_v52 = vrot.slane %v4372_v41, 1  ;;  %v4427_v10 = vrot.slane %v4374_v48, 1  ;;  %v4430_v34 = vrot.slane %v4376_v18, 1 }
 0x347   :  { %12363 = vst [vmem:[#allocation75_spill] sm:$0xff] %v10410_v56  ;;  %v4433_v43 = vrot.slane %v4378_v17, 1  ;;  %v4436_v30 = vrot.slane %v4380_v28, 1  ;;  %v4439_v38 = vrot.slane %v4382_v51, 1  ;;  %v4442_v60 = vrot.slane %v4384_v61, 1 }
 0x348   :  { %12365 = vst [vmem:[#allocation100_spill] sm:$0xff] %v10414_v46  ;;  %v4445_v47 = vrot.slane %v4386_v19, 1  ;;  %v11115_v48 = vrot.slane %v10406_v57, 1  ;;  %v4448_v55 = vrot.slane %v4388_v9, 1  ;;  %v4451_v29 = vrot.slane %v4390_v21, 1 }
 0x349   :  { %12367 = vst [vmem:[#allocation101_spill] sm:$0xff] %v10420_v39  ;;  %v4454_v24 = vrot.slane %v4392_v58, 1  ;;  %v4457_v4 = vrot.slane %v4394_v42, 1  ;;  %v4460_v45 = vrot.slane %v4396_v50, 1  ;;  %v12372_v41 = vrot.slane %v10378_v11, 1 }
 0x34a   :  { %12369 = vst [vmem:[#allocation102_spill] sm:$0xff] %v10424_v6  ;;  %v12373_v9 = vrot.slane %v10382_v59, 1  ;;  %v12374_v21 = vrot.slane %v10386_v16, 1  ;;  %v4515_v17 = vstv %s10416_s3  ;;  %v12375_v42 = vrot.slane %v10390_v0, 1 }
 0x34b   :  { %12371 = vst [vmem:[#allocation71_spill] sm:$0xff] %v10428_v49  ;;  %v4426_v19 = vsel %vm255_vm0, %v4424_v52, %v12372_v41  ;;  %v12376_v50 = vrot.slane %v10394_v36, 1  ;;  %v12377_v28 = vrot.slane %v10398_v53, 1  ;;  %v12378_v41 = vrot.slane %v10402_v40, 1 }
 0x34c   :  { %v4429_v18 = vsel %vm255_vm0, %v4427_v10, %v12373_v9  ;;  %v4432_v58 = vsel %vm255_vm0, %v4430_v34, %v12374_v21  ;;  %v4435_v51 = vsel %vm255_vm0, %v4433_v43, %v12375_v42  ;;  %v4447_v34 = vsel %vm255_vm0, %v4445_v47, %v11115_v48 }
 0x34d   :  { %v4438_v61 = vsel %vm255_vm0, %v4436_v30, %v12376_v50  ;;  %v4441_v52 = vsel %vm255_vm0, %v4439_v38, %v12377_v28  ;;  %v4444_v10 = vsel %vm255_vm0, %v4442_v60, %v12378_v41  ;;  %v12379_v9 = vrot.slane %v10410_v56, 1 }
 0x34e   :  { %v12380_v21 = vrot.slane %v10414_v46, 1  ;;  %v12381_v42 = vrot.slane %v10420_v39, 1  ;;  %v12382_v28 = vrot.slane %v10424_v6, 1  ;;  %v12383_v47 = vrot.slane %v10428_v49, 1 }
 0x34f   :  { %v4450_v43 = vsel %vm255_vm0, %v4448_v55, %v12379_v9  ;;  %v4489_v55 = vadd.f32 %v4426_v19, %v10347_v5  ;;  %v4491_v41 = vadd.f32 %v4429_v18, %v10351_v35  ;;  %v10498_v9 = vadd.f32 %v4438_v61, %v10357_v37  ;;  %v12385_v18 = vld [vmem:[#allocation12_spill] sm:$0xff]  ;;  %v12387_v61 = vld [vmem:[#allocation15_spill] sm:$0xff] }
 0x350   :  { %v4453_v30 = vsel %vm255_vm0, %v4451_v29, %v12380_v21  ;;  %v10477_v38 = vsel %vm255_vm0, %v4454_v24, %v12381_v42  ;;  %v10482_v60 = vsel %vm255_vm0, %v4457_v4, %v12382_v28  ;;  %v10487_v50 = vsel %vm255_vm0, %v4460_v45, %v12383_v47  ;;  %v12388_v19 = vld [vmem:[#allocation16_spill] sm:$0xff]  ;;  %v12391_v47 = vld [vmem:[#allocation19_spill] sm:$0xff] }
 0x351   :  { %v10492_v29 = vadd.f32 %v4432_v58, %v10353_v2  ;;  %v10495_v24 = vadd.f32 %v4435_v51, %v10355_v33  ;;  %v10501_v4 = vadd.f32 %v4441_v52, %v10360_v7  ;;  %v10504_v21 = vadd.f32 %v4444_v10, %v10362_v54  ;;  %v12386_v51 = vld [vmem:[#allocation14_spill] sm:$0xff] }
 0x352   :  { %v10507_v45 = vadd.f32 %v4447_v34, %v10364_v8  ;;  %v10510_v35 = vadd.f32 %v4450_v43, %v10366_v27  ;;  %v10513_v2 = vadd.f32 %v4453_v30, %v10368_v20  ;;  %v4516_v33 = vmul.f32 %v4515_v17, %v12329_v62  ;;  %v12390_v10 = vld [vmem:[#allocation18_spill] sm:$0xff] }
 0x353   :  { %v10517_v37 = vmul.f32 %v4515_v17, %v12330_v25  ;;  %v4518_v7 = vmul.f32 %v4515_v17, %v12331_v63  ;;  %v10521_v5 = vmul.f32 %v4515_v17, %v12332_v31  ;;  %v4520_v54 = vmul.f32 %v4515_v17, %v12334_v12 }
 0x354   :  { %v10525_v8 = vmul.f32 %v4515_v17, %v12335_v23  ;;  %v4522_v27 = vmul.f32 %v4515_v17, %v12337_v44  ;;  %v10529_v20 = vmul.f32 %v4515_v17, %v12338_v32  ;;  %v4524_v62 = vmul.f32 %v4515_v17, %v12340_v22 }
 0x355   :  { %v10533_v25 = vmul.f32 %v4515_v17, %v12341_v1  ;;  %v4526_v63 = vmul.f32 %v4515_v17, %v12343_v26  ;;  %v10537_v31 = vmul.f32 %v4515_v17, %v12344_v13  ;;  %v4528_v12 = vmul.f32 %v4515_v17, %v12346_v14  ;;  %v12389_v13 = vld [vmem:[#allocation17_spill] sm:$0xff] }
 0x356   :  { %v10541_v23 = vmul.f32 %v4515_v17, %v12347_v3  ;;  %v4530_v44 = vmul.f32 %v4515_v17, %v12385_v18  ;;  %v10545_v32 = vmul.f32 %v4515_v17, %v12386_v51  ;;  %v4532_v22 = vmul.f32 %v4515_v17, %v12387_v61  ;;  %v12392_v51 = vld [vmem:[#allocation72_spill] sm:$0xff] }
 0x357   :  { %12384 = vst [vmem:[#allocation104_spill] sm:$0xff] %v10533_v25  ;;  %v10549_v1 = vmul.f32 %v4515_v17, %v12388_v19  ;;  %v4568_v58 = vrot.slane %v4516_v33, 2  ;;  %v11118_v26 = vrot.slane %v10517_v37, 2  ;;  %v4534_v52 = vmul.f32 %v4515_v17, %v12389_v13  ;;  %v12393_v13 = vld [vmem:[#allocation73_spill] sm:$0xff] }
 0x358   :  { %v10554_v14 = vmul.f32 %v4515_v17, %v12390_v10  ;;  %v4571_v3 = vrot.slane %v4518_v7, 2  ;;  %v4574_v43 = vrot.slane %v4520_v54, 2  ;;  %v4577_v42 = vrot.slane %v4522_v27, 2  ;;  %v12394_v27 = vld [vmem:[#allocation74_spill] sm:$0xff]  ;;  %v12396_v19 = vld [vmem:[#allocation105_spill] sm:$0xff] }
 0x359   :  { %v4536_v18 = vmul.f32 %v4515_v17, %v12391_v47  ;;  %v10561_v33 = vmul.f32 %v4515_v17, %v12392_v51  ;;  %v4580_v61 = vrot.slane %v4524_v62, 2  ;;  %v4538_v48 = vmul.f32 %v4515_v17, %v12393_v13 }
 0x35a   :  { %v4570_v7 = vsel %vm1839_vm1, %v4568_v58, %v11118_v26  ;;  %v4583_v54 = vrot.slane %v4526_v63, 2  ;;  %v10570_v34 = vmul.f32 %v4515_v17, %v12394_v27  ;;  %v12395_v47 = vrot.slane %v10521_v5, 2 }
 0x35b   :  { %v4586_v49 = vrot.slane %v4528_v12, 2  ;;  %v4540_v6 = vmul.f32 %v4515_v17, %v12396_v19  ;;  %v10578_v13 = vmul.f32 %v4515_v17, %v12370_v15  ;;  %v12397_v58 = vrot.slane %v10525_v8, 2 }
 0x35c   :  { %v4573_v28 = vsel %vm1839_vm1, %v4571_v3, %v12395_v47  ;;  %v12398_v26 = vrot.slane %v10529_v20, 2  ;;  %v12399_v39 = vrot.slane %v10533_v25, 2  ;;  %v4589_v12 = vrot.slane %v4530_v44, 2 }
 0x35d   :  { %v4576_v63 = vsel %vm1839_vm1, %v4574_v43, %v12397_v58  ;;  %v4590_v47 = vrot.slane %v10545_v32, 2  ;;  %v4633_v62 = vadd.f32 %v4570_v7, %v4489_v55  ;;  %v12400_v19 = vrot.slane %v10537_v31, 2  ;;  %v12404_v7 = vld [vmem:[#allocation47_spill] sm:$0xff] }
 0x35e   :  { %v4579_v30 = vsel %vm1839_vm1, %v4577_v42, %v12398_v26  ;;  %v4582_v3 = vsel %vm1839_vm1, %v4580_v61, %v12399_v39  ;;  %v4592_v46 = vrot.slane %v4532_v22, 2  ;;  %v4593_v56 = vrot.slane %v10549_v1, 2 }
 0x35f   :  { %v4585_v17 = vsel %vm1839_vm1, %v4583_v54, %v12400_v19  ;;  %v4635_v43 = vadd.f32 %v4573_v28, %v4491_v41  ;;  %v12401_v58 = vrot.slane %v10541_v23, 2  ;;  %v4595_v42 = vrot.slane %v4534_v52, 2  ;;  %4660 = vst.msk [vmem:[%s10823_s5] sm:$0xff] %vm4659_vm2, %v4633_v62  ;;  %v12406_v62 = vld [vmem:[#allocation42_spill] sm:$0xff] }
 0x360   :  { %v4596_v25 = vrot.slane %v10554_v14, 2  ;;  %v4637_v39 = vadd.f32 %v4576_v63, %v10492_v29  ;;  %v4598_v44 = vrot.slane %v4536_v18, 2  ;;  %v4599_v55 = vrot.slane %v10561_v33, 2 }
 0x361   :  { %v4588_v26 = vsel %vm1839_vm1, %v4586_v49, %v12401_v58  ;;  %v4639_v61 = vadd.f32 %v4579_v30, %v10495_v24  ;;  %v4591_v22 = vsel %vm1839_vm1, %v4589_v12, %v4590_v47  ;;  %v4601_v41 = vrot.slane %v4538_v48, 2  ;;  %4663 = vst.msk [vmem:[%s10823_s5 + $0x10] sm:$0xff] %vm4659_vm2, %v4635_v43  ;;  %v12402_v48 = vld [vmem:[#allocation58_spill] sm:$0xff] }
 0x362   :  { %v4602_v28 = vrot.slane %v10570_v34, 2  ;;  %v4641_v49 = vadd.f32 %v4582_v3, %v10498_v9  ;;  %v4594_v29 = vsel %vm1839_vm1, %v4592_v46, %v4593_v56  ;;  %v4604_v24 = vrot.slane %v4540_v6, 2  ;;  %v12403_v9 = vld [vmem:[#allocation44_spill] sm:$0xff]  ;;  %4665 = vst.msk [vmem:[%s10823_s5 + $0x20] sm:$0xff] %vm4659_vm2, %v4637_v39  ;;  %v12410_v58 = vld [vmem:[#allocation46_spill] sm:$0xff] }
 0x363   :  { %v4605_v52 = vrot.slane %v10578_v13, 2  ;;  %v4643_v30 = vadd.f32 %v4585_v17, %v10501_v4  ;;  %v4348_v18 = vadd.f32 %v12403_v9, %v12402_v48  ;;  %v4509_v54 = vadd.f32 %v10477_v38, %v12404_v7  ;;  %v12405_v4 = vld [vmem:[#allocation59_spill] sm:$0xff]  ;;  %v12407_v3 = vld [vmem:[#allocation48_spill] sm:$0xff]  ;;  %4667 = vst.msk [vmem:[%s10823_s5 + $0x30] sm:$0xff] %vm4659_vm2, %v4639_v61  ;;  %v12409_v17 = vld [vmem:[#allocation13_spill] sm:$0xff] }
 0x364   :  { %v4597_v46 = vsel %vm1839_vm1, %v4595_v42, %v4596_v25  ;;  %v4645_v6 = vadd.f32 %v4588_v26, %v10504_v21  ;;  %v4350_v63 = vadd.f32 %v12406_v62, %v12405_v4  ;;  %v4511_v12 = vadd.f32 %v10482_v60, %v12407_v3  ;;  %v12408_v21 = vld [vmem:[#allocation60_spill] sm:$0xff]  ;;  %4669 = vst.msk [vmem:[%s10823_s5 + $0x40] sm:$0xff] %vm4659_vm2, %v4641_v49  ;;  %v12413_v61 = vld [vmem:[#allocation99_spill] sm:$0xff]  ;;  %v12417_v9 = vld [vmem:[#allocation109_spill] sm:$0xff] }
 0x365   :  { %v4600_v38 = vsel %vm1839_vm1, %v4598_v44, %v4599_v55  ;;  %v4647_v19 = vadd.f32 %v4591_v22, %v10507_v45  ;;  %v4352_v43 = vadd.f32 %v12409_v17, %v12408_v21  ;;  %v4513_v26 = vadd.f32 %v10487_v50, %v12410_v58  ;;  %v12411_v45 = vld [vmem:[#allocation61_spill] sm:$0xff]  ;;  %v12412_v39 = vld [vmem:[#allocation108_spill] sm:$0xff]  ;;  %4671 = vst.msk [vmem:[%s10823_s5 + $0x50] sm:$0xff] %vm4659_vm2, %v4643_v30  ;;  %v12420_v30 = vld [vmem:[#allocation27_spill] sm:$0xff] }
 0x366   :  { %v4603_v60 = vsel %vm1839_vm1, %v4601_v41, %v4602_v28  ;;  %v4649_v42 = vadd.f32 %v4594_v29, %v10510_v35  ;;  %v4354_v44 = vadd.f32 %v12412_v39, %v12411_v45  ;;  %v12414_v22 = vrot.slane %v10378_v11, 1  ;;  %v12415_v35 = vld [vmem:[#allocation64_spill] sm:$0xff]  ;;  %v12416_v29 = vld [vmem:[#allocation62_spill] sm:$0xff]  ;;  %4673 = vst.msk [vmem:[%s10823_s5 + $0x60] sm:$0xff] %vm4659_vm2, %v4645_v6 }
 0x367   :  { %v4606_v50 = vsel %vm1839_vm1, %v4604_v24, %v4605_v52  ;;  %v4651_v41 = vadd.f32 %v4597_v46, %v10513_v2  ;;  %v4338_v49 = vmul.f32 %v12415_v35, %v12390_v10  ;;  %v4356_v7 = vadd.f32 %v12417_v9, %v12416_v29  ;;  %v12419_v24 = vld [vmem:[#allocation63_spill] sm:$0xff]  ;;  %4675 = vst.msk [vmem:[%s10823_s5 + $0x70] sm:$0xff] %vm4659_vm2, %v4647_v19 }
 0x368   :  { %v4490_v48 = vadd.f32 %v12414_v22, %v12413_v61  ;;  %v12418_v11 = vrot.slane %v10382_v59, 1  ;;  %v4653_v62 = vadd.f32 %v4600_v38, %v4509_v54  ;;  %v4340_v2 = vmul.f32 %v12415_v35, %v12392_v51  ;;  %v12423_v54 = vld [vmem:[#allocation45_spill] sm:$0xff]  ;;  %4677 = vst.msk [vmem:[%s10823_s5 + $0x80] sm:$0xff] %vm4659_vm2, %v4649_v42  ;;  %v12439_v29 = vld [vmem:[#allocation75_spill] sm:$0xff] }
 0x369   :  { %v4358_v46 = vadd.f32 %v12420_v30, %v12419_v24  ;;  %v12421_v10 = vrot.slane %v10386_v16, 1  ;;  %v4655_v21 = vadd.f32 %v4603_v60, %v4511_v12  ;;  %v4342_v59 = vmul.f32 %v12415_v35, %v12394_v27  ;;  %v12426_v12 = vld [vmem:[#allocation98_spill] sm:$0xff]  ;;  %4679 = vst.msk [vmem:[%s10823_s5 + $0x90] sm:$0xff] %vm4659_vm2, %v4651_v41 }
 0x36a   :  { %v4492_v4 = vadd.f32 %v12418_v11, %v4348_v18  ;;  %v12422_v18 = vld [vmem:[#allocation65_spill] sm:$0xff]  ;;  %v12424_v51 = vrot.slane %v10390_v0, 1  ;;  %v4657_v17 = vadd.f32 %v4606_v50, %v4513_v26  ;;  %v4344_v16 = vmul.f32 %v12415_v35, %v12370_v15  ;;  %v12429_v0 = vld [vmem:[#allocation67_spill] sm:$0xff]  ;;  %4681 = vst.msk [vmem:[%s10823_s5 + $0xa0] sm:$0xff] %vm4659_vm2, %v4653_v62  ;;  %v12441_v11 = vld [vmem:[#allocation104_spill] sm:$0xff] }
 0x36b   :  { %v4494_v3 = vadd.f32 %v12421_v10, %v4350_v63  ;;  %v4360_v6 = vadd.f32 %v12423_v54, %v12422_v18  ;;  %v12425_v63 = vld [vmem:[#allocation66_spill] sm:$0xff]  ;;  %v12427_v27 = vrot.slane %v10394_v36, 1  ;;  %v12428_v60 = vrot.slane %v10517_v37, 2  ;;  %v12432_v36 = vld [vmem:[#allocation68_spill] sm:$0xff]  ;;  %4683 = vst.msk [vmem:[%s10823_s5 + $0xb0] sm:$0xff] %vm4659_vm2, %v4655_v21 }
 0x36c   :  { %v4496_v38 = vadd.f32 %v12424_v51, %v4352_v43  ;;  %v4362_v19 = vadd.f32 %v12426_v12, %v12425_v63  ;;  %v4364_v43 = vadd.f32 %v4338_v49, %v12429_v0  ;;  %v12430_v26 = vrot.slane %v10398_v53, 1  ;;  %v12435_v53 = vld [vmem:[#allocation69_spill] sm:$0xff]  ;;  %4685 = vst.msk [vmem:[%s10823_s5 + $0xc0] sm:$0xff] %vm4659_vm2, %v4657_v17  ;;  %v12449_v18 = vld [vmem:[#allocation102_spill] sm:$0xff]  ;;  %v12451_v51 = vld [vmem:[#allocation71_spill] sm:$0xff] }
 0x36d   :  { %v4498_v58 = vadd.f32 %v12427_v27, %v4354_v44  ;;  %v4634_v45 = vadd.f32 %v12428_v60, %v4490_v48  ;;  %v12431_v15 = vrot.slane %v10521_v5, 2  ;;  %v4366_v37 = vadd.f32 %v4340_v2, %v12432_v36 }
 0x36e   :  { %v4500_v42 = vadd.f32 %v12430_v26, %v4356_v7  ;;  %v12433_v44 = vrot.slane %v10402_v40, 1  ;;  %v12434_v22 = vrot.slane %v10525_v8, 2  ;;  %v4368_v5 = vadd.f32 %v4342_v59, %v12435_v53  ;;  %v12438_v40 = vld [vmem:[#allocation70_spill] sm:$0xff] }
 0x36f   :  { %v4636_v39 = vadd.f32 %v12431_v15, %v4492_v4  ;;  %v12436_v50 = vrot.slane %v10406_v57, 1  ;;  %v12437_v35 = vrot.slane %v10529_v20, 2  ;;  %v4370_v8 = vadd.f32 %v4344_v16, %v12438_v40  ;;  %4662 = vst.msk [vmem:[%s10823_s5 + $0x8] sm:$0x1f] %vm4661_vm3, %v4634_v45  ;;  %v12443_v57 = vld [vmem:[#allocation100_spill] sm:$0xff] }
 0x370   :  { %v4502_v61 = vadd.f32 %v12433_v44, %v4358_v46  ;;  %v4638_v48 = vadd.f32 %v12434_v22, %v4494_v3  ;;  %v12440_v9 = vrot.slane %v12439_v29, 1  ;;  %v12442_v4 = vrot.slane %v12441_v11, 2  ;;  %v12446_v46 = vld [vmem:[#allocation101_spill] sm:$0xff] }
 0x371   :  { %v4504_v41 = vadd.f32 %v12436_v50, %v4360_v6  ;;  %v4640_v49 = vadd.f32 %v12437_v35, %v4496_v38  ;;  %v12444_v20 = vrot.slane %v12443_v57, 1  ;;  %v12445_v24 = vrot.slane %v10537_v31, 2  ;;  %4664 = vst.msk [vmem:[%s10823_s5 + $0x18] sm:$0x1f] %vm4661_vm3, %v4636_v39 }
 0x372   :  { %v4506_v7 = vadd.f32 %v12440_v9, %v4362_v19  ;;  %v4642_v62 = vadd.f32 %v12442_v4, %v4498_v58  ;;  %v12447_v10 = vrot.slane %v12446_v46, 1  ;;  %v12448_v21 = vrot.slane %v10541_v23, 2  ;;  %4666 = vst.msk [vmem:[%s10823_s5 + $0x28] sm:$0x1f] %vm4661_vm3, %v4638_v48 }
 0x373   :  { %v4508_v2 = vadd.f32 %v12444_v20, %v4364_v43  ;;  %v4644_v30 = vadd.f32 %v12445_v24, %v4500_v42  ;;  %v12450_v54 = vrot.slane %v12449_v18, 1  ;;  %v4648_v6 = vadd.f32 %v4590_v47, %v4504_v41  ;;  %4668 = vst.msk [vmem:[%s10823_s5 + $0x38] sm:$0x1f] %vm4661_vm3, %v4640_v49 }
 0x374   :  { %v4510_v3 = vadd.f32 %v12447_v10, %v4366_v37  ;;  %v4646_v59 = vadd.f32 %v12448_v21, %v4502_v61  ;;  %v12452_v38 = vrot.slane %v12451_v51, 1  ;;  %v4650_v17 = vadd.f32 %v4593_v56, %v4506_v7  ;;  %4670 = vst.msk [vmem:[%s10823_s5 + $0x48] sm:$0x1f] %vm4661_vm3, %v4642_v62 }
 0x375   :  { %v4512_v31 = vadd.f32 %v12450_v54, %v4368_v5  ;;  %v4652_v32 = vadd.f32 %v4596_v25, %v4508_v2  ;;  %4672 = vst.msk [vmem:[%s10823_s5 + $0x58] sm:$0x1f] %vm4661_vm3, %v4644_v30 }
 0x376   :  { %v4514_v23 = vadd.f32 %v12452_v38, %v4370_v8  ;;  %v4654_v47 = vadd.f32 %v4599_v55, %v4510_v3  ;;  %4674 = vst.msk [vmem:[%s10823_s5 + $0x68] sm:$0x1f] %vm4661_vm3, %v4646_v59 }
 0x377   :  { %v4656_v56 = vadd.f32 %v4602_v28, %v4512_v31  ;;  %4676 = vst.msk [vmem:[%s10823_s5 + $0x78] sm:$0x1f] %vm4661_vm3, %v4648_v6 }
 0x378   :  { %v4658_v25 = vadd.f32 %v4605_v52, %v4514_v23  ;;  %4678 = vst.msk [vmem:[%s10823_s5 + $0x88] sm:$0x1f] %vm4661_vm3, %v4650_v17 }
 0x379   :  { %4680 = vst.msk [vmem:[%s10823_s5 + $0x98] sm:$0x1f] %vm4661_vm3, %v4652_v32 }
 0x37a   :  { %4682 = vst.msk [vmem:[%s10823_s5 + $0xa8] sm:$0x1f] %vm4661_vm3, %v4654_v47 }
 0x37b   :  { %4684 = vst.msk [vmem:[%s10823_s5 + $0xb8] sm:$0x1f] %vm4661_vm3, %v4656_v56 }
 0x37c   :  { %4686 = vst.msk [vmem:[%s10823_s5 + $0xc8] sm:$0x1f] %vm4661_vm3, %v4658_v25 }
 0x37d   :  { %4691 = vsyncpa [#allocation4], 1 }
 0x37e   :  { %4692 = vsyncpa [#allocation6], 1 }

</bundles_post_ra>
